<compile_context>
chip_gen: v5e
topology: v5e:2x2
jax: 0.10.0
libtpu: 0.0.40
codegen_flags: <defaults>
</compile_context>

<pallas_src>
import functools

import jax
import jax.numpy as jnp
from jax.experimental import pallas as pl
from jax.experimental.pallas import tpu as pltpu


# ----------------------------------------------------------------------------
# Fused Dec_Blk kernel (one grid step == one image)
# ----------------------------------------------------------------------------
def _dec_blk_kernel(xp_ref, wmix_ref, bcat_ref, wf_ref, bf_ref, wt_ref, bt_ref,
                    out_ref, catp_ref, ypd_ref, *, H, W, C, OC):
    M = H * W

    # ---- MixDConv: branches A(d=3) / B(d=2) / C(d=1) / D(1x1) fused into one
    #      lane-dense (M, C) accumulator via per-tap weight slabs (28, C, C).
    acc = jnp.zeros((M, C), jnp.float32)
    tap = 0
    for d in (3, 2, 1):                       # dilation of each 3x3 branch
        o = 3 - d                             # offset into the halo-3 padded x
        for ky in range(3):
            for kx in range(3):
                win = xp_ref[o + ky * d:o + ky * d + H,
                             o + kx * d:o + kx * d + W, :]
                win = win.reshape(M, C).astype(jnp.bfloat16)
                acc += jnp.dot(win, wmix_ref[tap],
                               preferred_element_type=jnp.float32)
                tap += 1
    centre = xp_ref[3:3 + H, 3:3 + W, :].reshape(M, C).astype(jnp.bfloat16)
    acc += jnp.dot(centre, wmix_ref[tap], preferred_element_type=jnp.float32)
    cat = jnp.maximum(acc + bcat_ref[...], 0.0)            # (M, C) f32, == torch.cat

    # ---- pyconv1F: 3x3, pad 1, BN folded, ReLU.  cat is written into a small
    #      zero-padded VMEM scratch so the 9 taps are plain shifted slices.
    catp_ref[...] = jnp.zeros((H + 2, W + 2, C), jnp.float32)
    catp_ref[1:H + 1, 1:W + 1, :] = cat.reshape(H, W, C)
    yacc = jnp.zeros((M, OC), jnp.float32)
    for ky in range(3):
        for kx in range(3):
            win = catp_ref[ky:ky + H, kx:kx + W, :]
            win = win.reshape(M, C).astype(jnp.bfloat16)
            yacc += jnp.dot(win, wf_ref[ky * 3 + kx],
                            preferred_element_type=jnp.float32)
    y = jnp.maximum(yacc + bf_ref[...], 0.0)                # (M, OC) f32

    # ---- ConvTranspose2d(3, stride=2, pad=1, out_pad=1): sub-pixel phases.
    #      Column group p of t is output phase p in (0,0),(0,1),(1,0),(1,1).
    ypd_ref[...] = jnp.zeros((H + 1, W + 1, OC), jnp.float32)
    ypd_ref[0:H, 0:W, :] = y.reshape(H, W, OC)
    t = jnp.zeros((M, 4 * OC), jnp.float32)
    for g, (dy, dx) in enumerate(((0, 0), (0, 1), (1, 0), (1, 1))):
        slab = ypd_ref[dy:dy + H, dx:dx + W, :]
        slab = slab.reshape(M, OC).astype(jnp.bfloat16)
        t += jnp.dot(slab, wt_ref[g], preferred_element_type=jnp.float32)
    t = t + bt_ref[...]
    out_ref[...] = t.reshape(H, W, 4 * OC).astype(out_ref.dtype)


def _vmem_limit_bytes(hp, wp, h, w, c, oc):
    """Footprint-based VMEM limit, clamped to stay v7x-safe (64 MiB physical)."""
    m = h * w
    est = (
        2 * hp * wp * c * 4                                    # dbl-buffered input block (f32)
        + 2 * h * w * 4 * oc * 2                               # dbl-buffered output block (bf16)
        + 2 * (28 * c * c + 9 * c * oc + 16 * oc * oc) * 2     # resident bf16 weights
        + 2 * (c + oc + 4 * oc) * 4                            # biases
        + (h + 2) * (w + 2) * c * 4 + (h + 1) * (w + 1) * oc * 4   # scratch pads
        + m * (c + 4 * oc) * 4 * 2                             # f32 accumulators + slack
        + m * c * 4 * 2                                        # in-flight tap windows
    )
    return int(min(40 * 2 ** 20, max(16 * 2 ** 20, 2 * est)))


# ----------------------------------------------------------------------------
# Dec_Blk forward: single pallas_call + final phase->spatial interleave
# ----------------------------------------------------------------------------
def dec_blk_apply(params, x_nchw):
    n, c, h, w = x_nchw.shape
    oc = params["bf"].shape[-1]
    hp, wp = h + 6, w + 6

    x = jnp.transpose(x_nchw, (0, 2, 3, 1)).astype(jnp.float32)   # NHWC
    xp = jnp.pad(x, ((0, 0), (3, 3), (3, 3), (0, 0)))             # halo-3 pad (max dilation)

    kernel = functools.partial(_dec_blk_kernel, H=h, W=w, C=c, OC=oc)
    t = pl.pallas_call(
        kernel,
        out_shape=jax.ShapeDtypeStruct((n, h, w, 4 * oc), jnp.bfloat16),
        grid_spec=pltpu.PrefetchScalarGridSpec(
            num_scalar_prefetch=0,
            grid=(n,),
            in_specs=[
                pl.BlockSpec((None, hp, wp, c), lambda b: (b, 0, 0, 0)),   # x (per image)
                pl.BlockSpec((28, c, c), lambda b: (0, 0, 0)),             # fused MixDConv taps
                pl.BlockSpec((1, c), lambda b: (0, 0)),                    # cat bias
                pl.BlockSpec((9, c, oc), lambda b: (0, 0, 0)),             # F per-tap weights
                pl.BlockSpec((1, oc), lambda b: (0, 0)),                   # F bias (BN folded)
                pl.BlockSpec((4, oc, 4 * oc), lambda b: (0, 0, 0)),        # deconv row groups
                pl.BlockSpec((1, 4 * oc), lambda b: (0, 0)),               # deconv bias (x4 phases)
            ],
            out_specs=pl.BlockSpec((None, h, w, 4 * oc), lambda b: (b, 0, 0, 0)),
            scratch_shapes=[
                pltpu.VMEM((h + 2, w + 2, c), jnp.float32),    # zero-padded cat
                pltpu.VMEM((h + 1, w + 1, oc), jnp.float32),   # zero-padded y
            ],
        ),
        compiler_params=pltpu.CompilerParams(
            dimension_semantics=("parallel",),
            vmem_limit_bytes=_vmem_limit_bytes(hp, wp, h, w, c, oc),
        ),
    )(xp, params["wmix"], params["bcat"], params["wf9"], params["bf"],
      params["wt4"], params["bt"])

    # phase -> spatial interleave (2x2 sub-pixel) and back to NCHW f32.
    out = t.reshape(n, h, w, 2, 2, oc).transpose(0, 5, 1, 3, 2, 4)
    return out.reshape(n, oc, 2 * h, 2 * w).astype(jnp.float32)


# ----------------------------------------------------------------------------
# Weight packing (done once at init)
# ----------------------------------------------------------------------------
def _densify_grouped(w, cin, groups):
    """(OC, Cin//g, kh, kw) grouped weight -> dense block-diagonal (OC, Cin, kh, kw)."""
    oc = w.shape[0]
    ocg, cg = oc // groups, cin // groups
    wd = jnp.zeros((oc, cin) + w.shape[2:], w.dtype)
    for g in range(groups):
        wd = wd.at[g * ocg:(g + 1) * ocg, g * cg:(g + 1) * cg].set(
            w[g * ocg:(g + 1) * ocg])
    return wd


def _pack_mix_weights(wA, wB, wC, wD, in_chs):
    """Fused MixDConv per-tap weights (28, C, C): taps 0-8 d=3 (cols 0:q),
    9-17 d=2 (cols q:2q), 18-26 d=1 (cols 2q:3q), 27 = 1x1 (cols 3q:4q)."""
    C = in_chs
    q = C // 4
    dense = (_densify_grouped(wA, C, 8), _densify_grouped(wB, C, 4), wC)
    taps = []
    for branch, dw in enumerate(dense):
        col0 = branch * q
        for ky in range(3):
            for kx in range(3):
                wt = jnp.zeros((C, C), jnp.float32)
                taps.append(wt.at[:, col0:col0 + q].set(dw[:, :, ky, kx].T))
    wt = jnp.zeros((C, C), jnp.float32)
    taps.append(wt.at[:, 3 * q:].set(wD[:, :, 0, 0].T))
    return jnp.stack(taps, axis=0).astype(jnp.bfloat16)           # (28, C, C)


def _pack_deconv_weights(wT):
    """ConvTranspose2d weight (Cin, Cout, 3, 3) -> (4, Cin, 4*Cout).
    Row groups: [y, y>>W, y>>H, y>>HW]; column groups: phases (0,0),(0,1),(1,0),(1,1)."""
    z = jnp.zeros(wT.shape[:2], jnp.float32)
    w = lambda ky, kx: wT[:, :, ky, kx]
    rows = [
        jnp.concatenate([w(1, 1), w(1, 2), w(2, 1), w(2, 2)], axis=1),  # y[r, s]
        jnp.concatenate([z,       w(1, 0), z,       w(2, 0)], axis=1),  # y[r, s+1]
        jnp.concatenate([z,       z,       w(0, 1), w(0, 2)], axis=1),  # y[r+1, s]
        jnp.concatenate([z,       z,       z,       w(0, 0)], axis=1),  # y[r+1, s+1]
    ]
    return jnp.stack(rows, axis=0).astype(jnp.bfloat16)           # (4, OC, 4*OC)


# ----------------------------------------------------------------------------
# Parameter init (deterministic, synthetic)
# ----------------------------------------------------------------------------
def _init_conv(key, oc, icg, kh, kw):
    k1, k2 = jax.random.split(key)
    fan_in = icg * kh * kw
    w = jax.random.normal(k1, (oc, icg, kh, kw), jnp.float32) / jnp.sqrt(fan_in)
    b = 0.01 * jax.random.normal(k2, (oc,), jnp.float32)
    return w, b


def _fold_bn(key, w, b, eps=1e-5):
    """Fold eval-mode BatchNorm (synthetic gamma/beta, running mean=0, var=1)."""
    k1, k2 = jax.random.split(key)
    oc = w.shape[0]
    gamma = 1.0 + 0.1 * jax.random.normal(k1, (oc,), jnp.float32)
    beta = 0.05 * jax.random.normal(k2, (oc,), jnp.float32)
    s = gamma / jnp.sqrt(1.0 + eps)
    return w * s[:, None, None, None], b * s + beta


def init_dec_blk(key, in_chs, out_chs):
    assert in_chs % 32 == 0, "in_chs must be divisible by 32 (groups=8 branch)"
    ks = jax.random.split(key, 7)
    q = in_chs // 4
    wA, bA = _init_conv(ks[0], q, in_chs // 8, 3, 3)     # groups=8, dilation 3
    wB, bB = _init_conv(ks[1], q, in_chs // 4, 3, 3)     # groups=4, dilation 2
    wC, bC = _init_conv(ks[2], q, in_chs, 3, 3)          # groups=1, dilation 1
    wD, bD = _init_conv(ks[3], q, in_chs, 1, 1)          # 1x1
    wF, bF = _fold_bn(ks[5], *_init_conv(ks[4], out_chs, in_chs, 3, 3))
    k1, k2 = jax.random.split(ks[6])
    wT = jax.random.normal(k1, (out_chs, out_chs, 3, 3), jnp.float32) / jnp.sqrt(out_chs * 9)
    bT = 0.01 * jax.random.normal(k2, (out_chs,), jnp.float32)

    params = {
        "wmix": _pack_mix_weights(wA, wB, wC, wD, in_chs),
        "bcat": jnp.concatenate([bA, bB, bC, bD]).reshape(1, in_chs),
        "wf9": jnp.transpose(wF, (2, 3, 1, 0)).reshape(9, in_chs, out_chs).astype(jnp.bfloat16),
        "bf": bF.reshape(1, out_chs),
        "wt4": _pack_deconv_weights(wT),
        "bt": jnp.tile(bT, 4).reshape(1, 4 * out_chs),
    }
    raw = dict(wA=wA, bA=bA, wB=wB, bB=bB, wC=wC, bC=bC, wD=wD, bD=bD,
               wF=wF, bF=bF, wT=wT, bT=bT)
    return params, raw


# ----------------------------------------------------------------------------
# Pure-JAX f32 reference (for numerical validation only)
# ----------------------------------------------------------------------------
def dec_blk_reference(raw, x):
    hi = jax.lax.Precision.HIGHEST

    def conv(x, w, b, dil, groups):
        y = jax.lax.conv_general_dilated(
            x, w, window_strides=(1, 1),
            padding=[(dil, dil), (dil, dil)], rhs_dilation=(dil, dil),
            dimension_numbers=("NCHW", "OIHW", "NCHW"),
            feature_group_count=groups, precision=hi)
        return jnp.maximum(y + b[None, :, None, None], 0.0)

    a = conv(x, raw["wA"], raw["bA"], 3, 8)
    b = conv(x, raw["wB"], raw["bB"], 2, 4)
    c = conv(x, raw["wC"], raw["bC"], 1, 1)
    d = jax.lax.conv_general_dilated(
        x, raw["wD"], (1, 1), [(0, 0), (0, 0)],
        dimension_numbers=("NCHW", "OIHW", "NCHW"), precision=hi)
    d = jnp.maximum(d + raw["bD"][None, :, None, None], 0.0)
    cat = jnp.concatenate([a, b, c, d], axis=1)
    y = conv(cat, raw["wF"], raw["bF"], 1, 1)
    # ConvTranspose2d(3, s=2, p=1, out_pad=1) == lhs-dilated conv with the
    # spatially flipped, (in,out)->(out,in) transposed kernel and pad (1, 2).
    wt = jnp.flip(raw["wT"], axis=(2, 3)).transpose(1, 0, 2, 3)
    out = jax.lax.conv_general_dilated(
        y, wt, (1, 1), [(1, 2), (1, 2)], lhs_dilation=(2, 2),
        dimension_numbers=("NCHW", "OIHW", "NCHW"), precision=hi)
    return out + raw["bT"][None, :, None, None]


# ----------------------------------------------------------------------------
if __name__ == "__main__":
    key = jax.random.PRNGKey(0)
    kp, kx = jax.random.split(key)

    in_chs, out_chs = 32, 16      # in_chs must be a multiple of 32 (groups=8 branch)
    N, H, W = 2, 16, 16

    params, raw = init_dec_blk(kp, in_chs, out_chs)
    x = jax.random.normal(kx, (N, in_chs, H, W), jnp.float32)

    fwd = jax.jit(dec_blk_apply)
    out = jax.block_until_ready(fwd(params, x))

    assert out.shape == (N, out_chs, 2 * H, 2 * W), out.shape
    assert bool(jnp.all(jnp.isfinite(out)))

    ref = dec_blk_reference(raw, x)
    err = float(jnp.max(jnp.abs(out - ref)))
    assert err < 0.15, f"max abs error vs f32 reference: {err}"
    print("KERNEL_OK")
</pallas_src>

<mosaic_0001>
module attributes {stable_mosaic.version = 11 : i64} {
  func.func @_dec_blk_kernel(%arg0: i32, %arg1: memref<1x22x22x32xf32, #tpu.memory_space<vmem>>, %arg2: memref<28x32x32xbf16, #tpu.memory_space<vmem>>, %arg3: memref<1x32xf32, #tpu.memory_space<vmem>>, %arg4: memref<9x32x16xbf16, #tpu.memory_space<vmem>>, %arg5: memref<1x16xf32, #tpu.memory_space<vmem>>, %arg6: memref<4x16x64xbf16, #tpu.memory_space<vmem>>, %arg7: memref<1x64xf32, #tpu.memory_space<vmem>>, %arg8: memref<1x16x16x64xbf16, #tpu.memory_space<vmem>>, %arg9: memref<18x18x32xf32, #tpu.memory_space<vmem>>, %arg10: memref<17x17x16xf32, #tpu.memory_space<vmem>>) attributes {dimension_semantics = [#tpu.dimension_semantics<parallel>], iteration_bounds = array<i64: 2>, scalar_prefetch = 0 : i64, scratch_operands = 2 : i64, tpu.core_type = #tpu.core_type<tc>, window_params = [{transform_indices = @transform_0, window_bounds = array<i64: 1, 22, 22, 32>}, {pipeline_mode = #tpu.pipeline_mode<synchronous>, transform_indices = @transform_1, window_bounds = array<i64: 28, 32, 32>}, {pipeline_mode = #tpu.pipeline_mode<synchronous>, transform_indices = @transform_2, window_bounds = array<i64: 1, 32>}, {pipeline_mode = #tpu.pipeline_mode<synchronous>, transform_indices = @transform_3, window_bounds = array<i64: 9, 32, 16>}, {pipeline_mode = #tpu.pipeline_mode<synchronous>, transform_indices = @transform_4, window_bounds = array<i64: 1, 16>}, {pipeline_mode = #tpu.pipeline_mode<synchronous>, transform_indices = @transform_5, window_bounds = array<i64: 4, 16, 64>}, {pipeline_mode = #tpu.pipeline_mode<synchronous>, transform_indices = @transform_6, window_bounds = array<i64: 1, 64>}, {transform_indices = @transform_7, window_bounds = array<i64: 1, 16, 16, 64>}]} {
    %cst = arith.constant 0.000000e+00 : f32
    %0 = vector.broadcast %cst : f32 to vector<256x32xf32>
    %c0 = arith.constant 0 : index
    %c0_0 = arith.constant 0 : index
    %c0_1 = arith.constant 0 : index
    %c0_2 = arith.constant 0 : index
    %1 = vector.load %arg1[%c0, %c0_0, %c0_1, %c0_2] : memref<1x22x22x32xf32, #tpu.memory_space<vmem>>, vector<1x16x16x32xf32>
    %2 = vector.shape_cast %1 : vector<1x16x16x32xf32> to vector<16x16x32xf32>
    %3 = vector.shape_cast %2 : vector<16x16x32xf32> to vector<256x32xf32>
    %4 = arith.truncf %3 : vector<256x32xf32> to vector<256x32xbf16>
    %c0_3 = arith.constant 0 : index
    %c0_4 = arith.constant 0 : index
    %c0_5 = arith.constant 0 : index
    %5 = vector.load %arg2[%c0_3, %c0_4, %c0_5] : memref<28x32x32xbf16, #tpu.memory_space<vmem>>, vector<1x32x32xbf16>
    %6 = vector.shape_cast %5 : vector<1x32x32xbf16> to vector<32x32xbf16>
    %cst_6 = arith.constant dense<0.000000e+00> : vector<256x32xf32>
    %7 = tpu.matmul %4, %6, %cst_6 {dimension_numbers = #tpu.dot_dimension_numbers<[1], [0], [0], [1], [0, 0, 1, 1], [], []>} : vector<256x32xbf16>, vector<32x32xbf16>, vector<256x32xf32> -> vector<256x32xf32>
    %8 = arith.addf %0, %7 : vector<256x32xf32>
    %c0_7 = arith.constant 0 : index
    %c0_8 = arith.constant 0 : index
    %c3 = arith.constant 3 : index
    %c0_9 = arith.constant 0 : index
    %9 = vector.load %arg1[%c0_7, %c0_8, %c3, %c0_9] : memref<1x22x22x32xf32, #tpu.memory_space<vmem>>, vector<1x16x16x32xf32>
    %10 = vector.shape_cast %9 : vector<1x16x16x32xf32> to vector<16x16x32xf32>
    %11 = vector.shape_cast %10 : vector<16x16x32xf32> to vector<256x32xf32>
    %12 = arith.truncf %11 : vector<256x32xf32> to vector<256x32xbf16>
    %c1 = arith.constant 1 : index
    %c0_10 = arith.constant 0 : index
    %c0_11 = arith.constant 0 : index
    %13 = vector.load %arg2[%c1, %c0_10, %c0_11] : memref<28x32x32xbf16, #tpu.memory_space<vmem>>, vector<1x32x32xbf16>
    %14 = vector.shape_cast %13 : vector<1x32x32xbf16> to vector<32x32xbf16>
    %cst_12 = arith.constant dense<0.000000e+00> : vector<256x32xf32>
    %15 = tpu.matmul %12, %14, %cst_12 {dimension_numbers = #tpu.dot_dimension_numbers<[1], [0], [0], [1], [0, 0, 1, 1], [], []>} : vector<256x32xbf16>, vector<32x32xbf16>, vector<256x32xf32> -> vector<256x32xf32>
    %16 = arith.addf %8, %15 : vector<256x32xf32>
    %c0_13 = arith.constant 0 : index
    %c0_14 = arith.constant 0 : index
    %c6 = arith.constant 6 : index
    %c0_15 = arith.constant 0 : index
    %17 = vector.load %arg1[%c0_13, %c0_14, %c6, %c0_15] : memref<1x22x22x32xf32, #tpu.memory_space<vmem>>, vector<1x16x16x32xf32>
    %18 = vector.shape_cast %17 : vector<1x16x16x32xf32> to vector<16x16x32xf32>
    %19 = vector.shape_cast %18 : vector<16x16x32xf32> to vector<256x32xf32>
    %20 = arith.truncf %19 : vector<256x32xf32> to vector<256x32xbf16>
    %c2 = arith.constant 2 : index
    %c0_16 = arith.constant 0 : index
    %c0_17 = arith.constant 0 : index
    %21 = vector.load %arg2[%c2, %c0_16, %c0_17] : memref<28x32x32xbf16, #tpu.memory_space<vmem>>, vector<1x32x32xbf16>
    %22 = vector.shape_cast %21 : vector<1x32x32xbf16> to vector<32x32xbf16>
    %cst_18 = arith.constant dense<0.000000e+00> : vector<256x32xf32>
    %23 = tpu.matmul %20, %22, %cst_18 {dimension_numbers = #tpu.dot_dimension_numbers<[1], [0], [0], [1], [0, 0, 1, 1], [], []>} : vector<256x32xbf16>, vector<32x32xbf16>, vector<256x32xf32> -> vector<256x32xf32>
    %24 = arith.addf %16, %23 : vector<256x32xf32>
    %c0_19 = arith.constant 0 : index
    %c3_20 = arith.constant 3 : index
    %c0_21 = arith.constant 0 : index
    %c0_22 = arith.constant 0 : index
    %25 = vector.load %arg1[%c0_19, %c3_20, %c0_21, %c0_22] : memref<1x22x22x32xf32, #tpu.memory_space<vmem>>, vector<1x16x16x32xf32>
    %26 = vector.shape_cast %25 : vector<1x16x16x32xf32> to vector<16x16x32xf32>
    %27 = vector.shape_cast %26 : vector<16x16x32xf32> to vector<256x32xf32>
    %28 = arith.truncf %27 : vector<256x32xf32> to vector<256x32xbf16>
    %c3_23 = arith.constant 3 : index
    %c0_24 = arith.constant 0 : index
    %c0_25 = arith.constant 0 : index
    %29 = vector.load %arg2[%c3_23, %c0_24, %c0_25] : memref<28x32x32xbf16, #tpu.memory_space<vmem>>, vector<1x32x32xbf16>
    %30 = vector.shape_cast %29 : vector<1x32x32xbf16> to vector<32x32xbf16>
    %cst_26 = arith.constant dense<0.000000e+00> : vector<256x32xf32>
    %31 = tpu.matmul %28, %30, %cst_26 {dimension_numbers = #tpu.dot_dimension_numbers<[1], [0], [0], [1], [0, 0, 1, 1], [], []>} : vector<256x32xbf16>, vector<32x32xbf16>, vector<256x32xf32> -> vector<256x32xf32>
    %32 = arith.addf %24, %31 : vector<256x32xf32>
    %c0_27 = arith.constant 0 : index
    %c3_28 = arith.constant 3 : index
    %c3_29 = arith.constant 3 : index
    %c0_30 = arith.constant 0 : index
    %33 = vector.load %arg1[%c0_27, %c3_28, %c3_29, %c0_30] : memref<1x22x22x32xf32, #tpu.memory_space<vmem>>, vector<1x16x16x32xf32>
    %34 = vector.shape_cast %33 : vector<1x16x16x32xf32> to vector<16x16x32xf32>
    %35 = vector.shape_cast %34 : vector<16x16x32xf32> to vector<256x32xf32>
    %36 = arith.truncf %35 : vector<256x32xf32> to vector<256x32xbf16>
    %c4 = arith.constant 4 : index
    %c0_31 = arith.constant 0 : index
    %c0_32 = arith.constant 0 : index
    %37 = vector.load %arg2[%c4, %c0_31, %c0_32] : memref<28x32x32xbf16, #tpu.memory_space<vmem>>, vector<1x32x32xbf16>
    %38 = vector.shape_cast %37 : vector<1x32x32xbf16> to vector<32x32xbf16>
    %cst_33 = arith.constant dense<0.000000e+00> : vector<256x32xf32>
    %39 = tpu.matmul %36, %38, %cst_33 {dimension_numbers = #tpu.dot_dimension_numbers<[1], [0], [0], [1], [0, 0, 1, 1], [], []>} : vector<256x32xbf16>, vector<32x32xbf16>, vector<256x32xf32> -> vector<256x32xf32>
    %40 = arith.addf %32, %39 : vector<256x32xf32>
    %c0_34 = arith.constant 0 : index
    %c3_35 = arith.constant 3 : index
    %c6_36 = arith.constant 6 : index
    %c0_37 = arith.constant 0 : index
    %41 = vector.load %arg1[%c0_34, %c3_35, %c6_36, %c0_37] : memref<1x22x22x32xf32, #tpu.memory_space<vmem>>, vector<1x16x16x32xf32>
    %42 = vector.shape_cast %41 : vector<1x16x16x32xf32> to vector<16x16x32xf32>
    %43 = vector.shape_cast %42 : vector<16x16x32xf32> to vector<256x32xf32>
    %44 = arith.truncf %43 : vector<256x32xf32> to vector<256x32xbf16>
    %c5 = arith.constant 5 : index
    %c0_38 = arith.constant 0 : index
    %c0_39 = arith.constant 0 : index
    %45 = vector.load %arg2[%c5, %c0_38, %c0_39] : memref<28x32x32xbf16, #tpu.memory_space<vmem>>, vector<1x32x32xbf16>
    %46 = vector.shape_cast %45 : vector<1x32x32xbf16> to vector<32x32xbf16>
    %cst_40 = arith.constant dense<0.000000e+00> : vector<256x32xf32>
    %47 = tpu.matmul %44, %46, %cst_40 {dimension_numbers = #tpu.dot_dimension_numbers<[1], [0], [0], [1], [0, 0, 1, 1], [], []>} : vector<256x32xbf16>, vector<32x32xbf16>, vector<256x32xf32> -> vector<256x32xf32>
    %48 = arith.addf %40, %47 : vector<256x32xf32>
    %c0_41 = arith.constant 0 : index
    %c6_42 = arith.constant 6 : index
    %c0_43 = arith.constant 0 : index
    %c0_44 = arith.constant 0 : index
    %49 = vector.load %arg1[%c0_41, %c6_42, %c0_43, %c0_44] : memref<1x22x22x32xf32, #tpu.memory_space<vmem>>, vector<1x16x16x32xf32>
    %50 = vector.shape_cast %49 : vector<1x16x16x32xf32> to vector<16x16x32xf32>
    %51 = vector.shape_cast %50 : vector<16x16x32xf32> to vector<256x32xf32>
    %52 = arith.truncf %51 : vector<256x32xf32> to vector<256x32xbf16>
    %c6_45 = arith.constant 6 : index
    %c0_46 = arith.constant 0 : index
    %c0_47 = arith.constant 0 : index
    %53 = vector.load %arg2[%c6_45, %c0_46, %c0_47] : memref<28x32x32xbf16, #tpu.memory_space<vmem>>, vector<1x32x32xbf16>
    %54 = vector.shape_cast %53 : vector<1x32x32xbf16> to vector<32x32xbf16>
    %cst_48 = arith.constant dense<0.000000e+00> : vector<256x32xf32>
    %55 = tpu.matmul %52, %54, %cst_48 {dimension_numbers = #tpu.dot_dimension_numbers<[1], [0], [0], [1], [0, 0, 1, 1], [], []>} : vector<256x32xbf16>, vector<32x32xbf16>, vector<256x32xf32> -> vector<256x32xf32>
    %56 = arith.addf %48, %55 : vector<256x32xf32>
    %c0_49 = arith.constant 0 : index
    %c6_50 = arith.constant 6 : index
    %c3_51 = arith.constant 3 : index
    %c0_52 = arith.constant 0 : index
    %57 = vector.load %arg1[%c0_49, %c6_50, %c3_51, %c0_52] : memref<1x22x22x32xf32, #tpu.memory_space<vmem>>, vector<1x16x16x32xf32>
    %58 = vector.shape_cast %57 : vector<1x16x16x32xf32> to vector<16x16x32xf32>
    %59 = vector.shape_cast %58 : vector<16x16x32xf32> to vector<256x32xf32>
    %60 = arith.truncf %59 : vector<256x32xf32> to vector<256x32xbf16>
    %c7 = arith.constant 7 : index
    %c0_53 = arith.constant 0 : index
    %c0_54 = arith.constant 0 : index
    %61 = vector.load %arg2[%c7, %c0_53, %c0_54] : memref<28x32x32xbf16, #tpu.memory_space<vmem>>, vector<1x32x32xbf16>
    %62 = vector.shape_cast %61 : vector<1x32x32xbf16> to vector<32x32xbf16>
    %cst_55 = arith.constant dense<0.000000e+00> : vector<256x32xf32>
    %63 = tpu.matmul %60, %62, %cst_55 {dimension_numbers = #tpu.dot_dimension_numbers<[1], [0], [0], [1], [0, 0, 1, 1], [], []>} : vector<256x32xbf16>, vector<32x32xbf16>, vector<256x32xf32> -> vector<256x32xf32>
    %64 = arith.addf %56, %63 : vector<256x32xf32>
    %c0_56 = arith.constant 0 : index
    %c6_57 = arith.constant 6 : index
    %c6_58 = arith.constant 6 : index
    %c0_59 = arith.constant 0 : index
    %65 = vector.load %arg1[%c0_56, %c6_57, %c6_58, %c0_59] : memref<1x22x22x32xf32, #tpu.memory_space<vmem>>, vector<1x16x16x32xf32>
    %66 = vector.shape_cast %65 : vector<1x16x16x32xf32> to vector<16x16x32xf32>
    %67 = vector.shape_cast %66 : vector<16x16x32xf32> to vector<256x32xf32>
    %68 = arith.truncf %67 : vector<256x32xf32> to vector<256x32xbf16>
    %c8 = arith.constant 8 : index
    %c0_60 = arith.constant 0 : index
    %c0_61 = arith.constant 0 : index
    %69 = vector.load %arg2[%c8, %c0_60, %c0_61] : memref<28x32x32xbf16, #tpu.memory_space<vmem>>, vector<1x32x32xbf16>
    %70 = vector.shape_cast %69 : vector<1x32x32xbf16> to vector<32x32xbf16>
    %cst_62 = arith.constant dense<0.000000e+00> : vector<256x32xf32>
    %71 = tpu.matmul %68, %70, %cst_62 {dimension_numbers = #tpu.dot_dimension_numbers<[1], [0], [0], [1], [0, 0, 1, 1], [], []>} : vector<256x32xbf16>, vector<32x32xbf16>, vector<256x32xf32> -> vector<256x32xf32>
    %72 = arith.addf %64, %71 : vector<256x32xf32>
    %c0_63 = arith.constant 0 : index
    %c1_64 = arith.constant 1 : index
    %c1_65 = arith.constant 1 : index
    %c0_66 = arith.constant 0 : index
    %73 = vector.load %arg1[%c0_63, %c1_64, %c1_65, %c0_66] : memref<1x22x22x32xf32, #tpu.memory_space<vmem>>, vector<1x16x16x32xf32>
    %74 = vector.shape_cast %73 : vector<1x16x16x32xf32> to vector<16x16x32xf32>
    %75 = vector.shape_cast %74 : vector<16x16x32xf32> to vector<256x32xf32>
    %76 = arith.truncf %75 : vector<256x32xf32> to vector<256x32xbf16>
    %c9 = arith.constant 9 : index
    %c0_67 = arith.constant 0 : index
    %c0_68 = arith.constant 0 : index
    %77 = vector.load %arg2[%c9, %c0_67, %c0_68] : memref<28x32x32xbf16, #tpu.memory_space<vmem>>, vector<1x32x32xbf16>
    %78 = vector.shape_cast %77 : vector<1x32x32xbf16> to vector<32x32xbf16>
    %cst_69 = arith.constant dense<0.000000e+00> : vector<256x32xf32>
    %79 = tpu.matmul %76, %78, %cst_69 {dimension_numbers = #tpu.dot_dimension_numbers<[1], [0], [0], [1], [0, 0, 1, 1], [], []>} : vector<256x32xbf16>, vector<32x32xbf16>, vector<256x32xf32> -> vector<256x32xf32>
    %80 = arith.addf %72, %79 : vector<256x32xf32>
    %c0_70 = arith.constant 0 : index
    %c1_71 = arith.constant 1 : index
    %c3_72 = arith.constant 3 : index
    %c0_73 = arith.constant 0 : index
    %81 = vector.load %arg1[%c0_70, %c1_71, %c3_72, %c0_73] : memref<1x22x22x32xf32, #tpu.memory_space<vmem>>, vector<1x16x16x32xf32>
    %82 = vector.shape_cast %81 : vector<1x16x16x32xf32> to vector<16x16x32xf32>
    %83 = vector.shape_cast %82 : vector<16x16x32xf32> to vector<256x32xf32>
    %84 = arith.truncf %83 : vector<256x32xf32> to vector<256x32xbf16>
    %c10 = arith.constant 10 : index
    %c0_74 = arith.constant 0 : index
    %c0_75 = arith.constant 0 : index
    %85 = vector.load %arg2[%c10, %c0_74, %c0_75] : memref<28x32x32xbf16, #tpu.memory_space<vmem>>, vector<1x32x32xbf16>
    %86 = vector.shape_cast %85 : vector<1x32x32xbf16> to vector<32x32xbf16>
    %cst_76 = arith.constant dense<0.000000e+00> : vector<256x32xf32>
    %87 = tpu.matmul %84, %86, %cst_76 {dimension_numbers = #tpu.dot_dimension_numbers<[1], [0], [0], [1], [0, 0, 1, 1], [], []>} : vector<256x32xbf16>, vector<32x32xbf16>, vector<256x32xf32> -> vector<256x32xf32>
    %88 = arith.addf %80, %87 : vector<256x32xf32>
    %c0_77 = arith.constant 0 : index
    %c1_78 = arith.constant 1 : index
    %c5_79 = arith.constant 5 : index
    %c0_80 = arith.constant 0 : index
    %89 = vector.load %arg1[%c0_77, %c1_78, %c5_79, %c0_80] : memref<1x22x22x32xf32, #tpu.memory_space<vmem>>, vector<1x16x16x32xf32>
    %90 = vector.shape_cast %89 : vector<1x16x16x32xf32> to vector<16x16x32xf32>
    %91 = vector.shape_cast %90 : vector<16x16x32xf32> to vector<256x32xf32>
    %92 = arith.truncf %91 : vector<256x32xf32> to vector<256x32xbf16>
    %c11 = arith.constant 11 : index
    %c0_81 = arith.constant 0 : index
    %c0_82 = arith.constant 0 : index
    %93 = vector.load %arg2[%c11, %c0_81, %c0_82] : memref<28x32x32xbf16, #tpu.memory_space<vmem>>, vector<1x32x32xbf16>
    %94 = vector.shape_cast %93 : vector<1x32x32xbf16> to vector<32x32xbf16>
    %cst_83 = arith.constant dense<0.000000e+00> : vector<256x32xf32>
    %95 = tpu.matmul %92, %94, %cst_83 {dimension_numbers = #tpu.dot_dimension_numbers<[1], [0], [0], [1], [0, 0, 1, 1], [], []>} : vector<256x32xbf16>, vector<32x32xbf16>, vector<256x32xf32> -> vector<256x32xf32>
    %96 = arith.addf %88, %95 : vector<256x32xf32>
    %c0_84 = arith.constant 0 : index
    %c3_85 = arith.constant 3 : index
    %c1_86 = arith.constant 1 : index
    %c0_87 = arith.constant 0 : index
    %97 = vector.load %arg1[%c0_84, %c3_85, %c1_86, %c0_87] : memref<1x22x22x32xf32, #tpu.memory_space<vmem>>, vector<1x16x16x32xf32>
    %98 = vector.shape_cast %97 : vector<1x16x16x32xf32> to vector<16x16x32xf32>
    %99 = vector.shape_cast %98 : vector<16x16x32xf32> to vector<256x32xf32>
    %100 = arith.truncf %99 : vector<256x32xf32> to vector<256x32xbf16>
    %c12 = arith.constant 12 : index
    %c0_88 = arith.constant 0 : index
    %c0_89 = arith.constant 0 : index
    %101 = vector.load %arg2[%c12, %c0_88, %c0_89] : memref<28x32x32xbf16, #tpu.memory_space<vmem>>, vector<1x32x32xbf16>
    %102 = vector.shape_cast %101 : vector<1x32x32xbf16> to vector<32x32xbf16>
    %cst_90 = arith.constant dense<0.000000e+00> : vector<256x32xf32>
    %103 = tpu.matmul %100, %102, %cst_90 {dimension_numbers = #tpu.dot_dimension_numbers<[1], [0], [0], [1], [0, 0, 1, 1], [], []>} : vector<256x32xbf16>, vector<32x32xbf16>, vector<256x32xf32> -> vector<256x32xf32>
    %104 = arith.addf %96, %103 : vector<256x32xf32>
    %c0_91 = arith.constant 0 : index
    %c3_92 = arith.constant 3 : index
    %c3_93 = arith.constant 3 : index
    %c0_94 = arith.constant 0 : index
    %105 = vector.load %arg1[%c0_91, %c3_92, %c3_93, %c0_94] : memref<1x22x22x32xf32, #tpu.memory_space<vmem>>, vector<1x16x16x32xf32>
    %106 = vector.shape_cast %105 : vector<1x16x16x32xf32> to vector<16x16x32xf32>
    %107 = vector.shape_cast %106 : vector<16x16x32xf32> to vector<256x32xf32>
    %108 = arith.truncf %107 : vector<256x32xf32> to vector<256x32xbf16>
    %c13 = arith.constant 13 : index
    %c0_95 = arith.constant 0 : index
    %c0_96 = arith.constant 0 : index
    %109 = vector.load %arg2[%c13, %c0_95, %c0_96] : memref<28x32x32xbf16, #tpu.memory_space<vmem>>, vector<1x32x32xbf16>
    %110 = vector.shape_cast %109 : vector<1x32x32xbf16> to vector<32x32xbf16>
    %cst_97 = arith.constant dense<0.000000e+00> : vector<256x32xf32>
    %111 = tpu.matmul %108, %110, %cst_97 {dimension_numbers = #tpu.dot_dimension_numbers<[1], [0], [0], [1], [0, 0, 1, 1], [], []>} : vector<256x32xbf16>, vector<32x32xbf16>, vector<256x32xf32> -> vector<256x32xf32>
    %112 = arith.addf %104, %111 : vector<256x32xf32>
    %c0_98 = arith.constant 0 : index
    %c3_99 = arith.constant 3 : index
    %c5_100 = arith.constant 5 : index
    %c0_101 = arith.constant 0 : index
    %113 = vector.load %arg1[%c0_98, %c3_99, %c5_100, %c0_101] : memref<1x22x22x32xf32, #tpu.memory_space<vmem>>, vector<1x16x16x32xf32>
    %114 = vector.shape_cast %113 : vector<1x16x16x32xf32> to vector<16x16x32xf32>
    %115 = vector.shape_cast %114 : vector<16x16x32xf32> to vector<256x32xf32>
    %116 = arith.truncf %115 : vector<256x32xf32> to vector<256x32xbf16>
    %c14 = arith.constant 14 : index
    %c0_102 = arith.constant 0 : index
    %c0_103 = arith.constant 0 : index
    %117 = vector.load %arg2[%c14, %c0_102, %c0_103] : memref<28x32x32xbf16, #tpu.memory_space<vmem>>, vector<1x32x32xbf16>
    %118 = vector.shape_cast %117 : vector<1x32x32xbf16> to vector<32x32xbf16>
    %cst_104 = arith.constant dense<0.000000e+00> : vector<256x32xf32>
    %119 = tpu.matmul %116, %118, %cst_104 {dimension_numbers = #tpu.dot_dimension_numbers<[1], [0], [0], [1], [0, 0, 1, 1], [], []>} : vector<256x32xbf16>, vector<32x32xbf16>, vector<256x32xf32> -> vector<256x32xf32>
    %120 = arith.addf %112, %119 : vector<256x32xf32>
    %c0_105 = arith.constant 0 : index
    %c5_106 = arith.constant 5 : index
    %c1_107 = arith.constant 1 : index
    %c0_108 = arith.constant 0 : index
    %121 = vector.load %arg1[%c0_105, %c5_106, %c1_107, %c0_108] : memref<1x22x22x32xf32, #tpu.memory_space<vmem>>, vector<1x16x16x32xf32>
    %122 = vector.shape_cast %121 : vector<1x16x16x32xf32> to vector<16x16x32xf32>
    %123 = vector.shape_cast %122 : vector<16x16x32xf32> to vector<256x32xf32>
    %124 = arith.truncf %123 : vector<256x32xf32> to vector<256x32xbf16>
    %c15 = arith.constant 15 : index
    %c0_109 = arith.constant 0 : index
    %c0_110 = arith.constant 0 : index
    %125 = vector.load %arg2[%c15, %c0_109, %c0_110] : memref<28x32x32xbf16, #tpu.memory_space<vmem>>, vector<1x32x32xbf16>
    %126 = vector.shape_cast %125 : vector<1x32x32xbf16> to vector<32x32xbf16>
    %cst_111 = arith.constant dense<0.000000e+00> : vector<256x32xf32>
    %127 = tpu.matmul %124, %126, %cst_111 {dimension_numbers = #tpu.dot_dimension_numbers<[1], [0], [0], [1], [0, 0, 1, 1], [], []>} : vector<256x32xbf16>, vector<32x32xbf16>, vector<256x32xf32> -> vector<256x32xf32>
    %128 = arith.addf %120, %127 : vector<256x32xf32>
    %c0_112 = arith.constant 0 : index
    %c5_113 = arith.constant 5 : index
    %c3_114 = arith.constant 3 : index
    %c0_115 = arith.constant 0 : index
    %129 = vector.load %arg1[%c0_112, %c5_113, %c3_114, %c0_115] : memref<1x22x22x32xf32, #tpu.memory_space<vmem>>, vector<1x16x16x32xf32>
    %130 = vector.shape_cast %129 : vector<1x16x16x32xf32> to vector<16x16x32xf32>
    %131 = vector.shape_cast %130 : vector<16x16x32xf32> to vector<256x32xf32>
    %132 = arith.truncf %131 : vector<256x32xf32> to vector<256x32xbf16>
    %c16 = arith.constant 16 : index
    %c0_116 = arith.constant 0 : index
    %c0_117 = arith.constant 0 : index
    %133 = vector.load %arg2[%c16, %c0_116, %c0_117] : memref<28x32x32xbf16, #tpu.memory_space<vmem>>, vector<1x32x32xbf16>
    %134 = vector.shape_cast %133 : vector<1x32x32xbf16> to vector<32x32xbf16>
    %cst_118 = arith.constant dense<0.000000e+00> : vector<256x32xf32>
    %135 = tpu.matmul %132, %134, %cst_118 {dimension_numbers = #tpu.dot_dimension_numbers<[1], [0], [0], [1], [0, 0, 1, 1], [], []>} : vector<256x32xbf16>, vector<32x32xbf16>, vector<256x32xf32> -> vector<256x32xf32>
    %136 = arith.addf %128, %135 : vector<256x32xf32>
    %c0_119 = arith.constant 0 : index
    %c5_120 = arith.constant 5 : index
    %c5_121 = arith.constant 5 : index
    %c0_122 = arith.constant 0 : index
    %137 = vector.load %arg1[%c0_119, %c5_120, %c5_121, %c0_122] : memref<1x22x22x32xf32, #tpu.memory_space<vmem>>, vector<1x16x16x32xf32>
    %138 = vector.shape_cast %137 : vector<1x16x16x32xf32> to vector<16x16x32xf32>
    %139 = vector.shape_cast %138 : vector<16x16x32xf32> to vector<256x32xf32>
    %140 = arith.truncf %139 : vector<256x32xf32> to vector<256x32xbf16>
    %c17 = arith.constant 17 : index
    %c0_123 = arith.constant 0 : index
    %c0_124 = arith.constant 0 : index
    %141 = vector.load %arg2[%c17, %c0_123, %c0_124] : memref<28x32x32xbf16, #tpu.memory_space<vmem>>, vector<1x32x32xbf16>
    %142 = vector.shape_cast %141 : vector<1x32x32xbf16> to vector<32x32xbf16>
    %cst_125 = arith.constant dense<0.000000e+00> : vector<256x32xf32>
    %143 = tpu.matmul %140, %142, %cst_125 {dimension_numbers = #tpu.dot_dimension_numbers<[1], [0], [0], [1], [0, 0, 1, 1], [], []>} : vector<256x32xbf16>, vector<32x32xbf16>, vector<256x32xf32> -> vector<256x32xf32>
    %144 = arith.addf %136, %143 : vector<256x32xf32>
    %c0_126 = arith.constant 0 : index
    %c2_127 = arith.constant 2 : index
    %c2_128 = arith.constant 2 : index
    %c0_129 = arith.constant 0 : index
    %145 = vector.load %arg1[%c0_126, %c2_127, %c2_128, %c0_129] : memref<1x22x22x32xf32, #tpu.memory_space<vmem>>, vector<1x16x16x32xf32>
    %146 = vector.shape_cast %145 : vector<1x16x16x32xf32> to vector<16x16x32xf32>
    %147 = vector.shape_cast %146 : vector<16x16x32xf32> to vector<256x32xf32>
    %148 = arith.truncf %147 : vector<256x32xf32> to vector<256x32xbf16>
    %c18 = arith.constant 18 : index
    %c0_130 = arith.constant 0 : index
    %c0_131 = arith.constant 0 : index
    %149 = vector.load %arg2[%c18, %c0_130, %c0_131] : memref<28x32x32xbf16, #tpu.memory_space<vmem>>, vector<1x32x32xbf16>
    %150 = vector.shape_cast %149 : vector<1x32x32xbf16> to vector<32x32xbf16>
    %cst_132 = arith.constant dense<0.000000e+00> : vector<256x32xf32>
    %151 = tpu.matmul %148, %150, %cst_132 {dimension_numbers = #tpu.dot_dimension_numbers<[1], [0], [0], [1], [0, 0, 1, 1], [], []>} : vector<256x32xbf16>, vector<32x32xbf16>, vector<256x32xf32> -> vector<256x32xf32>
    %152 = arith.addf %144, %151 : vector<256x32xf32>
    %c0_133 = arith.constant 0 : index
    %c2_134 = arith.constant 2 : index
    %c3_135 = arith.constant 3 : index
    %c0_136 = arith.constant 0 : index
    %153 = vector.load %arg1[%c0_133, %c2_134, %c3_135, %c0_136] : memref<1x22x22x32xf32, #tpu.memory_space<vmem>>, vector<1x16x16x32xf32>
    %154 = vector.shape_cast %153 : vector<1x16x16x32xf32> to vector<16x16x32xf32>
    %155 = vector.shape_cast %154 : vector<16x16x32xf32> to vector<256x32xf32>
    %156 = arith.truncf %155 : vector<256x32xf32> to vector<256x32xbf16>
    %c19 = arith.constant 19 : index
    %c0_137 = arith.constant 0 : index
    %c0_138 = arith.constant 0 : index
    %157 = vector.load %arg2[%c19, %c0_137, %c0_138] : memref<28x32x32xbf16, #tpu.memory_space<vmem>>, vector<1x32x32xbf16>
    %158 = vector.shape_cast %157 : vector<1x32x32xbf16> to vector<32x32xbf16>
    %cst_139 = arith.constant dense<0.000000e+00> : vector<256x32xf32>
    %159 = tpu.matmul %156, %158, %cst_139 {dimension_numbers = #tpu.dot_dimension_numbers<[1], [0], [0], [1], [0, 0, 1, 1], [], []>} : vector<256x32xbf16>, vector<32x32xbf16>, vector<256x32xf32> -> vector<256x32xf32>
    %160 = arith.addf %152, %159 : vector<256x32xf32>
    %c0_140 = arith.constant 0 : index
    %c2_141 = arith.constant 2 : index
    %c4_142 = arith.constant 4 : index
    %c0_143 = arith.constant 0 : index
    %161 = vector.load %arg1[%c0_140, %c2_141, %c4_142, %c0_143] : memref<1x22x22x32xf32, #tpu.memory_space<vmem>>, vector<1x16x16x32xf32>
    %162 = vector.shape_cast %161 : vector<1x16x16x32xf32> to vector<16x16x32xf32>
    %163 = vector.shape_cast %162 : vector<16x16x32xf32> to vector<256x32xf32>
    %164 = arith.truncf %163 : vector<256x32xf32> to vector<256x32xbf16>
    %c20 = arith.constant 20 : index
    %c0_144 = arith.constant 0 : index
    %c0_145 = arith.constant 0 : index
    %165 = vector.load %arg2[%c20, %c0_144, %c0_145] : memref<28x32x32xbf16, #tpu.memory_space<vmem>>, vector<1x32x32xbf16>
    %166 = vector.shape_cast %165 : vector<1x32x32xbf16> to vector<32x32xbf16>
    %cst_146 = arith.constant dense<0.000000e+00> : vector<256x32xf32>
    %167 = tpu.matmul %164, %166, %cst_146 {dimension_numbers = #tpu.dot_dimension_numbers<[1], [0], [0], [1], [0, 0, 1, 1], [], []>} : vector<256x32xbf16>, vector<32x32xbf16>, vector<256x32xf32> -> vector<256x32xf32>
    %168 = arith.addf %160, %167 : vector<256x32xf32>
    %c0_147 = arith.constant 0 : index
    %c3_148 = arith.constant 3 : index
    %c2_149 = arith.constant 2 : index
    %c0_150 = arith.constant 0 : index
    %169 = vector.load %arg1[%c0_147, %c3_148, %c2_149, %c0_150] : memref<1x22x22x32xf32, #tpu.memory_space<vmem>>, vector<1x16x16x32xf32>
    %170 = vector.shape_cast %169 : vector<1x16x16x32xf32> to vector<16x16x32xf32>
    %171 = vector.shape_cast %170 : vector<16x16x32xf32> to vector<256x32xf32>
    %172 = arith.truncf %171 : vector<256x32xf32> to vector<256x32xbf16>
    %c21 = arith.constant 21 : index
    %c0_151 = arith.constant 0 : index
    %c0_152 = arith.constant 0 : index
    %173 = vector.load %arg2[%c21, %c0_151, %c0_152] : memref<28x32x32xbf16, #tpu.memory_space<vmem>>, vector<1x32x32xbf16>
    %174 = vector.shape_cast %173 : vector<1x32x32xbf16> to vector<32x32xbf16>
    %cst_153 = arith.constant dense<0.000000e+00> : vector<256x32xf32>
    %175 = tpu.matmul %172, %174, %cst_153 {dimension_numbers = #tpu.dot_dimension_numbers<[1], [0], [0], [1], [0, 0, 1, 1], [], []>} : vector<256x32xbf16>, vector<32x32xbf16>, vector<256x32xf32> -> vector<256x32xf32>
    %176 = arith.addf %168, %175 : vector<256x32xf32>
    %c0_154 = arith.constant 0 : index
    %c3_155 = arith.constant 3 : index
    %c3_156 = arith.constant 3 : index
    %c0_157 = arith.constant 0 : index
    %177 = vector.load %arg1[%c0_154, %c3_155, %c3_156, %c0_157] : memref<1x22x22x32xf32, #tpu.memory_space<vmem>>, vector<1x16x16x32xf32>
    %178 = vector.shape_cast %177 : vector<1x16x16x32xf32> to vector<16x16x32xf32>
    %179 = vector.shape_cast %178 : vector<16x16x32xf32> to vector<256x32xf32>
    %180 = arith.truncf %179 : vector<256x32xf32> to vector<256x32xbf16>
    %c22 = arith.constant 22 : index
    %c0_158 = arith.constant 0 : index
    %c0_159 = arith.constant 0 : index
    %181 = vector.load %arg2[%c22, %c0_158, %c0_159] : memref<28x32x32xbf16, #tpu.memory_space<vmem>>, vector<1x32x32xbf16>
    %182 = vector.shape_cast %181 : vector<1x32x32xbf16> to vector<32x32xbf16>
    %cst_160 = arith.constant dense<0.000000e+00> : vector<256x32xf32>
    %183 = tpu.matmul %180, %182, %cst_160 {dimension_numbers = #tpu.dot_dimension_numbers<[1], [0], [0], [1], [0, 0, 1, 1], [], []>} : vector<256x32xbf16>, vector<32x32xbf16>, vector<256x32xf32> -> vector<256x32xf32>
    %184 = arith.addf %176, %183 : vector<256x32xf32>
    %c0_161 = arith.constant 0 : index
    %c3_162 = arith.constant 3 : index
    %c4_163 = arith.constant 4 : index
    %c0_164 = arith.constant 0 : index
    %185 = vector.load %arg1[%c0_161, %c3_162, %c4_163, %c0_164] : memref<1x22x22x32xf32, #tpu.memory_space<vmem>>, vector<1x16x16x32xf32>
    %186 = vector.shape_cast %185 : vector<1x16x16x32xf32> to vector<16x16x32xf32>
    %187 = vector.shape_cast %186 : vector<16x16x32xf32> to vector<256x32xf32>
    %188 = arith.truncf %187 : vector<256x32xf32> to vector<256x32xbf16>
    %c23 = arith.constant 23 : index
    %c0_165 = arith.constant 0 : index
    %c0_166 = arith.constant 0 : index
    %189 = vector.load %arg2[%c23, %c0_165, %c0_166] : memref<28x32x32xbf16, #tpu.memory_space<vmem>>, vector<1x32x32xbf16>
    %190 = vector.shape_cast %189 : vector<1x32x32xbf16> to vector<32x32xbf16>
    %cst_167 = arith.constant dense<0.000000e+00> : vector<256x32xf32>
    %191 = tpu.matmul %188, %190, %cst_167 {dimension_numbers = #tpu.dot_dimension_numbers<[1], [0], [0], [1], [0, 0, 1, 1], [], []>} : vector<256x32xbf16>, vector<32x32xbf16>, vector<256x32xf32> -> vector<256x32xf32>
    %192 = arith.addf %184, %191 : vector<256x32xf32>
    %c0_168 = arith.constant 0 : index
    %c4_169 = arith.constant 4 : index
    %c2_170 = arith.constant 2 : index
    %c0_171 = arith.constant 0 : index
    %193 = vector.load %arg1[%c0_168, %c4_169, %c2_170, %c0_171] : memref<1x22x22x32xf32, #tpu.memory_space<vmem>>, vector<1x16x16x32xf32>
    %194 = vector.shape_cast %193 : vector<1x16x16x32xf32> to vector<16x16x32xf32>
    %195 = vector.shape_cast %194 : vector<16x16x32xf32> to vector<256x32xf32>
    %196 = arith.truncf %195 : vector<256x32xf32> to vector<256x32xbf16>
    %c24 = arith.constant 24 : index
    %c0_172 = arith.constant 0 : index
    %c0_173 = arith.constant 0 : index
    %197 = vector.load %arg2[%c24, %c0_172, %c0_173] : memref<28x32x32xbf16, #tpu.memory_space<vmem>>, vector<1x32x32xbf16>
    %198 = vector.shape_cast %197 : vector<1x32x32xbf16> to vector<32x32xbf16>
    %cst_174 = arith.constant dense<0.000000e+00> : vector<256x32xf32>
    %199 = tpu.matmul %196, %198, %cst_174 {dimension_numbers = #tpu.dot_dimension_numbers<[1], [0], [0], [1], [0, 0, 1, 1], [], []>} : vector<256x32xbf16>, vector<32x32xbf16>, vector<256x32xf32> -> vector<256x32xf32>
    %200 = arith.addf %192, %199 : vector<256x32xf32>
    %c0_175 = arith.constant 0 : index
    %c4_176 = arith.constant 4 : index
    %c3_177 = arith.constant 3 : index
    %c0_178 = arith.constant 0 : index
    %201 = vector.load %arg1[%c0_175, %c4_176, %c3_177, %c0_178] : memref<1x22x22x32xf32, #tpu.memory_space<vmem>>, vector<1x16x16x32xf32>
    %202 = vector.shape_cast %201 : vector<1x16x16x32xf32> to vector<16x16x32xf32>
    %203 = vector.shape_cast %202 : vector<16x16x32xf32> to vector<256x32xf32>
    %204 = arith.truncf %203 : vector<256x32xf32> to vector<256x32xbf16>
    %c25 = arith.constant 25 : index
    %c0_179 = arith.constant 0 : index
    %c0_180 = arith.constant 0 : index
    %205 = vector.load %arg2[%c25, %c0_179, %c0_180] : memref<28x32x32xbf16, #tpu.memory_space<vmem>>, vector<1x32x32xbf16>
    %206 = vector.shape_cast %205 : vector<1x32x32xbf16> to vector<32x32xbf16>
    %cst_181 = arith.constant dense<0.000000e+00> : vector<256x32xf32>
    %207 = tpu.matmul %204, %206, %cst_181 {dimension_numbers = #tpu.dot_dimension_numbers<[1], [0], [0], [1], [0, 0, 1, 1], [], []>} : vector<256x32xbf16>, vector<32x32xbf16>, vector<256x32xf32> -> vector<256x32xf32>
    %208 = arith.addf %200, %207 : vector<256x32xf32>
    %c0_182 = arith.constant 0 : index
    %c4_183 = arith.constant 4 : index
    %c4_184 = arith.constant 4 : index
    %c0_185 = arith.constant 0 : index
    %209 = vector.load %arg1[%c0_182, %c4_183, %c4_184, %c0_185] : memref<1x22x22x32xf32, #tpu.memory_space<vmem>>, vector<1x16x16x32xf32>
    %210 = vector.shape_cast %209 : vector<1x16x16x32xf32> to vector<16x16x32xf32>
    %211 = vector.shape_cast %210 : vector<16x16x32xf32> to vector<256x32xf32>
    %212 = arith.truncf %211 : vector<256x32xf32> to vector<256x32xbf16>
    %c26 = arith.constant 26 : index
    %c0_186 = arith.constant 0 : index
    %c0_187 = arith.constant 0 : index
    %213 = vector.load %arg2[%c26, %c0_186, %c0_187] : memref<28x32x32xbf16, #tpu.memory_space<vmem>>, vector<1x32x32xbf16>
    %214 = vector.shape_cast %213 : vector<1x32x32xbf16> to vector<32x32xbf16>
    %cst_188 = arith.constant dense<0.000000e+00> : vector<256x32xf32>
    %215 = tpu.matmul %212, %214, %cst_188 {dimension_numbers = #tpu.dot_dimension_numbers<[1], [0], [0], [1], [0, 0, 1, 1], [], []>} : vector<256x32xbf16>, vector<32x32xbf16>, vector<256x32xf32> -> vector<256x32xf32>
    %216 = arith.addf %208, %215 : vector<256x32xf32>
    %c0_189 = arith.constant 0 : index
    %c3_190 = arith.constant 3 : index
    %c3_191 = arith.constant 3 : index
    %c0_192 = arith.constant 0 : index
    %217 = vector.load %arg1[%c0_189, %c3_190, %c3_191, %c0_192] : memref<1x22x22x32xf32, #tpu.memory_space<vmem>>, vector<1x16x16x32xf32>
    %218 = vector.shape_cast %217 : vector<1x16x16x32xf32> to vector<16x16x32xf32>
    %219 = vector.shape_cast %218 : vector<16x16x32xf32> to vector<256x32xf32>
    %220 = arith.truncf %219 : vector<256x32xf32> to vector<256x32xbf16>
    %c27 = arith.constant 27 : index
    %c0_193 = arith.constant 0 : index
    %c0_194 = arith.constant 0 : index
    %221 = vector.load %arg2[%c27, %c0_193, %c0_194] : memref<28x32x32xbf16, #tpu.memory_space<vmem>>, vector<1x32x32xbf16>
    %222 = vector.shape_cast %221 : vector<1x32x32xbf16> to vector<32x32xbf16>
    %cst_195 = arith.constant dense<0.000000e+00> : vector<256x32xf32>
    %223 = tpu.matmul %220, %222, %cst_195 {dimension_numbers = #tpu.dot_dimension_numbers<[1], [0], [0], [1], [0, 0, 1, 1], [], []>} : vector<256x32xbf16>, vector<32x32xbf16>, vector<256x32xf32> -> vector<256x32xf32>
    %224 = arith.addf %216, %223 : vector<256x32xf32>
    %c0_196 = arith.constant 0 : index
    %c0_197 = arith.constant 0 : index
    %225 = vector.load %arg3[%c0_196, %c0_197] : memref<1x32xf32, #tpu.memory_space<vmem>>, vector<1x32xf32>
    %226 = vector.broadcast %225 : vector<1x32xf32> to vector<256x32xf32>
    %227 = arith.addf %224, %226 : vector<256x32xf32>
    %cst_198 = arith.constant 0.000000e+00 : f32
    %228 = vector.broadcast %cst_198 : f32 to vector<256x32xf32>
    %229 = arith.maximumf %227, %228 : vector<256x32xf32>
    %cst_199 = arith.constant 0.000000e+00 : f32
    %230 = vector.broadcast %cst_199 : f32 to vector<18x18x32xf32>
    %c0_200 = arith.constant 0 : index
    %c0_201 = arith.constant 0 : index
    %c0_202 = arith.constant 0 : index
    %231 = vector.load %arg9[%c0_200, %c0_201, %c0_202] : memref<18x18x32xf32, #tpu.memory_space<vmem>>, vector<18x18x32xf32>
    tpu.vector_store %arg9[%c0_200, %c0_201, %c0_202], %230 {strides = array<i32>} : memref<18x18x32xf32, #tpu.memory_space<vmem>>, vector<18x18x32xf32>,
    %232 = vector.shape_cast %229 : vector<256x32xf32> to vector<16x16x32xf32>
    %c1_203 = arith.constant 1 : index
    %c1_204 = arith.constant 1 : index
    %c0_205 = arith.constant 0 : index
    %233 = vector.load %arg9[%c1_203, %c1_204, %c0_205] : memref<18x18x32xf32, #tpu.memory_space<vmem>>, vector<16x16x32xf32>
    tpu.vector_store %arg9[%c1_203, %c1_204, %c0_205], %232 {strides = array<i32>} : memref<18x18x32xf32, #tpu.memory_space<vmem>>, vector<16x16x32xf32>,
    %cst_206 = arith.constant 0.000000e+00 : f32
    %234 = vector.broadcast %cst_206 : f32 to vector<256x16xf32>
    %c0_207 = arith.constant 0 : index
    %c0_208 = arith.constant 0 : index
    %c0_209 = arith.constant 0 : index
    %235 = vector.load %arg9[%c0_207, %c0_208, %c0_209] : memref<18x18x32xf32, #tpu.memory_space<vmem>>, vector<16x16x32xf32>
    %236 = vector.shape_cast %235 : vector<16x16x32xf32> to vector<256x32xf32>
    %237 = arith.truncf %236 : vector<256x32xf32> to vector<256x32xbf16>
    %c0_210 = arith.constant 0 : index
    %c0_211 = arith.constant 0 : index
    %c0_212 = arith.constant 0 : index
    %238 = vector.load %arg4[%c0_210, %c0_211, %c0_212] : memref<9x32x16xbf16, #tpu.memory_space<vmem>>, vector<1x32x16xbf16>
    %239 = vector.shape_cast %238 : vector<1x32x16xbf16> to vector<32x16xbf16>
    %cst_213 = arith.constant dense<0.000000e+00> : vector<256x16xf32>
    %240 = tpu.matmul %237, %239, %cst_213 {dimension_numbers = #tpu.dot_dimension_numbers<[1], [0], [0], [1], [0, 0, 1, 1], [], []>} : vector<256x32xbf16>, vector<32x16xbf16>, vector<256x16xf32> -> vector<256x16xf32>
    %241 = arith.addf %234, %240 : vector<256x16xf32>
    %c0_214 = arith.constant 0 : index
    %c1_215 = arith.constant 1 : index
    %c0_216 = arith.constant 0 : index
    %242 = vector.load %arg9[%c0_214, %c1_215, %c0_216] : memref<18x18x32xf32, #tpu.memory_space<vmem>>, vector<16x16x32xf32>
    %243 = vector.shape_cast %242 : vector<16x16x32xf32> to vector<256x32xf32>
    %244 = arith.truncf %243 : vector<256x32xf32> to vector<256x32xbf16>
    %c1_217 = arith.constant 1 : index
    %c0_218 = arith.constant 0 : index
    %c0_219 = arith.constant 0 : index
    %245 = vector.load %arg4[%c1_217, %c0_218, %c0_219] : memref<9x32x16xbf16, #tpu.memory_space<vmem>>, vector<1x32x16xbf16>
    %246 = vector.shape_cast %245 : vector<1x32x16xbf16> to vector<32x16xbf16>
    %cst_220 = arith.constant dense<0.000000e+00> : vector<256x16xf32>
    %247 = tpu.matmul %244, %246, %cst_220 {dimension_numbers = #tpu.dot_dimension_numbers<[1], [0], [0], [1], [0, 0, 1, 1], [], []>} : vector<256x32xbf16>, vector<32x16xbf16>, vector<256x16xf32> -> vector<256x16xf32>
    %248 = arith.addf %241, %247 : vector<256x16xf32>
    %c0_221 = arith.constant 0 : index
    %c2_222 = arith.constant 2 : index
    %c0_223 = arith.constant 0 : index
    %249 = vector.load %arg9[%c0_221, %c2_222, %c0_223] : memref<18x18x32xf32, #tpu.memory_space<vmem>>, vector<16x16x32xf32>
    %250 = vector.shape_cast %249 : vector<16x16x32xf32> to vector<256x32xf32>
    %251 = arith.truncf %250 : vector<256x32xf32> to vector<256x32xbf16>
    %c2_224 = arith.constant 2 : index
    %c0_225 = arith.constant 0 : index
    %c0_226 = arith.constant 0 : index
    %252 = vector.load %arg4[%c2_224, %c0_225, %c0_226] : memref<9x32x16xbf16, #tpu.memory_space<vmem>>, vector<1x32x16xbf16>
    %253 = vector.shape_cast %252 : vector<1x32x16xbf16> to vector<32x16xbf16>
    %cst_227 = arith.constant dense<0.000000e+00> : vector<256x16xf32>
    %254 = tpu.matmul %251, %253, %cst_227 {dimension_numbers = #tpu.dot_dimension_numbers<[1], [0], [0], [1], [0, 0, 1, 1], [], []>} : vector<256x32xbf16>, vector<32x16xbf16>, vector<256x16xf32> -> vector<256x16xf32>
    %255 = arith.addf %248, %254 : vector<256x16xf32>
    %c1_228 = arith.constant 1 : index
    %c0_229 = arith.constant 0 : index
    %c0_230 = arith.constant 0 : index
    %256 = vector.load %arg9[%c1_228, %c0_229, %c0_230] : memref<18x18x32xf32, #tpu.memory_space<vmem>>, vector<16x16x32xf32>
    %257 = vector.shape_cast %256 : vector<16x16x32xf32> to vector<256x32xf32>
    %258 = arith.truncf %257 : vector<256x32xf32> to vector<256x32xbf16>
    %c3_231 = arith.constant 3 : index
    %c0_232 = arith.constant 0 : index
    %c0_233 = arith.constant 0 : index
    %259 = vector.load %arg4[%c3_231, %c0_232, %c0_233] : memref<9x32x16xbf16, #tpu.memory_space<vmem>>, vector<1x32x16xbf16>
    %260 = vector.shape_cast %259 : vector<1x32x16xbf16> to vector<32x16xbf16>
    %cst_234 = arith.constant dense<0.000000e+00> : vector<256x16xf32>
    %261 = tpu.matmul %258, %260, %cst_234 {dimension_numbers = #tpu.dot_dimension_numbers<[1], [0], [0], [1], [0, 0, 1, 1], [], []>} : vector<256x32xbf16>, vector<32x16xbf16>, vector<256x16xf32> -> vector<256x16xf32>
    %262 = arith.addf %255, %261 : vector<256x16xf32>
    %c1_235 = arith.constant 1 : index
    %c1_236 = arith.constant 1 : index
    %c0_237 = arith.constant 0 : index
    %263 = vector.load %arg9[%c1_235, %c1_236, %c0_237] : memref<18x18x32xf32, #tpu.memory_space<vmem>>, vector<16x16x32xf32>
    %264 = vector.shape_cast %263 : vector<16x16x32xf32> to vector<256x32xf32>
    %265 = arith.truncf %264 : vector<256x32xf32> to vector<256x32xbf16>
    %c4_238 = arith.constant 4 : index
    %c0_239 = arith.constant 0 : index
    %c0_240 = arith.constant 0 : index
    %266 = vector.load %arg4[%c4_238, %c0_239, %c0_240] : memref<9x32x16xbf16, #tpu.memory_space<vmem>>, vector<1x32x16xbf16>
    %267 = vector.shape_cast %266 : vector<1x32x16xbf16> to vector<32x16xbf16>
    %cst_241 = arith.constant dense<0.000000e+00> : vector<256x16xf32>
    %268 = tpu.matmul %265, %267, %cst_241 {dimension_numbers = #tpu.dot_dimension_numbers<[1], [0], [0], [1], [0, 0, 1, 1], [], []>} : vector<256x32xbf16>, vector<32x16xbf16>, vector<256x16xf32> -> vector<256x16xf32>
    %269 = arith.addf %262, %268 : vector<256x16xf32>
    %c1_242 = arith.constant 1 : index
    %c2_243 = arith.constant 2 : index
    %c0_244 = arith.constant 0 : index
    %270 = vector.load %arg9[%c1_242, %c2_243, %c0_244] : memref<18x18x32xf32, #tpu.memory_space<vmem>>, vector<16x16x32xf32>
    %271 = vector.shape_cast %270 : vector<16x16x32xf32> to vector<256x32xf32>
    %272 = arith.truncf %271 : vector<256x32xf32> to vector<256x32xbf16>
    %c5_245 = arith.constant 5 : index
    %c0_246 = arith.constant 0 : index
    %c0_247 = arith.constant 0 : index
    %273 = vector.load %arg4[%c5_245, %c0_246, %c0_247] : memref<9x32x16xbf16, #tpu.memory_space<vmem>>, vector<1x32x16xbf16>
    %274 = vector.shape_cast %273 : vector<1x32x16xbf16> to vector<32x16xbf16>
    %cst_248 = arith.constant dense<0.000000e+00> : vector<256x16xf32>
    %275 = tpu.matmul %272, %274, %cst_248 {dimension_numbers = #tpu.dot_dimension_numbers<[1], [0], [0], [1], [0, 0, 1, 1], [], []>} : vector<256x32xbf16>, vector<32x16xbf16>, vector<256x16xf32> -> vector<256x16xf32>
    %276 = arith.addf %269, %275 : vector<256x16xf32>
    %c2_249 = arith.constant 2 : index
    %c0_250 = arith.constant 0 : index
    %c0_251 = arith.constant 0 : index
    %277 = vector.load %arg9[%c2_249, %c0_250, %c0_251] : memref<18x18x32xf32, #tpu.memory_space<vmem>>, vector<16x16x32xf32>
    %278 = vector.shape_cast %277 : vector<16x16x32xf32> to vector<256x32xf32>
    %279 = arith.truncf %278 : vector<256x32xf32> to vector<256x32xbf16>
    %c6_252 = arith.constant 6 : index
    %c0_253 = arith.constant 0 : index
    %c0_254 = arith.constant 0 : index
    %280 = vector.load %arg4[%c6_252, %c0_253, %c0_254] : memref<9x32x16xbf16, #tpu.memory_space<vmem>>, vector<1x32x16xbf16>
    %281 = vector.shape_cast %280 : vector<1x32x16xbf16> to vector<32x16xbf16>
    %cst_255 = arith.constant dense<0.000000e+00> : vector<256x16xf32>
    %282 = tpu.matmul %279, %281, %cst_255 {dimension_numbers = #tpu.dot_dimension_numbers<[1], [0], [0], [1], [0, 0, 1, 1], [], []>} : vector<256x32xbf16>, vector<32x16xbf16>, vector<256x16xf32> -> vector<256x16xf32>
    %283 = arith.addf %276, %282 : vector<256x16xf32>
    %c2_256 = arith.constant 2 : index
    %c1_257 = arith.constant 1 : index
    %c0_258 = arith.constant 0 : index
    %284 = vector.load %arg9[%c2_256, %c1_257, %c0_258] : memref<18x18x32xf32, #tpu.memory_space<vmem>>, vector<16x16x32xf32>
    %285 = vector.shape_cast %284 : vector<16x16x32xf32> to vector<256x32xf32>
    %286 = arith.truncf %285 : vector<256x32xf32> to vector<256x32xbf16>
    %c7_259 = arith.constant 7 : index
    %c0_260 = arith.constant 0 : index
    %c0_261 = arith.constant 0 : index
    %287 = vector.load %arg4[%c7_259, %c0_260, %c0_261] : memref<9x32x16xbf16, #tpu.memory_space<vmem>>, vector<1x32x16xbf16>
    %288 = vector.shape_cast %287 : vector<1x32x16xbf16> to vector<32x16xbf16>
    %cst_262 = arith.constant dense<0.000000e+00> : vector<256x16xf32>
    %289 = tpu.matmul %286, %288, %cst_262 {dimension_numbers = #tpu.dot_dimension_numbers<[1], [0], [0], [1], [0, 0, 1, 1], [], []>} : vector<256x32xbf16>, vector<32x16xbf16>, vector<256x16xf32> -> vector<256x16xf32>
    %290 = arith.addf %283, %289 : vector<256x16xf32>
    %c2_263 = arith.constant 2 : index
    %c2_264 = arith.constant 2 : index
    %c0_265 = arith.constant 0 : index
    %291 = vector.load %arg9[%c2_263, %c2_264, %c0_265] : memref<18x18x32xf32, #tpu.memory_space<vmem>>, vector<16x16x32xf32>
    %292 = vector.shape_cast %291 : vector<16x16x32xf32> to vector<256x32xf32>
    %293 = arith.truncf %292 : vector<256x32xf32> to vector<256x32xbf16>
    %c8_266 = arith.constant 8 : index
    %c0_267 = arith.constant 0 : index
    %c0_268 = arith.constant 0 : index
    %294 = vector.load %arg4[%c8_266, %c0_267, %c0_268] : memref<9x32x16xbf16, #tpu.memory_space<vmem>>, vector<1x32x16xbf16>
    %295 = vector.shape_cast %294 : vector<1x32x16xbf16> to vector<32x16xbf16>
    %cst_269 = arith.constant dense<0.000000e+00> : vector<256x16xf32>
    %296 = tpu.matmul %293, %295, %cst_269 {dimension_numbers = #tpu.dot_dimension_numbers<[1], [0], [0], [1], [0, 0, 1, 1], [], []>} : vector<256x32xbf16>, vector<32x16xbf16>, vector<256x16xf32> -> vector<256x16xf32>
    %297 = arith.addf %290, %296 : vector<256x16xf32>
    %c0_270 = arith.constant 0 : index
    %c0_271 = arith.constant 0 : index
    %298 = vector.load %arg5[%c0_270, %c0_271] : memref<1x16xf32, #tpu.memory_space<vmem>>, vector<1x16xf32>
    %299 = vector.broadcast %298 : vector<1x16xf32> to vector<256x16xf32>
    %300 = arith.addf %297, %299 : vector<256x16xf32>
    %cst_272 = arith.constant 0.000000e+00 : f32
    %301 = vector.broadcast %cst_272 : f32 to vector<256x16xf32>
    %302 = arith.maximumf %300, %301 : vector<256x16xf32>
    %cst_273 = arith.constant 0.000000e+00 : f32
    %303 = vector.broadcast %cst_273 : f32 to vector<17x17x16xf32>
    %c0_274 = arith.constant 0 : index
    %c0_275 = arith.constant 0 : index
    %c0_276 = arith.constant 0 : index
    %304 = vector.load %arg10[%c0_274, %c0_275, %c0_276] : memref<17x17x16xf32, #tpu.memory_space<vmem>>, vector<17x17x16xf32>
    tpu.vector_store %arg10[%c0_274, %c0_275, %c0_276], %303 {strides = array<i32>} : memref<17x17x16xf32, #tpu.memory_space<vmem>>, vector<17x17x16xf32>,
    %305 = vector.shape_cast %302 : vector<256x16xf32> to vector<16x16x16xf32>
    %c0_277 = arith.constant 0 : index
    %c0_278 = arith.constant 0 : index
    %c0_279 = arith.constant 0 : index
    %306 = vector.load %arg10[%c0_277, %c0_278, %c0_279] : memref<17x17x16xf32, #tpu.memory_space<vmem>>, vector<16x16x16xf32>
    tpu.vector_store %arg10[%c0_277, %c0_278, %c0_279], %305 {strides = array<i32>} : memref<17x17x16xf32, #tpu.memory_space<vmem>>, vector<16x16x16xf32>,
    %cst_280 = arith.constant 0.000000e+00 : f32
    %307 = vector.broadcast %cst_280 : f32 to vector<256x64xf32>
    %c0_281 = arith.constant 0 : index
    %c0_282 = arith.constant 0 : index
    %c0_283 = arith.constant 0 : index
    %308 = vector.load %arg10[%c0_281, %c0_282, %c0_283] : memref<17x17x16xf32, #tpu.memory_space<vmem>>, vector<16x16x16xf32>
    %309 = vector.shape_cast %308 : vector<16x16x16xf32> to vector<256x16xf32>
    %310 = arith.truncf %309 : vector<256x16xf32> to vector<256x16xbf16>
    %c0_284 = arith.constant 0 : index
    %c0_285 = arith.constant 0 : index
    %c0_286 = arith.constant 0 : index
    %311 = vector.load %arg6[%c0_284, %c0_285, %c0_286] : memref<4x16x64xbf16, #tpu.memory_space<vmem>>, vector<1x16x64xbf16>
    %312 = vector.shape_cast %311 : vector<1x16x64xbf16> to vector<16x64xbf16>
    %cst_287 = arith.constant dense<0.000000e+00> : vector<256x64xf32>
    %313 = tpu.matmul %310, %312, %cst_287 {dimension_numbers = #tpu.dot_dimension_numbers<[1], [0], [0], [1], [0, 0, 1, 1], [], []>} : vector<256x16xbf16>, vector<16x64xbf16>, vector<256x64xf32> -> vector<256x64xf32>
    %314 = arith.addf %307, %313 : vector<256x64xf32>
    %c0_288 = arith.constant 0 : index
    %c1_289 = arith.constant 1 : index
    %c0_290 = arith.constant 0 : index
    %315 = vector.load %arg10[%c0_288, %c1_289, %c0_290] : memref<17x17x16xf32, #tpu.memory_space<vmem>>, vector<16x16x16xf32>
    %316 = vector.shape_cast %315 : vector<16x16x16xf32> to vector<256x16xf32>
    %317 = arith.truncf %316 : vector<256x16xf32> to vector<256x16xbf16>
    %c1_291 = arith.constant 1 : index
    %c0_292 = arith.constant 0 : index
    %c0_293 = arith.constant 0 : index
    %318 = vector.load %arg6[%c1_291, %c0_292, %c0_293] : memref<4x16x64xbf16, #tpu.memory_space<vmem>>, vector<1x16x64xbf16>
    %319 = vector.shape_cast %318 : vector<1x16x64xbf16> to vector<16x64xbf16>
    %cst_294 = arith.constant dense<0.000000e+00> : vector<256x64xf32>
    %320 = tpu.matmul %317, %319, %cst_294 {dimension_numbers = #tpu.dot_dimension_numbers<[1], [0], [0], [1], [0, 0, 1, 1], [], []>} : vector<256x16xbf16>, vector<16x64xbf16>, vector<256x64xf32> -> vector<256x64xf32>
    %321 = arith.addf %314, %320 : vector<256x64xf32>
    %c1_295 = arith.constant 1 : index
    %c0_296 = arith.constant 0 : index
    %c0_297 = arith.constant 0 : index
    %322 = vector.load %arg10[%c1_295, %c0_296, %c0_297] : memref<17x17x16xf32, #tpu.memory_space<vmem>>, vector<16x16x16xf32>
    %323 = vector.shape_cast %322 : vector<16x16x16xf32> to vector<256x16xf32>
    %324 = arith.truncf %323 : vector<256x16xf32> to vector<256x16xbf16>
    %c2_298 = arith.constant 2 : index
    %c0_299 = arith.constant 0 : index
    %c0_300 = arith.constant 0 : index
    %325 = vector.load %arg6[%c2_298, %c0_299, %c0_300] : memref<4x16x64xbf16, #tpu.memory_space<vmem>>, vector<1x16x64xbf16>
    %326 = vector.shape_cast %325 : vector<1x16x64xbf16> to vector<16x64xbf16>
    %cst_301 = arith.constant dense<0.000000e+00> : vector<256x64xf32>
    %327 = tpu.matmul %324, %326, %cst_301 {dimension_numbers = #tpu.dot_dimension_numbers<[1], [0], [0], [1], [0, 0, 1, 1], [], []>} : vector<256x16xbf16>, vector<16x64xbf16>, vector<256x64xf32> -> vector<256x64xf32>
    %328 = arith.addf %321, %327 : vector<256x64xf32>
    %c1_302 = arith.constant 1 : index
    %c1_303 = arith.constant 1 : index
    %c0_304 = arith.constant 0 : index
    %329 = vector.load %arg10[%c1_302, %c1_303, %c0_304] : memref<17x17x16xf32, #tpu.memory_space<vmem>>, vector<16x16x16xf32>
    %330 = vector.shape_cast %329 : vector<16x16x16xf32> to vector<256x16xf32>
    %331 = arith.truncf %330 : vector<256x16xf32> to vector<256x16xbf16>
    %c3_305 = arith.constant 3 : index
    %c0_306 = arith.constant 0 : index
    %c0_307 = arith.constant 0 : index
    %332 = vector.load %arg6[%c3_305, %c0_306, %c0_307] : memref<4x16x64xbf16, #tpu.memory_space<vmem>>, vector<1x16x64xbf16>
    %333 = vector.shape_cast %332 : vector<1x16x64xbf16> to vector<16x64xbf16>
    %cst_308 = arith.constant dense<0.000000e+00> : vector<256x64xf32>
    %334 = tpu.matmul %331, %333, %cst_308 {dimension_numbers = #tpu.dot_dimension_numbers<[1], [0], [0], [1], [0, 0, 1, 1], [], []>} : vector<256x16xbf16>, vector<16x64xbf16>, vector<256x64xf32> -> vector<256x64xf32>
    %335 = arith.addf %328, %334 : vector<256x64xf32>
    %c0_309 = arith.constant 0 : index
    %c0_310 = arith.constant 0 : index
    %336 = vector.load %arg7[%c0_309, %c0_310] : memref<1x64xf32, #tpu.memory_space<vmem>>, vector<1x64xf32>
    %337 = vector.broadcast %336 : vector<1x64xf32> to vector<256x64xf32>
    %338 = arith.addf %335, %337 : vector<256x64xf32>
    %339 = vector.shape_cast %338 : vector<256x64xf32> to vector<16x16x64xf32>
    %340 = arith.truncf %339 : vector<16x16x64xf32> to vector<16x16x64xbf16>
    %c0_311 = arith.constant 0 : index
    %c0_312 = arith.constant 0 : index
    %c0_313 = arith.constant 0 : index
    %c0_314 = arith.constant 0 : index
    %341 = vector.load %arg8[%c0_311, %c0_312, %c0_313, %c0_314] : memref<1x16x16x64xbf16, #tpu.memory_space<vmem>>, vector<1x16x16x64xbf16>
    %342 = vector.shape_cast %341 : vector<1x16x16x64xbf16> to vector<16x16x64xbf16>
    %343 = vector.shape_cast %340 : vector<16x16x64xbf16> to vector<1x16x16x64xbf16>
    tpu.vector_store %arg8[%c0_311, %c0_312, %c0_313, %c0_314], %343 {strides = array<i32>} : memref<1x16x16x64xbf16, #tpu.memory_space<vmem>>, vector<1x16x16x64xbf16>,
    return
  }
  func.func @transform_0(%arg0: i32) -> (i32, i32, i32, i32) {
    %c0_i32 = arith.constant 0 : i32
    %c0_i32_0 = arith.constant 0 : i32
    %c0_i32_1 = arith.constant 0 : i32
    %c0_i32_2 = arith.constant 0 : i32
    return %arg0, %c0_i32, %c0_i32_0, %c0_i32_1 : i32, i32, i32, i32
  }
  func.func @transform_1(%arg0: i32) -> (i32, i32, i32) {
    %c0_i32 = arith.constant 0 : i32
    %c0_i32_0 = arith.constant 0 : i32
    %c0_i32_1 = arith.constant 0 : i32
    %c0_i32_2 = arith.constant 0 : i32
    return %c0_i32, %c0_i32_0, %c0_i32_1 : i32, i32, i32
  }
  func.func @transform_2(%arg0: i32) -> (i32, i32) {
    %c0_i32 = arith.constant 0 : i32
    %c0_i32_0 = arith.constant 0 : i32
    %c0_i32_1 = arith.constant 0 : i32
    return %c0_i32, %c0_i32_0 : i32, i32
  }
  func.func @transform_3(%arg0: i32) -> (i32, i32, i32) {
    %c0_i32 = arith.constant 0 : i32
    %c0_i32_0 = arith.constant 0 : i32
    %c0_i32_1 = arith.constant 0 : i32
    %c0_i32_2 = arith.constant 0 : i32
    return %c0_i32, %c0_i32_0, %c0_i32_1 : i32, i32, i32
  }
  func.func @transform_4(%arg0: i32) -> (i32, i32) {
    %c0_i32 = arith.constant 0 : i32
    %c0_i32_0 = arith.constant 0 : i32
    %c0_i32_1 = arith.constant 0 : i32
    return %c0_i32, %c0_i32_0 : i32, i32
  }
  func.func @transform_5(%arg0: i32) -> (i32, i32, i32) {
    %c0_i32 = arith.constant 0 : i32
    %c0_i32_0 = arith.constant 0 : i32
    %c0_i32_1 = arith.constant 0 : i32
    %c0_i32_2 = arith.constant 0 : i32
    return %c0_i32, %c0_i32_0, %c0_i32_1 : i32, i32, i32
  }
  func.func @transform_6(%arg0: i32) -> (i32, i32) {
    %c0_i32 = arith.constant 0 : i32
    %c0_i32_0 = arith.constant 0 : i32
    %c0_i32_1 = arith.constant 0 : i32
    return %c0_i32, %c0_i32_0 : i32, i32
  }
  func.func @transform_7(%arg0: i32) -> (i32, i32, i32, i32) {
    %c0_i32 = arith.constant 0 : i32
    %c0_i32_0 = arith.constant 0 : i32
    %c0_i32_1 = arith.constant 0 : i32
    %c0_i32_2 = arith.constant 0 : i32
    return %arg0, %c0_i32, %c0_i32_0, %c0_i32_1 : i32, i32, i32, i32
  }
}

</mosaic_0001>

<bundles_post_ra>
// kernel: dec_blk_apply.1
= control target key start
LH: loop header
LB: loop body
LE: loop exit
PB: predicated region body
PF: predicated region fallthrough
CT: control target
= control target key end

     0   :  { %s11809_s24 = smov 0   ;;  %s15761_s0 = inlined_call_operand.vmem [shape: f32[2,22,22,32], index: 0, kind: input, shape index: {}]   ;;  %s15762_s1 = inlined_call_operand.vmem [shape: bf16[28,32,32], index: 1, kind: input, shape index: {}]   ;;  %s15763_s2 = inlined_call_operand.vmem [shape: f32[1,32], index: 2, kind: input, shape index: {}]   ;;  %s15764_s3 = inlined_call_operand.vmem [shape: bf16[9,32,16], index: 3, kind: input, shape index: {}]   ;;  %s15765_s4 = inlined_call_operand.vmem [shape: f32[1,16], index: 4, kind: input, shape index: {}]   ;;  %s15766_s5 = inlined_call_operand.vmem [shape: bf16[4,16,64], index: 5, kind: input, shape index: {}]   ;;  %s15767_s6 = inlined_call_operand.vmem [shape: f32[1,64], index: 6, kind: input, shape index: {}]   ;;  %s15768_s7 = inlined_call_operand.vmem [shape: bf16[2,16,16,64], index: 7, kind: output, shape index: {}]  }
   0x1 LB: > { %s9833_s25 = sadd.s32 4294967295, %s11766_s24   ;;  %p9837_p0 = scmp.ge.s32.totalorder %s11766_s24, 1  ;;  %s11766_s24 = sphi %s11809_s24, %s17_s24  }
   0x2   : > { %p237_p1 = scmp.lt.s32.totalorder %s11766_s24, 3 }
   0x4   : > { %p238_p2 = pnand %p9837_p0, %p237_p1 }
   0x6   : > { %241 = sbr.rel (%p238_p2) target bundleno = 2914 (0xb62), region = 48 }
   0xb   : > { %v11665_v0 = vld [vmem:[%s15762_s1 + $0x18] sm:$0xff]  ;;  %p269_p3 = scmp.lt.s32.totalorder %s9833_s25, 1  ;;  %v11664_v1 = vld [vmem:[%s15762_s1 + $0x10] sm:$0xff]  ;;  %v11667_v2 = vld [vmem:[%s15762_s1 + $0x28] sm:$0xff]  ;;  %vm397_vm0 = vcmask 261120   ;;  %vm6556_vm1 = vcmask 254976  }
   0xc   : > { %11740 = vmatpush.bf16.msra.mxu1 %v11665_v0  ;;  %11741 = vmatpush.bf16.msra.mxu2 %v11665_v0  ;;  %v11669_v3 = vld [vmem:[%s15762_s1 + $0x38] sm:$0xff]  ;;  %v11663_v4 = vld [vmem:[%s15762_s1 + $0x8] sm:$0xff]  ;;  %v11666_v17 = vld [vmem:[%s15762_s1 + $0x20] sm:$0xff]  ;;  %vm8752_vm2 = vcmask 130048   ;;  %vm8755_vm3 = vcmask 122880   ;;  %vm9745_vm4 = vcmask 519168  }
   0xd   : > { %s16088_s25 = smov (!%p269_p3, %s9833_s25), 1  ;;  %11742 = vmatpush.bf16.msra.mxu3 %v11665_v0  ;;  %452 = vmatpush.bf16.msra.mxu0 %v11665_v0  ;;  %v11668_v18 = vld [vmem:[%s15762_s1 + $0x30] sm:$0xff]  ;;  %v11662_v19 = vld [vmem:[%s15762_s1] sm:$0xff]  ;;  %v11675_v44 = vld [vmem:[%s15762_s1 + $0x68] sm:$0xff] }
   0xe   : > { %s11746_s9 = smul.u32 528, %s16088_s25  ;;  %v11677_v45 = vld [vmem:[%s15762_s1 + $0x78] sm:$0xff]  ;;  %v11671_v46 = vld [vmem:[%s15762_s1 + $0x48] sm:$0xff]  ;;  %v11670_v48 = vld [vmem:[%s15762_s1 + $0x40] sm:$0xff]  ;;  %s11661_s8 = sshll.u32 %s16088_s25, 7 }
   0xf   : > { %v11673_v47 = vld [vmem:[%s15762_s1 + $0x58] sm:$0xff]  ;;  %s15614_s11 = scalar_lea.vmem %s15768_s7, %s11661_s8 }
  0x10   : > { %11743 = vmatpush.bf16.msra.mxu1 %v11664_v1  ;;  %11744 = vmatpush.bf16.msra.mxu2 %v11664_v1  ;;  %s11838_s16 = scalar_lea.vmem %s15761_s0, %s11746_s9 }
  0x11   : > { %11745 = vmatpush.bf16.msra.mxu3 %v11664_v1  ;;  %v340_v5 = vld [vmem:[%s11838_s16 + $0x63] sm:$0xff]  ;;  %v341_v6 = vld [vmem:[%s11838_s16 + $0x6b] sm:$0xff]  ;;  %453 = vmatpush.bf16.msra.mxu0 %v11664_v1  ;;  %v342_v20 = vld [vmem:[%s11838_s16 + $0x7b] sm:$0xff] }
  0x12   : > { %v348_v7 = vld [vmem:[%s11838_s16 + $0xc3] sm:$0xff]  ;;  %v11843_v8 = vpack.c.bf16 %v341_v6, %v340_v5  ;;  %v349_v9 = vld [vmem:[%s11838_s16 + $0xcb] sm:$0xff]  ;;  %v350_v22 = vld [vmem:[%s11838_s16 + $0xdb] sm:$0xff] }
  0x13   : > { %v356_v10 = vld [vmem:[%s11838_s16 + $0x123] sm:$0xff]  ;;  %v357_v11 = vld [vmem:[%s11838_s16 + $0x12b] sm:$0xff]  ;;  %v11848_v12 = vpack.c.bf16 %v349_v9, %v348_v7  ;;  %v358_v24 = vld [vmem:[%s11838_s16 + $0x13b] sm:$0xff] }
  0x14   : > { %803 = vmatpush.bf16.msrb.mxu2 %v11667_v2  ;;  %15836 = vst [vmem:[#allocation4_spill] sm:$0xff] %v11843_v8  ;;  %601 = vmatpush.bf16.msrb.mxu1 %v11663_v4  ;;  %v11850_v13 = vpack.c.bf16 %v357_v11, %v356_v10  ;;  %v332_v14 = vld [vmem:[%s11838_s16 + $0x3] sm:$0xff]  ;;  %v333_v15 = vld [vmem:[%s11838_s16 + $0xb] sm:$0xff]  ;;  %v334_v26 = vld [vmem:[%s11838_s16 + $0x1b] sm:$0xff] }
  0x15   : > { %1038 = vmatpush.bf16.msrb.mxu3 %v11669_v3  ;;  %15837 = vst [vmem:[#allocation5_spill] sm:$0xff] %v11848_v12  ;;  %9857 = vmatmul.msk.bf16.vlgmr.msra.gmra.mxu1 %vm397_vm0, %v11843_v8  ;;  %v364_v16 = vpack.c.bf16 %v333_v15, %v332_v14  ;;  %v343_v21 = vld [vmem:[%s11838_s16 + $0x83] sm:$0xff]  ;;  %v344_v32 = vld [vmem:[%s11838_s16 + $0x93] sm:$0xff]  ;;  %v345_v33 = vld [vmem:[%s11838_s16 + $0x9b] sm:$0xff] }
  0x16   : > { %15838 = vst [vmem:[#allocation6_spill] sm:$0xff] %v11850_v13  ;;  %9861 = vmatmul.msk.bf16.vlgmr.msra.gmra.mxu2 %vm397_vm0, %v11848_v12  ;;  %9865 = vmatmul.msk.bf16.vlgmr.msra.gmra.mxu3 %vm397_vm0, %v11850_v13  ;;  %v351_v23 = vld [vmem:[%s11838_s16 + $0xe3] sm:$0xff]  ;;  %v11878_v28 = vpack.c.bf16 %v343_v21, %v342_v20  ;;  %v352_v34 = vld [vmem:[%s11838_s16 + $0xf3] sm:$0xff]  ;;  %v353_v35 = vld [vmem:[%s11838_s16 + $0xfb] sm:$0xff]  ;;  %v11899_v40 = vpack.c.bf16 %v345_v33, %v344_v32 }
  0x17   : > { %9853 = vmatmul.msk.bf16.vlgmr.msra.gmra.mxu0 %vm397_vm0, %v364_v16  ;;  %v359_v25 = vld [vmem:[%s11838_s16 + $0x143] sm:$0xff]  ;;  %v11880_v29 = vpack.c.bf16 %v351_v23, %v350_v22  ;;  %v360_v36 = vld [vmem:[%s11838_s16 + $0x153] sm:$0xff]  ;;  %v361_v37 = vld [vmem:[%s11838_s16 + $0x15b] sm:$0xff]  ;;  %v11901_v41 = vpack.c.bf16 %v353_v35, %v352_v34 }
  0x18   : > { %804 = vmatpush.bf16.msrb.mxu2 %v11666_v17  ;;  %602 = vmatpush.bf16.msrb.mxu1 %v11662_v19  ;;  %v335_v27 = vld [vmem:[%s11838_s16 + $0x23] sm:$0xff]  ;;  %15839 = vst [vmem:[#allocation7_spill] sm:$0xff] %v11878_v28  ;;  %v11882_v30 = vpack.c.bf16 %v359_v25, %v358_v24  ;;  %v336_v38 = vld [vmem:[%s11838_s16 + $0x33] sm:$0xff]  ;;  %v337_v39 = vld [vmem:[%s11838_s16 + $0x3b] sm:$0xff]  ;;  %v11903_v42 = vpack.c.bf16 %v361_v37, %v360_v36 }
  0x19   : > { %1039 = vmatpush.bf16.msrb.mxu3 %v11668_v18  ;;  %15840 = vst [vmem:[#allocation8_spill] sm:$0xff] %v11880_v29  ;;  %v365_v31 = vpack.c.bf16 %v335_v27, %v334_v26  ;;  %v366_v43 = vpack.c.bf16 %v337_v39, %v336_v38  ;;  %1272 = vmatpush.bf16.msrb.mxu0 %v11671_v46  ;;  %v346_v49 = vld [vmem:[%s11838_s16 + $0xab] sm:$0xff]  ;;  %v347_v50 = vld [vmem:[%s11838_s16 + $0xb3] sm:$0xff]  ;;  %v280_v61 = vld [vmem:[%s11838_s16] sm:$0xff] }
  0x1a   : > { %15841 = vst [vmem:[#allocation9_spill] sm:$0xff] %v11882_v30  ;;  %v354_v51 = vld [vmem:[%s11838_s16 + $0x10b] sm:$0xff]  ;;  %v355_v52 = vld [vmem:[%s11838_s16 + $0x113] sm:$0xff]  ;;  %v11935_v57 = vpack.c.bf16 %v347_v50, %v346_v49  ;;  %v283_v7 = vld [vmem:[%s11838_s16 + $0x20] sm:$0xff] }
  0x1b   : > { %15842 = vst [vmem:[#allocation10_spill] sm:$0xff] %v11899_v40  ;;  %v362_v53 = vld [vmem:[%s11838_s16 + $0x16b] sm:$0xff]  ;;  %v363_v54 = vld [vmem:[%s11838_s16 + $0x173] sm:$0xff]  ;;  %v11937_v58 = vpack.c.bf16 %v355_v52, %v354_v51  ;;  %v686_v9 = vld [vmem:[%s11838_s16 + $0x1e] sm:$0xff] }
  0x1c   : > { %15843 = vst [vmem:[#allocation11_spill] sm:$0xff] %v11901_v41  ;;  %1741 = vmatpush.bf16.msra.mxu2 %v11675_v44  ;;  %1506 = vmatpush.bf16.msra.mxu1 %v11673_v47  ;;  %v338_v55 = vld [vmem:[%s11838_s16 + $0x4b] sm:$0xff]  ;;  %v339_v56 = vld [vmem:[%s11838_s16 + $0x53] sm:$0xff]  ;;  %v11939_v59 = vpack.c.bf16 %v363_v54, %v362_v53  ;;  %v9923_v11 = vld [vmem:[%s11838_s16 + $0x60] sm:$0xff] }
  0x1d   : > { %15844 = vst [vmem:[#allocation12_spill] sm:$0xff] %v11903_v42  ;;  %1975 = vmatpush.bf16.msra.mxu3 %v11677_v45  ;;  %1273 = vmatpush.bf16.msrb.mxu0 %v11670_v48  ;;  %v11941_v60 = vpack.c.bf16 %v339_v56, %v338_v55  ;;  %v281_v62 = vld [vmem:[%s11838_s16 + $0x8] sm:$0xff]  ;;  %v9922_v2 = vld [vmem:[%s11838_s16 + $0x50] sm:$0xff]  ;;  %v282_v6 = vld [vmem:[%s11838_s16 + $0x18] sm:$0xff] }
  0x1e   : > { %15845 = vst [vmem:[#allocation13_spill] sm:$0xff] %v11935_v57  ;;  %v684_v63 = vld [vmem:[%s11838_s16 + $0x6] sm:$0xff]  ;;  %v685_v0 = vld [vmem:[%s11838_s16 + $0xe] sm:$0xff]  ;;  %v312_v3 = vpack.c.bf16 %v281_v62, %v280_v61  ;;  %v313_v15 = vpack.c.bf16 %v283_v7, %v282_v6  ;;  %v285_v19 = vld [vmem:[%s11838_s16 + $0x38] sm:$0xff] }
  0x1f   : > { %15846 = vst [vmem:[#allocation14_spill] sm:$0xff] %v11937_v58  ;;  %v9921_v1 = vld [vmem:[%s11838_s16 + $0x48] sm:$0xff]  ;;  %v716_v4 = vpack.c.bf16 %v685_v0, %v684_v63  ;;  %v284_v18 = vld [vmem:[%s11838_s16 + $0x30] sm:$0xff]  ;;  %v689_v21 = vld [vmem:[%s11838_s16 + $0x3e] sm:$0xff] }
  0x20   : > { %15847 = vst [vmem:[#allocation15_spill] sm:$0xff] %v11939_v59  ;;  %v951_v5 = vpack.c.bf16 %v9922_v2, %v9921_v1  ;;  %v687_v10 = vld [vmem:[%s11838_s16 + $0x26] sm:$0xff]  ;;  %v688_v20 = vld [vmem:[%s11838_s16 + $0x36] sm:$0xff]  ;;  %v314_v24 = vpack.c.bf16 %v285_v19, %v284_v18  ;;  %v690_v27 = vld [vmem:[%s11838_s16 + $0x4e] sm:$0xff] }
  0x21   : > { %15848 = vst [vmem:[#allocation16_spill] sm:$0xff] %v11941_v60  ;;  %v9924_v14 = vld [vmem:[%s11838_s16 + $0x68] sm:$0xff]  ;;  %v717_v16 = vpack.c.bf16 %v687_v10, %v686_v9  ;;  %v9925_v22 = vld [vmem:[%s11838_s16 + $0x78] sm:$0xff]  ;;  %v9926_v23 = vld [vmem:[%s11838_s16 + $0x80] sm:$0xff]  ;;  %v718_v25 = vpack.c.bf16 %v689_v21, %v688_v20 }
  0x22   : > { %v952_v17 = vpack.c.bf16 %v9924_v14, %v9923_v11  ;;  %v953_v26 = vpack.c.bf16 %v9926_v23, %v9925_v22  ;;  %v9927_v32 = vld [vmem:[%s11838_s16 + $0x90] sm:$0xff]  ;;  %v9928_v33 = vld [vmem:[%s11838_s16 + $0x98] sm:$0xff]  ;;  %v692_v36 = vld [vmem:[%s11838_s16 + $0x66] sm:$0xff] }
  0x23   : > { %v11990_v35 = vpack.c.bf16 %v9928_v33, %v9927_v32  ;;  %v693_v37 = vld [vmem:[%s11838_s16 + $0x6e] sm:$0xff]  ;;  %v694_v51 = vld [vmem:[%s11838_s16 + $0x7e] sm:$0xff]  ;;  %v695_v52 = vld [vmem:[%s11838_s16 + $0x86] sm:$0xff] }
  0x24   : > { %v9929_v38 = vld [vmem:[%s11838_s16 + $0xa8] sm:$0xff]  ;;  %v9930_v39 = vld [vmem:[%s11838_s16 + $0xb0] sm:$0xff]  ;;  %v12005_v44 = vpack.c.bf16 %v693_v37, %v692_v36  ;;  %v9931_v53 = vld [vmem:[%s11838_s16 + $0xc0] sm:$0xff]  ;;  %v12036_v62 = vpack.c.bf16 %v695_v52, %v694_v51 }
  0x25   : > { %9858 = vmatmul.msk.bf16.gmra.mxu1 %vm397_vm0, %v11878_v28  ;;  %v12007_v45 = vpack.c.bf16 %v9930_v39, %v9929_v38  ;;  %v9932_v54 = vld [vmem:[%s11838_s16 + $0xc8] sm:$0xff]  ;;  %v697_v6 = vld [vmem:[%s11838_s16 + $0x9e] sm:$0xff]  ;;  %v11676_v19 = vld [vmem:[%s15762_s1 + $0x70] sm:$0xff] }
  0x26   : > { %9862 = vmatmul.msk.bf16.gmra.mxu2 %vm397_vm0, %v11880_v29  ;;  %9866 = vmatmul.msk.bf16.gmra.mxu3 %vm397_vm0, %v11882_v30  ;;  %v12038_v63 = vpack.c.bf16 %v9932_v54, %v9931_v53  ;;  %v9933_v7 = vld [vmem:[%s11838_s16 + $0xd8] sm:$0xff]  ;;  %v9934_v9 = vld [vmem:[%s11838_s16 + $0xe0] sm:$0xff]  ;;  %v11679_v51 = vld [vmem:[%s15762_s1 + $0x88] sm:$0xff] }
  0x27   : > { %9854 = vmatmul.msk.bf16.gmra.mxu0 %vm397_vm0, %v365_v31  ;;  %v691_v31 = vld [vmem:[%s11838_s16 + $0x56] sm:$0xff]  ;;  %v11674_v18 = vld [vmem:[%s15762_s1 + $0x60] sm:$0xff]  ;;  %1976 = vmatpush.bf16.msra.mxu3 %v11676_v19 }
  0x28   : > { %v11988_v34 = vpack.c.bf16 %v691_v31, %v690_v27  ;;  %1742 = vmatpush.bf16.msra.mxu2 %v11674_v18  ;;  %v9935_v27 = vld [vmem:[%s11838_s16 + $0xf0] sm:$0xff]  ;;  %v9936_v31 = vld [vmem:[%s11838_s16 + $0xf8] sm:$0xff]  ;;  %2209 = vmatpush.bf16.msra.mxu0 %v11679_v51 }
  0x29   : > { %v12110_v38 = vpack.c.bf16 %v9936_v31, %v9935_v27  ;;  %v9938_v18 = vld [vmem:[%s11838_s16 + $0x110] sm:$0xff] }
  0x35   : > { %9859 = vmatmul.msk.bf16.gmra.mxu1 %vm397_vm0, %v11899_v40 }
  0x36   : > { %9863 = vmatmul.msk.bf16.gmra.mxu2 %vm397_vm0, %v11901_v41  ;;  %9867 = vmatmul.msk.bf16.gmra.mxu3 %vm397_vm0, %v11903_v42 }
  0x37   : > { %9855 = vmatmul.msk.bf16.gmra.mxu0 %vm397_vm0, %v366_v43 }
  0x45   : > { %9860 = vmatmul.msk.bf16.gmra.mxu1 %vm397_vm0, %v11935_v57 }
  0x46   : > { %9864 = vmatmul.msk.bf16.gmra.mxu2 %vm397_vm0, %v11937_v58  ;;  %9868 = vmatmul.msk.bf16.gmra.mxu3 %vm397_vm0, %v11939_v59 }
  0x47   : > { %9856 = vmatmul.msk.bf16.gmra.mxu0 %vm397_vm0, %v11941_v60 }
  0x55   : > { %9877 = vmatmul.msk.bf16.vlgmr.msrb.gmra.mxu1 %vm397_vm0, %v312_v3 }
  0x56   : > { %9905 = vmatmul.msk.bf16.vlgmr.msrb.gmra.mxu2 %vm397_vm0, %v716_v4  ;;  %9965 = vmatmul.msk.bf16.vlgmr.msrb.gmra.mxu3 %vm397_vm0, %v951_v5 }
  0x57   : > { %10025 = vmatmul.msk.bf16.vlgmr.msrb.gmra.mxu0 %vm397_vm0, %v11941_v60 }
  0x65   : > { %9878 = vmatmul.msk.bf16.gmra.mxu1 %vm397_vm0, %v313_v15 }
  0x66   : > { %9906 = vmatmul.msk.bf16.gmra.mxu2 %vm397_vm0, %v717_v16  ;;  %9966 = vmatmul.msk.bf16.gmra.mxu3 %vm397_vm0, %v952_v17  ;;  %v12069_v16 = vpack.c.bf16 %v9934_v9, %v9933_v7  ;;  %v701_v7 = vld [vmem:[%s11838_s16 + $0xce] sm:$0xff] }
  0x67   : > { %10026 = vmatmul.msk.bf16.gmra.mxu0 %vm397_vm0, %v11843_v8  ;;  %v9937_v9 = vld [vmem:[%s11838_s16 + $0x108] sm:$0xff] }
  0x68   : > { %v12143_v27 = vpack.c.bf16 %v9938_v18, %v9937_v9  ;;  %v9940_v8 = vld [vmem:[%s11838_s16 + $0x128] sm:$0xff] }
  0x75   : > { %9879 = vmatmul.msk.bf16.gmra.mxu1 %vm397_vm0, %v314_v24  ;;  %v11672_v24 = vld [vmem:[%s15762_s1 + $0x50] sm:$0xff] }
  0x76   : > { %9907 = vmatmul.msk.bf16.gmra.mxu2 %vm397_vm0, %v718_v25  ;;  %9967 = vmatmul.msk.bf16.gmra.mxu3 %vm397_vm0, %v953_v26  ;;  %v698_v25 = vld [vmem:[%s11838_s16 + $0xae] sm:$0xff] }
  0x77   : > { %10027 = vmatmul.msk.bf16.gmra.mxu0 %vm397_vm0, %v11878_v28  ;;  %1507 = vmatpush.bf16.msra.mxu1 %v11672_v24  ;;  %v9939_v28 = vld [vmem:[%s11838_s16 + $0x120] sm:$0xff] }
  0x85   : > { %9880 = vmatmul.msk.bf16.gmra.mxu1 %vm397_vm0, %v951_v5  ;;  %v696_v5 = vld [vmem:[%s11838_s16 + $0x96] sm:$0xff] }
  0x86   : > { %9908 = vmatmul.msk.bf16.gmra.mxu2 %vm397_vm0, %v11988_v34  ;;  %9968 = vmatmul.msk.bf16.gmra.mxu3 %vm397_vm0, %v11990_v35  ;;  %v12067_v15 = vpack.c.bf16 %v697_v6, %v696_v5  ;;  %v700_v6 = vld [vmem:[%s11838_s16 + $0xc6] sm:$0xff] }
  0x87   : > { %10028 = vmatmul.msk.bf16.gmra.mxu0 %vm397_vm0, %v11899_v40 }
  0x92   : > { %v12003_v43 = vpop.f32.mrf.mxu1 }
  0x94   : > { %v12009_v46 = vpop.f32.mrf.mxu0 }
  0x95   : > { %9881 = vmatmul.msk.bf16.gmra.mxu1 %vm397_vm0, %v952_v17 }
  0x96   : > { %9909 = vmatmul.msk.bf16.gmra.mxu2 %vm397_vm0, %v12005_v44  ;;  %9969 = vmatmul.msk.bf16.gmra.mxu3 %vm397_vm0, %v12007_v45 }
  0x97   : > { %10029 = vmatmul.msk.bf16.gmra.mxu0 %vm397_vm0, %v11935_v57  ;;  %v703_v57 = vld [vmem:[%s11838_s16 + $0xe6] sm:$0xff] }
  0x99   : > { %v12018_v47 = vpop.f32.mrf.mxu2  ;;  %v12020_v48 = vpop.f32.mrf.mxu3 }
  0x9a   : > { %v12022_v49 = vpop.f32.mrf.mxu1 }
  0x9c   : > { %v12024_v50 = vpop.f32.mrf.mxu0 }
  0xa1   : > { %v12030_v55 = vpop.f32.mrf.mxu2  ;;  %v12032_v56 = vpop.f32.mrf.mxu3 }
  0xa2   : > { %v12034_v61 = vpop.f32.mrf.mxu1 }
  0xa4   : > { %v12040_v0 = vpop.f32.mrf.mxu0 }
  0xa5   : > { %9882 = vmatmul.msk.bf16.gmra.mxu1 %vm397_vm0, %v953_v26  ;;  %v699_v26 = vld [vmem:[%s11838_s16 + $0xb6] sm:$0xff] }
  0xa6   : > { %9910 = vmatmul.msk.bf16.gmra.mxu2 %vm397_vm0, %v12036_v62  ;;  %9970 = vmatmul.msk.bf16.gmra.mxu3 %vm397_vm0, %v12038_v63  ;;  %v12108_v37 = vpack.c.bf16 %v699_v26, %v698_v25  ;;  %v12141_v26 = vpack.c.bf16 %v701_v7, %v700_v6 }
  0xa7   : > { %10030 = vmatmul.msk.bf16.gmra.mxu0 %vm397_vm0, %v11848_v12  ;;  %v702_v12 = vld [vmem:[%s11838_s16 + $0xde] sm:$0xff] }
  0xa9   : > { %v12049_v1 = vpop.f32.mrf.mxu2  ;;  %v12051_v2 = vpop.f32.mrf.mxu3 }
  0xaa   : > { %v12053_v3 = vpop.f32.mrf.mxu1 }
  0xac   : > { %v12055_v4 = vpop.f32.mrf.mxu0 }
  0xb1   : > { %v12061_v10 = vpop.f32.mrf.mxu2  ;;  %v12063_v11 = vpop.f32.mrf.mxu3 }
  0xb2   : > { %v12065_v14 = vpop.f32.mrf.mxu1 }
  0xb4   : > { %v12071_v17 = vpop.f32.mrf.mxu0 }
  0xb5   : > { %9883 = vmatmul.msk.bf16.gmra.mxu1 %vm397_vm0, %v11990_v35 }
  0xb6   : > { %9911 = vmatmul.msk.bf16.gmra.mxu2 %vm397_vm0, %v12067_v15  ;;  %9971 = vmatmul.msk.bf16.gmra.mxu3 %vm397_vm0, %v12069_v16 }
  0xb7   : > { %10031 = vmatmul.msk.bf16.gmra.mxu0 %vm397_vm0, %v11880_v29 }
  0xb9   : > { %v12087_v20 = vpop.f32.mrf.mxu2  ;;  %v12089_v21 = vpop.f32.mrf.mxu3 }
  0xba   : > { %15849 = vst [vmem:[#allocation17_spill] sm:$0xff] %v12089_v21  ;;  %v12091_v22 = vpop.f32.mrf.mxu1  ;;  %v12161_v21 = vpack.c.bf16 %v703_v57, %v702_v12 }
  0xbc   : > { %v12093_v23 = vpop.f32.mrf.mxu0 }
  0xc1   : > { %v12102_v32 = vpop.f32.mrf.mxu2  ;;  %v12104_v33 = vpop.f32.mrf.mxu3 }
  0xc2   : > { %15850 = vst [vmem:[#allocation18_spill] sm:$0xff] %v12104_v33  ;;  %v12106_v36 = vpop.f32.mrf.mxu1 }
  0xc4   : > { %v12112_v39 = vpop.f32.mrf.mxu0 }
  0xc5   : > { %9884 = vmatmul.msk.bf16.gmra.mxu1 %vm397_vm0, %v12007_v45 }
  0xc6   : > { %9912 = vmatmul.msk.bf16.gmra.mxu2 %vm397_vm0, %v12108_v37  ;;  %9972 = vmatmul.msk.bf16.gmra.mxu3 %vm397_vm0, %v12110_v38 }
  0xc7   : > { %10032 = vmatmul.msk.bf16.gmra.mxu0 %vm397_vm0, %v11901_v41 }
  0xc9   : > { %v12125_v52 = vpop.f32.mrf.mxu2  ;;  %v12127_v53 = vpop.f32.mrf.mxu3 }
  0xca   : > { %15851 = vst [vmem:[#allocation19_spill] sm:$0xff] %v12127_v53  ;;  %v12129_v54 = vpop.f32.mrf.mxu1 }
  0xcc   : > { %v12131_v5 = vpop.f32.mrf.mxu0 }
  0xd1   : > { %v12137_v19 = vpop.f32.mrf.mxu2  ;;  %v12139_v24 = vpop.f32.mrf.mxu3 }
  0xd2   : > { %15852 = vst [vmem:[#allocation20_spill] sm:$0xff] %v12139_v24  ;;  %v604_v25 = vpop.f32.mrf.mxu1 }
  0xd3   : > { %v605_v31 = vadd.f32 %v604_v25, %v12009_v46 }
  0xd4   : > { %v1275_v51 = vpop.f32.mrf.mxu0 }
  0xd5   : > { %9885 = vmatmul.msk.bf16.gmra.mxu1 %vm397_vm0, %v12038_v63 }
  0xd6   : > { %9913 = vmatmul.msk.bf16.gmra.mxu2 %vm397_vm0, %v12141_v26  ;;  %9973 = vmatmul.msk.bf16.gmra.mxu3 %vm397_vm0, %v12143_v27 }
  0xd7   : > { %10033 = vmatmul.msk.bf16.gmra.mxu0 %vm397_vm0, %v11937_v58  ;;  %v12163_v58 = vpack.c.bf16 %v9940_v8, %v9939_v28 }
  0xd9   : > { %v806_v6 = vpop.f32.mrf.mxu2  ;;  %v1041_v7 = vpop.f32.mrf.mxu3 }
  0xda   : > { %v886_v9 = vadd.f32 %v806_v6, %v605_v31  ;;  %v606_v18 = vpop.f32.mrf.mxu1 }
  0xdb   : > { %v607_v46 = vadd.f32 %v606_v18, %v12024_v50 }
  0xdc   : > { %v1121_v25 = vadd.f32 %v1041_v7, %v886_v9  ;;  %v1277_v41 = vpop.f32.mrf.mxu0  ;;  %v9941_v7 = vld [vmem:[%s11838_s16 + $0x138] sm:$0xff]  ;;  %v9942_v9 = vld [vmem:[%s11838_s16 + $0x140] sm:$0xff] }
  0xde   : > { %v12155_v29 = vadd.f32 %v1275_v51, %v1121_v25 }
  0xe1   : > { %v808_v60 = vpop.f32.mrf.mxu2  ;;  %v1043_v24 = vpop.f32.mrf.mxu3 }
  0xe2   : > { %v887_v53 = vadd.f32 %v808_v60, %v607_v46  ;;  %v609_v33 = vpop.f32.mrf.mxu1 }
  0xe3   : > { %v610_v31 = vadd.f32 %v609_v33, %v12040_v0 }
  0xe4   : > { %v1122_v50 = vadd.f32 %v1043_v24, %v887_v53  ;;  %v1280_v6 = vpop.f32.mrf.mxu0  ;;  %v705_v24 = vld [vmem:[%s11838_s16 + $0xfe] sm:$0xff] }
  0xe5   : > { %9886 = vmatmul.msk.bf16.gmra.mxu1 %vm397_vm0, %v12069_v16 }
  0xe6   : > { %v12168_v51 = vadd.f32 %v1277_v41, %v1122_v50  ;;  %9914 = vmatmul.msk.bf16.gmra.mxu2 %vm397_vm0, %v12161_v21  ;;  %9974 = vmatmul.msk.bf16.gmra.mxu3 %vm397_vm0, %v12163_v58  ;;  %v704_v41 = vld [vmem:[%s11838_s16 + $0xf6] sm:$0xff] }
  0xe7   : > { %10034 = vmatmul.msk.bf16.gmra.mxu0 %vm397_vm0, %v11850_v13  ;;  %v12185_v13 = vpack.c.bf16 %v9942_v9, %v9941_v7  ;;  %v707_v7 = vld [vmem:[%s11838_s16 + $0x116] sm:$0xff] }
  0xe8   : > { %15853 = vst [vmem:[#allocation21_spill] sm:$0xff] %v12168_v51  ;;  %v12183_v51 = vpack.c.bf16 %v705_v24, %v704_v41  ;;  %v9943_v9 = vld [vmem:[%s11838_s16 + $0x150] sm:$0xff] }
  0xe9   : > { %v811_v8 = vpop.f32.mrf.mxu2  ;;  %v1046_v12 = vpop.f32.mrf.mxu3 }
  0xea   : > { %v888_v28 = vadd.f32 %v811_v8, %v610_v31  ;;  %v611_v57 = vpop.f32.mrf.mxu1 }
  0xeb   : > { %v612_v60 = vadd.f32 %v611_v57, %v12055_v4 }
  0xec   : > { %v1123_v0 = vadd.f32 %v1046_v12, %v888_v28  ;;  %v1282_v33 = vpop.f32.mrf.mxu0 }
  0xee   : > { %v12177_v53 = vadd.f32 %v1280_v6, %v1123_v0 }
  0xf1   : > { %v813_v18 = vpop.f32.mrf.mxu2  ;;  %v1048_v46 = vpop.f32.mrf.mxu3 }
  0xf2   : > { %v889_v25 = vadd.f32 %v813_v18, %v612_v60  ;;  %v614_v50 = vpop.f32.mrf.mxu1  ;;  %v9944_v18 = vld [vmem:[%s11838_s16 + $0x158] sm:$0xff] }
  0xf3   : > { %v615_v31 = vadd.f32 %v614_v50, %v12071_v17 }
  0xf4   : > { %v1124_v4 = vadd.f32 %v1048_v46, %v889_v25  ;;  %v1285_v8 = vpop.f32.mrf.mxu0 }
  0xf5   : > { %9887 = vmatmul.msk.bf16.gmra.mxu1 %vm397_vm0, %v12110_v38 }
  0xf6   : > { %v12190_v6 = vadd.f32 %v1282_v33, %v1124_v4  ;;  %9915 = vmatmul.msk.bf16.gmra.mxu2 %vm397_vm0, %v12183_v51  ;;  %9975 = vmatmul.msk.bf16.gmra.mxu3 %vm397_vm0, %v12185_v13  ;;  %v706_v33 = vld [vmem:[%s11838_s16 + $0x10e] sm:$0xff] }
  0xf7   : > { %10035 = vmatmul.msk.bf16.gmra.mxu0 %vm397_vm0, %v11882_v30  ;;  %v12207_v30 = vpack.c.bf16 %v9944_v18, %v9943_v9  ;;  %v709_v9 = vld [vmem:[%s11838_s16 + $0x12e] sm:$0xff] }
  0xf8   : > { %15854 = vst [vmem:[#allocation22_spill] sm:$0xff] %v12190_v6  ;;  %v12205_v6 = vpack.c.bf16 %v707_v7, %v706_v33  ;;  %v9945_v18 = vld [vmem:[%s11838_s16 + $0x168] sm:$0xff] }
  0xf9   : > { %v816_v17 = vpop.f32.mrf.mxu2  ;;  %v1051_v12 = vpop.f32.mrf.mxu3 }
  0xfa   : > { %v890_v28 = vadd.f32 %v816_v17, %v615_v31  ;;  %v616_v57 = vpop.f32.mrf.mxu1 }
  0xfb   : > { %v617_v60 = vadd.f32 %v616_v57, %v12093_v23 }
  0xfc   : > { %v1125_v0 = vadd.f32 %v1051_v12, %v890_v28  ;;  %v1287_v41 = vpop.f32.mrf.mxu0 }
  0xfe   : > { %v12199_v24 = vadd.f32 %v1285_v8, %v1125_v0 }
 0x101   : > { %v818_v46 = vpop.f32.mrf.mxu2  ;;  %v1053_v25 = vpop.f32.mrf.mxu3 }
 0x102   : > { %v891_v50 = vadd.f32 %v818_v46, %v617_v60  ;;  %v619_v4 = vpop.f32.mrf.mxu1  ;;  %v9946_v46 = vld [vmem:[%s11838_s16 + $0x170] sm:$0xff] }
 0x103   : > { %v620_v31 = vadd.f32 %v619_v4, %v12112_v39 }
 0x104   : > { %v1126_v23 = vadd.f32 %v1053_v25, %v891_v50  ;;  %v1290_v17 = vpop.f32.mrf.mxu0 }
 0x105   : > { %9888 = vmatmul.msk.bf16.gmra.mxu1 %vm397_vm0, %v12143_v27 }
 0x106   : > { %v12212_v8 = vadd.f32 %v1287_v41, %v1126_v23  ;;  %9916 = vmatmul.msk.bf16.gmra.mxu2 %vm397_vm0, %v12205_v6  ;;  %9976 = vmatmul.msk.bf16.gmra.mxu3 %vm397_vm0, %v12207_v30  ;;  %v708_v41 = vld [vmem:[%s11838_s16 + $0x126] sm:$0xff] }
 0x107   : > { %10036 = vmatmul.msk.bf16.gmra.mxu0 %vm397_vm0, %v11903_v42  ;;  %v12229_v42 = vpack.c.bf16 %v9946_v46, %v9945_v18  ;;  %v711_v18 = vld [vmem:[%s11838_s16 + $0x146] sm:$0xff] }
 0x108   : > { %15855 = vst [vmem:[#allocation23_spill] sm:$0xff] %v12212_v8  ;;  %v12227_v8 = vpack.c.bf16 %v709_v9, %v708_v41  ;;  %v710_v9 = vld [vmem:[%s11838_s16 + $0x13e] sm:$0xff] }
 0x109   : > { %v821_v39 = vpop.f32.mrf.mxu2  ;;  %v1056_v12 = vpop.f32.mrf.mxu3  ;;  %v9947_v46 = vld [vmem:[%s11838_s16 + $0x180] sm:$0xff] }
 0x10a   : > { %v892_v28 = vadd.f32 %v821_v39, %v620_v31  ;;  %v621_v57 = vpop.f32.mrf.mxu1 }
 0x10b   : > { %v622_v60 = vadd.f32 %v621_v57, %v12131_v5 }
 0x10c   : > { %v1127_v0 = vadd.f32 %v1056_v12, %v892_v28  ;;  %v1292_v33 = vpop.f32.mrf.mxu0 }
 0x10e   : > { %v12221_v7 = vadd.f32 %v1290_v17, %v1127_v0 }
 0x110   : > { %15856 = vst [vmem:[#allocation24_spill] sm:$0xff] %v12221_v7 }
 0x111   : > { %v823_v25 = vpop.f32.mrf.mxu2  ;;  %v1058_v50 = vpop.f32.mrf.mxu3 }
 0x112   : > { %v893_v4 = vadd.f32 %v823_v25, %v622_v60  ;;  %v624_v23 = vpop.f32.mrf.mxu1  ;;  %v9948_v25 = vld [vmem:[%s11838_s16 + $0x188] sm:$0xff] }
 0x113   : > { %v625_v39 = vadd.f32 %v624_v23, %v12003_v43  ;;  %v12251_v23 = vpack.c.bf16 %v711_v18, %v710_v9  ;;  %v712_v18 = vld [vmem:[%s11838_s16 + $0x156] sm:$0xff] }
 0x114   : > { %v1128_v31 = vadd.f32 %v1058_v50, %v893_v4  ;;  %v1295_v5 = vpop.f32.mrf.mxu0  ;;  %v10007_v4 = vld [vmem:[%s11838_s16 + $0x183] sm:$0xff] }
 0x115   : > { %9889 = vmatmul.msk.bf16.gmra.mxu1 %vm397_vm0, %v12163_v58 }
 0x116   : > { %v12233_v17 = vadd.f32 %v1292_v33, %v1128_v31  ;;  %9917 = vmatmul.msk.bf16.gmra.mxu2 %vm397_vm0, %v12227_v8  ;;  %9977 = vmatmul.msk.bf16.gmra.mxu3 %vm397_vm0, %v12229_v42  ;;  %v10008_v31 = vld [vmem:[%s11838_s16 + $0x18b] sm:$0xff] }
 0x117   : > { %10037 = vmatmul.msk.bf16.gmra.mxu0 %vm397_vm0, %v11939_v59 }
 0x118   : > { %15857 = vst [vmem:[#allocation25_spill] sm:$0xff] %v12233_v17 }
 0x119   : > { %v826_v12 = vpop.f32.mrf.mxu2  ;;  %v1061_v28 = vpop.f32.mrf.mxu3 }
 0x11a   : > { %v894_v57 = vadd.f32 %v826_v12, %v625_v39  ;;  %v626_v60 = vpop.f32.mrf.mxu1  ;;  %v12253_v39 = vpack.c.bf16 %v9948_v25, %v9947_v46  ;;  %v12255_v12 = vpack.c.bf16 %v10008_v31, %v10007_v4  ;;  %v713_v46 = vld [vmem:[%s11838_s16 + $0x15e] sm:$0xff] }
 0x11b   : > { %v627_v50 = vadd.f32 %v626_v60, %v12022_v49  ;;  %v9949_v25 = vld [vmem:[%s11838_s16 + $0x198] sm:$0xff] }
 0x11c   : > { %v1129_v0 = vadd.f32 %v1061_v28, %v894_v57  ;;  %v1297_v33 = vpop.f32.mrf.mxu0  ;;  %15859 = vst [vmem:[#allocation27_spill] sm:$0xff] %v12255_v12  ;;  %v10009_v31 = vld [vmem:[%s11838_s16 + $0x19b] sm:$0xff] }
 0x11e   : > { %v12242_v41 = vadd.f32 %v1295_v5, %v1129_v0 }
 0x120   : > { %15858 = vst [vmem:[#allocation26_spill] sm:$0xff] %v12242_v41 }
 0x121   : > { %v828_v17 = vpop.f32.mrf.mxu2  ;;  %v1063_v59 = vpop.f32.mrf.mxu3 }
 0x122   : > { %v895_v7 = vadd.f32 %v828_v17, %v627_v50  ;;  %v629_v43 = vpop.f32.mrf.mxu1  ;;  %v9950_v50 = vld [vmem:[%s11838_s16 + $0x1a0] sm:$0xff] }
 0x124   : > { %v1130_v5 = vadd.f32 %v1063_v59, %v895_v7  ;;  %v1300_v28 = vpop.f32.mrf.mxu0  ;;  %v630_v59 = vadd.f32 %v629_v43, %v12034_v61  ;;  %v12277_v43 = vpack.c.bf16 %v713_v46, %v712_v18  ;;  %v11678_v18 = vld [vmem:[%s15762_s1 + $0x80] sm:$0xff] }
 0x125   : > { %9890 = vmatmul.msk.bf16.gmra.mxu1 %vm397_vm0, %v12185_v13  ;;  %2210 = vmatpush.bf16.msra.mxu0 %v11678_v18 }
 0x126   : > { %v12259_v49 = vadd.f32 %v1297_v33, %v1130_v5  ;;  %9918 = vmatmul.msk.bf16.gmra.mxu2 %vm397_vm0, %v12251_v23  ;;  %9978 = vmatmul.msk.bf16.gmra.mxu3 %vm397_vm0, %v12253_v39  ;;  %v10010_v5 = vld [vmem:[%s11838_s16 + $0x1a3] sm:$0xff] }
 0x127   : > { %10038 = vmatmul.msk.bf16.gmra.mxu0 %vm397_vm0, %v12255_v12 }
 0x128   : > { %15860 = vst [vmem:[#allocation28_spill] sm:$0xff] %v12259_v49 }
 0x129   : > { %v831_v7 = vpop.f32.mrf.mxu2  ;;  %v1066_v17 = vpop.f32.mrf.mxu3 }
 0x12a   : > { %v896_v57 = vadd.f32 %v831_v7, %v630_v59  ;;  %v631_v60 = vpop.f32.mrf.mxu1  ;;  %v12279_v59 = vpack.c.bf16 %v9950_v50, %v9949_v25  ;;  %v12281_v7 = vpack.c.bf16 %v10010_v5, %v10009_v31  ;;  %v715_v31 = vld [vmem:[%s11838_s16 + $0x176] sm:$0xff] }
 0x12b   : > { %v632_v4 = vadd.f32 %v631_v60, %v12053_v3  ;;  %v11683_v3 = vld [vmem:[%s15762_s1 + $0xa8] sm:$0xff]  ;;  %v9951_v5 = vld [vmem:[%s11838_s16 + $0x1b0] sm:$0xff] }
 0x12c   : > { %v1131_v0 = vadd.f32 %v1066_v17, %v896_v57  ;;  %v1302_v33 = vpop.f32.mrf.mxu0  ;;  %15862 = vst [vmem:[#allocation30_spill] sm:$0xff] %v12281_v7  ;;  %2678 = vmatpush.bf16.msrb.mxu2 %v11683_v3  ;;  %v10011_v3 = vld [vmem:[%s11838_s16 + $0x1b3] sm:$0xff] }
 0x12e   : > { %v12268_v9 = vadd.f32 %v1300_v28, %v1131_v0 }
 0x130   : > { %15861 = vst [vmem:[#allocation29_spill] sm:$0xff] %v12268_v9 }
 0x131   : > { %v833_v49 = vpop.f32.mrf.mxu2  ;;  %v1068_v41 = vpop.f32.mrf.mxu3 }
 0x132   : > { %v897_v12 = vadd.f32 %v833_v49, %v632_v4  ;;  %v634_v61 = vpop.f32.mrf.mxu1  ;;  %v714_v4 = vld [vmem:[%s11838_s16 + $0x16e] sm:$0xff] }
 0x134   : > { %v1132_v28 = vadd.f32 %v1068_v41, %v897_v12  ;;  %v1305_v17 = vpop.f32.mrf.mxu0  ;;  %v11685_v41 = vld [vmem:[%s15762_s1 + $0xb8] sm:$0xff]  ;;  %v635_v12 = vadd.f32 %v634_v61, %v12065_v14 }
 0x135   : > { %9891 = vmatmul.msk.bf16.gmra.mxu1 %vm397_vm0, %v12207_v30  ;;  %2912 = vmatpush.bf16.msrb.mxu3 %v11685_v41  ;;  %v11681_v14 = vld [vmem:[%s15762_s1 + $0x98] sm:$0xff] }
 0x136   : > { %v12285_v57 = vadd.f32 %v1302_v33, %v1132_v28  ;;  %9919 = vmatmul.msk.bf16.gmra.mxu2 %vm397_vm0, %v12277_v43  ;;  %9979 = vmatmul.msk.bf16.gmra.mxu3 %vm397_vm0, %v12279_v59  ;;  %v9952_v61 = vld [vmem:[%s11838_s16 + $0x1b8] sm:$0xff] }
 0x137   : > { %10039 = vmatmul.msk.bf16.gmra.mxu0 %vm397_vm0, %v12281_v7  ;;  %2444 = vmatpush.bf16.msrb.mxu1 %v11681_v14  ;;  %v10012_v41 = vld [vmem:[%s11838_s16 + $0x1bb] sm:$0xff]  ;;  %v12317_v9 = vpack.c.bf16 %v9952_v61, %v9951_v5 }
 0x138   : > { %15863 = vst [vmem:[#allocation31_spill] sm:$0xff] %v12285_v57  ;;  %v12315_v57 = vpack.c.bf16 %v715_v31, %v714_v4  ;;  %v12319_v18 = vpack.c.bf16 %v10012_v41, %v10011_v3 }
 0x139   : > { %v836_v49 = vpop.f32.mrf.mxu2  ;;  %v1071_v60 = vpop.f32.mrf.mxu3 }
 0x13a   : > { %v898_v0 = vadd.f32 %v836_v49, %v635_v12  ;;  %v636_v33 = vpop.f32.mrf.mxu1  ;;  %15864 = vst [vmem:[#allocation32_spill] sm:$0xff] %v12319_v18 }
 0x13b   : > { %v637_v28 = vadd.f32 %v636_v33, %v12091_v22 }
 0x13c   : > { %v1133_v46 = vadd.f32 %v1071_v60, %v898_v0  ;;  %v1307_v25 = vpop.f32.mrf.mxu0 }
 0x13e   : > { %v12306_v50 = vadd.f32 %v1305_v17, %v1133_v46 }
 0x141   : > { %v838_v12 = vpop.f32.mrf.mxu2  ;;  %v1073_v49 = vpop.f32.mrf.mxu3 }
 0x142   : > { %v899_v60 = vadd.f32 %v838_v12, %v637_v28  ;;  %v639_v0 = vpop.f32.mrf.mxu1 }
 0x143   : > { %v640_v22 = vadd.f32 %v639_v0, %v12106_v36 }
 0x144   : > { %v1134_v17 = vadd.f32 %v1073_v49, %v899_v60  ;;  %v1310_v46 = vpop.f32.mrf.mxu0 }
 0x145   : > { %9892 = vmatmul.msk.bf16.gmra.mxu1 %vm397_vm0, %v12229_v42 }
 0x146   : > { %v12323_v14 = vadd.f32 %v1307_v25, %v1134_v17  ;;  %9920 = vmatmul.msk.bf16.gmra.mxu2 %vm397_vm0, %v12315_v57  ;;  %9980 = vmatmul.msk.bf16.gmra.mxu3 %vm397_vm0, %v12317_v9 }
 0x147   : > { %10040 = vmatmul.msk.bf16.gmra.mxu0 %vm397_vm0, %v12319_v18 }
 0x148   : > { %15865 = vst [vmem:[#allocation33_spill] sm:$0xff] %v12323_v14 }
 0x149   : > { %v841_v33 = vpop.f32.mrf.mxu2  ;;  %v1076_v4 = vpop.f32.mrf.mxu3 }
 0x14a   : > { %v900_v31 = vadd.f32 %v841_v33, %v640_v22  ;;  %v641_v5 = vpop.f32.mrf.mxu1 }
 0x14b   : > { %v642_v25 = vadd.f32 %v641_v5, %v12129_v54  ;;  %v10163_v5 = vld [vmem:[%s11838_s16 + $0xab] sm:$0xff] }
 0x14c   : > { %v1135_v61 = vadd.f32 %v1076_v4, %v900_v31  ;;  %v1312_v28 = vpop.f32.mrf.mxu0 }
 0x14e   : > { %v12332_v3 = vadd.f32 %v1310_v46, %v1135_v61  ;;  %v10164_v61 = vld [vmem:[%s11838_s16 + $0xb3] sm:$0xff] }
 0x151   : > { %v843_v41 = vpop.f32.mrf.mxu2  ;;  %v1078_v12 = vpop.f32.mrf.mxu3 }
 0x152   : > { %v901_v49 = vadd.f32 %v843_v41, %v642_v25  ;;  %v644_v60 = vpop.f32.mrf.mxu1 }
 0x153   : > { %v645_v54 = vadd.f32 %v644_v60, %v12018_v47 }
 0x154   : > { %v1136_v17 = vadd.f32 %v1078_v12, %v901_v49  ;;  %v1315_v14 = vpop.f32.mrf.mxu0  ;;  %v1889_v49 = vpack.c.bf16 %v10164_v61, %v10163_v5 }
 0x155   : > { %10085 = vmatmul.msk.bf16.vlgmr.msra.gmra.mxu1 %vm397_vm0, %v11988_v34 }
 0x156   : > { %v12337_v36 = vadd.f32 %v1312_v28, %v1136_v17  ;;  %10145 = vmatmul.msk.bf16.vlgmr.msra.gmra.mxu2 %vm397_vm0, %v11990_v35  ;;  %10205 = vmatmul.msk.bf16.vlgmr.msra.gmra.mxu3 %vm397_vm0, %v11899_v40 }
 0x157   : > { %10265 = vmatmul.msk.bf16.vlgmr.msra.gmra.mxu0 %vm397_vm0, %v12067_v15 }
 0x159   : > { %v846_v0 = vpop.f32.mrf.mxu2  ;;  %v1081_v46 = vpop.f32.mrf.mxu3 }
 0x15a   : > { %v902_v22 = vadd.f32 %v846_v0, %v645_v54  ;;  %v646_v33 = vpop.f32.mrf.mxu1 }
 0x15b   : > { %v647_v35 = vadd.f32 %v646_v33, %v12030_v55 }
 0x15c   : > { %v1137_v4 = vadd.f32 %v1081_v46, %v902_v22  ;;  %v1317_v31 = vpop.f32.mrf.mxu0 }
 0x15e   : > { %v12346_v34 = vadd.f32 %v1315_v14, %v1137_v4 }
 0x161   : > { %v848_v28 = vpop.f32.mrf.mxu2  ;;  %v1083_v25 = vpop.f32.mrf.mxu3 }
 0x162   : > { %v903_v41 = vadd.f32 %v848_v28, %v647_v35  ;;  %v649_v12 = vpop.f32.mrf.mxu1 }
 0x163   : > { %v650_v55 = vadd.f32 %v649_v12, %v12049_v1 }
 0x164   : > { %v1138_v17 = vadd.f32 %v1083_v25, %v903_v41  ;;  %v1320_v47 = vpop.f32.mrf.mxu0 }
 0x165   : > { %10086 = vmatmul.msk.bf16.gmra.mxu1 %vm397_vm0, %v12005_v44  ;;  %v10165_v44 = vld [vmem:[%s11838_s16 + $0xc3] sm:$0xff] }
 0x166   : > { %v12353_v60 = vadd.f32 %v1317_v31, %v1138_v17  ;;  %10146 = vmatmul.msk.bf16.gmra.mxu2 %vm397_vm0, %v12007_v45  ;;  %10206 = vmatmul.msk.bf16.gmra.mxu3 %vm397_vm0, %v1889_v49  ;;  %v10166_v31 = vld [vmem:[%s11838_s16 + $0xcb] sm:$0xff] }
 0x167   : > { %10266 = vmatmul.msk.bf16.gmra.mxu0 %vm397_vm0, %v12108_v37  ;;  %v1890_v25 = vpack.c.bf16 %v10166_v31, %v10165_v44 }
 0x169   : > { %v851_v14 = vpop.f32.mrf.mxu2  ;;  %v1086_v54 = vpop.f32.mrf.mxu3 }
 0x16a   : > { %v904_v0 = vadd.f32 %v851_v14, %v650_v55  ;;  %v651_v46 = vpop.f32.mrf.mxu1 }
 0x16b   : > { %v652_v5 = vadd.f32 %v651_v46, %v12061_v10  ;;  %v10168_v46 = vld [vmem:[%s11838_s16 + $0xe3] sm:$0xff] }
 0x16c   : > { %v1139_v22 = vadd.f32 %v1086_v54, %v904_v0  ;;  %v1322_v33 = vpop.f32.mrf.mxu0 }
 0x16e   : > { %v12361_v4 = vadd.f32 %v1320_v47, %v1139_v22 }
 0x171   : > { %v853_v45 = vpop.f32.mrf.mxu2  ;;  %v1088_v61 = vpop.f32.mrf.mxu3 }
 0x172   : > { %v905_v35 = vadd.f32 %v853_v45, %v652_v5  ;;  %v654_v28 = vpop.f32.mrf.mxu1 }
 0x173   : > { %v655_v10 = vadd.f32 %v654_v28, %v12087_v20 }
 0x174   : > { %v1140_v41 = vadd.f32 %v1088_v61, %v905_v35  ;;  %v1325_v1 = vpop.f32.mrf.mxu0 }
 0x175   : > { %10087 = vmatmul.msk.bf16.gmra.mxu1 %vm397_vm0, %v12036_v62  ;;  %v10167_v62 = vld [vmem:[%s11838_s16 + $0xdb] sm:$0xff] }
 0x176   : > { %v12368_v12 = vadd.f32 %v1322_v33, %v1140_v41  ;;  %10147 = vmatmul.msk.bf16.gmra.mxu2 %vm397_vm0, %v12038_v63  ;;  %10207 = vmatmul.msk.bf16.gmra.mxu3 %vm397_vm0, %v1890_v25  ;;  %v1891_v5 = vpack.c.bf16 %v10168_v46, %v10167_v62 }
 0x177   : > { %10267 = vmatmul.msk.bf16.gmra.mxu0 %vm397_vm0, %v12141_v26 }
 0x179   : > { %v856_v49 = vpop.f32.mrf.mxu2  ;;  %v1091_v17 = vpop.f32.mrf.mxu3 }
 0x17a   : > { %v906_v47 = vadd.f32 %v856_v49, %v655_v10  ;;  %v656_v55 = vpop.f32.mrf.mxu1 }
 0x17b   : > { %v657_v22 = vadd.f32 %v656_v55, %v12102_v32 }
 0x17c   : > { %v1141_v14 = vadd.f32 %v1091_v17, %v906_v47  ;;  %v1327_v54 = vpop.f32.mrf.mxu0  ;;  %v10170_v17 = vld [vmem:[%s11838_s16 + $0xfb] sm:$0xff] }
 0x17e   : > { %v12376_v0 = vadd.f32 %v1325_v1, %v1141_v14 }
 0x181   : > { %v858_v63 = vpop.f32.mrf.mxu2  ;;  %v1093_v33 = vpop.f32.mrf.mxu3 }
 0x182   : > { %v907_v44 = vadd.f32 %v858_v63, %v657_v22  ;;  %v659_v31 = vpop.f32.mrf.mxu1 }
 0x183   : > { %v660_v32 = vadd.f32 %v659_v31, %v12125_v52 }
 0x184   : > { %v1142_v45 = vadd.f32 %v1093_v33, %v907_v44  ;;  %v1330_v20 = vpop.f32.mrf.mxu0 }
 0x185   : > { %10088 = vmatmul.msk.bf16.gmra.mxu1 %vm397_vm0, %v12067_v15  ;;  %v10169_v15 = vld [vmem:[%s11838_s16 + $0xf3] sm:$0xff] }
 0x186   : > { %v12383_v61 = vadd.f32 %v1327_v54, %v1142_v45  ;;  %10148 = vmatmul.msk.bf16.gmra.mxu2 %vm397_vm0, %v12069_v16  ;;  %10208 = vmatmul.msk.bf16.gmra.mxu3 %vm397_vm0, %v1891_v5  ;;  %v1892_v62 = vpack.c.bf16 %v10170_v17, %v10169_v15 }
 0x187   : > { %10268 = vmatmul.msk.bf16.gmra.mxu0 %vm397_vm0, %v12161_v21 }
 0x189   : > { %v861_v35 = vpop.f32.mrf.mxu2  ;;  %v1096_v28 = vpop.f32.mrf.mxu3 }
 0x18a   : > { %v908_v25 = vadd.f32 %v861_v35, %v660_v32  ;;  %v661_v41 = vpop.f32.mrf.mxu1  ;;  %v10172_v32 = vld [vmem:[%s11838_s16 + $0x113] sm:$0xff] }
 0x18b   : > { %v662_v47 = vadd.f32 %v661_v41, %v12137_v19 }
 0x18c   : > { %v1143_v1 = vadd.f32 %v1096_v28, %v908_v25  ;;  %v1332_v10 = vpop.f32.mrf.mxu0 }
 0x18e   : > { %v12391_v49 = vadd.f32 %v1330_v20, %v1143_v1 }
 0x191   : > { %v863_v16 = vpop.f32.mrf.mxu2  ;;  %v1098_v55 = vpop.f32.mrf.mxu3 }
 0x192   : > { %v909_v14 = vadd.f32 %v863_v16, %v662_v47  ;;  %v664_v54 = vpop.f32.mrf.mxu1 }
 0x193   : > { %v665_v19 = vadd.f32 %v664_v54, %v12020_v48 }
 0x194   : > { %v1144_v46 = vadd.f32 %v1098_v55, %v909_v14  ;;  %v1335_v52 = vpop.f32.mrf.mxu0 }
 0x195   : > { %10089 = vmatmul.msk.bf16.gmra.mxu1 %vm397_vm0, %v12108_v37  ;;  %v10171_v37 = vld [vmem:[%s11838_s16 + $0x10b] sm:$0xff] }
 0x196   : > { %v12398_v22 = vadd.f32 %v1332_v10, %v1144_v46  ;;  %10149 = vmatmul.msk.bf16.gmra.mxu2 %vm397_vm0, %v12110_v38  ;;  %10209 = vmatmul.msk.bf16.gmra.mxu3 %vm397_vm0, %v1892_v62  ;;  %v1893_v1 = vpack.c.bf16 %v10172_v32, %v10171_v37  ;;  %v10174_v46 = vld [vmem:[%s11838_s16 + $0x12b] sm:$0xff] }
 0x197   : > { %10269 = vmatmul.msk.bf16.gmra.mxu0 %vm397_vm0, %v12183_v51 }
 0x199   : > { %v866_v63 = vpop.f32.mrf.mxu2  ;;  %v1101_v33 = vpop.f32.mrf.mxu3 }
 0x19a   : > { %v910_v44 = vadd.f32 %v866_v63, %v665_v19  ;;  %v666_v31 = vpop.f32.mrf.mxu1 }
 0x19b   : > { %v667_v35 = vadd.f32 %v666_v31, %v12032_v56 }
 0x19c   : > { %v1145_v5 = vadd.f32 %v1101_v33, %v910_v44  ;;  %v1337_v45 = vpop.f32.mrf.mxu0 }
 0x19e   : > { %v12406_v20 = vadd.f32 %v1335_v52, %v1145_v5 }
 0x1a1   : > { %v868_v38 = vpop.f32.mrf.mxu2  ;;  %v1103_v28 = vpop.f32.mrf.mxu3 }
 0x1a2   : > { %v911_v25 = vadd.f32 %v868_v38, %v667_v35  ;;  %v669_v41 = vpop.f32.mrf.mxu1 }
 0x1a3   : > { %v670_v56 = vadd.f32 %v669_v41, %v12051_v2  ;;  %v11680_v41 = vld [vmem:[%s15762_s1 + $0x90] sm:$0xff] }
 0x1a4   : > { %v1146_v10 = vadd.f32 %v1103_v28, %v911_v25  ;;  %v1340_v48 = vpop.f32.mrf.mxu0  ;;  %2445 = vmatpush.bf16.msrb.mxu1 %v11680_v41 }
 0x1a5   : > { %10090 = vmatmul.msk.bf16.gmra.mxu1 %vm397_vm0, %v12141_v26  ;;  %v10173_v26 = vld [vmem:[%s11838_s16 + $0x123] sm:$0xff] }
 0x1a6   : > { %v12413_v15 = vadd.f32 %v1337_v45, %v1146_v10  ;;  %10150 = vmatmul.msk.bf16.gmra.mxu2 %vm397_vm0, %v12143_v27  ;;  %10210 = vmatmul.msk.bf16.gmra.mxu3 %vm397_vm0, %v1893_v1  ;;  %v1894_v44 = vpack.c.bf16 %v10174_v46, %v10173_v26  ;;  %v11684_v45 = vld [vmem:[%s15762_s1 + $0xb0] sm:$0xff]  ;;  %v10175_v10 = vld [vmem:[%s11838_s16 + $0x13b] sm:$0xff] }
 0x1a7   : > { %10270 = vmatmul.msk.bf16.gmra.mxu0 %vm397_vm0, %v12205_v6  ;;  %2913 = vmatpush.bf16.msrb.mxu3 %v11684_v45 }
 0x1a9   : > { %v871_v17 = vpop.f32.mrf.mxu2  ;;  %v1106_v47 = vpop.f32.mrf.mxu3 }
 0x1aa   : > { %v912_v16 = vadd.f32 %v871_v17, %v670_v56  ;;  %v671_v55 = vpop.f32.mrf.mxu1  ;;  %v15867_v56 = vld [vmem:[#allocation18_spill] sm:$0xff] }
 0x1ab   : > { %v672_v52 = vadd.f32 %v671_v55, %v12063_v11  ;;  %v11682_v11 = vld [vmem:[%s15762_s1 + $0xa0] sm:$0xff] }
 0x1ac   : > { %v1147_v14 = vadd.f32 %v1106_v47, %v912_v16  ;;  %v1342_v54 = vpop.f32.mrf.mxu0  ;;  %2679 = vmatpush.bf16.msrb.mxu2 %v11682_v11 }
 0x1ae   : > { %v12421_v62 = vadd.f32 %v1340_v48, %v1147_v14  ;;  %v10176_v48 = vld [vmem:[%s11838_s16 + $0x143] sm:$0xff] }
 0x1b1   : > { %v873_v27 = vpop.f32.mrf.mxu2  ;;  %v1108_v19 = vpop.f32.mrf.mxu3 }
 0x1b2   : > { %v913_v63 = vadd.f32 %v873_v27, %v672_v52  ;;  %v674_v33 = vpop.f32.mrf.mxu1  ;;  %v11687_v52 = vld [vmem:[%s15762_s1 + $0xc8] sm:$0xff] }
 0x1b3   : > { %3146 = vmatpush.bf16.msrb.mxu0 %v11687_v52  ;;  %v10180_v52 = vld [vmem:[%s11838_s16 + $0x173] sm:$0xff] }
 0x1b4   : > { %v1148_v31 = vadd.f32 %v1108_v19, %v913_v63  ;;  %v1345_v5 = vpop.f32.mrf.mxu0  ;;  %v15868_v19 = vld [vmem:[#allocation19_spill] sm:$0xff] }
 0x1b5   : > { %10091 = vmatmul.msk.bf16.gmra.mxu1 %vm397_vm0, %v12161_v21  ;;  %v15866_v21 = vld [vmem:[#allocation17_spill] sm:$0xff] }
 0x1b6   : > { %v12428_v2 = vadd.f32 %v1342_v54, %v1148_v31  ;;  %10151 = vmatmul.msk.bf16.gmra.mxu2 %vm397_vm0, %v12163_v58  ;;  %10211 = vmatmul.msk.bf16.gmra.mxu3 %vm397_vm0, %v1894_v44  ;;  %v675_v37 = vadd.f32 %v674_v33, %v15866_v21  ;;  %v1895_v54 = vpack.c.bf16 %v10176_v48, %v10175_v10  ;;  %v10177_v21 = vld [vmem:[%s11838_s16 + $0x153] sm:$0xff] }
 0x1b7   : > { %10271 = vmatmul.msk.bf16.gmra.mxu0 %vm397_vm0, %v12227_v8 }
 0x1b9   : > { %v876_v58 = vpop.f32.mrf.mxu2  ;;  %v1111_v32 = vpop.f32.mrf.mxu3 }
 0x1ba   : > { %v914_v35 = vadd.f32 %v876_v58, %v675_v37  ;;  %v676_v38 = vpop.f32.mrf.mxu1  ;;  %v10178_v37 = vld [vmem:[%s11838_s16 + $0x15b] sm:$0xff]  ;;  %v15869_v58 = vld [vmem:[#allocation20_spill] sm:$0xff] }
 0x1bb   : > { %v677_v17 = vadd.f32 %v676_v38, %v15867_v56 }
 0x1bc   : > { %v1149_v28 = vadd.f32 %v1111_v32, %v914_v35  ;;  %v1347_v25 = vpop.f32.mrf.mxu0 }
 0x1be   : > { %v12445_v1 = vadd.f32 %v1345_v5, %v1149_v28 }
 0x1c1   : > { %v878_v47 = vpop.f32.mrf.mxu2  ;;  %v1113_v16 = vpop.f32.mrf.mxu3 }
 0x1c2   : > { %v915_v55 = vadd.f32 %v878_v47, %v677_v17  ;;  %v679_v14 = vpop.f32.mrf.mxu1 }
 0x1c3   : > { %v680_v63 = vadd.f32 %v679_v14, %v15868_v19 }
 0x1c4   : > { %v1150_v26 = vadd.f32 %v1113_v16, %v915_v55  ;;  %v1350_v46 = vpop.f32.mrf.mxu0  ;;  %v15870_v55 = vld [vmem:[#allocation21_spill] sm:$0xff] }
 0x1c5   : > { %10092 = vmatmul.msk.bf16.gmra.mxu1 %vm397_vm0, %v12183_v51 }
 0x1c6   : > { %v12455_v27 = vadd.f32 %v1347_v25, %v1150_v26  ;;  %10152 = vmatmul.msk.bf16.gmra.mxu2 %vm397_vm0, %v12185_v13  ;;  %10212 = vmatmul.msk.bf16.gmra.mxu3 %vm397_vm0, %v1895_v54  ;;  %v1896_v25 = vpack.c.bf16 %v10178_v37, %v10177_v21 }
 0x1c7   : > { %10272 = vmatmul.msk.bf16.gmra.mxu0 %vm397_vm0, %v12251_v23 }
 0x1c9   : > { %v881_v33 = vpop.f32.mrf.mxu2  ;;  %v1116_v44 = vpop.f32.mrf.mxu3 }
 0x1ca   : > { %v916_v31 = vadd.f32 %v881_v33, %v680_v63  ;;  %v681_v5 = vpop.f32.mrf.mxu1 }
 0x1cb   : > { %v682_v13 = vadd.f32 %v681_v5, %v15869_v58 }
 0x1cc   : > { %v1151_v11 = vadd.f32 %v1116_v44, %v916_v31  ;;  %v1352_v45 = vpop.f32.mrf.mxu0 }
 0x1ce   : > { %v12463_v51 = vadd.f32 %v1350_v46, %v1151_v11 }
 0x1d1   : > { %v883_v32 = vpop.f32.mrf.mxu2  ;;  %v1118_v35 = vpop.f32.mrf.mxu3 }
 0x1d2   : > { %v917_v38 = vadd.f32 %v883_v32, %v682_v13  ;;  %v1509_v28 = vpop.f32.mrf.mxu1  ;;  %v15871_v13 = vld [vmem:[#allocation22_spill] sm:$0xff] }
 0x1d3   : > { %v1589_v41 = vadd.f32 %v1509_v28, %v12155_v29 }
 0x1d4   : > { %v1152_v10 = vadd.f32 %v1118_v35, %v917_v38  ;;  %v2212_v48 = vpop.f32.mrf.mxu0 }
 0x1d5   : > { %10093 = vmatmul.msk.bf16.gmra.mxu1 %vm397_vm0, %v12205_v6  ;;  %v10179_v6 = vld [vmem:[%s11838_s16 + $0x16b] sm:$0xff] }
 0x1d6   : > { %v12471_v56 = vadd.f32 %v1352_v45, %v1152_v10  ;;  %10153 = vmatmul.msk.bf16.gmra.mxu2 %vm397_vm0, %v12207_v30  ;;  %10213 = vmatmul.msk.bf16.gmra.mxu3 %vm397_vm0, %v1896_v25  ;;  %v1897_v44 = vpack.c.bf16 %v10180_v52, %v10179_v6  ;;  %v10242_v25 = vld [vmem:[%s11838_s16 + $0x18e] sm:$0xff]  ;;  %v15873_v52 = vld [vmem:[#allocation23_spill] sm:$0xff] }
 0x1d7   : > { %10273 = vmatmul.msk.bf16.gmra.mxu0 %vm397_vm0, %v12277_v43 }
 0x1d9   : > { %v1744_v17 = vpop.f32.mrf.mxu2  ;;  %v1978_v47 = vpop.f32.mrf.mxu3 }
 0x1da   : > { %v1824_v29 = vadd.f32 %v1744_v17, %v1589_v41  ;;  %v1511_v16 = vpop.f32.mrf.mxu1 }
 0x1db   : > { %v1590_v14 = vadd.f32 %v1511_v16, %v15870_v55 }
 0x1dc   : > { %v2058_v54 = vadd.f32 %v1978_v47, %v1824_v29  ;;  %v2214_v26 = vpop.f32.mrf.mxu0 }
 0x1de   : > { %v12479_v46 = vadd.f32 %v2212_v48, %v2058_v54 }
 0x1e1   : > { %v1746_v19 = vpop.f32.mrf.mxu2  ;;  %v1980_v63 = vpop.f32.mrf.mxu3 }
 0x1e2   : > { %v1825_v30 = vadd.f32 %v1746_v19, %v1590_v14  ;;  %v1514_v33 = vpop.f32.mrf.mxu1  ;;  %v15872_v14 = vld [vmem:[#allocation27_spill] sm:$0xff] }
 0x1e3   : > { %v1591_v31 = vadd.f32 %v1514_v33, %v12177_v53  ;;  %v10243_v33 = vld [vmem:[%s11838_s16 + $0x19e] sm:$0xff] }
 0x1e4   : > { %v2059_v5 = vadd.f32 %v1980_v63, %v1825_v30  ;;  %v2217_v11 = vpop.f32.mrf.mxu0 }
 0x1e5   : > { %10094 = vmatmul.msk.bf16.gmra.mxu1 %vm397_vm0, %v12227_v8  ;;  %v10241_v8 = vld [vmem:[%s11838_s16 + $0x186] sm:$0xff] }
 0x1e6   : > { %v12486_v45 = vadd.f32 %v2214_v26, %v2059_v5  ;;  %10154 = vmatmul.msk.bf16.gmra.mxu2 %vm397_vm0, %v12229_v42  ;;  %10214 = vmatmul.msk.bf16.gmra.mxu3 %vm397_vm0, %v1897_v44  ;;  %v12499_v47 = vpack.c.bf16 %v10242_v25, %v10241_v8  ;;  %v10244_v44 = vld [vmem:[%s11838_s16 + $0x1a6] sm:$0xff] }
 0x1e7   : > { %10274 = vmatmul.msk.bf16.gmra.mxu0 %vm397_vm0, %v12315_v57 }
 0x1e9   : > { %v1749_v21 = vpop.f32.mrf.mxu2  ;;  %v1983_v37 = vpop.f32.mrf.mxu3 }
 0x1ea   : > { %v1826_v53 = vadd.f32 %v1749_v21, %v1591_v31  ;;  %v1516_v58 = vpop.f32.mrf.mxu1  ;;  %v15874_v21 = vld [vmem:[#allocation24_spill] sm:$0xff] }
 0x1eb   : > { %v1592_v32 = vadd.f32 %v1516_v58, %v15871_v13 }
 0x1ec   : > { %v2060_v35 = vadd.f32 %v1983_v37, %v1826_v53  ;;  %v2219_v38 = vpop.f32.mrf.mxu0  ;;  %v12517_v53 = vpack.c.bf16 %v10244_v44, %v10243_v33 }
 0x1ee   : > { %v12494_v28 = vadd.f32 %v2217_v11, %v2060_v35 }
 0x1f1   : > { %v1751_v41 = vpop.f32.mrf.mxu2  ;;  %v1985_v10 = vpop.f32.mrf.mxu3 }
 0x1f2   : > { %v1827_v42 = vadd.f32 %v1751_v41, %v1592_v32  ;;  %v1519_v48 = vpop.f32.mrf.mxu1  ;;  %v15875_v41 = vld [vmem:[#allocation25_spill] sm:$0xff] }
 0x1f3   : > { %v1593_v17 = vadd.f32 %v1519_v48, %v12199_v24 }
 0x1f4   : > { %v2061_v29 = vadd.f32 %v1985_v10, %v1827_v42  ;;  %v2222_v16 = vpop.f32.mrf.mxu0 }
 0x1f5   : > { %10095 = vmatmul.msk.bf16.gmra.mxu1 %vm397_vm0, %v12251_v23 }
 0x1f6   : > { %v12503_v55 = vadd.f32 %v2219_v38, %v2061_v29  ;;  %10155 = vmatmul.msk.bf16.gmra.mxu2 %vm397_vm0, %v12253_v39  ;;  %10215 = vmatmul.msk.bf16.gmra.mxu3 %vm397_vm0, %v15872_v14  ;;  %v10246_v29 = vld [vmem:[%s11838_s16 + $0x1be] sm:$0xff] }
 0x1f7   : > { %10275 = vmatmul.msk.bf16.gmra.mxu0 %vm397_vm0, %v12499_v47 }
 0x1f9   : > { %v1754_v24 = vpop.f32.mrf.mxu2  ;;  %v1988_v54 = vpop.f32.mrf.mxu3 }
 0x1fa   : > { %v1828_v26 = vadd.f32 %v1754_v24, %v1593_v17  ;;  %v1521_v6 = vpop.f32.mrf.mxu1  ;;  %v10245_v17 = vld [vmem:[%s11838_s16 + $0x1b6] sm:$0xff] }
 0x1fb   : > { %v1594_v19 = vadd.f32 %v1521_v6, %v15873_v52  ;;  %v12535_v52 = vpack.c.bf16 %v10246_v29, %v10245_v17  ;;  %v15878_v29 = vld [vmem:[#allocation29_spill] sm:$0xff] }
 0x1fc   : > { %v2062_v63 = vadd.f32 %v1988_v54, %v1828_v26  ;;  %v2224_v30 = vpop.f32.mrf.mxu0  ;;  %v15876_v26 = vld [vmem:[#allocation26_spill] sm:$0xff] }
 0x1fe   : > { %v12512_v23 = vadd.f32 %v2222_v16, %v2062_v63 }
 0x201   : > { %v1756_v31 = vpop.f32.mrf.mxu2  ;;  %v1990_v39 = vpop.f32.mrf.mxu3 }
 0x202   : > { %v1829_v5 = vadd.f32 %v1756_v31, %v1594_v19  ;;  %v1524_v11 = vpop.f32.mrf.mxu1 }
 0x203   : > { %v1595_v37 = vadd.f32 %v1524_v11, %v15874_v21 }
 0x204   : > { %v2063_v58 = vadd.f32 %v1990_v39, %v1829_v5  ;;  %v2227_v13 = vpop.f32.mrf.mxu0  ;;  %v15877_v5 = vld [vmem:[#allocation28_spill] sm:$0xff] }
 0x205   : > { %10096 = vmatmul.msk.bf16.gmra.mxu1 %vm397_vm0, %v12277_v43 }
 0x206   : > { %v12521_v32 = vadd.f32 %v2224_v30, %v2063_v58  ;;  %10156 = vmatmul.msk.bf16.gmra.mxu2 %vm397_vm0, %v12279_v59  ;;  %10216 = vmatmul.msk.bf16.gmra.mxu3 %vm397_vm0, %v12281_v7  ;;  %v10127_v58 = vld [vmem:[%s11838_s16 + $0x1c8] sm:$0xff] }
 0x207   : > { %10276 = vmatmul.msk.bf16.gmra.mxu0 %vm397_vm0, %v12517_v53 }
 0x209   : > { %v1759_v35 = vpop.f32.mrf.mxu2  ;;  %v1993_v38 = vpop.f32.mrf.mxu3 }
 0x20a   : > { %v1830_v8 = vadd.f32 %v1759_v35, %v1595_v37  ;;  %v1526_v25 = vpop.f32.mrf.mxu1  ;;  %v10188_v35 = vld [vmem:[%s11838_s16 + $0x1d3] sm:$0xff] }
 0x20b   : > { %v1596_v10 = vadd.f32 %v1526_v25, %v15875_v41 }
 0x20c   : > { %v2064_v42 = vadd.f32 %v1993_v38, %v1830_v8  ;;  %v2229_v48 = vpop.f32.mrf.mxu0  ;;  %v10247_v38 = vld [vmem:[%s11838_s16 + $0x1ce] sm:$0xff]  ;;  %v10248_v8 = vld [vmem:[%s11838_s16 + $0x1d6] sm:$0xff] }
 0x20e   : > { %v12530_v43 = vadd.f32 %v2227_v13, %v2064_v42  ;;  %v10128_v13 = vld [vmem:[%s11838_s16 + $0x1d0] sm:$0xff] }
 0x211   : > { %v1761_v16 = vpop.f32.mrf.mxu2  ;;  %v1995_v59 = vpop.f32.mrf.mxu3 }
 0x212   : > { %v1831_v24 = vadd.f32 %v1761_v16, %v1596_v10  ;;  %v1529_v54 = vpop.f32.mrf.mxu1 }
 0x213   : > { %v1597_v6 = vadd.f32 %v1529_v54, %v15876_v26 }
 0x214   : > { %v2065_v19 = vadd.f32 %v1995_v59, %v1831_v24  ;;  %v2232_v63 = vpop.f32.mrf.mxu0  ;;  %v2135_v59 = vpack.c.bf16 %v10248_v8, %v10247_v38 }
 0x215   : > { %10097 = vmatmul.msk.bf16.gmra.mxu1 %vm397_vm0, %v12315_v57 }
 0x216   : > { %v12539_v30 = vadd.f32 %v2229_v48, %v2065_v19  ;;  %10157 = vmatmul.msk.bf16.gmra.mxu2 %vm397_vm0, %v12317_v9  ;;  %10217 = vmatmul.msk.bf16.gmra.mxu3 %vm397_vm0, %v12319_v18  ;;  %v10187_v9 = vld [vmem:[%s11838_s16 + $0x1cb] sm:$0xff]  ;;  %v1667_v48 = vpack.c.bf16 %v10128_v13, %v10127_v58 }
 0x217   : > { %10277 = vmatmul.msk.bf16.gmra.mxu0 %vm397_vm0, %v12535_v52  ;;  %v1901_v17 = vpack.c.bf16 %v10188_v35, %v10187_v9  ;;  %v10190_v58 = vld [vmem:[%s11838_s16 + $0x1eb] sm:$0xff] }
 0x218   : > { %v10249_v13 = vld [vmem:[%s11838_s16 + $0x1e6] sm:$0xff]  ;;  %v10250_v9 = vld [vmem:[%s11838_s16 + $0x1ee] sm:$0xff] }
 0x219   : > { %v1764_v33 = vpop.f32.mrf.mxu2  ;;  %v1998_v44 = vpop.f32.mrf.mxu3 }
 0x21a   : > { %v1832_v31 = vadd.f32 %v1764_v33, %v1597_v6  ;;  %v1531_v39 = vpop.f32.mrf.mxu1 }
 0x21b   : > { %v1598_v57 = vadd.f32 %v1531_v39, %v15877_v5 }
 0x21c   : > { %v2066_v11 = vadd.f32 %v1998_v44, %v1832_v31  ;;  %v2234_v21 = vpop.f32.mrf.mxu0  ;;  %v15879_v44 = vld [vmem:[#allocation31_spill] sm:$0xff] }
 0x21e   : > { %v12548_v37 = vadd.f32 %v2232_v63, %v2066_v11  ;;  %v10130_v11 = vld [vmem:[%s11838_s16 + $0x1e8] sm:$0xff] }
 0x221   : > { %v1766_v25 = vpop.f32.mrf.mxu2  ;;  %v2000_v41 = vpop.f32.mrf.mxu3 }
 0x222   : > { %v1833_v10 = vadd.f32 %v1766_v25, %v1598_v57  ;;  %v1534_v42 = vpop.f32.mrf.mxu1  ;;  %v10129_v57 = vld [vmem:[%s11838_s16 + $0x1e0] sm:$0xff] }
 0x223   : > { %v1599_v16 = vadd.f32 %v1534_v42, %v15878_v29 }
 0x224   : > { %v2067_v24 = vadd.f32 %v2000_v41, %v1833_v10  ;;  %v2237_v54 = vpop.f32.mrf.mxu0  ;;  %v1668_v41 = vpack.c.bf16 %v10130_v11, %v10129_v57  ;;  %v10131_v57 = vld [vmem:[%s11838_s16 + $0x1f8] sm:$0xff]  ;;  %v10132_v11 = vld [vmem:[%s11838_s16 + $0x200] sm:$0xff] }
 0x225   : > { %10098 = vmatmul.msk.bf16.gmra.mxu1 %vm397_vm0, %v12499_v47 }
 0x226   : > { %v12559_v26 = vadd.f32 %v2234_v21, %v2067_v24  ;;  %10158 = vmatmul.msk.bf16.gmra.mxu2 %vm397_vm0, %v1667_v48  ;;  %10218 = vmatmul.msk.bf16.gmra.mxu3 %vm397_vm0, %v1901_v17  ;;  %v10189_v21 = vld [vmem:[%s11838_s16 + $0x1e3] sm:$0xff]  ;;  %v2136_v48 = vpack.c.bf16 %v10250_v9, %v10249_v13 }
 0x227   : > { %10278 = vmatmul.msk.bf16.gmra.mxu0 %vm397_vm0, %v2135_v59  ;;  %v1902_v10 = vpack.c.bf16 %v10190_v58, %v10189_v21  ;;  %v11691_v59 = vld [vmem:[%s15762_s1 + $0xe8] sm:$0xff]  ;;  %v10191_v21 = vld [vmem:[%s11838_s16 + $0x1fb] sm:$0xff] }
 0x228   : > { %3518 = vmatpush.bf16.msra.mxu2 %v11691_v59  ;;  %v10192_v58 = vld [vmem:[%s11838_s16 + $0x203] sm:$0xff] }
 0x229   : > { %v1769_v6 = vpop.f32.mrf.mxu2  ;;  %v2003_v19 = vpop.f32.mrf.mxu3  ;;  %v10251_v13 = vld [vmem:[%s11838_s16 + $0x1fe] sm:$0xff]  ;;  %v10252_v9 = vld [vmem:[%s11838_s16 + $0x206] sm:$0xff] }
 0x22a   : > { %v1834_v63 = vadd.f32 %v1769_v6, %v1599_v16  ;;  %v1536_v33 = vpop.f32.mrf.mxu1 }
 0x22b   : > { %v1600_v31 = vadd.f32 %v1536_v33, %v15879_v44  ;;  %v11686_v33 = vld [vmem:[%s15762_s1 + $0xc0] sm:$0xff] }
 0x22c   : > { %v2068_v39 = vadd.f32 %v2003_v19, %v1834_v63  ;;  %v2239_v5 = vpop.f32.mrf.mxu0  ;;  %v15880_v19 = vld [vmem:[#allocation33_spill] sm:$0xff]  ;;  %3147 = vmatpush.bf16.msrb.mxu0 %v11686_v33  ;;  %v10282_v33 = vld [vmem:[%s11838_s16 + $0x21] sm:$0xff] }
 0x22e   : > { %v12565_v47 = vadd.f32 %v2237_v54, %v2068_v39  ;;  %v11689_v39 = vld [vmem:[%s15762_s1 + $0xd8] sm:$0xff] }
 0x22f   : > { %3284 = vmatpush.bf16.msra.mxu1 %v11689_v39  ;;  %v10401_v39 = vld [vmem:[%s11838_s16 + $0x1d] sm:$0xff] }
 0x231   : > { %v1771_v35 = vpop.f32.mrf.mxu2  ;;  %v2005_v38 = vpop.f32.mrf.mxu3 }
 0x232   : > { %v1835_v8 = vadd.f32 %v1771_v35, %v1600_v31  ;;  %v1539_v25 = vpop.f32.mrf.mxu1 }
 0x233   : > { %v1601_v42 = vadd.f32 %v1539_v25, %v12306_v50  ;;  %v11693_v50 = vld [vmem:[%s15762_s1 + $0xf8] sm:$0xff] }
 0x234   : > { %v2069_v17 = vadd.f32 %v2005_v38, %v1835_v8  ;;  %v2242_v29 = vpop.f32.mrf.mxu0  ;;  %3753 = vmatpush.bf16.msra.mxu3 %v11693_v50 }
 0x235   : > { %10099 = vmatmul.msk.bf16.gmra.mxu1 %vm397_vm0, %v12517_v53 }
 0x236   : > { %v12576_v16 = vadd.f32 %v2239_v5, %v2069_v17  ;;  %10159 = vmatmul.msk.bf16.gmra.mxu2 %vm397_vm0, %v1668_v41  ;;  %10219 = vmatmul.msk.bf16.gmra.mxu3 %vm397_vm0, %v1902_v10  ;;  %v1669_v41 = vpack.c.bf16 %v10132_v11, %v10131_v57  ;;  %v1903_v10 = vpack.c.bf16 %v10192_v58, %v10191_v21  ;;  %v10402_v57 = vld [vmem:[%s11838_s16 + $0x25] sm:$0xff]  ;;  %v10462_v21 = vld [vmem:[%s11838_s16 + $0x51] sm:$0xff] }
 0x237   : > { %10279 = vmatmul.msk.bf16.gmra.mxu0 %vm397_vm0, %v2136_v48  ;;  %v2137_v48 = vpack.c.bf16 %v10252_v9, %v10251_v13  ;;  %v10461_v11 = vld [vmem:[%s11838_s16 + $0x49] sm:$0xff] }
 0x239   : > { %v1774_v53 = vpop.f32.mrf.mxu2  ;;  %v2008_v24 = vpop.f32.mrf.mxu3 }
 0x23a   : > { %v1836_v54 = vadd.f32 %v1774_v53, %v1601_v42  ;;  %v1541_v6 = vpop.f32.mrf.mxu1 }
 0x23b   : > { %v1602_v63 = vadd.f32 %v1541_v6, %v15880_v19 }
 0x23c   : > { %v2070_v44 = vadd.f32 %v2008_v24, %v1836_v54  ;;  %v2244_v31 = vpop.f32.mrf.mxu0 }
 0x23e   : > { %v12594_v5 = vadd.f32 %v2242_v29, %v2070_v44  ;;  %v10341_v44 = vld [vmem:[%s11838_s16 + $0x1b] sm:$0xff] }
 0x241   : > { %v1776_v35 = vpop.f32.mrf.mxu2  ;;  %v2010_v38 = vpop.f32.mrf.mxu3 }
 0x242   : > { %v1837_v8 = vadd.f32 %v1776_v35, %v1602_v63  ;;  %v1544_v25 = vpop.f32.mrf.mxu1  ;;  %v10281_v63 = vld [vmem:[%s11838_s16 + $0x19] sm:$0xff] }
 0x243   : > { %v1603_v42 = vadd.f32 %v1544_v25, %v12332_v3  ;;  %v2357_v9 = vpack.c.bf16 %v10282_v33, %v10281_v63  ;;  %v2825_v25 = vpack.c.bf16 %v10402_v57, %v10401_v39  ;;  %v10343_v63 = vld [vmem:[%s11838_s16 + $0x33] sm:$0xff]  ;;  %v10344_v33 = vld [vmem:[%s11838_s16 + $0x3b] sm:$0xff]  ;;  %v10464_v57 = vld [vmem:[%s11838_s16 + $0x69] sm:$0xff] }
 0x244   : > { %v2071_v17 = vadd.f32 %v2010_v38, %v1837_v8  ;;  %v2247_v29 = vpop.f32.mrf.mxu0  ;;  %v10463_v39 = vld [vmem:[%s11838_s16 + $0x61] sm:$0xff] }
 0x245   : > { %10100 = vmatmul.msk.bf16.gmra.mxu1 %vm397_vm0, %v12535_v52 }
 0x246   : > { %v12605_v59 = vadd.f32 %v2244_v31, %v2071_v17  ;;  %10160 = vmatmul.msk.bf16.gmra.mxu2 %vm397_vm0, %v1669_v41  ;;  %10220 = vmatmul.msk.bf16.gmra.mxu3 %vm397_vm0, %v1903_v10  ;;  %v10342_v31 = vld [vmem:[%s11838_s16 + $0x23] sm:$0xff]  ;;  %v12622_v41 = vpack.c.bf16 %v10462_v21, %v10461_v11 }
 0x247   : > { %10280 = vmatmul.msk.bf16.gmra.mxu0 %vm397_vm0, %v2137_v48  ;;  %v2591_v8 = vpack.c.bf16 %v10342_v31, %v10341_v44  ;;  %v10403_v44 = vld [vmem:[%s11838_s16 + $0x35] sm:$0xff]  ;;  %v10404_v31 = vld [vmem:[%s11838_s16 + $0x3d] sm:$0xff] }
 0x249   : > { %v1779_v3 = vpop.f32.mrf.mxu2  ;;  %v2013_v50 = vpop.f32.mrf.mxu3 }
 0x24a   : > { %v1838_v53 = vadd.f32 %v1779_v3, %v1603_v42  ;;  %v1546_v24 = vpop.f32.mrf.mxu1 }
 0x24b   : > { %v1604_v54 = vadd.f32 %v1546_v24, %v12337_v36 }
 0x24c   : > { %v2072_v52 = vadd.f32 %v2013_v50, %v1838_v53  ;;  %v2249_v6 = vpop.f32.mrf.mxu0 }
 0x24e   : > { %v12611_v19 = vadd.f32 %v2247_v29, %v2072_v52  ;;  %v10283_v52 = vld [vmem:[%s11838_s16 + $0x31] sm:$0xff] }
 0x251   : > { %v1781_v58 = vpop.f32.mrf.mxu2  ;;  %v2015_v13 = vpop.f32.mrf.mxu3 }
 0x252   : > { %v1839_v35 = vadd.f32 %v1781_v58, %v1604_v54  ;;  %v1549_v38 = vpop.f32.mrf.mxu1 }
 0x253   : > { %v1605_v36 = vadd.f32 %v1549_v38, %v12346_v34  ;;  %v2826_v38 = vpack.c.bf16 %v10404_v31, %v10403_v44  ;;  %v10466_v44 = vld [vmem:[%s11838_s16 + $0x81] sm:$0xff] }
 0x254   : > { %v2073_v10 = vadd.f32 %v2015_v13, %v1839_v35  ;;  %v2252_v42 = vpop.f32.mrf.mxu0  ;;  %v2592_v35 = vpack.c.bf16 %v10344_v33, %v10343_v63  ;;  %v10406_v63 = vld [vmem:[%s11838_s16 + $0x55] sm:$0xff] }
 0x255   : > { %10325 = vmatmul.msk.bf16.vlgmr.msrb.gmra.mxu1 %vm397_vm0, %v2357_v9  ;;  %v10465_v33 = vld [vmem:[%s11838_s16 + $0x79] sm:$0xff] }
 0x256   : > { %v12625_v48 = vadd.f32 %v2249_v6, %v2073_v10  ;;  %10385 = vmatmul.msk.bf16.vlgmr.msrb.gmra.mxu2 %vm397_vm0, %v2591_v8  ;;  %10445 = vmatmul.msk.bf16.vlgmr.msrb.gmra.mxu3 %vm397_vm0, %v2825_v25  ;;  %v10284_v6 = vld [vmem:[%s11838_s16 + $0x39] sm:$0xff]  ;;  %v3060_v8 = vpack.c.bf16 %v10464_v57, %v10463_v39 }
 0x257   : > { %10505 = vmatmul.msk.bf16.vlgmr.msrb.gmra.mxu0 %vm397_vm0, %v12622_v41  ;;  %v2358_v58 = vpack.c.bf16 %v10284_v6, %v10283_v52  ;;  %v10346_v52 = vld [vmem:[%s11838_s16 + $0x53] sm:$0xff] }
 0x258   : > { %v10405_v6 = vld [vmem:[%s11838_s16 + $0x4d] sm:$0xff] }
 0x259   : > { %v1784_v34 = vpop.f32.mrf.mxu2  ;;  %v2018_v17 = vpop.f32.mrf.mxu3 }
 0x25a   : > { %v1840_v29 = vadd.f32 %v1784_v34, %v1605_v36  ;;  %v1551_v3 = vpop.f32.mrf.mxu1 }
 0x25b   : > { %v1606_v50 = vadd.f32 %v1551_v3, %v12353_v60 }
 0x25c   : > { %v2074_v53 = vadd.f32 %v2018_v17, %v1840_v29  ;;  %v2254_v24 = vpop.f32.mrf.mxu0 }
 0x25e   : > { %v12632_v54 = vadd.f32 %v2252_v42, %v2074_v53 }
 0x261   : > { %v1786_v11 = vpop.f32.mrf.mxu2  ;;  %v2020_v21 = vpop.f32.mrf.mxu3 }
 0x262   : > { %v1841_v13 = vadd.f32 %v1786_v11, %v1606_v50  ;;  %v1554_v9 = vpop.f32.mrf.mxu1 }
 0x263   : > { %v1607_v60 = vadd.f32 %v1554_v9, %v12361_v4 }
 0x264   : > { %v2075_v25 = vadd.f32 %v2020_v21, %v1841_v13  ;;  %v2257_v36 = vpop.f32.mrf.mxu0 }
 0x265   : > { %10326 = vmatmul.msk.bf16.gmra.mxu1 %vm397_vm0, %v2358_v58  ;;  %v12658_v58 = vpack.c.bf16 %v10406_v63, %v10405_v6 }
 0x266   : > { %v12644_v10 = vadd.f32 %v2254_v24, %v2075_v25  ;;  %10386 = vmatmul.msk.bf16.gmra.mxu2 %vm397_vm0, %v2592_v35  ;;  %10446 = vmatmul.msk.bf16.gmra.mxu3 %vm397_vm0, %v2826_v38  ;;  %v10345_v24 = vld [vmem:[%s11838_s16 + $0x4b] sm:$0xff] }
 0x267   : > { %10506 = vmatmul.msk.bf16.gmra.mxu0 %vm397_vm0, %v3060_v8  ;;  %v2593_v21 = vpack.c.bf16 %v10346_v52, %v10345_v24  ;;  %v10467_v24 = vld [vmem:[%s11838_s16 + $0x91] sm:$0xff]  ;;  %v10468_v52 = vld [vmem:[%s11838_s16 + $0x99] sm:$0xff] }
 0x269   : > { %v1789_v4 = vpop.f32.mrf.mxu2  ;;  %v2023_v42 = vpop.f32.mrf.mxu3 }
 0x26a   : > { %v1842_v34 = vadd.f32 %v1789_v4, %v1607_v60  ;;  %v1556_v17 = vpop.f32.mrf.mxu1 }
 0x26b   : > { %v1608_v29 = vadd.f32 %v1556_v17, %v12368_v12  ;;  %v12661_v12 = vpack.c.bf16 %v10466_v44, %v10465_v33  ;;  %v10347_v17 = vld [vmem:[%s11838_s16 + $0x63] sm:$0xff] }
 0x26c   : > { %v2076_v3 = vadd.f32 %v2023_v42, %v1842_v34  ;;  %v2259_v50 = vpop.f32.mrf.mxu0 }
 0x26e   : > { %v12650_v53 = vadd.f32 %v2257_v36, %v2076_v3  ;;  %v10407_v3 = vld [vmem:[%s11838_s16 + $0x65] sm:$0xff] }
 0x271   : > { %v1791_v31 = vpop.f32.mrf.mxu2  ;;  %v2025_v39 = vpop.f32.mrf.mxu3 }
 0x272   : > { %v1843_v57 = vadd.f32 %v1791_v31, %v1608_v29  ;;  %v1559_v11 = vpop.f32.mrf.mxu1  ;;  %v10348_v29 = vld [vmem:[%s11838_s16 + $0x6b] sm:$0xff] }
 0x273   : > { %v1609_v13 = vadd.f32 %v1559_v11, %v12376_v0  ;;  %v2594_v31 = vpack.c.bf16 %v10348_v29, %v10347_v17  ;;  %v10410_v17 = vld [vmem:[%s11838_s16 + $0x85] sm:$0xff] }
 0x274   : > { %v2077_v9 = vadd.f32 %v2025_v39, %v1843_v57  ;;  %v2262_v35 = vpop.f32.mrf.mxu0  ;;  %v10469_v29 = vld [vmem:[%s11838_s16 + $0xa9] sm:$0xff] }
 0x275   : > { %10327 = vmatmul.msk.bf16.gmra.mxu1 %vm397_vm0, %v12622_v41 }
 0x276   : > { %v12665_v38 = vadd.f32 %v2259_v50, %v2077_v9  ;;  %10387 = vmatmul.msk.bf16.gmra.mxu2 %vm397_vm0, %v2593_v21  ;;  %10447 = vmatmul.msk.bf16.gmra.mxu3 %vm397_vm0, %v12658_v58  ;;  %v10408_v50 = vld [vmem:[%s11838_s16 + $0x6d] sm:$0xff] }
 0x277   : > { %10507 = vmatmul.msk.bf16.gmra.mxu0 %vm397_vm0, %v12661_v12  ;;  %v12681_v39 = vpack.c.bf16 %v10408_v50, %v10407_v3  ;;  %v10470_v3 = vld [vmem:[%s11838_s16 + $0xb1] sm:$0xff] }
 0x279   : > { %v1794_v0 = vpop.f32.mrf.mxu2  ;;  %v2028_v60 = vpop.f32.mrf.mxu3 }
 0x27a   : > { %v1844_v25 = vadd.f32 %v1794_v0, %v1609_v13  ;;  %v1561_v36 = vpop.f32.mrf.mxu1 }
 0x27b   : > { %v1610_v4 = vadd.f32 %v1561_v36, %v12383_v61  ;;  %v12684_v61 = vpack.c.bf16 %v10468_v52, %v10467_v24 }
 0x27c   : > { %v2078_v41 = vadd.f32 %v2028_v60, %v1844_v25  ;;  %v2264_v42 = vpop.f32.mrf.mxu0 }
 0x27e   : > { %v12673_v34 = vadd.f32 %v2262_v35, %v2078_v41  ;;  %v10350_v41 = vld [vmem:[%s11838_s16 + $0x83] sm:$0xff] }
 0x281   : > { %v1796_v6 = vpop.f32.mrf.mxu2  ;;  %v2030_v63 = vpop.f32.mrf.mxu3 }
 0x282   : > { %v1845_v33 = vadd.f32 %v1796_v6, %v1610_v4  ;;  %v1564_v44 = vpop.f32.mrf.mxu1  ;;  %v10349_v4 = vld [vmem:[%s11838_s16 + $0x7b] sm:$0xff] }
 0x283   : > { %v1611_v57 = vadd.f32 %v1564_v44, %v12391_v49  ;;  %v12708_v44 = vpack.c.bf16 %v10470_v3, %v10469_v29  ;;  %v10472_v29 = vld [vmem:[%s11838_s16 + $0xc9] sm:$0xff] }
 0x284   : > { %v2079_v11 = vadd.f32 %v2030_v63, %v1845_v33  ;;  %v2267_v21 = vpop.f32.mrf.mxu0  ;;  %v12703_v63 = vpack.c.bf16 %v10350_v41, %v10349_v4  ;;  %v10352_v4 = vld [vmem:[%s11838_s16 + $0x9b] sm:$0xff] }
 0x285   : > { %10328 = vmatmul.msk.bf16.gmra.mxu1 %vm397_vm0, %v3060_v8  ;;  %v10411_v41 = vld [vmem:[%s11838_s16 + $0x95] sm:$0xff] }
 0x286   : > { %v12687_v13 = vadd.f32 %v2264_v42, %v2079_v11  ;;  %10388 = vmatmul.msk.bf16.gmra.mxu2 %vm397_vm0, %v2594_v31  ;;  %10448 = vmatmul.msk.bf16.gmra.mxu3 %vm397_vm0, %v12681_v39  ;;  %v10409_v42 = vld [vmem:[%s11838_s16 + $0x7d] sm:$0xff] }
 0x287   : > { %10508 = vmatmul.msk.bf16.gmra.mxu0 %vm397_vm0, %v12684_v61  ;;  %v12705_v33 = vpack.c.bf16 %v10410_v17, %v10409_v42  ;;  %v10412_v42 = vld [vmem:[%s11838_s16 + $0x9d] sm:$0xff] }
 0x288   : > { %v10471_v17 = vld [vmem:[%s11838_s16 + $0xc1] sm:$0xff] }
 0x289   : > { %v1799_v49 = vpop.f32.mrf.mxu2  ;;  %v2033_v9 = vpop.f32.mrf.mxu3 }
 0x28a   : > { %v1846_v35 = vadd.f32 %v1799_v49, %v1611_v57  ;;  %v1566_v0 = vpop.f32.mrf.mxu1 }
 0x28b   : > { %v1612_v60 = vadd.f32 %v1566_v0, %v12398_v22 }
 0x28c   : > { %v2080_v8 = vadd.f32 %v2033_v9, %v1846_v35  ;;  %v2269_v25 = vpop.f32.mrf.mxu0 }
 0x28e   : > { %v12695_v36 = vadd.f32 %v2267_v21, %v2080_v8 }
 0x291   : > { %v1801_v50 = vpop.f32.mrf.mxu2  ;;  %v2035_v24 = vpop.f32.mrf.mxu3 }
 0x292   : > { %v1847_v52 = vadd.f32 %v1801_v50, %v1612_v60  ;;  %v1569_v6 = vpop.f32.mrf.mxu1 }
 0x293   : > { %v1613_v22 = vadd.f32 %v1569_v6, %v12406_v20 }
 0x294   : > { %v2081_v31 = vadd.f32 %v2035_v24, %v1847_v52  ;;  %v2272_v57 = vpop.f32.mrf.mxu0 }
 0x295   : > { %10329 = vmatmul.msk.bf16.gmra.mxu1 %vm397_vm0, %v12661_v12 }
 0x296   : > { %v12712_v11 = vadd.f32 %v2269_v25, %v2081_v31  ;;  %10389 = vmatmul.msk.bf16.gmra.mxu2 %vm397_vm0, %v12703_v63  ;;  %10449 = vmatmul.msk.bf16.gmra.mxu3 %vm397_vm0, %v12705_v33  ;;  %v10351_v25 = vld [vmem:[%s11838_s16 + $0x93] sm:$0xff]  ;;  %v12734_v31 = vpack.c.bf16 %v10472_v29, %v10471_v17 }
 0x297   : > { %10509 = vmatmul.msk.bf16.gmra.mxu0 %vm397_vm0, %v12708_v44  ;;  %v12729_v6 = vpack.c.bf16 %v10352_v4, %v10351_v25  ;;  %v10413_v17 = vld [vmem:[%s11838_s16 + $0xad] sm:$0xff]  ;;  %v10414_v29 = vld [vmem:[%s11838_s16 + $0xb5] sm:$0xff] }
 0x299   : > { %v1804_v20 = vpop.f32.mrf.mxu2  ;;  %v2038_v21 = vpop.f32.mrf.mxu3 }
 0x29a   : > { %v1848_v49 = vadd.f32 %v1804_v20, %v1613_v22  ;;  %v1571_v9 = vpop.f32.mrf.mxu1  ;;  %v12731_v22 = vpack.c.bf16 %v10412_v42, %v10411_v41  ;;  %v10353_v41 = vld [vmem:[%s11838_s16 + $0xab] sm:$0xff]  ;;  %v10354_v42 = vld [vmem:[%s11838_s16 + $0xb3] sm:$0xff] }
 0x29b   : > { %v1614_v35 = vadd.f32 %v1571_v9, %v12413_v15  ;;  %v12755_v7 = vpack.c.bf16 %v10354_v42, %v10353_v41 }
 0x29c   : > { %v2082_v0 = vadd.f32 %v2038_v21, %v1848_v49  ;;  %v2274_v60 = vpop.f32.mrf.mxu0 }
 0x29e   : > { %v12721_v8 = vadd.f32 %v2272_v57, %v2082_v0 }
 0x2a1   : > { %v1806_v3 = vpop.f32.mrf.mxu2  ;;  %v2040_v50 = vpop.f32.mrf.mxu3 }
 0x2a2   : > { %v1849_v24 = vadd.f32 %v1806_v3, %v1614_v35  ;;  %v1574_v52 = vpop.f32.mrf.mxu1  ;;  %v10473_v3 = vld [vmem:[%s11838_s16 + $0xd9] sm:$0xff] }
 0x2a3   : > { %v1615_v15 = vadd.f32 %v1574_v52, %v12421_v62 }
 0x2a4   : > { %v2083_v57 = vadd.f32 %v2040_v50, %v1849_v24  ;;  %v2277_v20 = vpop.f32.mrf.mxu0  ;;  %v10474_v50 = vld [vmem:[%s11838_s16 + $0xe1] sm:$0xff] }
 0x2a5   : > { %10330 = vmatmul.msk.bf16.gmra.mxu1 %vm397_vm0, %v12684_v61 }
 0x2a6   : > { %v12738_v21 = vadd.f32 %v2274_v60, %v2083_v57  ;;  %10390 = vmatmul.msk.bf16.gmra.mxu2 %vm397_vm0, %v12729_v6  ;;  %10450 = vmatmul.msk.bf16.gmra.mxu3 %vm397_vm0, %v12731_v22 }
 0x2a7   : > { %10510 = vmatmul.msk.bf16.gmra.mxu0 %vm397_vm0, %v12734_v31 }
 0x2a9   : > { %v1809_v62 = vpop.f32.mrf.mxu2  ;;  %v2043_v49 = vpop.f32.mrf.mxu3 }
 0x2aa   : > { %v1850_v9 = vadd.f32 %v1809_v62, %v1615_v15  ;;  %v1576_v35 = vpop.f32.mrf.mxu1  ;;  %v12757_v15 = vpack.c.bf16 %v10414_v29, %v10413_v17  ;;  %v12760_v62 = vpack.c.bf16 %v10474_v50, %v10473_v3  ;;  %v11688_v29 = vld [vmem:[%s15762_s1 + $0xd0] sm:$0xff]  ;;  %v10355_v50 = vld [vmem:[%s11838_s16 + $0xc3] sm:$0xff] }
 0x2ab   : > { %v1616_v0 = vadd.f32 %v1576_v35, %v12428_v2  ;;  %3285 = vmatpush.bf16.msra.mxu1 %v11688_v29  ;;  %v11695_v29 = vld [vmem:[%s15762_s1 + $0x108] sm:$0xff] }
 0x2ac   : > { %v2084_v25 = vadd.f32 %v2043_v49, %v1850_v9  ;;  %v2279_v60 = vpop.f32.mrf.mxu0  ;;  %3987 = vmatpush.bf16.msra.mxu0 %v11695_v29 }
 0x2ae   : > { %v12747_v4 = vadd.f32 %v2277_v20, %v2084_v25 }
 0x2b0   : > { %15881 = vst [vmem:[#allocation17_spill] sm:$0xff] %v12747_v4 }
 0x2b1   : > { %v1811_v24 = vpop.f32.mrf.mxu2  ;;  %v2045_v52 = vpop.f32.mrf.mxu3 }
 0x2b2   : > { %v1851_v57 = vadd.f32 %v1811_v24, %v1616_v0  ;;  %v1579_v18 = vpop.f32.mrf.mxu1  ;;  %v10356_v24 = vld [vmem:[%s11838_s16 + $0xcb] sm:$0xff] }
 0x2b3   : > { %v1617_v2 = vadd.f32 %v1579_v18, %v12445_v1  ;;  %v11690_v18 = vld [vmem:[%s15762_s1 + $0xe0] sm:$0xff]  ;;  %v11692_v1 = vld [vmem:[%s15762_s1 + $0xf0] sm:$0xff] }
 0x2b4   : > { %v2085_v20 = vadd.f32 %v2045_v52, %v1851_v57  ;;  %v2282_v49 = vpop.f32.mrf.mxu0  ;;  %3519 = vmatpush.bf16.msra.mxu2 %v11690_v18  ;;  %3754 = vmatpush.bf16.msra.mxu3 %v11692_v1  ;;  %v10415_v52 = vld [vmem:[%s11838_s16 + $0xc5] sm:$0xff]  ;;  %v10416_v57 = vld [vmem:[%s11838_s16 + $0xcd] sm:$0xff]  ;;  %v10476_v18 = vld [vmem:[%s11838_s16 + $0xf9] sm:$0xff] }
 0x2b5   : > { %10331 = vmatmul.msk.bf16.gmra.mxu1 %vm397_vm0, %v12708_v44 }
 0x2b6   : > { %v12764_v9 = vadd.f32 %v2279_v60, %v2085_v20  ;;  %10391 = vmatmul.msk.bf16.gmra.mxu2 %vm397_vm0, %v12755_v7  ;;  %10451 = vmatmul.msk.bf16.gmra.mxu3 %vm397_vm0, %v12757_v15  ;;  %v10475_v20 = vld [vmem:[%s11838_s16 + $0xf1] sm:$0xff] }
 0x2b7   : > { %10511 = vmatmul.msk.bf16.gmra.mxu0 %vm397_vm0, %v12760_v62 }
 0x2b8   : > { %15882 = vst [vmem:[#allocation18_spill] sm:$0xff] %v12764_v9 }
 0x2b9   : > { %v1814_v35 = vpop.f32.mrf.mxu2  ;;  %v2048_v0 = vpop.f32.mrf.mxu3 }
 0x2ba   : > { %v1852_v25 = vadd.f32 %v1814_v35, %v1617_v2  ;;  %v1581_v60 = vpop.f32.mrf.mxu1 }
 0x2bb   : > { %v1618_v41 = vadd.f32 %v1581_v60, %v12455_v27  ;;  %v12790_v27 = vpack.c.bf16 %v10356_v24, %v10355_v50  ;;  %v12795_v60 = vpack.c.bf16 %v10476_v18, %v10475_v20  ;;  %v10357_v18 = vld [vmem:[%s11838_s16 + $0xdb] sm:$0xff] }
 0x2bc   : > { %v2086_v42 = vadd.f32 %v2048_v0, %v1852_v25  ;;  %v2284_v17 = vpop.f32.mrf.mxu0  ;;  %v12792_v0 = vpack.c.bf16 %v10416_v57, %v10415_v52 }
 0x2be   : > { %v12782_v3 = vadd.f32 %v2282_v49, %v2086_v42  ;;  %15884 = vst [vmem:[#allocation20_spill] sm:$0xff] %v12792_v0 }
 0x2c0   : > { %15883 = vst [vmem:[#allocation19_spill] sm:$0xff] %v12782_v3 }
 0x2c1   : > { %v1816_v1 = vpop.f32.mrf.mxu2  ;;  %v2050_v2 = vpop.f32.mrf.mxu3 }
 0x2c2   : > { %v1853_v35 = vadd.f32 %v1816_v1, %v1618_v41  ;;  %v1584_v14 = vpop.f32.mrf.mxu1  ;;  %v10358_v1 = vld [vmem:[%s11838_s16 + $0xe3] sm:$0xff] }
 0x2c3   : > { %v1619_v25 = vadd.f32 %v1584_v14, %v12463_v51  ;;  %v12819_v4 = vpack.c.bf16 %v10358_v1, %v10357_v18  ;;  %v10360_v18 = vld [vmem:[%s11838_s16 + $0xfb] sm:$0xff] }
 0x2c4   : > { %v2087_v49 = vadd.f32 %v2050_v2, %v1853_v35  ;;  %v2287_v42 = vpop.f32.mrf.mxu0  ;;  %v10417_v2 = vld [vmem:[%s11838_s16 + $0xdd] sm:$0xff]  ;;  %v10418_v35 = vld [vmem:[%s11838_s16 + $0xe5] sm:$0xff]  ;;  %v10419_v1 = vld [vmem:[%s11838_s16 + $0xf5] sm:$0xff] }
 0x2c5   : > { %10332 = vmatmul.msk.bf16.gmra.mxu1 %vm397_vm0, %v12734_v31 }
 0x2c6   : > { %v12802_v41 = vadd.f32 %v2284_v17, %v2087_v49  ;;  %10392 = vmatmul.msk.bf16.gmra.mxu2 %vm397_vm0, %v12790_v27  ;;  %10452 = vmatmul.msk.bf16.gmra.mxu3 %vm397_vm0, %v12792_v0  ;;  %v10477_v49 = vld [vmem:[%s11838_s16 + $0x109] sm:$0xff] }
 0x2c7   : > { %10512 = vmatmul.msk.bf16.gmra.mxu0 %vm397_vm0, %v12795_v60 }
 0x2c8   : > { %15885 = vst [vmem:[#allocation21_spill] sm:$0xff] %v12802_v41  ;;  %v10478_v41 = vld [vmem:[%s11838_s16 + $0x111] sm:$0xff] }
 0x2c9   : > { %v1819_v51 = vpop.f32.mrf.mxu2  ;;  %v2053_v14 = vpop.f32.mrf.mxu3 }
 0x2ca   : > { %v1854_v50 = vadd.f32 %v1819_v51, %v1619_v25  ;;  %v1586_v24 = vpop.f32.mrf.mxu1  ;;  %v12821_v25 = vpack.c.bf16 %v10418_v35, %v10417_v2  ;;  %v12824_v51 = vpack.c.bf16 %v10478_v41, %v10477_v49  ;;  %v10420_v2 = vld [vmem:[%s11838_s16 + $0xfd] sm:$0xff]  ;;  %v10480_v49 = vld [vmem:[%s11838_s16 + $0x129] sm:$0xff] }
 0x2cb   : > { %v1620_v17 = vadd.f32 %v1586_v24, %v12471_v56  ;;  %v10479_v35 = vld [vmem:[%s11838_s16 + $0x121] sm:$0xff] }
 0x2cc   : > { %v2088_v52 = vadd.f32 %v2053_v14, %v1854_v50  ;;  %v2289_v57 = vpop.f32.mrf.mxu0  ;;  %15887 = vst [vmem:[#allocation23_spill] sm:$0xff] %v12821_v25 }
 0x2ce   : > { %v12811_v20 = vadd.f32 %v2287_v42, %v2088_v52 }
 0x2d0   : > { %15886 = vst [vmem:[#allocation22_spill] sm:$0xff] %v12811_v20 }
 0x2d1   : > { %v1821_v3 = vpop.f32.mrf.mxu2  ;;  %v2055_v9 = vpop.f32.mrf.mxu3 }
 0x2d2   : > { %v1855_v0 = vadd.f32 %v1821_v3, %v1620_v17  ;;  %v2447_v29 = vpop.f32.mrf.mxu1 }
 0x2d3   : > { %v2527_v56 = vadd.f32 %v2447_v29, %v12479_v46 }
 0x2d4   : > { %v2089_v42 = vadd.f32 %v2055_v9, %v1855_v0  ;;  %v3149_v14 = vpop.f32.mrf.mxu0 }
 0x2d5   : > { %10333 = vmatmul.msk.bf16.gmra.mxu1 %vm397_vm0, %v12760_v62 }
 0x2d6   : > { %v12828_v50 = vadd.f32 %v2289_v57, %v2089_v42  ;;  %10393 = vmatmul.msk.bf16.gmra.mxu2 %vm397_vm0, %v12819_v4  ;;  %10453 = vmatmul.msk.bf16.gmra.mxu3 %vm397_vm0, %v12821_v25  ;;  %v10359_v57 = vld [vmem:[%s11838_s16 + $0xf3] sm:$0xff] }
 0x2d7   : > { %10513 = vmatmul.msk.bf16.gmra.mxu0 %vm397_vm0, %v12824_v51  ;;  %v12845_v25 = vpack.c.bf16 %v10360_v18, %v10359_v57  ;;  %v10361_v18 = vld [vmem:[%s11838_s16 + $0x10b] sm:$0xff] }
 0x2d8   : > { %15888 = vst [vmem:[#allocation24_spill] sm:$0xff] %v12828_v50 }
 0x2d9   : > { %v2681_v46 = vpop.f32.mrf.mxu2  ;;  %v2915_v9 = vpop.f32.mrf.mxu3 }
 0x2da   : > { %v2761_v3 = vadd.f32 %v2681_v46, %v2527_v56  ;;  %v2449_v0 = vpop.f32.mrf.mxu1  ;;  %v12847_v56 = vpack.c.bf16 %v10420_v2, %v10419_v1  ;;  %v12850_v46 = vpack.c.bf16 %v10480_v49, %v10479_v35  ;;  %v10362_v1 = vld [vmem:[%s11838_s16 + $0x113] sm:$0xff] }
 0x2db   : > { %v2528_v41 = vadd.f32 %v2449_v0, %v12486_v45  ;;  %v10421_v2 = vld [vmem:[%s11838_s16 + $0x10d] sm:$0xff]  ;;  %v10422_v35 = vld [vmem:[%s11838_s16 + $0x115] sm:$0xff] }
 0x2dc   : > { %v2995_v24 = vadd.f32 %v2915_v9, %v2761_v3  ;;  %v3151_v17 = vpop.f32.mrf.mxu0  ;;  %15890 = vst [vmem:[#allocation26_spill] sm:$0xff] %v12847_v56  ;;  %v10481_v49 = vld [vmem:[%s11838_s16 + $0x139] sm:$0xff] }
 0x2de   : > { %v12837_v52 = vadd.f32 %v3149_v14, %v2995_v24 }
 0x2e0   : > { %15889 = vst [vmem:[#allocation25_spill] sm:$0xff] %v12837_v52 }
 0x2e1   : > { %v2683_v29 = vpop.f32.mrf.mxu2  ;;  %v2917_v42 = vpop.f32.mrf.mxu3 }
 0x2e2   : > { %v2762_v50 = vadd.f32 %v2683_v29, %v2528_v41  ;;  %v2452_v20 = vpop.f32.mrf.mxu1  ;;  %v10482_v29 = vld [vmem:[%s11838_s16 + $0x141] sm:$0xff] }
 0x2e3   : > { %v2529_v45 = vadd.f32 %v2452_v20, %v12494_v28 }
 0x2e4   : > { %v2996_v14 = vadd.f32 %v2917_v42, %v2762_v50  ;;  %v3154_v9 = vpop.f32.mrf.mxu0 }
 0x2e5   : > { %10334 = vmatmul.msk.bf16.gmra.mxu1 %vm397_vm0, %v12795_v60 }
 0x2e6   : > { %v12854_v3 = vadd.f32 %v3151_v17, %v2996_v14  ;;  %10394 = vmatmul.msk.bf16.gmra.mxu2 %vm397_vm0, %v12845_v25  ;;  %10454 = vmatmul.msk.bf16.gmra.mxu3 %vm397_vm0, %v12847_v56  ;;  %v12871_v56 = vpack.c.bf16 %v10362_v1, %v10361_v18  ;;  %v10363_v1 = vld [vmem:[%s11838_s16 + $0x123] sm:$0xff] }
 0x2e7   : > { %10514 = vmatmul.msk.bf16.gmra.mxu0 %vm397_vm0, %v12850_v46 }
 0x2e8   : > { %15891 = vst [vmem:[#allocation28_spill] sm:$0xff] %v12854_v3 }
 0x2e9   : > { %v2686_v28 = vpop.f32.mrf.mxu2  ;;  %v2920_v20 = vpop.f32.mrf.mxu3 }
 0x2ea   : > { %v2763_v50 = vadd.f32 %v2686_v28, %v2529_v45  ;;  %v2454_v0 = vpop.f32.mrf.mxu1  ;;  %v12873_v45 = vpack.c.bf16 %v10422_v35, %v10421_v2  ;;  %v12876_v28 = vpack.c.bf16 %v10482_v29, %v10481_v49  ;;  %v10364_v2 = vld [vmem:[%s11838_s16 + $0x12b] sm:$0xff] }
 0x2eb   : > { %v2530_v41 = vadd.f32 %v2454_v0, %v12503_v55  ;;  %v10423_v35 = vld [vmem:[%s11838_s16 + $0x125] sm:$0xff]  ;;  %v10424_v49 = vld [vmem:[%s11838_s16 + $0x12d] sm:$0xff] }
 0x2ec   : > { %v2997_v24 = vadd.f32 %v2920_v20, %v2763_v50  ;;  %v3156_v17 = vpop.f32.mrf.mxu0  ;;  %15893 = vst [vmem:[#allocation31_spill] sm:$0xff] %v12873_v45  ;;  %v10483_v29 = vld [vmem:[%s11838_s16 + $0x151] sm:$0xff] }
 0x2ee   : > { %v12863_v57 = vadd.f32 %v3154_v9, %v2997_v24 }
 0x2f0   : > { %15892 = vst [vmem:[#allocation29_spill] sm:$0xff] %v12863_v57 }
 0x2f1   : > { %v2688_v42 = vpop.f32.mrf.mxu2  ;;  %v2922_v14 = vpop.f32.mrf.mxu3 }
 0x2f2   : > { %v2764_v3 = vadd.f32 %v2688_v42, %v2530_v41  ;;  %v2457_v52 = vpop.f32.mrf.mxu1  ;;  %v10484_v42 = vld [vmem:[%s11838_s16 + $0x159] sm:$0xff] }
 0x2f3   : > { %v2531_v55 = vadd.f32 %v2457_v52, %v12512_v23 }
 0x2f4   : > { %v2998_v9 = vadd.f32 %v2922_v14, %v2764_v3  ;;  %v3159_v20 = vpop.f32.mrf.mxu0 }
 0x2f5   : > { %10335 = vmatmul.msk.bf16.gmra.mxu1 %vm397_vm0, %v12824_v51 }
 0x2f6   : > { %v12880_v50 = vadd.f32 %v3156_v17, %v2998_v9  ;;  %10395 = vmatmul.msk.bf16.gmra.mxu2 %vm397_vm0, %v12871_v56  ;;  %10455 = vmatmul.msk.bf16.gmra.mxu3 %vm397_vm0, %v12873_v45  ;;  %v12897_v45 = vpack.c.bf16 %v10364_v2, %v10363_v1  ;;  %v10365_v2 = vld [vmem:[%s11838_s16 + $0x13b] sm:$0xff] }
 0x2f7   : > { %10515 = vmatmul.msk.bf16.gmra.mxu0 %vm397_vm0, %v12876_v28 }
 0x2f8   : > { %15894 = vst [vmem:[#allocation33_spill] sm:$0xff] %v12880_v50 }
 0x2f9   : > { %v2691_v23 = vpop.f32.mrf.mxu2  ;;  %v2925_v52 = vpop.f32.mrf.mxu3 }
 0x2fa   : > { %v2765_v3 = vadd.f32 %v2691_v23, %v2531_v55  ;;  %v2459_v0 = vpop.f32.mrf.mxu1  ;;  %v12899_v55 = vpack.c.bf16 %v10424_v49, %v10423_v35  ;;  %v12902_v23 = vpack.c.bf16 %v10484_v42, %v10483_v29  ;;  %v10366_v35 = vld [vmem:[%s11838_s16 + $0x143] sm:$0xff] }
 0x2fb   : > { %v2532_v41 = vadd.f32 %v2459_v0, %v12521_v32  ;;  %v10425_v49 = vld [vmem:[%s11838_s16 + $0x13d] sm:$0xff]  ;;  %v10426_v29 = vld [vmem:[%s11838_s16 + $0x145] sm:$0xff] }
 0x2fc   : > { %v2999_v24 = vadd.f32 %v2925_v52, %v2765_v3  ;;  %v3161_v17 = vpop.f32.mrf.mxu0  ;;  %15896 = vst [vmem:[#allocation35_spill] sm:$0xff] %v12899_v55  ;;  %v10485_v42 = vld [vmem:[%s11838_s16 + $0x169] sm:$0xff] }
 0x2fe   : > { %v12889_v18 = vadd.f32 %v3159_v20, %v2999_v24 }
 0x300   : > { %15895 = vst [vmem:[#allocation34_spill] sm:$0xff] %v12889_v18 }
 0x301   : > { %v2693_v14 = vpop.f32.mrf.mxu2  ;;  %v2927_v9 = vpop.f32.mrf.mxu3 }
 0x302   : > { %v2766_v50 = vadd.f32 %v2693_v14, %v2532_v41  ;;  %v2462_v57 = vpop.f32.mrf.mxu1  ;;  %v10486_v14 = vld [vmem:[%s11838_s16 + $0x171] sm:$0xff] }
 0x303   : > { %v2533_v32 = vadd.f32 %v2462_v57, %v12530_v43 }
 0x304   : > { %v3000_v20 = vadd.f32 %v2927_v9, %v2766_v50  ;;  %v3164_v52 = vpop.f32.mrf.mxu0 }
 0x305   : > { %10336 = vmatmul.msk.bf16.gmra.mxu1 %vm397_vm0, %v12850_v46 }
 0x306   : > { %v12906_v3 = vadd.f32 %v3161_v17, %v3000_v20  ;;  %10396 = vmatmul.msk.bf16.gmra.mxu2 %vm397_vm0, %v12897_v45  ;;  %10456 = vmatmul.msk.bf16.gmra.mxu3 %vm397_vm0, %v12899_v55  ;;  %v12923_v55 = vpack.c.bf16 %v10366_v35, %v10365_v2  ;;  %v10367_v35 = vld [vmem:[%s11838_s16 + $0x153] sm:$0xff] }
 0x307   : > { %10516 = vmatmul.msk.bf16.gmra.mxu0 %vm397_vm0, %v12902_v23 }
 0x308   : > { %15897 = vst [vmem:[#allocation36_spill] sm:$0xff] %v12906_v3 }
 0x309   : > { %v2696_v43 = vpop.f32.mrf.mxu2  ;;  %v2930_v57 = vpop.f32.mrf.mxu3 }
 0x30a   : > { %v2767_v50 = vadd.f32 %v2696_v43, %v2533_v32  ;;  %v2464_v0 = vpop.f32.mrf.mxu1  ;;  %v12925_v32 = vpack.c.bf16 %v10426_v29, %v10425_v49  ;;  %v12928_v43 = vpack.c.bf16 %v10486_v14, %v10485_v42  ;;  %v10368_v49 = vld [vmem:[%s11838_s16 + $0x15b] sm:$0xff] }
 0x30b   : > { %v2534_v41 = vadd.f32 %v2464_v0, %v12539_v30  ;;  %v10427_v29 = vld [vmem:[%s11838_s16 + $0x155] sm:$0xff]  ;;  %v10428_v42 = vld [vmem:[%s11838_s16 + $0x15d] sm:$0xff] }
 0x30c   : > { %v3001_v24 = vadd.f32 %v2930_v57, %v2767_v50  ;;  %v3166_v17 = vpop.f32.mrf.mxu0  ;;  %15899 = vst [vmem:[#allocation38_spill] sm:$0xff] %v12925_v32  ;;  %v10487_v14 = vld [vmem:[%s11838_s16 + $0x181] sm:$0xff] }
 0x30e   : > { %v12915_v1 = vadd.f32 %v3164_v52, %v3001_v24 }
 0x310   : > { %15898 = vst [vmem:[#allocation37_spill] sm:$0xff] %v12915_v1 }
 0x311   : > { %v2698_v9 = vpop.f32.mrf.mxu2  ;;  %v2932_v20 = vpop.f32.mrf.mxu3 }
 0x312   : > { %v2768_v3 = vadd.f32 %v2698_v9, %v2534_v41  ;;  %v2467_v18 = vpop.f32.mrf.mxu1  ;;  %v10488_v9 = vld [vmem:[%s11838_s16 + $0x189] sm:$0xff] }
 0x313   : > { %v2535_v30 = vadd.f32 %v2467_v18, %v12548_v37 }
 0x314   : > { %v3002_v52 = vadd.f32 %v2932_v20, %v2768_v3  ;;  %v3169_v57 = vpop.f32.mrf.mxu0 }
 0x315   : > { %10337 = vmatmul.msk.bf16.gmra.mxu1 %vm397_vm0, %v12876_v28 }
 0x316   : > { %v12932_v50 = vadd.f32 %v3166_v17, %v3002_v52  ;;  %10397 = vmatmul.msk.bf16.gmra.mxu2 %vm397_vm0, %v12923_v55  ;;  %10457 = vmatmul.msk.bf16.gmra.mxu3 %vm397_vm0, %v12925_v32  ;;  %v12949_v32 = vpack.c.bf16 %v10368_v49, %v10367_v35  ;;  %v10369_v49 = vld [vmem:[%s11838_s16 + $0x16b] sm:$0xff] }
 0x317   : > { %10517 = vmatmul.msk.bf16.gmra.mxu0 %vm397_vm0, %v12928_v43 }
 0x318   : > { %15900 = vst [vmem:[#allocation39_spill] sm:$0xff] %v12932_v50 }
 0x319   : > { %v2701_v37 = vpop.f32.mrf.mxu2  ;;  %v2935_v18 = vpop.f32.mrf.mxu3 }
 0x31a   : > { %v2769_v3 = vadd.f32 %v2701_v37, %v2535_v30  ;;  %v2469_v0 = vpop.f32.mrf.mxu1  ;;  %v12951_v30 = vpack.c.bf16 %v10428_v42, %v10427_v29  ;;  %v12954_v37 = vpack.c.bf16 %v10488_v9, %v10487_v14  ;;  %v10370_v29 = vld [vmem:[%s11838_s16 + $0x173] sm:$0xff] }
 0x31b   : > { %v2536_v41 = vadd.f32 %v2469_v0, %v12559_v26  ;;  %v10429_v42 = vld [vmem:[%s11838_s16 + $0x16d] sm:$0xff]  ;;  %v10430_v14 = vld [vmem:[%s11838_s16 + $0x175] sm:$0xff] }
 0x31c   : > { %v3003_v24 = vadd.f32 %v2935_v18, %v2769_v3  ;;  %v3171_v17 = vpop.f32.mrf.mxu0  ;;  %15902 = vst [vmem:[#allocation41_spill] sm:$0xff] %v12951_v30  ;;  %v10489_v9 = vld [vmem:[%s11838_s16 + $0x199] sm:$0xff] }
 0x31e   : > { %v12941_v2 = vadd.f32 %v3169_v57, %v3003_v24 }
 0x320   : > { %15901 = vst [vmem:[#allocation40_spill] sm:$0xff] %v12941_v2 }
 0x321   : > { %v2703_v20 = vpop.f32.mrf.mxu2  ;;  %v2937_v52 = vpop.f32.mrf.mxu3 }
 0x322   : > { %v2770_v50 = vadd.f32 %v2703_v20, %v2536_v41  ;;  %v2472_v1 = vpop.f32.mrf.mxu1  ;;  %v10490_v20 = vld [vmem:[%s11838_s16 + $0x1a1] sm:$0xff] }
 0x323   : > { %v2537_v26 = vadd.f32 %v2472_v1, %v12565_v47 }
 0x324   : > { %v3004_v57 = vadd.f32 %v2937_v52, %v2770_v50  ;;  %v3174_v18 = vpop.f32.mrf.mxu0 }
 0x325   : > { %10338 = vmatmul.msk.bf16.gmra.mxu1 %vm397_vm0, %v12902_v23 }
 0x326   : > { %v12958_v3 = vadd.f32 %v3171_v17, %v3004_v57  ;;  %10398 = vmatmul.msk.bf16.gmra.mxu2 %vm397_vm0, %v12949_v32  ;;  %10458 = vmatmul.msk.bf16.gmra.mxu3 %vm397_vm0, %v12951_v30  ;;  %v12975_v30 = vpack.c.bf16 %v10370_v29, %v10369_v49  ;;  %v11694_v49 = vld [vmem:[%s15762_s1 + $0x100] sm:$0xff] }
 0x327   : > { %10518 = vmatmul.msk.bf16.gmra.mxu0 %vm397_vm0, %v12954_v37 }
 0x328   : > { %15903 = vst [vmem:[#allocation42_spill] sm:$0xff] %v12958_v3  ;;  %3988 = vmatpush.bf16.msra.mxu0 %v11694_v49 }
 0x329   : > { %v2706_v47 = vpop.f32.mrf.mxu2  ;;  %v2940_v1 = vpop.f32.mrf.mxu3 }
 0x32a   : > { %v2771_v50 = vadd.f32 %v2706_v47, %v2537_v26  ;;  %v2474_v0 = vpop.f32.mrf.mxu1  ;;  %v12977_v26 = vpack.c.bf16 %v10430_v14, %v10429_v42  ;;  %v12980_v47 = vpack.c.bf16 %v10490_v20, %v10489_v9  ;;  %v11697_v14 = vld [vmem:[%s15762_s1 + $0x118] sm:$0xff]  ;;  %v10371_v20 = vld [vmem:[%s11838_s16 + $0x183] sm:$0xff] }
 0x32b   : > { %v2538_v41 = vadd.f32 %v2474_v0, %v12576_v16  ;;  %v11699_v0 = vld [vmem:[%s15762_s1 + $0x128] sm:$0xff]  ;;  %4221 = vmatpush.bf16.msrb.mxu1 %v11697_v14 }
 0x32c   : > { %v3005_v24 = vadd.f32 %v2940_v1, %v2771_v50  ;;  %v3176_v17 = vpop.f32.mrf.mxu0  ;;  %4456 = vmatpush.bf16.msrb.mxu2 %v11699_v0 }
 0x32e   : > { %v12967_v35 = vadd.f32 %v3174_v18, %v3005_v24 }
 0x331   : > { %v2708_v52 = vpop.f32.mrf.mxu2  ;;  %v2942_v57 = vpop.f32.mrf.mxu3 }
 0x332   : > { %v2772_v3 = vadd.f32 %v2708_v52, %v2538_v41  ;;  %v2477_v2 = vpop.f32.mrf.mxu1  ;;  %v10372_v52 = vld [vmem:[%s11838_s16 + $0x18b] sm:$0xff] }
 0x333   : > { %v2539_v16 = vadd.f32 %v2477_v2, %v12594_v5  ;;  %v11701_v5 = vld [vmem:[%s15762_s1 + $0x138] sm:$0xff] }
 0x334   : > { %v3006_v18 = vadd.f32 %v2942_v57, %v2772_v3  ;;  %v3179_v1 = vpop.f32.mrf.mxu0  ;;  %4690 = vmatpush.bf16.msrb.mxu3 %v11701_v5  ;;  %v10431_v57 = vld [vmem:[%s11838_s16 + $0x185] sm:$0xff] }
 0x335   : > { %10339 = vmatmul.msk.bf16.gmra.mxu1 %vm397_vm0, %v12928_v43 }
 0x336   : > { %v12984_v50 = vadd.f32 %v3176_v17, %v3006_v18  ;;  %10399 = vmatmul.msk.bf16.gmra.mxu2 %vm397_vm0, %v12975_v30  ;;  %10459 = vmatmul.msk.bf16.gmra.mxu3 %vm397_vm0, %v12977_v26  ;;  %v10491_v18 = vld [vmem:[%s11838_s16 + $0x1b1] sm:$0xff] }
 0x337   : > { %10519 = vmatmul.msk.bf16.gmra.mxu0 %vm397_vm0, %v12980_v47 }
 0x338   : > { %15904 = vst [vmem:[#allocation43_spill] sm:$0xff] %v12984_v50 }
 0x339   : > { %v2711_v2 = vpop.f32.mrf.mxu2  ;;  %v2945_v3 = vpop.f32.mrf.mxu3 }
 0x33a   : > { %v2773_v41 = vadd.f32 %v2711_v2, %v2539_v16  ;;  %v2479_v24 = vpop.f32.mrf.mxu1  ;;  %v10432_v16 = vld [vmem:[%s11838_s16 + $0x18d] sm:$0xff] }
 0x33b   : > { %v2540_v17 = vadd.f32 %v2479_v24, %v12605_v59  ;;  %v10492_v59 = vld [vmem:[%s11838_s16 + $0x1b9] sm:$0xff] }
 0x33c   : > { %v3007_v29 = vadd.f32 %v2945_v3, %v2773_v41  ;;  %v3181_v42 = vpop.f32.mrf.mxu0  ;;  %v13013_v3 = vpack.c.bf16 %v10372_v52, %v10371_v20  ;;  %v13015_v41 = vpack.c.bf16 %v10432_v16, %v10431_v57  ;;  %v13018_v49 = vpack.c.bf16 %v10492_v59, %v10491_v18 }
 0x33e   : > { %v13005_v9 = vadd.f32 %v3179_v1, %v3007_v29  ;;  %15906 = vst [vmem:[#allocation45_spill] sm:$0xff] %v13018_v49 }
 0x340   : > { %15905 = vst [vmem:[#allocation44_spill] sm:$0xff] %v13005_v9  ;;  %v15908_v9 = vld [vmem:[#allocation16_spill] sm:$0xff] }
 0x341   : > { %v2713_v0 = vpop.f32.mrf.mxu2  ;;  %v2947_v5 = vpop.f32.mrf.mxu3 }
 0x342   : > { %v2774_v2 = vadd.f32 %v2713_v0, %v2540_v17  ;;  %v2482_v24 = vpop.f32.mrf.mxu1 }
 0x343   : > { %v2541_v50 = vadd.f32 %v2482_v24, %v12611_v19 }
 0x344   : > { %v3008_v1 = vadd.f32 %v2947_v5, %v2774_v2  ;;  %v3184_v29 = vpop.f32.mrf.mxu0 }
 0x345   : > { %10340 = vmatmul.msk.bf16.gmra.mxu1 %vm397_vm0, %v12954_v37 }
 0x346   : > { %v13022_v14 = vadd.f32 %v3181_v42, %v3008_v1  ;;  %10400 = vmatmul.msk.bf16.gmra.mxu2 %vm397_vm0, %v13013_v3  ;;  %10460 = vmatmul.msk.bf16.gmra.mxu3 %vm397_vm0, %v13015_v41 }
 0x347   : > { %10520 = vmatmul.msk.bf16.gmra.mxu0 %vm397_vm0, %v13018_v49 }
 0x348   : > { %15907 = vst [vmem:[#allocation46_spill] sm:$0xff] %v13022_v14 }
 0x349   : > { %v2716_v17 = vpop.f32.mrf.mxu2  ;;  %v2950_v19 = vpop.f32.mrf.mxu3 }
 0x34a   : > { %v2775_v20 = vadd.f32 %v2716_v17, %v2541_v50  ;;  %v2484_v52 = vpop.f32.mrf.mxu1 }
 0x34b   : > { %v2542_v57 = vadd.f32 %v2484_v52, %v12625_v48 }
 0x34c   : > { %v3009_v16 = vadd.f32 %v2950_v19, %v2775_v20  ;;  %v3186_v18 = vpop.f32.mrf.mxu0 }
 0x34e   : > { %v13031_v59 = vadd.f32 %v3184_v29, %v3009_v16 }
 0x351   : > { %v2718_v42 = vpop.f32.mrf.mxu2  ;;  %v2952_v0 = vpop.f32.mrf.mxu3 }
 0x352   : > { %v2776_v5 = vadd.f32 %v2718_v42, %v2542_v57  ;;  %v2487_v2 = vpop.f32.mrf.mxu1 }
 0x353   : > { %v2543_v24 = vadd.f32 %v2487_v2, %v12632_v54 }
 0x354   : > { %v3010_v1 = vadd.f32 %v2952_v0, %v2776_v5  ;;  %v3189_v14 = vpop.f32.mrf.mxu0  ;;  %v15909_v5 = vld [vmem:[#allocation4_spill] sm:$0xff] }
 0x355   : > { %10533 = vmatmul.msk.bf16.vlgmr.msra.gmra.mxu1 %vm397_vm0, %v15908_v9 }
 0x356   : > { %v13036_v49 = vadd.f32 %v3186_v18, %v3010_v1  ;;  %10593 = vmatmul.msk.bf16.vlgmr.msra.gmra.mxu2 %vm397_vm0, %v12658_v58  ;;  %10653 = vmatmul.msk.bf16.vlgmr.msra.gmra.mxu3 %vm397_vm0, %v12661_v12 }
 0x357   : > { %10713 = vmatmul.msk.bf16.vlgmr.msra.gmra.mxu0 %vm397_vm0, %v12703_v63 }
 0x359   : > { %v2721_v48 = vpop.f32.mrf.mxu2  ;;  %v2955_v50 = vpop.f32.mrf.mxu3 }
 0x35a   : > { %v2777_v29 = vadd.f32 %v2721_v48, %v2543_v24  ;;  %v2489_v54 = vpop.f32.mrf.mxu1 }
 0x35b   : > { %v2544_v17 = vadd.f32 %v2489_v54, %v12644_v10 }
 0x35c   : > { %v3011_v19 = vadd.f32 %v2955_v50, %v2777_v29  ;;  %v3191_v20 = vpop.f32.mrf.mxu0 }
 0x35e   : > { %v13045_v52 = vadd.f32 %v3189_v14, %v3011_v19 }
 0x361   : > { %v2723_v57 = vpop.f32.mrf.mxu2  ;;  %v2957_v16 = vpop.f32.mrf.mxu3 }
 0x362   : > { %v2778_v18 = vadd.f32 %v2723_v57, %v2544_v17  ;;  %v2492_v58 = vpop.f32.mrf.mxu1  ;;  %v15910_v57 = vld [vmem:[#allocation7_spill] sm:$0xff] }
 0x363   : > { %v2545_v42 = vadd.f32 %v2492_v58, %v12650_v53 }
 0x364   : > { %v3012_v12 = vadd.f32 %v2957_v16, %v2778_v18  ;;  %v3194_v0 = vpop.f32.mrf.mxu0 }
 0x365   : > { %10534 = vmatmul.msk.bf16.gmra.mxu1 %vm397_vm0, %v15909_v5 }
 0x366   : > { %v13050_v63 = vadd.f32 %v3191_v20, %v3012_v12  ;;  %10594 = vmatmul.msk.bf16.gmra.mxu2 %vm397_vm0, %v12681_v39  ;;  %10654 = vmatmul.msk.bf16.gmra.mxu3 %vm397_vm0, %v12684_v61 }
 0x367   : > { %10714 = vmatmul.msk.bf16.gmra.mxu0 %vm397_vm0, %v12729_v6 }
 0x369   : > { %v2726_v10 = vpop.f32.mrf.mxu2  ;;  %v2960_v14 = vpop.f32.mrf.mxu3 }
 0x36a   : > { %v2779_v2 = vadd.f32 %v2726_v10, %v2545_v42  ;;  %v2494_v53 = vpop.f32.mrf.mxu1 }
 0x36b   : > { %v2546_v24 = vadd.f32 %v2494_v53, %v12665_v38 }
 0x36c   : > { %v3013_v1 = vadd.f32 %v2960_v14, %v2779_v2  ;;  %v3196_v48 = vpop.f32.mrf.mxu0 }
 0x36e   : > { %v13059_v50 = vadd.f32 %v3194_v0, %v3013_v1 }
 0x371   : > { %v2728_v29 = vpop.f32.mrf.mxu2  ;;  %v2962_v54 = vpop.f32.mrf.mxu3 }
 0x372   : > { %v2780_v17 = vadd.f32 %v2728_v29, %v2546_v24  ;;  %v2497_v39 = vpop.f32.mrf.mxu1 }
 0x373   : > { %v2547_v19 = vadd.f32 %v2497_v39, %v12673_v34 }
 0x374   : > { %v3014_v61 = vadd.f32 %v2962_v54, %v2780_v17  ;;  %v3199_v20 = vpop.f32.mrf.mxu0 }
 0x375   : > { %10535 = vmatmul.msk.bf16.gmra.mxu1 %vm397_vm0, %v15910_v57 }
 0x376   : > { %v13064_v6 = vadd.f32 %v3196_v48, %v3014_v61  ;;  %10595 = vmatmul.msk.bf16.gmra.mxu2 %vm397_vm0, %v12705_v33  ;;  %10655 = vmatmul.msk.bf16.gmra.mxu3 %vm397_vm0, %v12708_v44 }
 0x377   : > { %10715 = vmatmul.msk.bf16.gmra.mxu0 %vm397_vm0, %v12755_v7 }
 0x379   : > { %v2731_v38 = vpop.f32.mrf.mxu2  ;;  %v2965_v16 = vpop.f32.mrf.mxu3 }
 0x37a   : > { %v2781_v18 = vadd.f32 %v2731_v38, %v2547_v19  ;;  %v2499_v34 = vpop.f32.mrf.mxu1 }
 0x37b   : > { %v2548_v58 = vadd.f32 %v2499_v34, %v12687_v13 }
 0x37c   : > { %v3015_v42 = vadd.f32 %v2965_v16, %v2781_v18  ;;  %v3201_v12 = vpop.f32.mrf.mxu0  ;;  %v15911_v18 = vld [vmem:[#allocation13_spill] sm:$0xff] }
 0x37e   : > { %v13073_v0 = vadd.f32 %v3199_v20, %v3015_v42 }
 0x381   : > { %v2733_v10 = vpop.f32.mrf.mxu2  ;;  %v2967_v14 = vpop.f32.mrf.mxu3 }
 0x382   : > { %v2782_v2 = vadd.f32 %v2733_v10, %v2548_v58  ;;  %v2502_v33 = vpop.f32.mrf.mxu1 }
 0x383   : > { %v2549_v53 = vadd.f32 %v2502_v33, %v12695_v36 }
 0x384   : > { %v3016_v44 = vadd.f32 %v2967_v14, %v2782_v2  ;;  %v3204_v24 = vpop.f32.mrf.mxu0 }
 0x385   : > { %10536 = vmatmul.msk.bf16.gmra.mxu1 %vm397_vm0, %v11899_v40 }
 0x386   : > { %v13078_v7 = vadd.f32 %v3201_v12, %v3016_v44  ;;  %10596 = vmatmul.msk.bf16.gmra.mxu2 %vm397_vm0, %v12731_v22  ;;  %10656 = vmatmul.msk.bf16.gmra.mxu3 %vm397_vm0, %v12734_v31  ;;  %v15912_v44 = vld [vmem:[#allocation17_spill] sm:$0xff] }
 0x387   : > { %10716 = vmatmul.msk.bf16.gmra.mxu0 %vm397_vm0, %v12790_v27 }
 0x389   : > { %v2736_v13 = vpop.f32.mrf.mxu2  ;;  %v2970_v1 = vpop.f32.mrf.mxu3 }
 0x38a   : > { %v2783_v48 = vadd.f32 %v2736_v13, %v2549_v53  ;;  %v2504_v36 = vpop.f32.mrf.mxu1 }
 0x38b   : > { %v2550_v29 = vadd.f32 %v2504_v36, %v12712_v11 }
 0x38c   : > { %v3017_v54 = vadd.f32 %v2970_v1, %v2783_v48  ;;  %v3206_v17 = vpop.f32.mrf.mxu0  ;;  %v15913_v1 = vld [vmem:[#allocation5_spill] sm:$0xff]  ;;  %v15914_v48 = vld [vmem:[#allocation20_spill] sm:$0xff] }
 0x38e   : > { %v13087_v39 = vadd.f32 %v3204_v24, %v3017_v54 }
 0x391   : > { %v2738_v19 = vpop.f32.mrf.mxu2  ;;  %v2972_v61 = vpop.f32.mrf.mxu3 }
 0x392   : > { %v2784_v20 = vadd.f32 %v2738_v19, %v2550_v29  ;;  %v2507_v22 = vpop.f32.mrf.mxu1 }
 0x393   : > { %v2551_v38 = vadd.f32 %v2507_v22, %v12721_v8 }
 0x394   : > { %v3018_v31 = vadd.f32 %v2972_v61, %v2784_v20  ;;  %v3209_v16 = vpop.f32.mrf.mxu0 }
 0x395   : > { %10537 = vmatmul.msk.bf16.gmra.mxu1 %vm397_vm0, %v15911_v18 }
 0x396   : > { %v13092_v27 = vadd.f32 %v3206_v17, %v3018_v31  ;;  %10597 = vmatmul.msk.bf16.gmra.mxu2 %vm397_vm0, %v12757_v15  ;;  %10657 = vmatmul.msk.bf16.gmra.mxu3 %vm397_vm0, %v12760_v62  ;;  %v15915_v17 = vld [vmem:[#allocation18_spill] sm:$0xff] }
 0x397   : > { %10717 = vmatmul.msk.bf16.gmra.mxu0 %vm397_vm0, %v12819_v4 }
 0x399   : > { %v2741_v11 = vpop.f32.mrf.mxu2  ;;  %v2975_v34 = vpop.f32.mrf.mxu3 }
 0x39a   : > { %v2785_v58 = vadd.f32 %v2741_v11, %v2551_v38  ;;  %v2509_v8 = vpop.f32.mrf.mxu1 }
 0x39b   : > { %v2552_v42 = vadd.f32 %v2509_v8, %v12738_v21 }
 0x39c   : > { %v3019_v12 = vadd.f32 %v2975_v34, %v2785_v58  ;;  %v3211_v10 = vpop.f32.mrf.mxu0  ;;  %v15916_v34 = vld [vmem:[#allocation19_spill] sm:$0xff] }
 0x39e   : > { %v13101_v14 = vadd.f32 %v3209_v16, %v3019_v12  ;;  %v15918_v12 = vld [vmem:[#allocation23_spill] sm:$0xff] }
 0x3a1   : > { %v2743_v2 = vpop.f32.mrf.mxu2  ;;  %v2977_v33 = vpop.f32.mrf.mxu3 }
 0x3a2   : > { %v2786_v53 = vadd.f32 %v2743_v2, %v2552_v42  ;;  %v2512_v15 = vpop.f32.mrf.mxu1  ;;  %v15917_v42 = vld [vmem:[#allocation8_spill] sm:$0xff]  ;;  %v11700_v2 = vld [vmem:[%s15762_s1 + $0x130] sm:$0xff] }
 0x3a3   : > { %v2553_v24 = vadd.f32 %v2512_v15, %v15912_v44  ;;  %4691 = vmatpush.bf16.msrb.mxu3 %v11700_v2 }
 0x3a4   : > { %v3020_v62 = vadd.f32 %v2977_v33, %v2786_v53  ;;  %v3214_v13 = vpop.f32.mrf.mxu0 }
 0x3a5   : > { %10538 = vmatmul.msk.bf16.gmra.mxu1 %vm397_vm0, %v15913_v1 }
 0x3a6   : > { %v13106_v4 = vadd.f32 %v3211_v10, %v3020_v62  ;;  %10598 = vmatmul.msk.bf16.gmra.mxu2 %vm397_vm0, %v15914_v48  ;;  %10658 = vmatmul.msk.bf16.gmra.mxu3 %vm397_vm0, %v12795_v60  ;;  %v11698_v10 = vld [vmem:[%s15762_s1 + $0x120] sm:$0xff]  ;;  %v11696_v48 = vld [vmem:[%s15762_s1 + $0x110] sm:$0xff] }
 0x3a7   : > { %10718 = vmatmul.msk.bf16.gmra.mxu0 %vm397_vm0, %v12845_v25  ;;  %4457 = vmatpush.bf16.msrb.mxu2 %v11698_v10 }
 0x3a8   : > { %4222 = vmatpush.bf16.msrb.mxu1 %v11696_v48 }
 0x3a9   : > { %v2746_v21 = vpop.f32.mrf.mxu2  ;;  %v2980_v36 = vpop.f32.mrf.mxu3 }
 0x3aa   : > { %v2787_v29 = vadd.f32 %v2746_v21, %v2553_v24  ;;  %v2514_v54 = vpop.f32.mrf.mxu1  ;;  %v15919_v24 = vld [vmem:[#allocation21_spill] sm:$0xff] }
 0x3ab   : > { %v2554_v19 = vadd.f32 %v2514_v54, %v15915_v17  ;;  %v15920_v17 = vld [vmem:[#allocation22_spill] sm:$0xff] }
 0x3ac   : > { %v3021_v61 = vadd.f32 %v2980_v36, %v2787_v29  ;;  %v3216_v20 = vpop.f32.mrf.mxu0 }
 0x3ae   : > { %v13115_v22 = vadd.f32 %v3214_v13, %v3021_v61 }
 0x3b1   : > { %v2748_v38 = vpop.f32.mrf.mxu2  ;;  %v2982_v31 = vpop.f32.mrf.mxu3 }
 0x3b2   : > { %v2788_v16 = vadd.f32 %v2748_v38, %v2554_v19  ;;  %v2517_v11 = vpop.f32.mrf.mxu1  ;;  %v11703_v38 = vld [vmem:[%s15762_s1 + $0x148] sm:$0xff] }
 0x3b3   : > { %v2555_v58 = vadd.f32 %v2517_v11, %v15916_v34  ;;  %v15922_v11 = vld [vmem:[#allocation26_spill] sm:$0xff]  ;;  %4924 = vmatpush.bf16.msrb.mxu0 %v11703_v38 }
 0x3b4   : > { %v3022_v60 = vadd.f32 %v2982_v31, %v2788_v16  ;;  %v3219_v8 = vpop.f32.mrf.mxu0  ;;  %v15921_v31 = vld [vmem:[#allocation11_spill] sm:$0xff] }
 0x3b5   : > { %10539 = vmatmul.msk.bf16.gmra.mxu1 %vm397_vm0, %v15917_v42 }
 0x3b6   : > { %v13120_v25 = vadd.f32 %v3216_v20, %v3022_v60  ;;  %10599 = vmatmul.msk.bf16.gmra.mxu2 %vm397_vm0, %v15918_v12  ;;  %10659 = vmatmul.msk.bf16.gmra.mxu3 %vm397_vm0, %v12824_v51  ;;  %v15923_v12 = vld [vmem:[#allocation24_spill] sm:$0xff] }
 0x3b7   : > { %10719 = vmatmul.msk.bf16.gmra.mxu0 %vm397_vm0, %v12871_v56 }
 0x3b9   : > { %v2751_v33 = vpop.f32.mrf.mxu2  ;;  %v2985_v53 = vpop.f32.mrf.mxu3 }
 0x3ba   : > { %v2789_v15 = vadd.f32 %v2751_v33, %v2555_v58  ;;  %v2519_v44 = vpop.f32.mrf.mxu1 }
 0x3bb   : > { %v2556_v62 = vadd.f32 %v2519_v44, %v15919_v24 }
 0x3bc   : > { %v3023_v51 = vadd.f32 %v2985_v53, %v2789_v15  ;;  %v3221_v13 = vpop.f32.mrf.mxu0 }
 0x3be   : > { %v13138_v21 = vadd.f32 %v3219_v8, %v3023_v51  ;;  %v15924_v51 = vld [vmem:[#allocation25_spill] sm:$0xff] }
 0x3c1   : > { %v2753_v36 = vpop.f32.mrf.mxu2  ;;  %v2987_v29 = vpop.f32.mrf.mxu3 }
 0x3c2   : > { %v2790_v56 = vadd.f32 %v2753_v36, %v2556_v62  ;;  %v2522_v54 = vpop.f32.mrf.mxu1 }
 0x3c3   : > { %v2557_v19 = vadd.f32 %v2522_v54, %v15920_v17 }
 0x3c4   : > { %v3024_v61 = vadd.f32 %v2987_v29, %v2790_v56  ;;  %v3224_v20 = vpop.f32.mrf.mxu0  ;;  %v15926_v29 = vld [vmem:[#allocation31_spill] sm:$0xff] }
 0x3c5   : > { %10540 = vmatmul.msk.bf16.gmra.mxu1 %vm397_vm0, %v15921_v31 }
 0x3c6   : > { %v13146_v16 = vadd.f32 %v3221_v13, %v3024_v61  ;;  %10600 = vmatmul.msk.bf16.gmra.mxu2 %vm397_vm0, %v15922_v11  ;;  %10660 = vmatmul.msk.bf16.gmra.mxu3 %vm397_vm0, %v12850_v46  ;;  %v15927_v61 = vld [vmem:[#allocation28_spill] sm:$0xff] }
 0x3c7   : > { %10720 = vmatmul.msk.bf16.gmra.mxu0 %vm397_vm0, %v12897_v45  ;;  %v15925_v45 = vld [vmem:[#allocation14_spill] sm:$0xff] }
 0x3c9   : > { %v2756_v34 = vpop.f32.mrf.mxu2  ;;  %v2990_v58 = vpop.f32.mrf.mxu3 }
 0x3ca   : > { %v2791_v60 = vadd.f32 %v2756_v34, %v2557_v19  ;;  %v2524_v8 = vpop.f32.mrf.mxu1 }
 0x3cb   : > { %v2558_v10 = vadd.f32 %v2524_v8, %v15923_v12 }
 0x3cc   : > { %v3025_v2 = vadd.f32 %v2990_v58, %v2791_v60  ;;  %v3226_v33 = vpop.f32.mrf.mxu0 }
 0x3ce   : > { %v13155_v53 = vadd.f32 %v3224_v20, %v3025_v2 }
 0x3d1   : > { %v2758_v15 = vpop.f32.mrf.mxu2  ;;  %v2992_v44 = vpop.f32.mrf.mxu3 }
 0x3d2   : > { %v2792_v24 = vadd.f32 %v2758_v15, %v2558_v10  ;;  %v3287_v62 = vpop.f32.mrf.mxu1  ;;  %v15928_v10 = vld [vmem:[#allocation29_spill] sm:$0xff]  ;;  %v15929_v15 = vld [vmem:[#allocation6_spill] sm:$0xff] }
 0x3d3   : > { %v3367_v46 = vadd.f32 %v3287_v62, %v15924_v51 }
 0x3d4   : > { %v3026_v13 = vadd.f32 %v2992_v44, %v2792_v24  ;;  %v3990_v48 = vpop.f32.mrf.mxu0  ;;  %v15930_v44 = vld [vmem:[#allocation35_spill] sm:$0xff] }
 0x3d5   : > { %10541 = vmatmul.msk.bf16.gmra.mxu1 %vm397_vm0, %v15925_v45 }
 0x3d6   : > { %v13160_v36 = vadd.f32 %v3226_v33, %v3026_v13  ;;  %10601 = vmatmul.msk.bf16.gmra.mxu2 %vm397_vm0, %v15926_v29  ;;  %10661 = vmatmul.msk.bf16.gmra.mxu3 %vm397_vm0, %v12876_v28  ;;  %v15931_v13 = vld [vmem:[#allocation33_spill] sm:$0xff] }
 0x3d7   : > { %10721 = vmatmul.msk.bf16.gmra.mxu0 %vm397_vm0, %v12923_v55 }
 0x3d9   : > { %v3521_v56 = vpop.f32.mrf.mxu2  ;;  %v3756_v54 = vpop.f32.mrf.mxu3 }
 0x3da   : > { %v3601_v17 = vadd.f32 %v3521_v56, %v3367_v46  ;;  %v3289_v19 = vpop.f32.mrf.mxu1 }
 0x3db   : > { %v3368_v20 = vadd.f32 %v3289_v19, %v15927_v61 }
 0x3dc   : > { %v3836_v38 = vadd.f32 %v3756_v54, %v3601_v17  ;;  %v3992_v11 = vpop.f32.mrf.mxu0 }
 0x3de   : > { %v13169_v34 = vadd.f32 %v3990_v48, %v3836_v38  ;;  %v15932_v38 = vld [vmem:[#allocation34_spill] sm:$0xff] }
 0x3e1   : > { %v3523_v58 = vpop.f32.mrf.mxu2  ;;  %v3758_v60 = vpop.f32.mrf.mxu3 }
 0x3e2   : > { %v3602_v8 = vadd.f32 %v3523_v58, %v3368_v20  ;;  %v3292_v12 = vpop.f32.mrf.mxu1 }
 0x3e3   : > { %v3369_v2 = vadd.f32 %v3292_v12, %v15928_v10 }
 0x3e4   : > { %v3837_v28 = vadd.f32 %v3758_v60, %v3602_v8  ;;  %v3995_v33 = vpop.f32.mrf.mxu0  ;;  %v15933_v60 = vld [vmem:[#allocation9_spill] sm:$0xff]  ;;  %v15934_v8 = vld [vmem:[#allocation38_spill] sm:$0xff] }
 0x3e5   : > { %10542 = vmatmul.msk.bf16.gmra.mxu1 %vm397_vm0, %v15929_v15 }
 0x3e6   : > { %v13174_v55 = vadd.f32 %v3992_v11, %v3837_v28  ;;  %10602 = vmatmul.msk.bf16.gmra.mxu2 %vm397_vm0, %v15930_v44  ;;  %10662 = vmatmul.msk.bf16.gmra.mxu3 %vm397_vm0, %v12902_v23 }
 0x3e7   : > { %10722 = vmatmul.msk.bf16.gmra.mxu0 %vm397_vm0, %v12949_v32 }
 0x3e9   : > { %v3526_v24 = vpop.f32.mrf.mxu2  ;;  %v3761_v62 = vpop.f32.mrf.mxu3 }
 0x3ea   : > { %v3603_v51 = vadd.f32 %v3526_v24, %v3369_v2  ;;  %v3294_v46 = vpop.f32.mrf.mxu1 }
 0x3eb   : > { %v3370_v48 = vadd.f32 %v3294_v46, %v15931_v13 }
 0x3ec   : > { %v3838_v29 = vadd.f32 %v3761_v62, %v3603_v51  ;;  %v3997_v56 = vpop.f32.mrf.mxu0 }
 0x3ee   : > { %v13183_v54 = vadd.f32 %v3995_v33, %v3838_v29  ;;  %v15935_v33 = vld [vmem:[#allocation36_spill] sm:$0xff] }
 0x3f1   : > { %v3528_v17 = vpop.f32.mrf.mxu2  ;;  %v3763_v19 = vpop.f32.mrf.mxu3 }
 0x3f2   : > { %v3604_v61 = vadd.f32 %v3528_v17, %v3370_v48  ;;  %v3297_v20 = vpop.f32.mrf.mxu1 }
 0x3f3   : > { %v3371_v11 = vadd.f32 %v3297_v20, %v15932_v38  ;;  %v15938_v20 = vld [vmem:[#allocation41_spill] sm:$0xff] }
 0x3f4   : > { %v3839_v23 = vadd.f32 %v3763_v19, %v3604_v61  ;;  %v4000_v58 = vpop.f32.mrf.mxu0  ;;  %v15937_v19 = vld [vmem:[#allocation12_spill] sm:$0xff] }
 0x3f5   : > { %10543 = vmatmul.msk.bf16.gmra.mxu1 %vm397_vm0, %v15933_v60 }
 0x3f6   : > { %v13188_v32 = vadd.f32 %v3997_v56, %v3839_v23  ;;  %10603 = vmatmul.msk.bf16.gmra.mxu2 %vm397_vm0, %v15934_v8  ;;  %10663 = vmatmul.msk.bf16.gmra.mxu3 %vm397_vm0, %v12928_v43  ;;  %v15936_v56 = vld [vmem:[#allocation37_spill] sm:$0xff]  ;;  %v15939_v8 = vld [vmem:[#allocation39_spill] sm:$0xff] }
 0x3f7   : > { %10723 = vmatmul.msk.bf16.gmra.mxu0 %vm397_vm0, %v12975_v30 }
 0x3f9   : > { %v3531_v12 = vpop.f32.mrf.mxu2  ;;  %v3766_v10 = vpop.f32.mrf.mxu3 }
 0x3fa   : > { %v3605_v2 = vadd.f32 %v3531_v12, %v3371_v11  ;;  %v3299_v28 = vpop.f32.mrf.mxu1 }
 0x3fb   : > { %v3372_v44 = vadd.f32 %v3299_v28, %v15935_v33  ;;  %v10693_v33 = vld [vmem:[%s11838_s16 + $0x19b] sm:$0xff] }
 0x3fc   : > { %v3840_v24 = vadd.f32 %v3766_v10, %v3605_v2  ;;  %v4002_v62 = vpop.f32.mrf.mxu0 }
 0x3fe   : > { %v13197_v51 = vadd.f32 %v4000_v58, %v3840_v24 }
 0x401   : > { %v3533_v46 = vpop.f32.mrf.mxu2  ;;  %v3768_v13 = vpop.f32.mrf.mxu3 }
 0x402   : > { %v3606_v48 = vadd.f32 %v3533_v46, %v3372_v44  ;;  %v3302_v29 = vpop.f32.mrf.mxu1  ;;  %v10694_v44 = vld [vmem:[%s11838_s16 + $0x1a3] sm:$0xff] }
 0x403   : > { %v3373_v17 = vadd.f32 %v3302_v29, %v15936_v56  ;;  %v3912_v29 = vpack.c.bf16 %v10694_v44, %v10693_v33  ;;  %v10696_v33 = vld [vmem:[%s11838_s16 + $0x1bb] sm:$0xff] }
 0x404   : > { %v3841_v43 = vadd.f32 %v3768_v13, %v3606_v48  ;;  %v4005_v30 = vpop.f32.mrf.mxu0 }
 0x405   : > { %10544 = vmatmul.msk.bf16.gmra.mxu1 %vm397_vm0, %v15937_v19 }
 0x406   : > { %v13202_v61 = vadd.f32 %v4002_v62, %v3841_v43  ;;  %10604 = vmatmul.msk.bf16.gmra.mxu2 %vm397_vm0, %v15938_v20  ;;  %10664 = vmatmul.msk.bf16.gmra.mxu3 %vm397_vm0, %v12954_v37  ;;  %v15940_v37 = vld [vmem:[#allocation40_spill] sm:$0xff] }
 0x407   : > { %10724 = vmatmul.msk.bf16.gmra.mxu0 %vm397_vm0, %v13013_v3 }
 0x409   : > { %v3536_v38 = vpop.f32.mrf.mxu2  ;;  %v3771_v11 = vpop.f32.mrf.mxu3 }
 0x40a   : > { %v3607_v23 = vadd.f32 %v3536_v38, %v3373_v17  ;;  %v3304_v58 = vpop.f32.mrf.mxu1  ;;  %v15941_v17 = vld [vmem:[#allocation15_spill] sm:$0xff] }
 0x40b   : > { %v3374_v12 = vadd.f32 %v3304_v58, %v15939_v8 }
 0x40c   : > { %v3842_v10 = vadd.f32 %v3771_v11, %v3607_v23  ;;  %v4007_v2 = vpop.f32.mrf.mxu0  ;;  %v15942_v23 = vld [vmem:[#allocation42_spill] sm:$0xff] }
 0x40e   : > { %v13211_v28 = vadd.f32 %v4005_v30, %v3842_v10 }
 0x411   : > { %v3538_v24 = vpop.f32.mrf.mxu2  ;;  %v3773_v62 = vpop.f32.mrf.mxu3 }
 0x412   : > { %v3608_v46 = vadd.f32 %v3538_v24, %v3374_v12  ;;  %v3307_v13 = vpop.f32.mrf.mxu1 }
 0x413   : > { %v3375_v48 = vadd.f32 %v3307_v13, %v15940_v37 }
 0x414   : > { %v3843_v3 = vadd.f32 %v3773_v62, %v3608_v46  ;;  %v4010_v56 = vpop.f32.mrf.mxu0 }
 0x415   : > { %10545 = vmatmul.msk.bf16.gmra.mxu1 %vm397_vm0, %v15941_v17 }
 0x416   : > { %v13218_v43 = vadd.f32 %v4007_v2, %v3843_v3  ;;  %10605 = vmatmul.msk.bf16.gmra.mxu2 %vm397_vm0, %v12977_v26  ;;  %10665 = vmatmul.msk.bf16.gmra.mxu3 %vm397_vm0, %v12980_v47  ;;  %v10695_v2 = vld [vmem:[%s11838_s16 + $0x1b3] sm:$0xff] }
 0x417   : > { %10725 = vmatmul.msk.bf16.gmra.mxu0 %vm397_vm0, %v3912_v29  ;;  %v3913_v46 = vpack.c.bf16 %v10696_v33, %v10695_v2  ;;  %v15944_v3 = vld [vmem:[#allocation45_spill] sm:$0xff]  ;;  %v10578_v2 = vld [vmem:[%s11838_s16 + $0x1a5] sm:$0xff] }
 0x418   : > { %v10637_v33 = vld [vmem:[%s11838_s16 + $0x1c9] sm:$0xff] }
 0x419   : > { %v3541_v30 = vpop.f32.mrf.mxu2  ;;  %v3776_v20 = vpop.f32.mrf.mxu3 }
 0x41a   : > { %v3609_v38 = vadd.f32 %v3541_v30, %v3375_v48  ;;  %v3309_v11 = vpop.f32.mrf.mxu1  ;;  %v15943_v48 = vld [vmem:[#allocation27_spill] sm:$0xff] }
 0x41b   : > { %v3376_v58 = vadd.f32 %v3309_v11, %v15942_v23 }
 0x41c   : > { %v3844_v8 = vadd.f32 %v3776_v20, %v3609_v38  ;;  %v4012_v12 = vpop.f32.mrf.mxu0  ;;  %v15945_v38 = vld [vmem:[#allocation43_spill] sm:$0xff] }
 0x41e   : > { %v13226_v10 = vadd.f32 %v4010_v56, %v3844_v8 }
 0x421   : > { %v3543_v44 = vpop.f32.mrf.mxu2  ;;  %v3778_v24 = vpop.f32.mrf.mxu3 }
 0x422   : > { %v3610_v26 = vadd.f32 %v3543_v44, %v3376_v58  ;;  %v3312_v62 = vpop.f32.mrf.mxu1  ;;  %v10697_v44 = vld [vmem:[%s11838_s16 + $0x1cb] sm:$0xff] }
 0x423   : > { %v3377_v47 = vadd.f32 %v3312_v62, %v12967_v35 }
 0x424   : > { %v3845_v13 = vadd.f32 %v3778_v24, %v3610_v26  ;;  %v4015_v37 = vpop.f32.mrf.mxu0  ;;  %v10698_v24 = vld [vmem:[%s11838_s16 + $0x1d3] sm:$0xff] }
 0x425   : > { %10546 = vmatmul.msk.bf16.gmra.mxu1 %vm397_vm0, %v15943_v48 }
 0x426   : > { %v13233_v29 = vadd.f32 %v4012_v12, %v3845_v13  ;;  %10606 = vmatmul.msk.bf16.gmra.mxu2 %vm397_vm0, %v13015_v41  ;;  %10666 = vmatmul.msk.bf16.gmra.mxu3 %vm397_vm0, %v15944_v3  ;;  %v10577_v12 = vld [vmem:[%s11838_s16 + $0x19d] sm:$0xff]  ;;  %v10638_v41 = vld [vmem:[%s11838_s16 + $0x1d1] sm:$0xff] }
 0x427   : > { %10726 = vmatmul.msk.bf16.gmra.mxu0 %vm397_vm0, %v3913_v46  ;;  %v13249_v3 = vpack.c.bf16 %v10578_v2, %v10577_v12 }
 0x429   : > { %v3546_v35 = vpop.f32.mrf.mxu2  ;;  %v3781_v56 = vpop.f32.mrf.mxu3 }
 0x42a   : > { %v3611_v30 = vadd.f32 %v3546_v35, %v3377_v47  ;;  %v3314_v20 = vpop.f32.mrf.mxu1  ;;  %v3680_v47 = vpack.c.bf16 %v10638_v41, %v10637_v33  ;;  %v15946_v35 = vld [vmem:[#allocation44_spill] sm:$0xff]  ;;  %v15948_v41 = vld [vmem:[#allocation46_spill] sm:$0xff] }
 0x42b   : > { %v3378_v11 = vadd.f32 %v3314_v20, %v15945_v38  ;;  %v3914_v20 = vpack.c.bf16 %v10698_v24, %v10697_v44  ;;  %v11702_v24 = vld [vmem:[%s15762_s1 + $0x140] sm:$0xff] }
 0x42c   : > { %v3846_v23 = vadd.f32 %v3781_v56, %v3611_v30  ;;  %v4017_v58 = vpop.f32.mrf.mxu0  ;;  %4925 = vmatpush.bf16.msrb.mxu0 %v11702_v24 }
 0x42e   : > { %v13241_v8 = vadd.f32 %v4015_v37, %v3846_v23  ;;  %v15947_v37 = vld [vmem:[#allocation30_spill] sm:$0xff] }
 0x42f   : > { %v11709_v23 = vld [vmem:[%s15762_s1 + $0x178] sm:$0xff] }
 0x430   : > { %5530 = vmatpush.bf16.msra.mxu3 %v11709_v23 }
 0x431   : > { %v3548_v26 = vpop.f32.mrf.mxu2  ;;  %v3783_v62 = vpop.f32.mrf.mxu3 }
 0x432   : > { %v3612_v13 = vadd.f32 %v3548_v26, %v3378_v11  ;;  %v3317_v46 = vpop.f32.mrf.mxu1  ;;  %v11707_v11 = vld [vmem:[%s15762_s1 + $0x168] sm:$0xff] }
 0x433   : > { %v3379_v48 = vadd.f32 %v3317_v46, %v15946_v35  ;;  %5296 = vmatpush.bf16.msra.mxu2 %v11707_v11  ;;  %v10580_v35 = vld [vmem:[%s11838_s16 + $0x1bd] sm:$0xff]  ;;  %v10700_v11 = vld [vmem:[%s11838_s16 + $0x1eb] sm:$0xff] }
 0x434   : > { %v3847_v56 = vadd.f32 %v3783_v62, %v3612_v13  ;;  %v4020_v30 = vpop.f32.mrf.mxu0  ;;  %v11705_v13 = vld [vmem:[%s15762_s1 + $0x158] sm:$0xff] }
 0x435   : > { %10547 = vmatmul.msk.bf16.gmra.mxu1 %vm397_vm0, %v15947_v37 }
 0x436   : > { %v13254_v38 = vadd.f32 %v4017_v58, %v3847_v56  ;;  %10607 = vmatmul.msk.bf16.gmra.mxu2 %vm397_vm0, %v13249_v3  ;;  %10667 = vmatmul.msk.bf16.gmra.mxu3 %vm397_vm0, %v3680_v47  ;;  %v10579_v47 = vld [vmem:[%s11838_s16 + $0x1b5] sm:$0xff]  ;;  %v10699_v56 = vld [vmem:[%s11838_s16 + $0x1e3] sm:$0xff] }
 0x437   : > { %10727 = vmatmul.msk.bf16.gmra.mxu0 %vm397_vm0, %v3914_v20  ;;  %5158 = vmatpush.bf16.msra.mxu1 %v11705_v13  ;;  %v10640_v20 = vld [vmem:[%s11838_s16 + $0x1e9] sm:$0xff]  ;;  %v3915_v17 = vpack.c.bf16 %v10700_v11, %v10699_v56  ;;  %v10729_v11 = vld [vmem:[%s11838_s16 + $0x7d] sm:$0xff] }
 0x439   : > { %v3551_v58 = vpop.f32.mrf.mxu2  ;;  %v3786_v12 = vpop.f32.mrf.mxu3 }
 0x43a   : > { %v3613_v2 = vadd.f32 %v3551_v58, %v3379_v48  ;;  %v3319_v33 = vpop.f32.mrf.mxu1  ;;  %v10639_v48 = vld [vmem:[%s11838_s16 + $0x1e1] sm:$0xff] }
 0x43b   : > { %v3380_v44 = vadd.f32 %v3319_v33, %v15948_v41 }
 0x43c   : > { %v3848_v26 = vadd.f32 %v3786_v12, %v3613_v2  ;;  %v4022_v62 = vpop.f32.mrf.mxu0  ;;  %v13281_v12 = vpack.c.bf16 %v10580_v35, %v10579_v47  ;;  %v3681_v2 = vpack.c.bf16 %v10640_v20, %v10639_v48 }
 0x43e   : > { %v13273_v46 = vadd.f32 %v4020_v30, %v3848_v26  ;;  %v15949_v26 = vld [vmem:[#allocation32_spill] sm:$0xff] }
 0x441   : > { %v3553_v23 = vpop.f32.mrf.mxu2  ;;  %v3788_v58 = vpop.f32.mrf.mxu3 }
 0x442   : > { %v3614_v33 = vadd.f32 %v3553_v23, %v3380_v44  ;;  %v3322_v41 = vpop.f32.mrf.mxu1  ;;  %v10730_v23 = vld [vmem:[%s11838_s16 + $0x85] sm:$0xff] }
 0x443   : > { %v3381_v37 = vadd.f32 %v3322_v41, %v13031_v59  ;;  %v10849_v41 = vld [vmem:[%s11838_s16 + $0x33] sm:$0xff]  ;;  %v4134_v60 = vpack.c.bf16 %v10730_v23, %v10729_v11  ;;  %v10732_v23 = vld [vmem:[%s11838_s16 + $0x9d] sm:$0xff] }
 0x444   : > { %v3849_v30 = vadd.f32 %v3788_v58, %v3614_v33  ;;  %v4025_v24 = vpop.f32.mrf.mxu0  ;;  %v10789_v58 = vld [vmem:[%s11838_s16 + $0x32] sm:$0xff]  ;;  %v10790_v33 = vld [vmem:[%s11838_s16 + $0x3a] sm:$0xff] }
 0x445   : > { %10548 = vmatmul.msk.bf16.gmra.mxu1 %vm397_vm0, %v15949_v26  ;;  %v10910_v26 = vld [vmem:[%s11838_s16 + $0x3c] sm:$0xff] }
 0x446   : > { %v13286_v13 = vadd.f32 %v4022_v62, %v3849_v30  ;;  %10608 = vmatmul.msk.bf16.gmra.mxu2 %vm397_vm0, %v13281_v12  ;;  %10668 = vmatmul.msk.bf16.gmra.mxu3 %vm397_vm0, %v3681_v2  ;;  %v10850_v2 = vld [vmem:[%s11838_s16 + $0x3b] sm:$0xff] }
 0x447   : > { %10728 = vmatmul.msk.bf16.gmra.mxu0 %vm397_vm0, %v3915_v17  ;;  %v10909_v30 = vld [vmem:[%s11838_s16 + $0x34] sm:$0xff]  ;;  %v4603_v45 = vpack.c.bf16 %v10850_v2, %v10849_v41  ;;  %v10851_v41 = vld [vmem:[%s11838_s16 + $0x4b] sm:$0xff] }
 0x448   : > { %v10731_v11 = vld [vmem:[%s11838_s16 + $0x95] sm:$0xff]  ;;  %v10911_v2 = vld [vmem:[%s11838_s16 + $0x4c] sm:$0xff] }
 0x449   : > { %v3556_v59 = vpop.f32.mrf.mxu2  ;;  %v3791_v44 = vpop.f32.mrf.mxu3 }
 0x44a   : > { %v3615_v47 = vadd.f32 %v3556_v59, %v3381_v37  ;;  %v3324_v35 = vpop.f32.mrf.mxu1  ;;  %v4369_v59 = vpack.c.bf16 %v10790_v33, %v10789_v58  ;;  %v10791_v58 = vld [vmem:[%s11838_s16 + $0x4a] sm:$0xff]  ;;  %v10792_v33 = vld [vmem:[%s11838_s16 + $0x52] sm:$0xff] }
 0x44b   : > { %v3382_v48 = vadd.f32 %v3324_v35, %v13036_v49 }
 0x44c   : > { %v3850_v20 = vadd.f32 %v3791_v44, %v3615_v47  ;;  %v4027_v62 = vpop.f32.mrf.mxu0  ;;  %v4837_v44 = vpack.c.bf16 %v10910_v26, %v10909_v30  ;;  %v10912_v30 = vld [vmem:[%s11838_s16 + $0x54] sm:$0xff] }
 0x44e   : > { %v13293_v56 = vadd.f32 %v4025_v24, %v3850_v20 }
 0x451   : > { %v3558_v17 = vpop.f32.mrf.mxu2  ;;  %v3793_v19 = vpop.f32.mrf.mxu3 }
 0x452   : > { %v3616_v15 = vadd.f32 %v3558_v17, %v3382_v48  ;;  %v3327_v37 = vpop.f32.mrf.mxu1 }
 0x453   : > { %v3383_v49 = vadd.f32 %v3327_v37, %v13045_v52 }
 0x454   : > { %v3851_v24 = vadd.f32 %v3793_v19, %v3616_v15  ;;  %v4030_v47 = vpop.f32.mrf.mxu0 }
 0x455   : > { %10773 = vmatmul.msk.bf16.vlgmr.msrb.gmra.mxu1 %vm397_vm0, %v4134_v60 }
 0x456   : > { %v13305_v35 = vadd.f32 %v4027_v62, %v3851_v24  ;;  %10833 = vmatmul.msk.bf16.vlgmr.msrb.gmra.mxu2 %vm397_vm0, %v4369_v59  ;;  %10893 = vmatmul.msk.bf16.vlgmr.msrb.gmra.mxu3 %vm397_vm0, %v4603_v45  ;;  %v10852_v45 = vld [vmem:[%s11838_s16 + $0x53] sm:$0xff]  ;;  %v4135_v59 = vpack.c.bf16 %v10732_v23, %v10731_v11  ;;  %v13321_v24 = vpack.c.bf16 %v10792_v33, %v10791_v58 }
 0x457   : > { %10953 = vmatmul.msk.bf16.vlgmr.msrb.gmra.mxu0 %vm397_vm0, %v4837_v44 }
 0x459   : > { %v3561_v52 = vpop.f32.mrf.mxu2  ;;  %v3796_v15 = vpop.f32.mrf.mxu3 }
 0x45a   : > { %v3617_v19 = vadd.f32 %v3561_v52, %v3383_v49  ;;  %v3329_v26 = vpop.f32.mrf.mxu1 }
 0x45b   : > { %v3384_v48 = vadd.f32 %v3329_v26, %v13050_v63  ;;  %v4604_v63 = vpack.c.bf16 %v10852_v45, %v10851_v41  ;;  %v10733_v41 = vld [vmem:[%s11838_s16 + $0xad] sm:$0xff]  ;;  %v10734_v45 = vld [vmem:[%s11838_s16 + $0xb5] sm:$0xff] }
 0x45c   : > { %v3852_v60 = vadd.f32 %v3796_v15, %v3617_v19  ;;  %v4032_v20 = vpop.f32.mrf.mxu0 }
 0x45e   : > { %v13311_v62 = vadd.f32 %v4030_v47, %v3852_v60  ;;  %v13324_v47 = vpack.c.bf16 %v10912_v30, %v10911_v2  ;;  %v10793_v2 = vld [vmem:[%s11838_s16 + $0x62] sm:$0xff]  ;;  %v10794_v30 = vld [vmem:[%s11838_s16 + $0x6a] sm:$0xff] }
 0x461   : > { %v3563_v17 = vpop.f32.mrf.mxu2  ;;  %v3798_v37 = vpop.f32.mrf.mxu3 }
 0x462   : > { %v3618_v44 = vadd.f32 %v3563_v17, %v3384_v48  ;;  %v3332_v49 = vpop.f32.mrf.mxu1  ;;  %v10853_v17 = vld [vmem:[%s11838_s16 + $0x63] sm:$0xff] }
 0x463   : > { %v3385_v52 = vadd.f32 %v3332_v49, %v13059_v50 }
 0x464   : > { %v3853_v15 = vadd.f32 %v3798_v37, %v3618_v44  ;;  %v4035_v19 = vpop.f32.mrf.mxu0  ;;  %v10854_v37 = vld [vmem:[%s11838_s16 + $0x6b] sm:$0xff] }
 0x465   : > { %10774 = vmatmul.msk.bf16.gmra.mxu1 %vm397_vm0, %v4135_v59  ;;  %v10913_v59 = vld [vmem:[%s11838_s16 + $0x64] sm:$0xff]  ;;  %v10914_v44 = vld [vmem:[%s11838_s16 + $0x6c] sm:$0xff] }
 0x466   : > { %v13327_v26 = vadd.f32 %v4032_v20, %v3853_v15  ;;  %10834 = vmatmul.msk.bf16.gmra.mxu2 %vm397_vm0, %v13321_v24  ;;  %10894 = vmatmul.msk.bf16.gmra.mxu3 %vm397_vm0, %v4604_v63  ;;  %v4136_v15 = vpack.c.bf16 %v10734_v45, %v10733_v41 }
 0x467   : > { %10954 = vmatmul.msk.bf16.gmra.mxu0 %vm397_vm0, %v13324_v47 }
 0x469   : > { %v3566_v50 = vpop.f32.mrf.mxu2  ;;  %v3801_v48 = vpop.f32.mrf.mxu3 }
 0x46a   : > { %v3619_v60 = vadd.f32 %v3566_v50, %v3385_v52  ;;  %v3334_v11 = vpop.f32.mrf.mxu1  ;;  %v13345_v50 = vpack.c.bf16 %v10794_v30, %v10793_v2 }
 0x46b   : > { %v3386_v23 = vadd.f32 %v3334_v11, %v13064_v6  ;;  %v4605_v6 = vpack.c.bf16 %v10854_v37, %v10853_v17  ;;  %v10735_v17 = vld [vmem:[%s11838_s16 + $0xc5] sm:$0xff]  ;;  %v10736_v37 = vld [vmem:[%s11838_s16 + $0xcd] sm:$0xff] }
 0x46c   : > { %v3854_v20 = vadd.f32 %v3801_v48, %v3619_v60  ;;  %v4037_v58 = vpop.f32.mrf.mxu0  ;;  %v4137_v42 = vpack.c.bf16 %v10736_v37, %v10735_v17 }
 0x46e   : > { %v13335_v33 = vadd.f32 %v4035_v19, %v3854_v20  ;;  %v13348_v19 = vpack.c.bf16 %v10914_v44, %v10913_v59  ;;  %v10795_v59 = vld [vmem:[%s11838_s16 + $0x7a] sm:$0xff]  ;;  %v10796_v44 = vld [vmem:[%s11838_s16 + $0x82] sm:$0xff] }
 0x471   : > { %v3568_v49 = vpop.f32.mrf.mxu2  ;;  %v3803_v63 = vpop.f32.mrf.mxu3 }
 0x472   : > { %v3620_v31 = vadd.f32 %v3568_v49, %v3386_v23  ;;  %v3337_v52 = vpop.f32.mrf.mxu1  ;;  %v10855_v49 = vld [vmem:[%s11838_s16 + $0x7b] sm:$0xff] }
 0x473   : > { %v3387_v48 = vadd.f32 %v3337_v52, %v13073_v0  ;;  %v10916_v52 = vld [vmem:[%s11838_s16 + $0x84] sm:$0xff] }
 0x474   : > { %v3855_v60 = vadd.f32 %v3803_v63, %v3620_v31  ;;  %v4040_v11 = vpop.f32.mrf.mxu0  ;;  %v10856_v63 = vld [vmem:[%s11838_s16 + $0x83] sm:$0xff] }
 0x475   : > { %10775 = vmatmul.msk.bf16.gmra.mxu1 %vm397_vm0, %v4136_v15  ;;  %v10915_v15 = vld [vmem:[%s11838_s16 + $0x7c] sm:$0xff] }
 0x476   : > { %v13351_v20 = vadd.f32 %v4037_v58, %v3855_v60  ;;  %10835 = vmatmul.msk.bf16.gmra.mxu2 %vm397_vm0, %v13345_v50  ;;  %10895 = vmatmul.msk.bf16.gmra.mxu3 %vm397_vm0, %v4605_v6 }
 0x477   : > { %10955 = vmatmul.msk.bf16.gmra.mxu0 %vm397_vm0, %v13348_v19 }
 0x479   : > { %v3571_v0 = vpop.f32.mrf.mxu2  ;;  %v3806_v31 = vpop.f32.mrf.mxu3 }
 0x47a   : > { %v3621_v23 = vadd.f32 %v3571_v0, %v3387_v48  ;;  %v3339_v41 = vpop.f32.mrf.mxu1  ;;  %v13369_v0 = vpack.c.bf16 %v10796_v44, %v10795_v59  ;;  %v10737_v44 = vld [vmem:[%s11838_s16 + $0xdd] sm:$0xff] }
 0x47b   : > { %v3388_v45 = vadd.f32 %v3339_v41, %v13078_v7  ;;  %v4606_v7 = vpack.c.bf16 %v10856_v63, %v10855_v49  ;;  %v10738_v49 = vld [vmem:[%s11838_s16 + $0xe5] sm:$0xff]  ;;  %v10797_v63 = vld [vmem:[%s11838_s16 + $0x92] sm:$0xff] }
 0x47c   : > { %v3856_v58 = vadd.f32 %v3806_v31, %v3621_v23  ;;  %v4042_v2 = vpop.f32.mrf.mxu0  ;;  %v4138_v18 = vpack.c.bf16 %v10738_v49, %v10737_v44 }
 0x47e   : > { %v13359_v30 = vadd.f32 %v4040_v11, %v3856_v58  ;;  %v13372_v11 = vpack.c.bf16 %v10916_v52, %v10915_v15  ;;  %v10798_v15 = vld [vmem:[%s11838_s16 + $0x9a] sm:$0xff] }
 0x47f   : > { %v10857_v52 = vld [vmem:[%s11838_s16 + $0x93] sm:$0xff] }
 0x481   : > { %v3573_v6 = vpop.f32.mrf.mxu2  ;;  %v3808_v60 = vpop.f32.mrf.mxu3 }
 0x482   : > { %v3622_v1 = vadd.f32 %v3573_v6, %v3388_v45  ;;  %v3342_v48 = vpop.f32.mrf.mxu1  ;;  %v10858_v6 = vld [vmem:[%s11838_s16 + $0x9b] sm:$0xff] }
 0x483   : > { %v3389_v31 = vadd.f32 %v3342_v48, %v13087_v39  ;;  %v10918_v48 = vld [vmem:[%s11838_s16 + $0x9c] sm:$0xff] }
 0x484   : > { %v3857_v23 = vadd.f32 %v3808_v60, %v3622_v1  ;;  %v4045_v41 = vpop.f32.mrf.mxu0  ;;  %v10917_v60 = vld [vmem:[%s11838_s16 + $0x94] sm:$0xff] }
 0x485   : > { %10776 = vmatmul.msk.bf16.gmra.mxu1 %vm397_vm0, %v4137_v42 }
 0x486   : > { %v13375_v58 = vadd.f32 %v4042_v2, %v3857_v23  ;;  %10836 = vmatmul.msk.bf16.gmra.mxu2 %vm397_vm0, %v13369_v0  ;;  %10896 = vmatmul.msk.bf16.gmra.mxu3 %vm397_vm0, %v4606_v7 }
 0x487   : > { %10956 = vmatmul.msk.bf16.gmra.mxu0 %vm397_vm0, %v13372_v11 }
 0x489   : > { %v3576_v39 = vpop.f32.mrf.mxu2  ;;  %v3811_v1 = vpop.f32.mrf.mxu3 }
 0x48a   : > { %v3623_v45 = vadd.f32 %v3576_v39, %v3389_v31  ;;  %v3344_v17 = vpop.f32.mrf.mxu1  ;;  %v13393_v39 = vpack.c.bf16 %v10798_v15, %v10797_v63  ;;  %v10739_v15 = vld [vmem:[%s11838_s16 + $0xf5] sm:$0xff] }
 0x48b   : > { %v3390_v42 = vadd.f32 %v3344_v17, %v13092_v27  ;;  %v4607_v27 = vpack.c.bf16 %v10858_v6, %v10857_v52  ;;  %v10740_v52 = vld [vmem:[%s11838_s16 + $0xfd] sm:$0xff]  ;;  %v10799_v6 = vld [vmem:[%s11838_s16 + $0xaa] sm:$0xff] }
 0x48c   : > { %v3858_v2 = vadd.f32 %v3811_v1, %v3623_v45  ;;  %v4047_v37 = vpop.f32.mrf.mxu0 }
 0x48e   : > { %v13383_v59 = vadd.f32 %v4045_v41, %v3858_v2  ;;  %v13396_v41 = vpack.c.bf16 %v10918_v48, %v10917_v60  ;;  %v10800_v60 = vld [vmem:[%s11838_s16 + $0xb2] sm:$0xff] }
 0x48f   : > { %v10859_v48 = vld [vmem:[%s11838_s16 + $0xab] sm:$0xff] }
 0x490   : > { %15950 = vst [vmem:[#allocation16_spill] sm:$0xff] %v13396_v41 }
 0x491   : > { %v3578_v7 = vpop.f32.mrf.mxu2  ;;  %v3813_v23 = vpop.f32.mrf.mxu3 }
 0x492   : > { %v3624_v40 = vadd.f32 %v3578_v7, %v3390_v42  ;;  %v3347_v31 = vpop.f32.mrf.mxu1  ;;  %v10860_v7 = vld [vmem:[%s11838_s16 + $0xb3] sm:$0xff] }
 0x493   : > { %v3391_v1 = vadd.f32 %v3347_v31, %v13101_v14  ;;  %v10920_v31 = vld [vmem:[%s11838_s16 + $0xb4] sm:$0xff] }
 0x494   : > { %v3859_v45 = vadd.f32 %v3813_v23, %v3624_v40  ;;  %v4050_v17 = vpop.f32.mrf.mxu0  ;;  %v10919_v23 = vld [vmem:[%s11838_s16 + $0xac] sm:$0xff] }
 0x495   : > { %10777 = vmatmul.msk.bf16.gmra.mxu1 %vm397_vm0, %v4138_v18 }
 0x496   : > { %v13399_v2 = vadd.f32 %v4047_v37, %v3859_v45  ;;  %10837 = vmatmul.msk.bf16.gmra.mxu2 %vm397_vm0, %v13393_v39  ;;  %10897 = vmatmul.msk.bf16.gmra.mxu3 %vm397_vm0, %v4607_v27 }
 0x497   : > { %10957 = vmatmul.msk.bf16.gmra.mxu0 %vm397_vm0, %v13396_v41 }
 0x498   : > { %15951 = vst [vmem:[#allocation4_spill] sm:$0xff] %v13399_v2  ;;  %v4139_v2 = vpack.c.bf16 %v10740_v52, %v10739_v15 }
 0x499   : > { %v3581_v40 = vpop.f32.mrf.mxu2  ;;  %v3816_v14 = vpop.f32.mrf.mxu3 }
 0x49a   : > { %v3625_v42 = vadd.f32 %v3581_v40, %v3391_v1  ;;  %v3349_v44 = vpop.f32.mrf.mxu1  ;;  %v13417_v40 = vpack.c.bf16 %v10800_v60, %v10799_v6  ;;  %v10741_v60 = vld [vmem:[%s11838_s16 + $0x10d] sm:$0xff] }
 0x49b   : > { %v3392_v18 = vadd.f32 %v3349_v44, %v13106_v4  ;;  %v4608_v4 = vpack.c.bf16 %v10860_v7, %v10859_v48  ;;  %v10742_v48 = vld [vmem:[%s11838_s16 + $0x115] sm:$0xff]  ;;  %v10801_v7 = vld [vmem:[%s11838_s16 + $0xc2] sm:$0xff] }
 0x49c   : > { %v3860_v37 = vadd.f32 %v3816_v14, %v3625_v42  ;;  %v4052_v49 = vpop.f32.mrf.mxu0 }
 0x49e   : > { %v13407_v63 = vadd.f32 %v4050_v17, %v3860_v37  ;;  %v13420_v17 = vpack.c.bf16 %v10920_v31, %v10919_v23  ;;  %v10802_v23 = vld [vmem:[%s11838_s16 + $0xca] sm:$0xff] }
 0x49f   : > { %v10861_v31 = vld [vmem:[%s11838_s16 + $0xc3] sm:$0xff] }
 0x4a0   : > { %15952 = vst [vmem:[#allocation7_spill] sm:$0xff] %v13420_v17 }
 0x4a1   : > { %v3583_v27 = vpop.f32.mrf.mxu2  ;;  %v3818_v45 = vpop.f32.mrf.mxu3 }
 0x4a2   : > { %v3626_v41 = vadd.f32 %v3583_v27, %v3392_v18  ;;  %v3352_v1 = vpop.f32.mrf.mxu1  ;;  %v10862_v27 = vld [vmem:[%s11838_s16 + $0xcb] sm:$0xff] }
 0x4a3   : > { %v3393_v14 = vadd.f32 %v3352_v1, %v13115_v22  ;;  %v10922_v1 = vld [vmem:[%s11838_s16 + $0xcc] sm:$0xff] }
 0x4a4   : > { %v3861_v42 = vadd.f32 %v3818_v45, %v3626_v41  ;;  %v4055_v44 = vpop.f32.mrf.mxu0  ;;  %v10921_v45 = vld [vmem:[%s11838_s16 + $0xc4] sm:$0xff] }
 0x4a5   : > { %10778 = vmatmul.msk.bf16.gmra.mxu1 %vm397_vm0, %v4139_v2 }
 0x4a6   : > { %v13423_v37 = vadd.f32 %v4052_v49, %v3861_v42  ;;  %10838 = vmatmul.msk.bf16.gmra.mxu2 %vm397_vm0, %v13417_v40  ;;  %10898 = vmatmul.msk.bf16.gmra.mxu3 %vm397_vm0, %v4608_v4 }
 0x4a7   : > { %10958 = vmatmul.msk.bf16.gmra.mxu0 %vm397_vm0, %v13420_v17 }
 0x4a8   : > { %15953 = vst [vmem:[#allocation17_spill] sm:$0xff] %v13423_v37  ;;  %v4140_v37 = vpack.c.bf16 %v10742_v48, %v10741_v60 }
 0x4a9   : > { %v3586_v22 = vpop.f32.mrf.mxu2  ;;  %v3821_v41 = vpop.f32.mrf.mxu3 }
 0x4aa   : > { %v3627_v18 = vadd.f32 %v3586_v22, %v3393_v14  ;;  %v3354_v15 = vpop.f32.mrf.mxu1  ;;  %v13441_v22 = vpack.c.bf16 %v10802_v23, %v10801_v7 }
 0x4ab   : > { %v3394_v2 = vadd.f32 %v3354_v15, %v13120_v25  ;;  %v4609_v25 = vpack.c.bf16 %v10862_v27, %v10861_v31  ;;  %v11704_v31 = vld [vmem:[%s15762_s1 + $0x150] sm:$0xff] }
 0x4ac   : > { %v3862_v49 = vadd.f32 %v3821_v41, %v3627_v18  ;;  %v4057_v52 = vpop.f32.mrf.mxu0  ;;  %5159 = vmatpush.bf16.msra.mxu1 %v11704_v31  ;;  %v11711_v31 = vld [vmem:[%s15762_s1 + $0x188] sm:$0xff] }
 0x4ad   : > { %5765 = vmatpush.bf16.msra.mxu0 %v11711_v31 }
 0x4ae   : > { %v13431_v6 = vadd.f32 %v4055_v44, %v3862_v49  ;;  %v13444_v44 = vpack.c.bf16 %v10922_v1, %v10921_v45  ;;  %v10743_v45 = vld [vmem:[%s11838_s16 + $0x125] sm:$0xff]  ;;  %v10744_v1 = vld [vmem:[%s11838_s16 + $0x12d] sm:$0xff] }
 0x4b1   : > { %v3588_v4 = vpop.f32.mrf.mxu2  ;;  %v3823_v42 = vpop.f32.mrf.mxu3 }
 0x4b2   : > { %v3628_v17 = vadd.f32 %v3588_v4, %v3394_v2  ;;  %v3357_v14 = vpop.f32.mrf.mxu1  ;;  %v11706_v2 = vld [vmem:[%s15762_s1 + $0x160] sm:$0xff] }
 0x4b3   : > { %v3395_v41 = vadd.f32 %v3357_v14, %v13138_v21  ;;  %v11708_v21 = vld [vmem:[%s15762_s1 + $0x170] sm:$0xff]  ;;  %5297 = vmatpush.bf16.msra.mxu2 %v11706_v2  ;;  %v10803_v4 = vld [vmem:[%s11838_s16 + $0xda] sm:$0xff] }
 0x4b4   : > { %v3863_v18 = vadd.f32 %v3823_v42, %v3628_v17  ;;  %v4060_v15 = vpop.f32.mrf.mxu0  ;;  %5531 = vmatpush.bf16.msra.mxu3 %v11708_v21  ;;  %v10804_v42 = vld [vmem:[%s11838_s16 + $0xe2] sm:$0xff] }
 0x4b5   : > { %10779 = vmatmul.msk.bf16.gmra.mxu1 %vm397_vm0, %v4140_v37  ;;  %v10863_v14 = vld [vmem:[%s11838_s16 + $0xdb] sm:$0xff] }
 0x4b6   : > { %v13447_v49 = vadd.f32 %v4057_v52, %v3863_v18  ;;  %10839 = vmatmul.msk.bf16.gmra.mxu2 %vm397_vm0, %v13441_v22  ;;  %10899 = vmatmul.msk.bf16.gmra.mxu3 %vm397_vm0, %v4609_v25  ;;  %v10864_v25 = vld [vmem:[%s11838_s16 + $0xe3] sm:$0xff] }
 0x4b7   : > { %10959 = vmatmul.msk.bf16.gmra.mxu0 %vm397_vm0, %v13444_v44  ;;  %v10923_v18 = vld [vmem:[%s11838_s16 + $0xdc] sm:$0xff] }
 0x4b8   : > { %15954 = vst [vmem:[#allocation20_spill] sm:$0xff] %v13447_v49 }
 0x4b9   : > { %v3591_v17 = vpop.f32.mrf.mxu2  ;;  %v3826_v37 = vpop.f32.mrf.mxu3 }
 0x4ba   : > { %v3629_v52 = vadd.f32 %v3591_v17, %v3395_v41  ;;  %v3359_v60 = vpop.f32.mrf.mxu1  ;;  %v10924_v41 = vld [vmem:[%s11838_s16 + $0xe4] sm:$0xff] }
 0x4bb   : > { %v3396_v48 = vadd.f32 %v3359_v60, %v13146_v16  ;;  %v4141_v16 = vpack.c.bf16 %v10744_v1, %v10743_v45  ;;  %v4610_v60 = vpack.c.bf16 %v10864_v25, %v10863_v14  ;;  %v10745_v25 = vld [vmem:[%s11838_s16 + $0x13d] sm:$0xff] }
 0x4bc   : > { %v3864_v7 = vadd.f32 %v3826_v37, %v3629_v52  ;;  %v4062_v23 = vpop.f32.mrf.mxu0  ;;  %v13474_v52 = vpack.c.bf16 %v10804_v42, %v10803_v4 }
 0x4be   : > { %v13464_v27 = vadd.f32 %v4060_v15, %v3864_v7  ;;  %v13477_v7 = vpack.c.bf16 %v10924_v41, %v10923_v18  ;;  %v10746_v18 = vld [vmem:[%s11838_s16 + $0x145] sm:$0xff]  ;;  %v10805_v41 = vld [vmem:[%s11838_s16 + $0xf2] sm:$0xff] }
 0x4c0   : > { %15955 = vst [vmem:[#allocation18_spill] sm:$0xff] %v13464_v27 }
 0x4c1   : > { %v3593_v2 = vpop.f32.mrf.mxu2  ;;  %v3828_v21 = vpop.f32.mrf.mxu3  ;;  %15956 = vst [vmem:[#allocation19_spill] sm:$0xff] %v13477_v7 }
 0x4c2   : > { %v3630_v17 = vadd.f32 %v3593_v2, %v3396_v48  ;;  %v3362_v37 = vpop.f32.mrf.mxu1  ;;  %v10806_v2 = vld [vmem:[%s11838_s16 + $0xfa] sm:$0xff] }
 0x4c3   : > { %v3397_v15 = vadd.f32 %v3362_v37, %v13155_v53  ;;  %v10926_v37 = vld [vmem:[%s11838_s16 + $0xfc] sm:$0xff] }
 0x4c4   : > { %v3865_v27 = vadd.f32 %v3828_v21, %v3630_v17  ;;  %v4065_v49 = vpop.f32.mrf.mxu0  ;;  %v10865_v21 = vld [vmem:[%s11838_s16 + $0xf3] sm:$0xff] }
 0x4c5   : > { %10780 = vmatmul.msk.bf16.gmra.mxu1 %vm397_vm0, %v4141_v16  ;;  %v10866_v16 = vld [vmem:[%s11838_s16 + $0xfb] sm:$0xff] }
 0x4c6   : > { %v13483_v48 = vadd.f32 %v4062_v23, %v3865_v27  ;;  %10840 = vmatmul.msk.bf16.gmra.mxu2 %vm397_vm0, %v13474_v52  ;;  %10900 = vmatmul.msk.bf16.gmra.mxu3 %vm397_vm0, %v4610_v60  ;;  %v10925_v17 = vld [vmem:[%s11838_s16 + $0xf4] sm:$0xff] }
 0x4c7   : > { %10960 = vmatmul.msk.bf16.gmra.mxu0 %vm397_vm0, %v13477_v7 }
 0x4c8   : > { %15957 = vst [vmem:[#allocation23_spill] sm:$0xff] %v13483_v48  ;;  %v4142_v48 = vpack.c.bf16 %v10746_v18, %v10745_v25 }
 0x4c9   : > { %v3596_v53 = vpop.f32.mrf.mxu2  ;;  %v3831_v45 = vpop.f32.mrf.mxu3 }
 0x4ca   : > { %v3631_v1 = vadd.f32 %v3596_v53, %v3397_v15  ;;  %v3364_v4 = vpop.f32.mrf.mxu1  ;;  %v13501_v53 = vpack.c.bf16 %v10806_v2, %v10805_v41  ;;  %v10747_v2 = vld [vmem:[%s11838_s16 + $0x155] sm:$0xff] }
 0x4cb   : > { %v3398_v23 = vadd.f32 %v3364_v4, %v13160_v36  ;;  %v4611_v36 = vpack.c.bf16 %v10866_v16, %v10865_v21  ;;  %v10748_v21 = vld [vmem:[%s11838_s16 + $0x15d] sm:$0xff]  ;;  %v10807_v16 = vld [vmem:[%s11838_s16 + $0x10a] sm:$0xff] }
 0x4cc   : > { %v3866_v27 = vadd.f32 %v3831_v45, %v3631_v1  ;;  %v4067_v42 = vpop.f32.mrf.mxu0 }
 0x4ce   : > { %v13491_v14 = vadd.f32 %v4065_v49, %v3866_v27  ;;  %v13504_v49 = vpack.c.bf16 %v10926_v37, %v10925_v17  ;;  %v10808_v17 = vld [vmem:[%s11838_s16 + $0x112] sm:$0xff] }
 0x4cf   : > { %v10867_v37 = vld [vmem:[%s11838_s16 + $0x10b] sm:$0xff] }
 0x4d0   : > { %15958 = vst [vmem:[#allocation21_spill] sm:$0xff] %v13504_v49 }
 0x4d1   : > { %v3598_v60 = vpop.f32.mrf.mxu2  ;;  %v3833_v31 = vpop.f32.mrf.mxu3 }
 0x4d2   : > { %v3632_v7 = vadd.f32 %v3598_v60, %v3398_v23  ;;  %v4224_v15 = vpop.f32.mrf.mxu1  ;;  %v10868_v60 = vld [vmem:[%s11838_s16 + $0x113] sm:$0xff] }
 0x4d3   : > { %v4304_v45 = vadd.f32 %v4224_v15, %v13169_v34  ;;  %v10928_v15 = vld [vmem:[%s11838_s16 + $0x114] sm:$0xff] }
 0x4d4   : > { %v3867_v1 = vadd.f32 %v3833_v31, %v3632_v7  ;;  %v4927_v4 = vpop.f32.mrf.mxu0  ;;  %v10927_v31 = vld [vmem:[%s11838_s16 + $0x10c] sm:$0xff] }
 0x4d5   : > { %10781 = vmatmul.msk.bf16.gmra.mxu1 %vm397_vm0, %v4142_v48 }
 0x4d6   : > { %v13507_v27 = vadd.f32 %v4067_v42, %v3867_v1  ;;  %10841 = vmatmul.msk.bf16.gmra.mxu2 %vm397_vm0, %v13501_v53  ;;  %10901 = vmatmul.msk.bf16.gmra.mxu3 %vm397_vm0, %v4611_v36 }
 0x4d7   : > { %10961 = vmatmul.msk.bf16.gmra.mxu0 %vm397_vm0, %v13504_v49 }
 0x4d8   : > { %15959 = vst [vmem:[#allocation22_spill] sm:$0xff] %v13507_v27  ;;  %v4143_v27 = vpack.c.bf16 %v10748_v21, %v10747_v2 }
 0x4d9   : > { %v4459_v34 = vpop.f32.mrf.mxu2  ;;  %v4693_v7 = vpop.f32.mrf.mxu3 }
 0x4da   : > { %v4539_v23 = vadd.f32 %v4459_v34, %v4304_v45  ;;  %v4226_v25 = vpop.f32.mrf.mxu1  ;;  %v13525_v34 = vpack.c.bf16 %v10808_v17, %v10807_v16  ;;  %v10749_v17 = vld [vmem:[%s11838_s16 + $0x16d] sm:$0xff] }
 0x4db   : > { %v4305_v48 = vadd.f32 %v4226_v25, %v13174_v55  ;;  %v4612_v55 = vpack.c.bf16 %v10868_v60, %v10867_v37  ;;  %v10750_v37 = vld [vmem:[%s11838_s16 + $0x175] sm:$0xff]  ;;  %v10809_v60 = vld [vmem:[%s11838_s16 + $0x122] sm:$0xff] }
 0x4dc   : > { %v4773_v42 = vadd.f32 %v4693_v7, %v4539_v23  ;;  %v4929_v18 = vpop.f32.mrf.mxu0 }
 0x4de   : > { %v13515_v41 = vadd.f32 %v4927_v4, %v4773_v42  ;;  %v13528_v4 = vpack.c.bf16 %v10928_v15, %v10927_v31  ;;  %v10810_v31 = vld [vmem:[%s11838_s16 + $0x12a] sm:$0xff] }
 0x4df   : > { %v10869_v15 = vld [vmem:[%s11838_s16 + $0x123] sm:$0xff] }
 0x4e0   : > { %15960 = vst [vmem:[#allocation26_spill] sm:$0xff] %v13528_v4 }
 0x4e1   : > { %v4461_v36 = vpop.f32.mrf.mxu2  ;;  %v4695_v1 = vpop.f32.mrf.mxu3 }
 0x4e2   : > { %v4540_v49 = vadd.f32 %v4461_v36, %v4305_v48  ;;  %v4229_v45 = vpop.f32.mrf.mxu1  ;;  %v10870_v36 = vld [vmem:[%s11838_s16 + $0x12b] sm:$0xff] }
 0x4e3   : > { %v4306_v7 = vadd.f32 %v4229_v45, %v13183_v54  ;;  %v10930_v45 = vld [vmem:[%s11838_s16 + $0x12c] sm:$0xff] }
 0x4e4   : > { %v4774_v23 = vadd.f32 %v4695_v1, %v4540_v49  ;;  %v4932_v25 = vpop.f32.mrf.mxu0  ;;  %v10929_v1 = vld [vmem:[%s11838_s16 + $0x124] sm:$0xff] }
 0x4e5   : > { %10782 = vmatmul.msk.bf16.gmra.mxu1 %vm397_vm0, %v4143_v27 }
 0x4e6   : > { %v13531_v42 = vadd.f32 %v4929_v18, %v4774_v23  ;;  %10842 = vmatmul.msk.bf16.gmra.mxu2 %vm397_vm0, %v13525_v34  ;;  %10902 = vmatmul.msk.bf16.gmra.mxu3 %vm397_vm0, %v4612_v55 }
 0x4e7   : > { %10962 = vmatmul.msk.bf16.gmra.mxu0 %vm397_vm0, %v13528_v4 }
 0x4e8   : > { %15961 = vst [vmem:[#allocation24_spill] sm:$0xff] %v13531_v42  ;;  %v4144_v42 = vpack.c.bf16 %v10750_v37, %v10749_v17 }
 0x4e9   : > { %v4464_v54 = vpop.f32.mrf.mxu2  ;;  %v4698_v49 = vpop.f32.mrf.mxu3 }
 0x4ea   : > { %v4541_v48 = vadd.f32 %v4464_v54, %v4306_v7  ;;  %v4231_v2 = vpop.f32.mrf.mxu1  ;;  %v13549_v54 = vpack.c.bf16 %v10810_v31, %v10809_v60  ;;  %v10751_v31 = vld [vmem:[%s11838_s16 + $0x185] sm:$0xff] }
 0x4eb   : > { %v4307_v27 = vadd.f32 %v4231_v2, %v13188_v32  ;;  %v4613_v32 = vpack.c.bf16 %v10870_v36, %v10869_v15  ;;  %v10752_v15 = vld [vmem:[%s11838_s16 + $0x18d] sm:$0xff]  ;;  %v10811_v36 = vld [vmem:[%s11838_s16 + $0x13a] sm:$0xff] }
 0x4ec   : > { %v4775_v18 = vadd.f32 %v4698_v49, %v4541_v48  ;;  %v4934_v21 = vpop.f32.mrf.mxu0 }
 0x4ee   : > { %v13539_v16 = vadd.f32 %v4932_v25, %v4775_v18  ;;  %v13552_v25 = vpack.c.bf16 %v10930_v45, %v10929_v1  ;;  %v10812_v1 = vld [vmem:[%s11838_s16 + $0x142] sm:$0xff] }
 0x4ef   : > { %v10871_v45 = vld [vmem:[%s11838_s16 + $0x13b] sm:$0xff] }
 0x4f0   : > { %15962 = vst [vmem:[#allocation25_spill] sm:$0xff] %v13552_v25 }
 0x4f1   : > { %v4466_v55 = vpop.f32.mrf.mxu2  ;;  %v4700_v23 = vpop.f32.mrf.mxu3 }
 0x4f2   : > { %v4542_v4 = vadd.f32 %v4466_v55, %v4307_v27  ;;  %v4234_v7 = vpop.f32.mrf.mxu1  ;;  %v10872_v55 = vld [vmem:[%s11838_s16 + $0x143] sm:$0xff] }
 0x4f3   : > { %v4308_v49 = vadd.f32 %v4234_v7, %v13197_v51  ;;  %v10932_v7 = vld [vmem:[%s11838_s16 + $0x144] sm:$0xff] }
 0x4f4   : > { %v4776_v48 = vadd.f32 %v4700_v23, %v4542_v4  ;;  %v4937_v2 = vpop.f32.mrf.mxu0  ;;  %v10931_v23 = vld [vmem:[%s11838_s16 + $0x13c] sm:$0xff] }
 0x4f5   : > { %10783 = vmatmul.msk.bf16.gmra.mxu1 %vm397_vm0, %v4144_v42 }
 0x4f6   : > { %v13555_v18 = vadd.f32 %v4934_v21, %v4776_v48  ;;  %10843 = vmatmul.msk.bf16.gmra.mxu2 %vm397_vm0, %v13549_v54  ;;  %10903 = vmatmul.msk.bf16.gmra.mxu3 %vm397_vm0, %v4613_v32 }
 0x4f7   : > { %10963 = vmatmul.msk.bf16.gmra.mxu0 %vm397_vm0, %v13552_v25 }
 0x4f8   : > { %15963 = vst [vmem:[#allocation31_spill] sm:$0xff] %v13555_v18  ;;  %v4145_v18 = vpack.c.bf16 %v10752_v15, %v10751_v31 }
 0x4f9   : > { %v4469_v51 = vpop.f32.mrf.mxu2  ;;  %v4703_v4 = vpop.f32.mrf.mxu3 }
 0x4fa   : > { %v4543_v27 = vadd.f32 %v4469_v51, %v4308_v49  ;;  %v4236_v17 = vpop.f32.mrf.mxu1  ;;  %v13573_v51 = vpack.c.bf16 %v10812_v1, %v10811_v36  ;;  %v10813_v1 = vld [vmem:[%s11838_s16 + $0x152] sm:$0xff] }
 0x4fb   : > { %v4309_v42 = vadd.f32 %v4236_v17, %v13202_v61  ;;  %v4614_v61 = vpack.c.bf16 %v10872_v55, %v10871_v45  ;;  %v10814_v45 = vld [vmem:[%s11838_s16 + $0x15a] sm:$0xff] }
 0x4fc   : > { %v4777_v21 = vadd.f32 %v4703_v4, %v4543_v27  ;;  %v4939_v37 = vpop.f32.mrf.mxu0  ;;  %v10873_v55 = vld [vmem:[%s11838_s16 + $0x153] sm:$0xff] }
 0x4fe   : > { %v13563_v60 = vadd.f32 %v4937_v2, %v4777_v21  ;;  %v13576_v2 = vpack.c.bf16 %v10932_v7, %v10931_v23  ;;  %v10874_v23 = vld [vmem:[%s11838_s16 + $0x15b] sm:$0xff] }
 0x4ff   : > { %v10933_v7 = vld [vmem:[%s11838_s16 + $0x154] sm:$0xff] }
 0x501   : > { %v4471_v32 = vpop.f32.mrf.mxu2  ;;  %v4705_v48 = vpop.f32.mrf.mxu3 }
 0x502   : > { %v4544_v25 = vadd.f32 %v4471_v32, %v4309_v42  ;;  %v4239_v49 = vpop.f32.mrf.mxu1  ;;  %v10934_v32 = vld [vmem:[%s11838_s16 + $0x15c] sm:$0xff] }
 0x503   : > { %v4310_v4 = vadd.f32 %v4239_v49, %v13211_v28 }
 0x504   : > { %v4778_v27 = vadd.f32 %v4705_v48, %v4544_v25  ;;  %v4942_v17 = vpop.f32.mrf.mxu0 }
 0x505   : > { %10784 = vmatmul.msk.bf16.gmra.mxu1 %vm397_vm0, %v4145_v18 }
 0x506   : > { %v13579_v21 = vadd.f32 %v4939_v37, %v4778_v27  ;;  %10844 = vmatmul.msk.bf16.gmra.mxu2 %vm397_vm0, %v13573_v51  ;;  %10904 = vmatmul.msk.bf16.gmra.mxu3 %vm397_vm0, %v4614_v61 }
 0x507   : > { %10964 = vmatmul.msk.bf16.gmra.mxu0 %vm397_vm0, %v13576_v2 }
 0x508   : > { %15964 = vst [vmem:[#allocation28_spill] sm:$0xff] %v13579_v21  ;;  %v13595_v21 = vpack.c.bf16 %v10814_v45, %v10813_v1 }
 0x509   : > { %v4474_v28 = vpop.f32.mrf.mxu2  ;;  %v4708_v25 = vpop.f32.mrf.mxu3 }
 0x50a   : > { %v4545_v42 = vadd.f32 %v4474_v28, %v4310_v4  ;;  %v4241_v31 = vpop.f32.mrf.mxu1  ;;  %v4615_v4 = vpack.c.bf16 %v10874_v23, %v10873_v55  ;;  %v10815_v55 = vld [vmem:[%s11838_s16 + $0x16a] sm:$0xff]  ;;  %v10816_v23 = vld [vmem:[%s11838_s16 + $0x172] sm:$0xff] }
 0x50b   : > { %v4311_v15 = vadd.f32 %v4241_v31, %v13218_v43  ;;  %v13598_v43 = vpack.c.bf16 %v10934_v32, %v10933_v7  ;;  %v10875_v7 = vld [vmem:[%s11838_s16 + $0x16b] sm:$0xff]  ;;  %v10876_v32 = vld [vmem:[%s11838_s16 + $0x173] sm:$0xff] }
 0x50c   : > { %v4779_v18 = vadd.f32 %v4708_v25, %v4545_v42  ;;  %v4944_v36 = vpop.f32.mrf.mxu0 }
 0x50e   : > { %v13587_v37 = vadd.f32 %v4942_v17, %v4779_v18 }
 0x511   : > { %v4476_v48 = vpop.f32.mrf.mxu2  ;;  %v4710_v49 = vpop.f32.mrf.mxu3 }
 0x512   : > { %v4546_v61 = vadd.f32 %v4476_v48, %v4311_v15  ;;  %v4244_v27 = vpop.f32.mrf.mxu1  ;;  %v10935_v48 = vld [vmem:[%s11838_s16 + $0x16c] sm:$0xff] }
 0x513   : > { %v4312_v28 = vadd.f32 %v4244_v27, %v13226_v10 }
 0x514   : > { %v4780_v17 = vadd.f32 %v4710_v49, %v4546_v61  ;;  %v4947_v25 = vpop.f32.mrf.mxu0  ;;  %v10936_v49 = vld [vmem:[%s11838_s16 + $0x174] sm:$0xff] }
 0x515   : > { %10785 = vmatmul.msk.bf16.gmra.mxu1 %vm397_vm0, %v13249_v3 }
 0x516   : > { %v13602_v42 = vadd.f32 %v4944_v36, %v4780_v17  ;;  %10845 = vmatmul.msk.bf16.gmra.mxu2 %vm397_vm0, %v13595_v21  ;;  %10905 = vmatmul.msk.bf16.gmra.mxu3 %vm397_vm0, %v4615_v4 }
 0x517   : > { %10965 = vmatmul.msk.bf16.gmra.mxu0 %vm397_vm0, %v13598_v43 }
 0x518   : > { %15965 = vst [vmem:[#allocation29_spill] sm:$0xff] %v13602_v42  ;;  %v13618_v42 = vpack.c.bf16 %v10816_v23, %v10815_v55 }
 0x519   : > { %v4479_v10 = vpop.f32.mrf.mxu2  ;;  %v4713_v31 = vpop.f32.mrf.mxu3 }
 0x51a   : > { %v4547_v15 = vadd.f32 %v4479_v10, %v4312_v28  ;;  %v4246_v18 = vpop.f32.mrf.mxu1  ;;  %v4616_v28 = vpack.c.bf16 %v10876_v32, %v10875_v7  ;;  %v10757_v7 = vld [vmem:[%s11838_s16 + $0x1cd] sm:$0xff]  ;;  %v10758_v32 = vld [vmem:[%s11838_s16 + $0x1d5] sm:$0xff] }
 0x51b   : > { %v4313_v1 = vadd.f32 %v4246_v18, %v13233_v29  ;;  %v13621_v29 = vpack.c.bf16 %v10936_v49, %v10935_v48  ;;  %v10817_v48 = vld [vmem:[%s11838_s16 + $0x182] sm:$0xff]  ;;  %v10818_v49 = vld [vmem:[%s11838_s16 + $0x18a] sm:$0xff] }
 0x51c   : > { %v4781_v3 = vadd.f32 %v4713_v31, %v4547_v15  ;;  %v4949_v45 = vpop.f32.mrf.mxu0 }
 0x51d   : > { %15966 = vst [vmem:[#allocation35_spill] sm:$0xff] %v13621_v29 }
 0x51e   : > { %v13610_v36 = vadd.f32 %v4947_v25, %v4781_v3 }
 0x521   : > { %v4481_v61 = vpop.f32.mrf.mxu2  ;;  %v4715_v27 = vpop.f32.mrf.mxu3 }
 0x522   : > { %v4548_v4 = vadd.f32 %v4481_v61, %v4313_v1  ;;  %v4249_v17 = vpop.f32.mrf.mxu1  ;;  %v10877_v61 = vld [vmem:[%s11838_s16 + $0x183] sm:$0xff] }
 0x523   : > { %v4314_v10 = vadd.f32 %v4249_v17, %v13241_v8  ;;  %v10938_v17 = vld [vmem:[%s11838_s16 + $0x18c] sm:$0xff] }
 0x524   : > { %v4782_v25 = vadd.f32 %v4715_v27, %v4548_v4  ;;  %v4952_v31 = vpop.f32.mrf.mxu0  ;;  %v10878_v27 = vld [vmem:[%s11838_s16 + $0x18b] sm:$0xff] }
 0x525   : > { %10786 = vmatmul.msk.bf16.gmra.mxu1 %vm397_vm0, %v13281_v12  ;;  %v10937_v4 = vld [vmem:[%s11838_s16 + $0x184] sm:$0xff] }
 0x526   : > { %v13625_v15 = vadd.f32 %v4949_v45, %v4782_v25  ;;  %10846 = vmatmul.msk.bf16.gmra.mxu2 %vm397_vm0, %v13618_v42  ;;  %10906 = vmatmul.msk.bf16.gmra.mxu3 %vm397_vm0, %v4616_v28 }
 0x527   : > { %10966 = vmatmul.msk.bf16.gmra.mxu0 %vm397_vm0, %v13621_v29 }
 0x528   : > { %15967 = vst [vmem:[#allocation33_spill] sm:$0xff] %v13625_v15  ;;  %v4148_v15 = vpack.c.bf16 %v10758_v32, %v10757_v7 }
 0x529   : > { %v4484_v8 = vpop.f32.mrf.mxu2  ;;  %v4718_v18 = vpop.f32.mrf.mxu3 }
 0x52a   : > { %v4549_v1 = vadd.f32 %v4484_v8, %v4314_v10  ;;  %v4251_v3 = vpop.f32.mrf.mxu1  ;;  %v13643_v8 = vpack.c.bf16 %v10818_v49, %v10817_v48  ;;  %v11710_v48 = vld [vmem:[%s15762_s1 + $0x180] sm:$0xff] }
 0x52b   : > { %v4315_v12 = vadd.f32 %v4251_v3, %v13254_v38  ;;  %v4617_v38 = vpack.c.bf16 %v10878_v27, %v10877_v61  ;;  %v11713_v27 = vld [vmem:[%s15762_s1 + $0x198] sm:$0xff]  ;;  %5766 = vmatpush.bf16.msra.mxu0 %v11710_v48 }
 0x52c   : > { %v4783_v45 = vadd.f32 %v4718_v18, %v4549_v1  ;;  %v4954_v55 = vpop.f32.mrf.mxu0  ;;  %5999 = vmatpush.bf16.msrb.mxu1 %v11713_v27 }
 0x52e   : > { %v13633_v23 = vadd.f32 %v4952_v31, %v4783_v45  ;;  %v13646_v31 = vpack.c.bf16 %v10938_v17, %v10937_v4  ;;  %v10759_v17 = vld [vmem:[%s11838_s16 + $0x1e5] sm:$0xff] }
 0x531   : > { %v4486_v28 = vpop.f32.mrf.mxu2  ;;  %v4720_v25 = vpop.f32.mrf.mxu3 }
 0x532   : > { %v4550_v29 = vadd.f32 %v4486_v28, %v4315_v12  ;;  %v4254_v10 = vpop.f32.mrf.mxu1  ;;  %v11715_v12 = vld [vmem:[%s15762_s1 + $0x1a8] sm:$0xff] }
 0x533   : > { %v4316_v18 = vadd.f32 %v4254_v10, %v13273_v46  ;;  %v11717_v46 = vld [vmem:[%s15762_s1 + $0x1b8] sm:$0xff]  ;;  %6233 = vmatpush.bf16.msrb.mxu2 %v11715_v12  ;;  %v10760_v28 = vld [vmem:[%s11838_s16 + $0x1ed] sm:$0xff]  ;;  %v10820_v10 = vld [vmem:[%s11838_s16 + $0x1a2] sm:$0xff] }
 0x534   : > { %v4784_v1 = vadd.f32 %v4720_v25, %v4550_v29  ;;  %v4957_v3 = vpop.f32.mrf.mxu0  ;;  %6371 = vmatpush.bf16.msrb.mxu3 %v11717_v46  ;;  %v10819_v25 = vld [vmem:[%s11838_s16 + $0x19a] sm:$0xff] }
 0x535   : > { %10787 = vmatmul.msk.bf16.gmra.mxu1 %vm397_vm0, %v4148_v15 }
 0x536   : > { %v13649_v45 = vadd.f32 %v4954_v55, %v4784_v1  ;;  %10847 = vmatmul.msk.bf16.gmra.mxu2 %vm397_vm0, %v13643_v8  ;;  %10907 = vmatmul.msk.bf16.gmra.mxu3 %vm397_vm0, %v4617_v38  ;;  %v10879_v38 = vld [vmem:[%s11838_s16 + $0x19b] sm:$0xff]  ;;  %v10940_v1 = vld [vmem:[%s11838_s16 + $0x1a4] sm:$0xff] }
 0x537   : > { %10967 = vmatmul.msk.bf16.gmra.mxu0 %vm397_vm0, %v13646_v31 }
 0x538   : > { %15968 = vst [vmem:[#allocation34_spill] sm:$0xff] %v13649_v45 }
 0x539   : > { %v4489_v29 = vpop.f32.mrf.mxu2  ;;  %v4723_v15 = vpop.f32.mrf.mxu3 }
 0x53a   : > { %v4551_v55 = vadd.f32 %v4489_v29, %v4316_v18  ;;  %v4256_v7 = vpop.f32.mrf.mxu1  ;;  %v10939_v18 = vld [vmem:[%s11838_s16 + $0x19c] sm:$0xff]  ;;  %v4149_v29 = vpack.c.bf16 %v10760_v28, %v10759_v17 }
 0x53b   : > { %v4317_v32 = vadd.f32 %v4256_v7, %v13286_v13  ;;  %v10880_v13 = vld [vmem:[%s11838_s16 + $0x1a3] sm:$0xff]  ;;  %v13679_v7 = vpack.c.bf16 %v10820_v10, %v10819_v25  ;;  %v13682_v48 = vpack.c.bf16 %v10940_v1, %v10939_v18 }
 0x53c   : > { %v4785_v49 = vadd.f32 %v4723_v15, %v4551_v55  ;;  %v4959_v61 = vpop.f32.mrf.mxu0  ;;  %v4618_v45 = vpack.c.bf16 %v10880_v13, %v10879_v38 }
 0x53e   : > { %v13669_v4 = vadd.f32 %v4957_v3, %v4785_v49 }
 0x540   : > { %15969 = vst [vmem:[#allocation38_spill] sm:$0xff] %v13669_v4 }
 0x541   : > { %v4491_v12 = vpop.f32.mrf.mxu2  ;;  %v4725_v46 = vpop.f32.mrf.mxu3 }
 0x542   : > { %v4552_v15 = vadd.f32 %v4491_v12, %v4317_v32  ;;  %v4259_v55 = vpop.f32.mrf.mxu1 }
 0x543   : > { %v4318_v3 = vadd.f32 %v4259_v55, %v13293_v56 }
 0x544   : > { %v4786_v49 = vadd.f32 %v4725_v46, %v4552_v15  ;;  %v4962_v4 = vpop.f32.mrf.mxu0 }
 0x545   : > { %10788 = vmatmul.msk.bf16.gmra.mxu1 %vm397_vm0, %v4149_v29 }
 0x546   : > { %v13685_v27 = vadd.f32 %v4959_v61, %v4786_v49  ;;  %10848 = vmatmul.msk.bf16.gmra.mxu2 %vm397_vm0, %v13679_v7  ;;  %10908 = vmatmul.msk.bf16.gmra.mxu3 %vm397_vm0, %v4618_v45 }
 0x547   : > { %10968 = vmatmul.msk.bf16.gmra.mxu0 %vm397_vm0, %v13682_v48 }
 0x549   : > { %v4494_v32 = vpop.f32.mrf.mxu2  ;;  %v4728_v17 = vpop.f32.mrf.mxu3 }
 0x54a   : > { %v4553_v28 = vadd.f32 %v4494_v32, %v4318_v3  ;;  %v4261_v56 = vpop.f32.mrf.mxu1 }
 0x54b   : > { %v4319_v25 = vadd.f32 %v4261_v56, %v13305_v35 }
 0x54c   : > { %v4787_v10 = vadd.f32 %v4728_v17, %v4553_v28  ;;  %v4964_v38 = vpop.f32.mrf.mxu0 }
 0x54e   : > { %v13693_v13 = vadd.f32 %v4962_v4, %v4787_v10 }
 0x551   : > { %v4496_v61 = vpop.f32.mrf.mxu2  ;;  %v4730_v18 = vpop.f32.mrf.mxu3 }
 0x552   : > { %v4554_v1 = vadd.f32 %v4496_v61, %v4319_v25  ;;  %v4264_v12 = vpop.f32.mrf.mxu1 }
 0x553   : > { %v4320_v46 = vadd.f32 %v4264_v12, %v13311_v62 }
 0x554   : > { %v4788_v45 = vadd.f32 %v4730_v18, %v4554_v1  ;;  %v4967_v29 = vpop.f32.mrf.mxu0 }
 0x555   : > { %11013 = vmatmul.msk.bf16.vlgmr.msra.gmra.mxu1 %vm397_vm0, %v13321_v24 }
 0x556   : > { %v13698_v15 = vadd.f32 %v4964_v38, %v4788_v45  ;;  %11041 = vmatmul.msk.bf16.vlgmr.msra.gmra.mxu2 %vm397_vm0, %v15908_v9  ;;  %11101 = vmatmul.msk.bf16.vlgmr.msra.gmra.mxu3 %vm397_vm0, %v13324_v47 }
 0x557   : > { %11161 = vmatmul.msk.bf16.vlgmr.msra.gmra.mxu0 %vm397_vm0, %v13345_v50 }
 0x559   : > { %v4499_v35 = vpop.f32.mrf.mxu2  ;;  %v4733_v4 = vpop.f32.mrf.mxu3 }
 0x55a   : > { %v4555_v55 = vadd.f32 %v4499_v35, %v4320_v46  ;;  %v4266_v62 = vpop.f32.mrf.mxu1 }
 0x55b   : > { %v4321_v3 = vadd.f32 %v4266_v62, %v13327_v26 }
 0x55c   : > { %v4789_v49 = vadd.f32 %v4733_v4, %v4555_v55  ;;  %v4969_v32 = vpop.f32.mrf.mxu0 }
 0x55e   : > { %v13707_v24 = vadd.f32 %v4967_v29, %v4789_v49 }
 0x561   : > { %v4501_v17 = vpop.f32.mrf.mxu2  ;;  %v4735_v28 = vpop.f32.mrf.mxu3 }
 0x562   : > { %v4556_v56 = vadd.f32 %v4501_v17, %v4321_v3  ;;  %v4269_v25 = vpop.f32.mrf.mxu1 }
 0x563   : > { %v4322_v10 = vadd.f32 %v4269_v25, %v13335_v33 }
 0x564   : > { %v4790_v47 = vadd.f32 %v4735_v28, %v4556_v56  ;;  %v4972_v38 = vpop.f32.mrf.mxu0 }
 0x565   : > { %11014 = vmatmul.msk.bf16.gmra.mxu1 %vm397_vm0, %v13345_v50 }
 0x566   : > { %v13712_v61 = vadd.f32 %v4969_v32, %v4790_v47  ;;  %11042 = vmatmul.msk.bf16.gmra.mxu2 %vm397_vm0, %v15909_v5  ;;  %11102 = vmatmul.msk.bf16.gmra.mxu3 %vm397_vm0, %v13348_v19 }
 0x567   : > { %11162 = vmatmul.msk.bf16.gmra.mxu0 %vm397_vm0, %v13369_v0 }
 0x569   : > { %v4504_v26 = vpop.f32.mrf.mxu2  ;;  %v4738_v18 = vpop.f32.mrf.mxu3 }
 0x56a   : > { %v4557_v1 = vadd.f32 %v4504_v26, %v4322_v10  ;;  %v4271_v33 = vpop.f32.mrf.mxu1 }
 0x56b   : > { %v4323_v12 = vadd.f32 %v4271_v33, %v13351_v20 }
 0x56c   : > { %v4791_v46 = vadd.f32 %v4738_v18, %v4557_v1  ;;  %v4974_v45 = vpop.f32.mrf.mxu0 }
 0x56e   : > { %v13721_v50 = vadd.f32 %v4972_v38, %v4791_v46 }
 0x571   : > { %v4506_v29 = vpop.f32.mrf.mxu2  ;;  %v4740_v35 = vpop.f32.mrf.mxu3 }
 0x572   : > { %v4558_v4 = vadd.f32 %v4506_v29, %v4323_v12  ;;  %v4274_v55 = vpop.f32.mrf.mxu1  ;;  %v15970_v12 = vld [vmem:[#allocation10_spill] sm:$0xff] }
 0x573   : > { %v4324_v62 = vadd.f32 %v4274_v55, %v13359_v30 }
 0x574   : > { %v4792_v19 = vadd.f32 %v4740_v35, %v4558_v4  ;;  %v4977_v3 = vpop.f32.mrf.mxu0  ;;  %v15972_v35 = vld [vmem:[#allocation4_spill] sm:$0xff] }
 0x575   : > { %11015 = vmatmul.msk.bf16.gmra.mxu1 %vm397_vm0, %v13369_v0 }
 0x576   : > { %v13726_v49 = vadd.f32 %v4974_v45, %v4792_v19  ;;  %11043 = vmatmul.msk.bf16.gmra.mxu2 %vm397_vm0, %v15910_v57  ;;  %11103 = vmatmul.msk.bf16.gmra.mxu3 %vm397_vm0, %v13372_v11 }
 0x577   : > { %11163 = vmatmul.msk.bf16.gmra.mxu0 %vm397_vm0, %v13393_v39 }
 0x579   : > { %v4509_v20 = vpop.f32.mrf.mxu2  ;;  %v4743_v32 = vpop.f32.mrf.mxu3 }
 0x57a   : > { %v4559_v17 = vadd.f32 %v4509_v20, %v4324_v62  ;;  %v4276_v30 = vpop.f32.mrf.mxu1 }
 0x57b   : > { %v4325_v28 = vadd.f32 %v4276_v30, %v13375_v58  ;;  %v15971_v58 = vld [vmem:[#allocation16_spill] sm:$0xff] }
 0x57c   : > { %v4793_v56 = vadd.f32 %v4743_v32, %v4559_v17  ;;  %v4979_v25 = vpop.f32.mrf.mxu0 }
 0x57e   : > { %v13735_v0 = vadd.f32 %v4977_v3, %v4793_v56 }
 0x581   : > { %v4511_v10 = vpop.f32.mrf.mxu2  ;;  %v4745_v47 = vpop.f32.mrf.mxu3 }
 0x582   : > { %v4560_v38 = vadd.f32 %v4511_v10, %v4325_v28  ;;  %v4279_v26 = vpop.f32.mrf.mxu1  ;;  %v15974_v10 = vld [vmem:[#allocation7_spill] sm:$0xff] }
 0x583   : > { %v4326_v18 = vadd.f32 %v4279_v26, %v13383_v59 }
 0x584   : > { %v4794_v11 = vadd.f32 %v4745_v47, %v4560_v38  ;;  %v4982_v1 = vpop.f32.mrf.mxu0 }
 0x585   : > { %11016 = vmatmul.msk.bf16.gmra.mxu1 %vm397_vm0, %v13393_v39 }
 0x586   : > { %v13740_v33 = vadd.f32 %v4979_v25, %v4794_v11  ;;  %11044 = vmatmul.msk.bf16.gmra.mxu2 %vm397_vm0, %v15970_v12  ;;  %11104 = vmatmul.msk.bf16.gmra.mxu3 %vm397_vm0, %v15971_v58  ;;  %v15973_v25 = vld [vmem:[#allocation13_spill] sm:$0xff] }
 0x587   : > { %11164 = vmatmul.msk.bf16.gmra.mxu0 %vm397_vm0, %v13417_v40 }
 0x589   : > { %v4514_v46 = vpop.f32.mrf.mxu2  ;;  %v4748_v45 = vpop.f32.mrf.mxu3 }
 0x58a   : > { %v4561_v29 = vadd.f32 %v4514_v46, %v4326_v18  ;;  %v4281_v59 = vpop.f32.mrf.mxu1  ;;  %v15975_v18 = vld [vmem:[#allocation17_spill] sm:$0xff] }
 0x58b   : > { %v4327_v4 = vadd.f32 %v4281_v59, %v15972_v35 }
 0x58c   : > { %v4795_v55 = vadd.f32 %v4748_v45, %v4561_v29  ;;  %v4984_v62 = vpop.f32.mrf.mxu0 }
 0x58e   : > { %v13749_v39 = vadd.f32 %v4982_v1, %v4795_v55 }
 0x591   : > { %v4516_v19 = vpop.f32.mrf.mxu2  ;;  %v4750_v3 = vpop.f32.mrf.mxu3 }
 0x592   : > { %v4562_v20 = vadd.f32 %v4516_v19, %v4327_v4  ;;  %v4284_v32 = vpop.f32.mrf.mxu1  ;;  %v15976_v19 = vld [vmem:[#allocation5_spill] sm:$0xff] }
 0x593   : > { %v4328_v17 = vadd.f32 %v4284_v32, %v13407_v63 }
 0x594   : > { %v4796_v30 = vadd.f32 %v4750_v3, %v4562_v20  ;;  %v4987_v28 = vpop.f32.mrf.mxu0 }
 0x595   : > { %11017 = vmatmul.msk.bf16.gmra.mxu1 %vm397_vm0, %v13417_v40 }
 0x596   : > { %v13754_v56 = vadd.f32 %v4984_v62, %v4796_v30  ;;  %11045 = vmatmul.msk.bf16.gmra.mxu2 %vm397_vm0, %v15973_v25  ;;  %11105 = vmatmul.msk.bf16.gmra.mxu3 %vm397_vm0, %v15974_v10 }
 0x597   : > { %11165 = vmatmul.msk.bf16.gmra.mxu0 %vm397_vm0, %v13441_v22 }
 0x599   : > { %v4519_v47 = vpop.f32.mrf.mxu2  ;;  %v4753_v38 = vpop.f32.mrf.mxu3 }
 0x59a   : > { %v4563_v26 = vadd.f32 %v4519_v47, %v4328_v17  ;;  %v4286_v63 = vpop.f32.mrf.mxu1  ;;  %v15977_v17 = vld [vmem:[#allocation20_spill] sm:$0xff] }
 0x59b   : > { %v4329_v11 = vadd.f32 %v4286_v63, %v15975_v18  ;;  %v15978_v18 = vld [vmem:[#allocation18_spill] sm:$0xff] }
 0x59c   : > { %v4797_v1 = vadd.f32 %v4753_v38, %v4563_v26  ;;  %v4989_v58 = vpop.f32.mrf.mxu0 }
 0x59e   : > { %v13763_v40 = vadd.f32 %v4987_v28, %v4797_v1 }
 0x5a1   : > { %v4521_v46 = vpop.f32.mrf.mxu2  ;;  %v4755_v45 = vpop.f32.mrf.mxu3 }
 0x5a2   : > { %v4564_v29 = vadd.f32 %v4521_v46, %v4329_v11  ;;  %v4289_v59 = vpop.f32.mrf.mxu1  ;;  %v15979_v46 = vld [vmem:[#allocation8_spill] sm:$0xff] }
 0x5a3   : > { %v4330_v35 = vadd.f32 %v4289_v59, %v13431_v6  ;;  %v11716_v59 = vld [vmem:[%s15762_s1 + $0x1b0] sm:$0xff] }
 0x5a4   : > { %v4798_v4 = vadd.f32 %v4755_v45, %v4564_v29  ;;  %v4992_v55 = vpop.f32.mrf.mxu0  ;;  %v15980_v45 = vld [vmem:[#allocation19_spill] sm:$0xff]  ;;  %6372 = vmatpush.bf16.msrb.mxu3 %v11716_v59 }
 0x5a5   : > { %11018 = vmatmul.msk.bf16.gmra.mxu1 %vm397_vm0, %v13441_v22  ;;  %v11714_v29 = vld [vmem:[%s15762_s1 + $0x1a0] sm:$0xff] }
 0x5a6   : > { %v13768_v62 = vadd.f32 %v4989_v58, %v4798_v4  ;;  %11046 = vmatmul.msk.bf16.gmra.mxu2 %vm397_vm0, %v15976_v19  ;;  %11106 = vmatmul.msk.bf16.gmra.mxu3 %vm397_vm0, %v13444_v44 }
 0x5a7   : > { %11166 = vmatmul.msk.bf16.gmra.mxu0 %vm397_vm0, %v13474_v52  ;;  %6234 = vmatpush.bf16.msrb.mxu2 %v11714_v29 }
 0x5a9   : > { %v4524_v3 = vpop.f32.mrf.mxu2  ;;  %v4758_v20 = vpop.f32.mrf.mxu3 }
 0x5aa   : > { %v4565_v32 = vadd.f32 %v4524_v3, %v4330_v35  ;;  %v4291_v6 = vpop.f32.mrf.mxu1  ;;  %v15981_v3 = vld [vmem:[#allocation23_spill] sm:$0xff] }
 0x5ab   : > { %v4331_v30 = vadd.f32 %v4291_v6, %v15977_v17  ;;  %v11712_v17 = vld [vmem:[%s15762_s1 + $0x190] sm:$0xff] }
 0x5ac   : > { %v4799_v28 = vadd.f32 %v4758_v20, %v4565_v32  ;;  %v4994_v10 = vpop.f32.mrf.mxu0  ;;  %6000 = vmatpush.bf16.msrb.mxu1 %v11712_v17 }
 0x5ae   : > { %v13777_v22 = vadd.f32 %v4992_v55, %v4799_v28 }
 0x5b1   : > { %v4526_v47 = vpop.f32.mrf.mxu2  ;;  %v4760_v38 = vpop.f32.mrf.mxu3 }
 0x5b2   : > { %v4566_v26 = vadd.f32 %v4526_v47, %v4331_v30  ;;  %v4294_v63 = vpop.f32.mrf.mxu1 }
 0x5b3   : > { %v4332_v11 = vadd.f32 %v4294_v63, %v15978_v18 }
 0x5b4   : > { %v4800_v44 = vadd.f32 %v4760_v38, %v4566_v26  ;;  %v4997_v1 = vpop.f32.mrf.mxu0 }
 0x5b5   : > { %11019 = vmatmul.msk.bf16.gmra.mxu1 %vm397_vm0, %v13474_v52 }
 0x5b6   : > { %v13782_v58 = vadd.f32 %v4994_v10, %v4800_v44  ;;  %11047 = vmatmul.msk.bf16.gmra.mxu2 %vm397_vm0, %v15979_v46  ;;  %11107 = vmatmul.msk.bf16.gmra.mxu3 %vm397_vm0, %v15980_v45  ;;  %v15983_v45 = vld [vmem:[#allocation21_spill] sm:$0xff] }
 0x5b7   : > { %11167 = vmatmul.msk.bf16.gmra.mxu0 %vm397_vm0, %v13501_v53 }
 0x5b9   : > { %v4529_v52 = vpop.f32.mrf.mxu2  ;;  %v4763_v35 = vpop.f32.mrf.mxu3 }
 0x5ba   : > { %v4567_v4 = vadd.f32 %v4529_v52, %v4332_v11  ;;  %v4296_v55 = vpop.f32.mrf.mxu1  ;;  %v11721_v11 = vld [vmem:[%s15764_s3 + $0x18] sm:$0xff] }
 0x5bb   : > { %v4333_v20 = vadd.f32 %v4296_v55, %v15981_v3  ;;  %6813 = vmatpush.bf16.msrb.mxu0 %v11721_v11 }
 0x5bc   : > { %v4801_v32 = vadd.f32 %v4763_v35, %v4567_v4  ;;  %v4999_v6 = vpop.f32.mrf.mxu0  ;;  %v15984_v35 = vld [vmem:[#allocation22_spill] sm:$0xff] }
 0x5be   : > { %v13800_v30 = vadd.f32 %v4997_v1, %v4801_v32  ;;  %v15982_v1 = vld [vmem:[#allocation11_spill] sm:$0xff] }
 0x5c1   : > { %v4531_v28 = vpop.f32.mrf.mxu2  ;;  %v4765_v10 = vpop.f32.mrf.mxu3 }
 0x5c2   : > { %v4568_v47 = vadd.f32 %v4531_v28, %v4333_v20  ;;  %v4299_v38 = vpop.f32.mrf.mxu1 }
 0x5c3   : > { %v4334_v26 = vadd.f32 %v4299_v38, %v13491_v14 }
 0x5c4   : > { %v4802_v63 = vadd.f32 %v4765_v10, %v4568_v47  ;;  %v5002_v18 = vpop.f32.mrf.mxu0 }
 0x5c5   : > { %11020 = vmatmul.msk.bf16.gmra.mxu1 %vm397_vm0, %v13501_v53 }
 0x5c6   : > { %v13808_v44 = vadd.f32 %v4999_v6, %v4802_v63  ;;  %11048 = vmatmul.msk.bf16.gmra.mxu2 %vm397_vm0, %v15982_v1  ;;  %11108 = vmatmul.msk.bf16.gmra.mxu3 %vm397_vm0, %v15983_v45  ;;  %v15986_v63 = vld [vmem:[#allocation26_spill] sm:$0xff] }
 0x5c7   : > { %11168 = vmatmul.msk.bf16.gmra.mxu0 %vm397_vm0, %v13525_v34 }
 0x5c9   : > { %v4534_v14 = vpop.f32.mrf.mxu2  ;;  %v4768_v29 = vpop.f32.mrf.mxu3 }
 0x5ca   : > { %v4569_v59 = vadd.f32 %v4534_v14, %v4334_v26  ;;  %v4301_v52 = vpop.f32.mrf.mxu1  ;;  %v15985_v26 = vld [vmem:[#allocation14_spill] sm:$0xff]  ;;  %v15987_v14 = vld [vmem:[#allocation24_spill] sm:$0xff] }
 0x5cb   : > { %v4335_v4 = vadd.f32 %v4301_v52, %v15984_v35 }
 0x5cc   : > { %v4803_v55 = vadd.f32 %v4768_v29, %v4569_v59  ;;  %v5004_v53 = vpop.f32.mrf.mxu0 }
 0x5ce   : > { %v13817_v3 = vadd.f32 %v5002_v18, %v4803_v55 }
 0x5d1   : > { %v4536_v20 = vpop.f32.mrf.mxu2  ;;  %v4770_v32 = vpop.f32.mrf.mxu3 }
 0x5d2   : > { %v4570_v6 = vadd.f32 %v4536_v20, %v4335_v4  ;;  %v5161_v17 = vpop.f32.mrf.mxu1 }
 0x5d3   : > { %v5241_v28 = vadd.f32 %v5161_v17, %v13515_v41 }
 0x5d4   : > { %v4804_v10 = vadd.f32 %v4770_v32, %v4570_v6  ;;  %v5768_v47 = vpop.f32.mrf.mxu0 }
 0x5d5   : > { %11021 = vmatmul.msk.bf16.gmra.mxu1 %vm397_vm0, %v13525_v34 }
 0x5d6   : > { %v13822_v38 = vadd.f32 %v5004_v53, %v4804_v10  ;;  %11049 = vmatmul.msk.bf16.gmra.mxu2 %vm397_vm0, %v15985_v26  ;;  %11109 = vmatmul.msk.bf16.gmra.mxu3 %vm397_vm0, %v15986_v63  ;;  %v15989_v10 = vld [vmem:[#allocation25_spill] sm:$0xff] }
 0x5d7   : > { %11169 = vmatmul.msk.bf16.gmra.mxu0 %vm397_vm0, %v13549_v54 }
 0x5d9   : > { %v5299_v18 = vpop.f32.mrf.mxu2  ;;  %v5533_v11 = vpop.f32.mrf.mxu3 }
 0x5da   : > { %v5379_v45 = vadd.f32 %v5299_v18, %v5241_v28  ;;  %v5163_v41 = vpop.f32.mrf.mxu1  ;;  %v15988_v28 = vld [vmem:[#allocation6_spill] sm:$0xff] }
 0x5db   : > { %v5242_v29 = vadd.f32 %v5163_v41, %v15987_v14 }
 0x5dc   : > { %v5613_v59 = vadd.f32 %v5533_v11, %v5379_v45  ;;  %v5770_v52 = vpop.f32.mrf.mxu0  ;;  %v15990_v11 = vld [vmem:[#allocation31_spill] sm:$0xff] }
 0x5de   : > { %v13831_v34 = vadd.f32 %v5768_v47, %v5613_v59 }
 0x5e1   : > { %v5301_v35 = vpop.f32.mrf.mxu2  ;;  %v5535_v4 = vpop.f32.mrf.mxu3 }
 0x5e2   : > { %v5380_v55 = vadd.f32 %v5301_v35, %v5242_v29  ;;  %v5166_v53 = vpop.f32.mrf.mxu1 }
 0x5e3   : > { %v5243_v20 = vadd.f32 %v5166_v53, %v13539_v16 }
 0x5e4   : > { %v5614_v32 = vadd.f32 %v5535_v4, %v5380_v55  ;;  %v5773_v6 = vpop.f32.mrf.mxu0 }
 0x5e5   : > { %11022 = vmatmul.msk.bf16.gmra.mxu1 %vm397_vm0, %v13549_v54 }
 0x5e6   : > { %v13836_v17 = vadd.f32 %v5770_v52, %v5614_v32  ;;  %11050 = vmatmul.msk.bf16.gmra.mxu2 %vm397_vm0, %v15988_v28  ;;  %11110 = vmatmul.msk.bf16.gmra.mxu3 %vm397_vm0, %v15989_v10 }
 0x5e7   : > { %11170 = vmatmul.msk.bf16.gmra.mxu0 %vm397_vm0, %v13573_v51 }
 0x5e9   : > { %v5304_v47 = vpop.f32.mrf.mxu2  ;;  %v5538_v63 = vpop.f32.mrf.mxu3 }
 0x5ea   : > { %v5381_v18 = vadd.f32 %v5304_v47, %v5243_v20  ;;  %v5168_v16 = vpop.f32.mrf.mxu1  ;;  %v15991_v20 = vld [vmem:[#allocation9_spill] sm:$0xff] }
 0x5eb   : > { %v5244_v45 = vadd.f32 %v5168_v16, %v15990_v11 }
 0x5ec   : > { %v5615_v41 = vadd.f32 %v5538_v63, %v5381_v18  ;;  %v5775_v14 = vpop.f32.mrf.mxu0  ;;  %v15992_v63 = vld [vmem:[#allocation28_spill] sm:$0xff] }
 0x5ee   : > { %v13845_v54 = vadd.f32 %v5773_v6, %v5615_v41 }
 0x5f1   : > { %v5306_v29 = vpop.f32.mrf.mxu2  ;;  %v5540_v59 = vpop.f32.mrf.mxu3 }
 0x5f2   : > { %v5382_v52 = vadd.f32 %v5306_v29, %v5244_v45  ;;  %v5171_v35 = vpop.f32.mrf.mxu1 }
 0x5f3   : > { %v5245_v4 = vadd.f32 %v5171_v35, %v13563_v60 }
 0x5f4   : > { %v5616_v55 = vadd.f32 %v5540_v59, %v5382_v52  ;;  %v5778_v53 = vpop.f32.mrf.mxu0 }
 0x5f5   : > { %11023 = vmatmul.msk.bf16.gmra.mxu1 %vm397_vm0, %v13573_v51 }
 0x5f6   : > { %v13850_v32 = vadd.f32 %v5775_v14, %v5616_v55  ;;  %11051 = vmatmul.msk.bf16.gmra.mxu2 %vm397_vm0, %v15991_v20  ;;  %11111 = vmatmul.msk.bf16.gmra.mxu3 %vm397_vm0, %v13576_v2 }
 0x5f7   : > { %11171 = vmatmul.msk.bf16.gmra.mxu0 %vm397_vm0, %v13595_v21 }
 0x5f9   : > { %v5309_v6 = vpop.f32.mrf.mxu2  ;;  %v5543_v10 = vpop.f32.mrf.mxu3 }
 0x5fa   : > { %v5383_v47 = vadd.f32 %v5309_v6, %v5245_v4  ;;  %v5173_v60 = vpop.f32.mrf.mxu1  ;;  %v15993_v4 = vld [vmem:[#allocation12_spill] sm:$0xff] }
 0x5fb   : > { %v5246_v18 = vadd.f32 %v5173_v60, %v15992_v63 }
 0x5fc   : > { %v5617_v16 = vadd.f32 %v5543_v10, %v5383_v47  ;;  %v5780_v11 = vpop.f32.mrf.mxu0  ;;  %v15994_v10 = vld [vmem:[#allocation29_spill] sm:$0xff] }
 0x5fe   : > { %v13859_v51 = vadd.f32 %v5778_v53, %v5617_v16 }
 0x601   : > { %v5311_v45 = vpop.f32.mrf.mxu2  ;;  %v5545_v41 = vpop.f32.mrf.mxu3 }
 0x602   : > { %v5384_v14 = vadd.f32 %v5311_v45, %v5246_v18  ;;  %v5176_v29 = vpop.f32.mrf.mxu1 }
 0x603   : > { %v5247_v59 = vadd.f32 %v5176_v29, %v13587_v37 }
 0x604   : > { %v5618_v2 = vadd.f32 %v5545_v41, %v5384_v14  ;;  %v5783_v52 = vpop.f32.mrf.mxu0 }
 0x605   : > { %11024 = vmatmul.msk.bf16.gmra.mxu1 %vm397_vm0, %v13595_v21 }
 0x606   : > { %v13864_v35 = vadd.f32 %v5780_v11, %v5618_v2  ;;  %11052 = vmatmul.msk.bf16.gmra.mxu2 %vm397_vm0, %v15993_v4  ;;  %11112 = vmatmul.msk.bf16.gmra.mxu3 %vm397_vm0, %v13598_v43  ;;  %v15996_v2 = vld [vmem:[#allocation35_spill] sm:$0xff] }
 0x607   : > { %11172 = vmatmul.msk.bf16.gmra.mxu0 %vm397_vm0, %v13618_v42 }
 0x609   : > { %v5314_v55 = vpop.f32.mrf.mxu2  ;;  %v5548_v53 = vpop.f32.mrf.mxu3 }
 0x60a   : > { %v5385_v6 = vadd.f32 %v5314_v55, %v5247_v59  ;;  %v5178_v37 = vpop.f32.mrf.mxu1  ;;  %v15995_v59 = vld [vmem:[#allocation15_spill] sm:$0xff] }
 0x60b   : > { %v5248_v47 = vadd.f32 %v5178_v37, %v15994_v10 }
 0x60c   : > { %v5619_v60 = vadd.f32 %v5548_v53, %v5385_v6  ;;  %v5785_v63 = vpop.f32.mrf.mxu0  ;;  %v15997_v6 = vld [vmem:[#allocation33_spill] sm:$0xff] }
 0x60e   : > { %v13873_v21 = vadd.f32 %v5783_v52, %v5619_v60 }
 0x611   : > { %v5316_v18 = vpop.f32.mrf.mxu2  ;;  %v5550_v16 = vpop.f32.mrf.mxu3 }
 0x612   : > { %v5386_v11 = vadd.f32 %v5316_v18, %v5248_v47  ;;  %v5181_v45 = vpop.f32.mrf.mxu1 }
 0x613   : > { %v5249_v41 = vadd.f32 %v5181_v45, %v13610_v36 }
 0x614   : > { %v5620_v43 = vadd.f32 %v5550_v16, %v5386_v11  ;;  %v5788_v14 = vpop.f32.mrf.mxu0 }
 0x615   : > { %11025 = vmatmul.msk.bf16.gmra.mxu1 %vm397_vm0, %v13618_v42 }
 0x616   : > { %v13878_v29 = vadd.f32 %v5785_v63, %v5620_v43  ;;  %11053 = vmatmul.msk.bf16.gmra.mxu2 %vm397_vm0, %v15995_v59  ;;  %11113 = vmatmul.msk.bf16.gmra.mxu3 %vm397_vm0, %v15996_v2 }
 0x617   : > { %11173 = vmatmul.msk.bf16.gmra.mxu0 %vm397_vm0, %v13643_v8 }
 0x619   : > { %v5319_v52 = vpop.f32.mrf.mxu2  ;;  %v5553_v55 = vpop.f32.mrf.mxu3 }
 0x61a   : > { %v5387_v53 = vadd.f32 %v5319_v52, %v5249_v41  ;;  %v5183_v36 = vpop.f32.mrf.mxu1  ;;  %v15999_v41 = vld [vmem:[#allocation27_spill] sm:$0xff] }
 0x61b   : > { %v5250_v37 = vadd.f32 %v5183_v36, %v15997_v6 }
 0x61c   : > { %v5621_v10 = vadd.f32 %v5553_v55, %v5387_v53  ;;  %v13887_v47 = vpop.f32.mrf.mxu0  ;;  %v16000_v55 = vld [vmem:[#allocation34_spill] sm:$0xff] }
 0x61d   : > { %15998 = vst [vmem:[#allocation36_spill] sm:$0xff] %v13887_v47 }
 0x61e   : > { %v13889_v42 = vadd.f32 %v5788_v14, %v5621_v10  ;;  %v11146_v10 = vld [vmem:[%s11838_s16 + $0x1ba] sm:$0xff] }
 0x621   : > { %v5321_v60 = vpop.f32.mrf.mxu2  ;;  %v5555_v63 = vpop.f32.mrf.mxu3 }
 0x622   : > { %v5388_v18 = vadd.f32 %v5321_v60, %v5250_v37  ;;  %v5186_v16 = vpop.f32.mrf.mxu1 }
 0x623   : > { %v5251_v11 = vadd.f32 %v5186_v16, %v13633_v23  ;;  %v16002_v16 = vld [vmem:[#allocation38_spill] sm:$0xff] }
 0x624   : > { %v13892_v45 = vadd.f32 %v5555_v63, %v5388_v18  ;;  %v5793_v43 = vpop.f32.mrf.mxu0 }
 0x625   : > { %11026 = vmatmul.msk.bf16.gmra.mxu1 %vm397_vm0, %v13643_v8  ;;  %v11145_v8 = vld [vmem:[%s11838_s16 + $0x1b2] sm:$0xff] }
 0x626   : > { %11054 = vmatmul.msk.bf16.gmra.mxu2 %vm397_vm0, %v15999_v41  ;;  %11114 = vmatmul.msk.bf16.gmra.mxu3 %vm397_vm0, %v13646_v31  ;;  %v5692_v47 = vpack.c.bf16 %v11146_v10, %v11145_v8 }
 0x627   : > { %11174 = vmatmul.msk.bf16.gmra.mxu0 %vm397_vm0, %v13679_v7 }
 0x629   : > { %v5324_v14 = vpop.f32.mrf.mxu2  ;;  %v5558_v2 = vpop.f32.mrf.mxu3 }
 0x62a   : > { %v5389_v52 = vadd.f32 %v5324_v14, %v5251_v11  ;;  %v5188_v23 = vpop.f32.mrf.mxu1 }
 0x62b   : > { %v5252_v53 = vadd.f32 %v5188_v23, %v16000_v55 }
 0x62c   : > { %v5623_v36 = vadd.f32 %v5558_v2, %v5389_v52  ;;  %v13903_v6 = vpop.f32.mrf.mxu0 }
 0x62d   : > { %16001 = vst [vmem:[#allocation37_spill] sm:$0xff] %v13903_v6 }
 0x62e   : > { %v13905_v37 = vadd.f32 %v5793_v43, %v5623_v36  ;;  %v16004_v43 = vld [vmem:[#allocation30_spill] sm:$0xff] }
 0x631   : > { %v5326_v60 = vpop.f32.mrf.mxu2  ;;  %v5560_v63 = vpop.f32.mrf.mxu3 }
 0x632   : > { %v5390_v18 = vadd.f32 %v5326_v60, %v5252_v53  ;;  %v5191_v31 = vpop.f32.mrf.mxu1  ;;  %v11088_v60 = vld [vmem:[%s11838_s16 + $0x1bc] sm:$0xff] }
 0x633   : > { %v5253_v41 = vadd.f32 %v5191_v31, %v16002_v16 }
 0x634   : > { %v13910_v11 = vadd.f32 %v5560_v63, %v5390_v18  ;;  %v5798_v14 = vpop.f32.mrf.mxu0  ;;  %v11147_v63 = vld [vmem:[%s11838_s16 + $0x1ca] sm:$0xff]  ;;  %v11148_v18 = vld [vmem:[%s11838_s16 + $0x1d2] sm:$0xff] }
 0x635   : > { %11027 = vmatmul.msk.bf16.gmra.mxu1 %vm397_vm0, %v13679_v7  ;;  %v11087_v7 = vld [vmem:[%s11838_s16 + $0x1b4] sm:$0xff] }
 0x636   : > { %16003 = vst [vmem:[#allocation41_spill] sm:$0xff] %v13910_v11  ;;  %11055 = vmatmul.msk.bf16.gmra.mxu2 %vm397_vm0, %v16004_v43  ;;  %11115 = vmatmul.msk.bf16.gmra.mxu3 %vm397_vm0, %v13682_v48  ;;  %v13928_v6 = vpack.c.bf16 %v11088_v60, %v11087_v7  ;;  %v11177_v60 = vld [vmem:[%s11838_s16 + $0x63] sm:$0xff] }
 0x637   : > { %11175 = vmatmul.msk.bf16.gmra.mxu0 %vm397_vm0, %v5692_v47 }
 0x639   : > { %v5329_v2 = vpop.f32.mrf.mxu2  ;;  %v5563_v52 = vpop.f32.mrf.mxu3 }
 0x63a   : > { %v5391_v23 = vadd.f32 %v5329_v2, %v5253_v41  ;;  %v5193_v55 = vpop.f32.mrf.mxu1  ;;  %v5693_v2 = vpack.c.bf16 %v11148_v18, %v11147_v63  ;;  %v11178_v63 = vld [vmem:[%s11838_s16 + $0x6b] sm:$0xff] }
 0x63b   : > { %v5254_v53 = vadd.f32 %v5193_v55, %v13685_v27  ;;  %v11237_v18 = vld [vmem:[%s11838_s16 + $0x64] sm:$0xff] }
 0x63c   : > { %v5625_v36 = vadd.f32 %v5563_v52, %v5391_v23  ;;  %v13920_v8 = vpop.f32.mrf.mxu0  ;;  %v16006_v52 = vld [vmem:[#allocation32_spill] sm:$0xff] }
 0x63d   : > { %16005 = vst [vmem:[#allocation39_spill] sm:$0xff] %v13920_v8 }
 0x63e   : > { %v13922_v10 = vadd.f32 %v5798_v14, %v5625_v36  ;;  %v11720_v14 = vld [vmem:[%s15764_s3 + $0x10] sm:$0xff] }
 0x63f   : > { %6814 = vmatpush.bf16.msrb.mxu0 %v11720_v14 }
 0x641   : > { %v5331_v31 = vpop.f32.mrf.mxu2  ;;  %v5565_v16 = vpop.f32.mrf.mxu3 }
 0x642   : > { %v5392_v48 = vadd.f32 %v5331_v31, %v5254_v53  ;;  %v5196_v43 = vpop.f32.mrf.mxu1  ;;  %v11238_v31 = vld [vmem:[%s11838_s16 + $0x6c] sm:$0xff] }
 0x643   : > { %v5255_v41 = vadd.f32 %v5196_v43, %v13693_v13  ;;  %v6146_v8 = vpack.c.bf16 %v11238_v31, %v11237_v18  ;;  %v11180_v18 = vld [vmem:[%s11838_s16 + $0x83] sm:$0xff] }
 0x644   : > { %v13931_v11 = vadd.f32 %v5565_v16, %v5392_v48  ;;  %v5803_v27 = vpop.f32.mrf.mxu0  ;;  %v11239_v31 = vld [vmem:[%s11838_s16 + $0x7c] sm:$0xff] }
 0x645   : > { %11028 = vmatmul.msk.bf16.gmra.mxu1 %vm397_vm0, %v5692_v47 }
 0x646   : > { %11056 = vmatmul.msk.bf16.gmra.mxu2 %vm397_vm0, %v16006_v52  ;;  %11116 = vmatmul.msk.bf16.gmra.mxu3 %vm397_vm0, %v13928_v6  ;;  %v5912_v52 = vpack.c.bf16 %v11178_v63, %v11177_v60  ;;  %v11179_v63 = vld [vmem:[%s11838_s16 + $0x7b] sm:$0xff] }
 0x647   : > { %11176 = vmatmul.msk.bf16.gmra.mxu0 %vm397_vm0, %v5693_v2 }
 0x649   : > { %v5334_v13 = vpop.f32.mrf.mxu2  ;;  %v5568_v43 = vpop.f32.mrf.mxu3 }
 0x64a   : > { %v5393_v23 = vadd.f32 %v5334_v13, %v5255_v41  ;;  %v5198_v55 = vpop.f32.mrf.mxu1 }
 0x64b   : > { %v5256_v53 = vadd.f32 %v5198_v55, %v13698_v15 }
 0x64c   : > { %v5627_v36 = vadd.f32 %v5568_v43, %v5393_v23  ;;  %v13943_v7 = vpop.f32.mrf.mxu0 }
 0x64e   : > { %v13945_v47 = vadd.f32 %v5803_v27, %v5627_v36 }
 0x651   : > { %v5336_v16 = vpop.f32.mrf.mxu2  ;;  %v5570_v48 = vpop.f32.mrf.mxu3 }
 0x652   : > { %v5394_v2 = vadd.f32 %v5336_v16, %v5256_v53  ;;  %v5201_v14 = vpop.f32.mrf.mxu1 }
 0x653   : > { %v5257_v41 = vadd.f32 %v5201_v14, %v13707_v24 }
 0x654   : > { %v13952_v15 = vadd.f32 %v5570_v48, %v5394_v2  ;;  %v5808_v27 = vpop.f32.mrf.mxu0  ;;  %v5913_v48 = vpack.c.bf16 %v11180_v18, %v11179_v63  ;;  %v11181_v18 = vld [vmem:[%s11838_s16 + $0x93] sm:$0xff] }
 0x655   : > { %11221 = vmatmul.msk.bf16.vlgmr.msrb.gmra.mxu1 %vm397_vm0, %v5912_v52  ;;  %v11240_v52 = vld [vmem:[%s11838_s16 + $0x84] sm:$0xff] }
 0x656   : > { %11281 = vmatmul.msk.bf16.vlgmr.msrb.gmra.mxu2 %vm397_vm0, %v6146_v8  ;;  %11309 = vmatmul.msk.bf16.vlgmr.msrb.gmra.mxu3 %vm397_vm0, %v15908_v9  ;;  %v6147_v14 = vpack.c.bf16 %v11240_v52, %v11239_v31  ;;  %v11182_v31 = vld [vmem:[%s11838_s16 + $0x9b] sm:$0xff] }
 0x657   : > { %v11241_v52 = vld [vmem:[%s11838_s16 + $0x94] sm:$0xff] }
 0x659   : > { %v5339_v13 = vpop.f32.mrf.mxu2  ;;  %v5573_v43 = vpop.f32.mrf.mxu3 }
 0x65a   : > { %v5395_v23 = vadd.f32 %v5339_v13, %v5257_v41  ;;  %v5203_v55 = vpop.f32.mrf.mxu1 }
 0x65b   : > { %v5258_v53 = vadd.f32 %v5203_v55, %v13712_v61 }
 0x65c   : > { %v5629_v36 = vadd.f32 %v5573_v43, %v5395_v23  ;;  %v13959_v24 = vpop.f32.mrf.mxu0 }
 0x65e   : > { %v13961_v60 = vadd.f32 %v5808_v27, %v5629_v36 }
 0x661   : > { %v5341_v16 = vpop.f32.mrf.mxu2  ;;  %v5575_v8 = vpop.f32.mrf.mxu3 }
 0x662   : > { %v5396_v2 = vadd.f32 %v5341_v16, %v5258_v53  ;;  %v5206_v9 = vpop.f32.mrf.mxu1  ;;  %v11242_v16 = vld [vmem:[%s11838_s16 + $0x9c] sm:$0xff] }
 0x663   : > { %v5259_v41 = vadd.f32 %v5206_v9, %v13721_v50 }
 0x664   : > { %v13968_v61 = vadd.f32 %v5575_v8, %v5396_v2  ;;  %v5813_v27 = vpop.f32.mrf.mxu0  ;;  %v5914_v2 = vpack.c.bf16 %v11182_v31, %v11181_v18  ;;  %v11183_v31 = vld [vmem:[%s11838_s16 + $0xab] sm:$0xff] }
 0x665   : > { %11222 = vmatmul.msk.bf16.gmra.mxu1 %vm397_vm0, %v5913_v48 }
 0x666   : > { %11282 = vmatmul.msk.bf16.gmra.mxu2 %vm397_vm0, %v6147_v14  ;;  %11310 = vmatmul.msk.bf16.gmra.mxu3 %vm397_vm0, %v15909_v5  ;;  %v6148_v14 = vpack.c.bf16 %v11242_v16, %v11241_v52  ;;  %v11184_v52 = vld [vmem:[%s11838_s16 + $0xb3] sm:$0xff] }
 0x667   : > { %v11243_v16 = vld [vmem:[%s11838_s16 + $0xac] sm:$0xff] }
 0x669   : > { %v5344_v13 = vpop.f32.mrf.mxu2  ;;  %v5578_v43 = vpop.f32.mrf.mxu3 }
 0x66a   : > { %v5397_v23 = vadd.f32 %v5344_v13, %v5259_v41  ;;  %v5208_v55 = vpop.f32.mrf.mxu1 }
 0x66b   : > { %v5260_v53 = vadd.f32 %v5208_v55, %v13726_v49 }
 0x66c   : > { %v5631_v36 = vadd.f32 %v5578_v43, %v5397_v23  ;;  %v13975_v50 = vpop.f32.mrf.mxu0 }
 0x66e   : > { %v13977_v63 = vadd.f32 %v5813_v27, %v5631_v36 }
 0x671   : > { %v5346_v8 = vpop.f32.mrf.mxu2  ;;  %v5580_v48 = vpop.f32.mrf.mxu3 }
 0x672   : > { %v5398_v9 = vadd.f32 %v5346_v8, %v5260_v53  ;;  %v5211_v5 = vpop.f32.mrf.mxu1  ;;  %v11244_v8 = vld [vmem:[%s11838_s16 + $0xb4] sm:$0xff] }
 0x673   : > { %v5261_v41 = vadd.f32 %v5211_v5, %v13735_v0 }
 0x674   : > { %v13984_v49 = vadd.f32 %v5580_v48, %v5398_v9  ;;  %v5818_v27 = vpop.f32.mrf.mxu0  ;;  %v5915_v9 = vpack.c.bf16 %v11184_v52, %v11183_v31  ;;  %v11185_v52 = vld [vmem:[%s11838_s16 + $0xc3] sm:$0xff] }
 0x675   : > { %11223 = vmatmul.msk.bf16.gmra.mxu1 %vm397_vm0, %v5914_v2 }
 0x676   : > { %11283 = vmatmul.msk.bf16.gmra.mxu2 %vm397_vm0, %v6148_v14  ;;  %11311 = vmatmul.msk.bf16.gmra.mxu3 %vm397_vm0, %v15910_v57  ;;  %v6149_v14 = vpack.c.bf16 %v11244_v8, %v11243_v16  ;;  %v11186_v16 = vld [vmem:[%s11838_s16 + $0xcb] sm:$0xff] }
 0x677   : > { %v11245_v8 = vld [vmem:[%s11838_s16 + $0xc4] sm:$0xff] }
 0x679   : > { %v5349_v13 = vpop.f32.mrf.mxu2  ;;  %v5583_v43 = vpop.f32.mrf.mxu3 }
 0x67a   : > { %v5399_v23 = vadd.f32 %v5349_v13, %v5261_v41  ;;  %v5213_v55 = vpop.f32.mrf.mxu1 }
 0x67b   : > { %v5262_v53 = vadd.f32 %v5213_v55, %v13740_v33 }
 0x67c   : > { %v5633_v36 = vadd.f32 %v5583_v43, %v5399_v23  ;;  %v13991_v0 = vpop.f32.mrf.mxu0 }
 0x67e   : > { %v13993_v18 = vadd.f32 %v5818_v27, %v5633_v36 }
 0x681   : > { %v5351_v48 = vpop.f32.mrf.mxu2  ;;  %v5585_v2 = vpop.f32.mrf.mxu3 }
 0x682   : > { %v5400_v5 = vadd.f32 %v5351_v48, %v5262_v53  ;;  %v5216_v57 = vpop.f32.mrf.mxu1  ;;  %v11246_v48 = vld [vmem:[%s11838_s16 + $0xcc] sm:$0xff] }
 0x683   : > { %v5263_v41 = vadd.f32 %v5216_v57, %v13749_v39 }
 0x684   : > { %v14000_v33 = vadd.f32 %v5585_v2, %v5400_v5  ;;  %v5823_v27 = vpop.f32.mrf.mxu0  ;;  %v5916_v5 = vpack.c.bf16 %v11186_v16, %v11185_v52  ;;  %v11187_v16 = vld [vmem:[%s11838_s16 + $0xdb] sm:$0xff] }
 0x685   : > { %11224 = vmatmul.msk.bf16.gmra.mxu1 %vm397_vm0, %v5915_v9 }
 0x686   : > { %11284 = vmatmul.msk.bf16.gmra.mxu2 %vm397_vm0, %v6149_v14  ;;  %11312 = vmatmul.msk.bf16.gmra.mxu3 %vm397_vm0, %v15970_v12  ;;  %v6150_v14 = vpack.c.bf16 %v11246_v48, %v11245_v8  ;;  %v11188_v8 = vld [vmem:[%s11838_s16 + $0xe3] sm:$0xff] }
 0x687   : > { %v11247_v48 = vld [vmem:[%s11838_s16 + $0xdc] sm:$0xff] }
 0x689   : > { %v5354_v13 = vpop.f32.mrf.mxu2  ;;  %v5588_v43 = vpop.f32.mrf.mxu3 }
 0x68a   : > { %v5401_v23 = vadd.f32 %v5354_v13, %v5263_v41  ;;  %v5218_v55 = vpop.f32.mrf.mxu1 }
 0x68b   : > { %v5264_v53 = vadd.f32 %v5218_v55, %v13754_v56 }
 0x68c   : > { %v5635_v36 = vadd.f32 %v5588_v43, %v5401_v23  ;;  %v14007_v39 = vpop.f32.mrf.mxu0 }
 0x68e   : > { %v14009_v31 = vadd.f32 %v5823_v27, %v5635_v36 }
 0x691   : > { %v5356_v2 = vpop.f32.mrf.mxu2  ;;  %v5590_v9 = vpop.f32.mrf.mxu3 }
 0x692   : > { %v5402_v57 = vadd.f32 %v5356_v2, %v5264_v53  ;;  %v5221_v12 = vpop.f32.mrf.mxu1  ;;  %v11248_v2 = vld [vmem:[%s11838_s16 + $0xe4] sm:$0xff] }
 0x693   : > { %v5265_v41 = vadd.f32 %v5221_v12, %v13763_v40 }
 0x694   : > { %v14016_v56 = vadd.f32 %v5590_v9, %v5402_v57  ;;  %v5828_v27 = vpop.f32.mrf.mxu0  ;;  %v5917_v57 = vpack.c.bf16 %v11188_v8, %v11187_v16  ;;  %v11189_v8 = vld [vmem:[%s11838_s16 + $0xf3] sm:$0xff] }
 0x695   : > { %11225 = vmatmul.msk.bf16.gmra.mxu1 %vm397_vm0, %v5916_v5 }
 0x696   : > { %11285 = vmatmul.msk.bf16.gmra.mxu2 %vm397_vm0, %v6150_v14  ;;  %11313 = vmatmul.msk.bf16.gmra.mxu3 %vm397_vm0, %v15973_v25  ;;  %v6151_v14 = vpack.c.bf16 %v11248_v2, %v11247_v48  ;;  %v11190_v48 = vld [vmem:[%s11838_s16 + $0xfb] sm:$0xff] }
 0x697   : > { %v11249_v2 = vld [vmem:[%s11838_s16 + $0xf4] sm:$0xff] }
 0x699   : > { %v5359_v13 = vpop.f32.mrf.mxu2  ;;  %v5593_v43 = vpop.f32.mrf.mxu3 }
 0x69a   : > { %v5403_v23 = vadd.f32 %v5359_v13, %v5265_v41  ;;  %v5223_v55 = vpop.f32.mrf.mxu1 }
 0x69b   : > { %v5266_v53 = vadd.f32 %v5223_v55, %v13768_v62 }
 0x69c   : > { %v5637_v36 = vadd.f32 %v5593_v43, %v5403_v23  ;;  %v14023_v40 = vpop.f32.mrf.mxu0 }
 0x69d   : > { %16007 = vst [vmem:[#allocation40_spill] sm:$0xff] %v14023_v40  ;;  %v15816_v40 = vmov 0.0  }
 0x69e   : > { %v14025_v52 = vadd.f32 %v5828_v27, %v5637_v36  ;;  %6558 = vst.msk [vmem:[#allocation2 + $0x18] sm:$0xff] %vm397_vm0, %v15816_v40 }
 0x69f   : > { %6559 = vst.msk [vmem:[#allocation2 + $0x20] sm:$0xff] %vm397_vm0, %v15816_v40 }
 0x6a0   : > { %6554 = vst.msk [vmem:[#allocation2] sm:$0xff] %vm397_vm0, %v15816_v40 }
 0x6a1   : > { %v5361_v9 = vpop.f32.mrf.mxu2  ;;  %v5595_v5 = vpop.f32.mrf.mxu3  ;;  %6555 = vst.msk [vmem:[#allocation2 + $0x8] sm:$0xff] %vm397_vm0, %v15816_v40 }
 0x6a2   : > { %v5404_v12 = vadd.f32 %v5361_v9, %v5266_v53  ;;  %v5226_v25 = vpop.f32.mrf.mxu1  ;;  %v11250_v9 = vld [vmem:[%s11838_s16 + $0xfc] sm:$0xff]  ;;  %6561 = vst.msk [vmem:[#allocation2 + $0x30] sm:$0xff] %vm397_vm0, %v15816_v40 }
 0x6a3   : > { %v5267_v41 = vadd.f32 %v5226_v25, %v13777_v22  ;;  %6562 = vst.msk [vmem:[#allocation2 + $0x38] sm:$0xff] %vm397_vm0, %v15816_v40 }
 0x6a4   : > { %v14032_v62 = vadd.f32 %v5595_v5, %v5404_v12  ;;  %v5833_v27 = vpop.f32.mrf.mxu0  ;;  %v5918_v12 = vpack.c.bf16 %v11190_v48, %v11189_v8  ;;  %6564 = vst.msk [vmem:[#allocation2 + $0x48] sm:$0xff] %vm397_vm0, %v15816_v40  ;;  %v11192_v8 = vld [vmem:[%s11838_s16 + $0x113] sm:$0xff] }
 0x6a5   : > { %11226 = vmatmul.msk.bf16.gmra.mxu1 %vm397_vm0, %v5917_v57  ;;  %6565 = vst.msk [vmem:[#allocation2 + $0x50] sm:$0xff] %vm397_vm0, %v15816_v40  ;;  %v11251_v48 = vld [vmem:[%s11838_s16 + $0x10c] sm:$0xff] }
 0x6a6   : > { %11286 = vmatmul.msk.bf16.gmra.mxu2 %vm397_vm0, %v6151_v14  ;;  %11314 = vmatmul.msk.bf16.gmra.mxu3 %vm397_vm0, %v15976_v19  ;;  %v6152_v14 = vpack.c.bf16 %v11250_v9, %v11249_v2  ;;  %6567 = vst.msk [vmem:[#allocation2 + $0x60] sm:$0xff] %vm397_vm0, %v15816_v40  ;;  %v11252_v2 = vld [vmem:[%s11838_s16 + $0x114] sm:$0xff] }
 0x6a7   : > { %6568 = vst.msk [vmem:[#allocation2 + $0x68] sm:$0xff] %vm397_vm0, %v15816_v40 }
 0x6a8   : > { %6570 = vst.msk [vmem:[#allocation2 + $0x78] sm:$0xff] %vm397_vm0, %v15816_v40 }
 0x6a9   : > { %v5364_v13 = vpop.f32.mrf.mxu2  ;;  %v5598_v43 = vpop.f32.mrf.mxu3  ;;  %6571 = vst.msk [vmem:[#allocation2 + $0x80] sm:$0xff] %vm397_vm0, %v15816_v40 }
 0x6aa   : > { %v5405_v23 = vadd.f32 %v5364_v13, %v5267_v41  ;;  %v5228_v55 = vpop.f32.mrf.mxu1  ;;  %6573 = vst.msk [vmem:[#allocation2 + $0x90] sm:$0xff] %vm397_vm0, %v15816_v40 }
 0x6ab   : > { %v5268_v53 = vadd.f32 %v5228_v55, %v13782_v58  ;;  %6574 = vst.msk [vmem:[#allocation2 + $0x98] sm:$0xff] %vm397_vm0, %v15816_v40 }
 0x6ac   : > { %v5639_v36 = vadd.f32 %v5598_v43, %v5405_v23  ;;  %v14039_v22 = vpop.f32.mrf.mxu0  ;;  %6576 = vst.msk [vmem:[#allocation2 + $0xa8] sm:$0xff] %vm397_vm0, %v15816_v40 }
 0x6ad   : > { %6577 = vst.msk [vmem:[#allocation2 + $0xb0] sm:$0xff] %vm397_vm0, %v15816_v40 }
 0x6ae   : > { %v14041_v16 = vadd.f32 %v5833_v27, %v5639_v36  ;;  %v11191_v36 = vld [vmem:[%s11838_s16 + $0x10b] sm:$0xff]  ;;  %6579 = vst.msk [vmem:[#allocation2 + $0xc0] sm:$0xff] %vm397_vm0, %v15816_v40 }
 0x6af   : > { %6580 = vst.msk [vmem:[#allocation2 + $0xc8] sm:$0xff] %vm397_vm0, %v15816_v40 }
 0x6b0   : > { %6582 = vst.msk [vmem:[#allocation2 + $0xd8] sm:$0xff] %vm397_vm0, %v15816_v40 }
 0x6b1   : > { %v5366_v5 = vpop.f32.mrf.mxu2  ;;  %v5600_v57 = vpop.f32.mrf.mxu3  ;;  %6583 = vst.msk [vmem:[#allocation2 + $0xe0] sm:$0xff] %vm397_vm0, %v15816_v40 }
 0x6b2   : > { %v5406_v25 = vadd.f32 %v5366_v5, %v5268_v53  ;;  %v5231_v19 = vpop.f32.mrf.mxu1  ;;  %6585 = vst.msk [vmem:[#allocation2 + $0xf0] sm:$0xff] %vm397_vm0, %v15816_v40 }
 0x6b3   : > { %v5269_v58 = vadd.f32 %v5231_v19, %v13800_v30  ;;  %v6153_v19 = vpack.c.bf16 %v11252_v2, %v11251_v48  ;;  %6586 = vst.msk [vmem:[#allocation2 + $0xf8] sm:$0xff] %vm397_vm0, %v15816_v40  ;;  %v11193_v2 = vld [vmem:[%s11838_s16 + $0x123] sm:$0xff] }
 0x6b4   : > { %v14052_v41 = vadd.f32 %v5600_v57, %v5406_v25  ;;  %v5838_v27 = vpop.f32.mrf.mxu0  ;;  %v5919_v57 = vpack.c.bf16 %v11192_v8, %v11191_v36  ;;  %6588 = vst.msk [vmem:[#allocation2 + $0x108] sm:$0xff] %vm397_vm0, %v15816_v40 }
 0x6b5   : > { %11227 = vmatmul.msk.bf16.gmra.mxu1 %vm397_vm0, %v5918_v12  ;;  %6589 = vst.msk [vmem:[#allocation2 + $0x110] sm:$0xff] %vm397_vm0, %v15816_v40 }
 0x6b6   : > { %11287 = vmatmul.msk.bf16.gmra.mxu2 %vm397_vm0, %v6152_v14  ;;  %11315 = vmatmul.msk.bf16.gmra.mxu3 %vm397_vm0, %v15979_v46  ;;  %v11723_v14 = vld [vmem:[%s15764_s3 + $0x28] sm:$0xff]  ;;  %6591 = vst.msk [vmem:[#allocation2 + $0x120] sm:$0xff] %vm397_vm0, %v15816_v40 }
 0x6b7   : > { %7164 = vmatpush.bf16.msra.mxu2 %v11723_v14  ;;  %6592 = vst.msk [vmem:[#allocation2 + $0x128] sm:$0xff] %vm397_vm0, %v15816_v40 }
 0x6b8   : > { %6594 = vst.msk [vmem:[#allocation2 + $0x138] sm:$0xff] %vm397_vm0, %v15816_v40 }
 0x6b9   : > { %v5369_v30 = vpop.f32.mrf.mxu2  ;;  %v5603_v13 = vpop.f32.mrf.mxu3  ;;  %6595 = vst.msk [vmem:[#allocation2 + $0x140] sm:$0xff] %vm397_vm0, %v15816_v40 }
 0x6ba   : > { %v5407_v46 = vadd.f32 %v5369_v30, %v5269_v58  ;;  %v5233_v43 = vpop.f32.mrf.mxu1  ;;  %v11719_v30 = vld [vmem:[%s15764_s3 + $0x8] sm:$0xff]  ;;  %6597 = vst.msk [vmem:[#allocation2 + $0x150] sm:$0xff] %vm397_vm0, %v15816_v40 }
 0x6bb   : > { %v5270_v23 = vadd.f32 %v5233_v43, %v13808_v44  ;;  %6962 = vmatpush.bf16.msra.mxu1 %v11719_v30  ;;  %6598 = vst.msk [vmem:[#allocation2 + $0x158] sm:$0xff] %vm397_vm0, %v15816_v40 }
 0x6bc   : > { %v5641_v55 = vadd.f32 %v5603_v13, %v5407_v46  ;;  %v14089_v44 = vpop.f32.mrf.mxu0  ;;  %6600 = vst.msk [vmem:[#allocation2 + $0x168] sm:$0xff] %vm397_vm0, %v15816_v40 }
 0x6bd   : > { %6601 = vst.msk [vmem:[#allocation2 + $0x170] sm:$0xff] %vm397_vm0, %v15816_v40 }
 0x6be   : > { %v14079_v53 = vadd.f32 %v5838_v27, %v5641_v55  ;;  %6603 = vst.msk [vmem:[#allocation2 + $0x180] sm:$0xff] %vm397_vm0, %v15816_v40 }
 0x6bf   : > { %6604 = vst.msk [vmem:[#allocation2 + $0x188] sm:$0xff] %vm397_vm0, %v15816_v40 }
 0x6c0   : > { %6606 = vst.msk [vmem:[#allocation2 + $0x198] sm:$0xff] %vm397_vm0, %v15816_v40 }
 0x6c1   : > { %v5371_v9 = vpop.f32.mrf.mxu2  ;;  %v5605_v5 = vpop.f32.mrf.mxu3  ;;  %6607 = vst.msk [vmem:[#allocation2 + $0x1a0] sm:$0xff] %vm397_vm0, %v15816_v40 }
 0x6c2   : > { %v5408_v12 = vadd.f32 %v5371_v9, %v5270_v23  ;;  %v5236_v25 = vpop.f32.mrf.mxu1  ;;  %v11727_v23 = vld [vmem:[%s15764_s3 + $0x48] sm:$0xff]  ;;  %6557 = vst.msk [vmem:[#allocation2 + $0x10] sm:$0x3] %vm6556_vm1, %v15816_v40 }
 0x6c3   : > { %v5271_v58 = vadd.f32 %v5236_v25, %v13817_v3  ;;  %v11725_v3 = vld [vmem:[%s15764_s3 + $0x38] sm:$0xff]  ;;  %7632 = vmatpush.bf16.msra.mxu0 %v11727_v23  ;;  %v11194_v9 = vld [vmem:[%s11838_s16 + $0x12b] sm:$0xff]  ;;  %6560 = vst.msk [vmem:[#allocation2 + $0x28] sm:$0x3] %vm6556_vm1, %v15816_v40 }
 0x6c4   : > { %v14103_v27 = vadd.f32 %v5605_v5, %v5408_v12  ;;  %7398 = vmatpush.bf16.msra.mxu3 %v11725_v3  ;;  %v5843_v36 = vpop.f32.mrf.mxu0  ;;  %v11254_v5 = vld [vmem:[%s11838_s16 + $0x12c] sm:$0xff]  ;;  %v5920_v25 = vpack.c.bf16 %v11194_v9, %v11193_v2  ;;  %6563 = vst.msk [vmem:[#allocation2 + $0x40] sm:$0x3] %vm6556_vm1, %v15816_v40  ;;  %v11195_v2 = vld [vmem:[%s11838_s16 + $0x13b] sm:$0xff]  ;;  %v11196_v9 = vld [vmem:[%s11838_s16 + $0x143] sm:$0xff] }
 0x6c5   : > { %11228 = vmatmul.msk.bf16.gmra.mxu1 %vm397_vm0, %v5919_v57  ;;  %6566 = vst.msk [vmem:[#allocation2 + $0x58] sm:$0x3] %vm6556_vm1, %v15816_v40 }
 0x6c6   : > { %11288 = vmatmul.msk.bf16.gmra.mxu2 %vm397_vm0, %v6153_v19  ;;  %11316 = vmatmul.msk.bf16.gmra.mxu3 %vm397_vm0, %v15982_v1  ;;  %6569 = vst.msk [vmem:[#allocation2 + $0x70] sm:$0x3] %vm6556_vm1, %v15816_v40 }
 0x6c7   : > { %6572 = vst.msk [vmem:[#allocation2 + $0x88] sm:$0x3] %vm6556_vm1, %v15816_v40 }
 0x6c8   : > { %6575 = vst.msk [vmem:[#allocation2 + $0xa0] sm:$0x3] %vm6556_vm1, %v15816_v40 }
 0x6c9   : > { %v5374_v13 = vpop.f32.mrf.mxu2  ;;  %v5608_v46 = vpop.f32.mrf.mxu3  ;;  %6578 = vst.msk [vmem:[#allocation2 + $0xb8] sm:$0x3] %vm6556_vm1, %v15816_v40 }
 0x6ca   : > { %v5409_v1 = vadd.f32 %v5374_v13, %v5271_v58  ;;  %v5238_v43 = vpop.f32.mrf.mxu1  ;;  %6581 = vst.msk [vmem:[#allocation2 + $0xd0] sm:$0x3] %vm6556_vm1, %v15816_v40 }
 0x6cb   : > { %v5272_v55 = vadd.f32 %v5238_v43, %v13822_v38  ;;  %v11253_v38 = vld [vmem:[%s11838_s16 + $0x124] sm:$0xff]  ;;  %6584 = vst.msk [vmem:[#allocation2 + $0xe8] sm:$0x3] %vm6556_vm1, %v15816_v40 }
 0x6cc   : > { %v5643_v8 = vadd.f32 %v5608_v46, %v5409_v1  ;;  %v6154_v58 = vpack.c.bf16 %v11254_v5, %v11253_v38  ;;  %v11255_v38 = vld [vmem:[%s11838_s16 + $0x13c] sm:$0xff]  ;;  %v11256_v5 = vld [vmem:[%s11838_s16 + $0x144] sm:$0xff]  ;;  %6587 = vst.msk [vmem:[#allocation2 + $0x100] sm:$0x3] %vm6556_vm1, %v15816_v40 }
 0x6cd   : > { %6590 = vst.msk [vmem:[#allocation2 + $0x118] sm:$0x3] %vm6556_vm1, %v15816_v40 }
 0x6ce   : > { %v14139_v48 = vadd.f32 %v5843_v36, %v5643_v8  ;;  %6593 = vst.msk [vmem:[#allocation2 + $0x130] sm:$0x3] %vm6556_vm1, %v15816_v40 }
 0x6cf   : > { %6596 = vst.msk [vmem:[#allocation2 + $0x148] sm:$0x3] %vm6556_vm1, %v15816_v40 }
 0x6d0   : > { %6599 = vst.msk [vmem:[#allocation2 + $0x160] sm:$0x3] %vm6556_vm1, %v15816_v40 }
 0x6d1   : > { %v5376_v57 = vpop.f32.mrf.mxu2  ;;  %v5610_v12 = vpop.f32.mrf.mxu3  ;;  %6602 = vst.msk [vmem:[#allocation2 + $0x178] sm:$0x3] %vm6556_vm1, %v15816_v40 }
 0x6d2   : > { %v5410_v19 = vadd.f32 %v5376_v57, %v5272_v55  ;;  %v6002_v14 = vpop.f32.mrf.mxu1  ;;  %v6695_v55 = vld [vmem:[#allocation2 + $0x9] sm:$0xff]  ;;  %6605 = vst.msk [vmem:[#allocation2 + $0x190] sm:$0x3] %vm6556_vm1, %v15816_v40 }
 0x6d3   : > { %v6082_v30 = vadd.f32 %v6002_v14, %v13831_v34  ;;  %v6694_v34 = vld [vmem:[#allocation2 + $0x1] sm:$0xff]  ;;  %v5921_v14 = vpack.c.bf16 %v11196_v9, %v11195_v2  ;;  %6608 = vst.msk [vmem:[#allocation2 + $0x1a8] sm:$0x3] %vm6556_vm1, %v15816_v40  ;;  %v11197_v9 = vld [vmem:[%s11838_s16 + $0x153] sm:$0xff] }
 0x6d4   : > { %v14157_v3 = vadd.f32 %v5610_v12, %v5410_v19  ;;  %v6726_v8 = vpack.c.bf16 %v6695_v55, %v6694_v34 }
 0x6d5   : > { %11229 = vmatmul.msk.bf16.gmra.mxu1 %vm397_vm0, %v5920_v25 }
 0x6d6   : > { %11289 = vmatmul.msk.bf16.gmra.mxu2 %vm397_vm0, %v6154_v58  ;;  %11317 = vmatmul.msk.bf16.gmra.mxu3 %vm397_vm0, %v15985_v26  ;;  %v14179_v26 = vld [vmem:[%s15763_s2] ss:$0 sm:$0xff] }
 0x6d7   : > { %11337 = vmatmul.msk.bf16.vlgmr.msrb.gmra.mxu0 %vm397_vm0, %v6726_v8 }
 0x6d9   : > { %v6236_v13 = vpop.f32.mrf.mxu2  ;;  %v6374_v46 = vpop.f32.mrf.mxu3 }
 0x6da   : > { %v6316_v1 = vadd.f32 %v6236_v13, %v6082_v30  ;;  %v6004_v43 = vpop.f32.mrf.mxu1  ;;  %v6155_v13 = vpack.c.bf16 %v11256_v5, %v11255_v38  ;;  %v11257_v38 = vld [vmem:[%s11838_s16 + $0x154] sm:$0xff]  ;;  %v11258_v5 = vld [vmem:[%s11838_s16 + $0x15c] sm:$0xff] }
 0x6db   : > { %v6083_v12 = vadd.f32 %v6004_v43, %v13836_v17 }
 0x6dc   : > { %v6454_v23 = vadd.f32 %v6374_v46, %v6316_v1 }
 0x6de   : > { %v6490_v36 = vadd.f32 %v14179_v26, %v6454_v23 }
 0x6e0   : > { %v6522_v57 = vmax.f32 %v6490_v36, 0.0 }
 0x6e1   : > { %v6238_v25 = vpop.f32.mrf.mxu2  ;;  %v6376_v19 = vpop.f32.mrf.mxu3 }
 0x6e2   : > { %6610 = vst.msk [vmem:[#allocation2 + $0x19] sm:$0xff] %vm397_vm0, %v6522_v57  ;;  %v6317_v58 = vadd.f32 %v6238_v25, %v6083_v12  ;;  %v6007_v30 = vpop.f32.mrf.mxu1 }
 0x6e3   : > { %v6084_v43 = vadd.f32 %v6007_v30, %v13845_v54 }
 0x6e4   : > { %v6455_v17 = vadd.f32 %v6376_v19, %v6317_v58 }
 0x6e5   : > { %11230 = vmatmul.msk.bf16.gmra.mxu1 %vm397_vm0, %v5921_v14 }
 0x6e6   : > { %v6491_v46 = vadd.f32 %v14179_v26, %v6455_v17  ;;  %11290 = vmatmul.msk.bf16.gmra.mxu2 %vm397_vm0, %v6155_v13  ;;  %11318 = vmatmul.msk.bf16.gmra.mxu3 %vm397_vm0, %v15988_v28  ;;  %v11198_v28 = vld [vmem:[%s11838_s16 + $0x15b] sm:$0xff] }
 0x6e7   : > { %v5922_v58 = vpack.c.bf16 %v11198_v28, %v11197_v9  ;;  %v11199_v28 = vld [vmem:[%s11838_s16 + $0x16b] sm:$0xff] }
 0x6e8   : > { %v6523_v1 = vmax.f32 %v6491_v46, 0.0  ;;  %v6156_v46 = vpack.c.bf16 %v11258_v5, %v11257_v38  ;;  %v11200_v38 = vld [vmem:[%s11838_s16 + $0x173] sm:$0xff] }
 0x6e9   : > { %v6241_v34 = vpop.f32.mrf.mxu2  ;;  %v6379_v23 = vpop.f32.mrf.mxu3  ;;  %v6696_v14 = vld [vmem:[#allocation2 + $0x19] sm:$0xff]  ;;  %v11259_v5 = vld [vmem:[%s11838_s16 + $0x16c] sm:$0xff] }
 0x6ea   : > { %6611 = vst.msk [vmem:[#allocation2 + $0x21] sm:$0xff] %vm397_vm0, %v6523_v1  ;;  %v6318_v55 = vadd.f32 %v6241_v34, %v6084_v43  ;;  %v6009_v36 = vpop.f32.mrf.mxu1 }
 0x6eb   : > { %v6085_v12 = vadd.f32 %v6009_v36, %v13850_v32 }
 0x6ec   : > { %v6456_v8 = vadd.f32 %v6379_v23, %v6318_v55 }
 0x6ee   : > { %v6492_v2 = vadd.f32 %v14179_v26, %v6456_v8 }
 0x6f0   : > { %v6524_v57 = vmax.f32 %v6492_v2, 0.0 }
 0x6f1   : > { %v6243_v25 = vpop.f32.mrf.mxu2  ;;  %v6381_v19 = vpop.f32.mrf.mxu3  ;;  %v6697_v54 = vld [vmem:[#allocation2 + $0x21] sm:$0xff] }
 0x6f2   : > { %6612 = vst.msk [vmem:[#allocation2 + $0x31] sm:$0xff] %vm397_vm0, %v6524_v57  ;;  %v6319_v30 = vadd.f32 %v6243_v25, %v6085_v12  ;;  %v6012_v13 = vpop.f32.mrf.mxu1  ;;  %v6727_v17 = vpack.c.bf16 %v6697_v54, %v6696_v14  ;;  %v11260_v57 = vld [vmem:[%s11838_s16 + $0x174] sm:$0xff]  ;;  %v5923_v54 = vpack.c.bf16 %v11200_v38, %v11199_v28  ;;  %v11261_v28 = vld [vmem:[%s11838_s16 + $0x184] sm:$0xff]  ;;  %v11262_v38 = vld [vmem:[%s11838_s16 + $0x18c] sm:$0xff] }
 0x6f3   : > { %v6086_v34 = vadd.f32 %v6012_v13, %v13859_v51 }
 0x6f4   : > { %v6457_v1 = vadd.f32 %v6381_v19, %v6319_v30  ;;  %11338 = vmatmul.msk.bf16.gmra.mxu0 %vm397_vm0, %v6727_v17  ;;  %v6157_v17 = vpack.c.bf16 %v11260_v57, %v11259_v5 }
 0x6f5   : > { %11231 = vmatmul.msk.bf16.gmra.mxu1 %vm397_vm0, %v5922_v58 }
 0x6f6   : > { %v6493_v32 = vadd.f32 %v14179_v26, %v6457_v1  ;;  %11291 = vmatmul.msk.bf16.gmra.mxu2 %vm397_vm0, %v6156_v46  ;;  %11319 = vmatmul.msk.bf16.gmra.mxu3 %vm397_vm0, %v15991_v20 }
 0x6f8   : > { %v6525_v43 = vmax.f32 %v6493_v32, 0.0 }
 0x6f9   : > { %v6246_v23 = vpop.f32.mrf.mxu2  ;;  %v6384_v55 = vpop.f32.mrf.mxu3  ;;  %v6698_v14 = vld [vmem:[#allocation2 + $0x31] sm:$0xff] }
 0x6fa   : > { %6613 = vst.msk [vmem:[#allocation2 + $0x39] sm:$0xff] %vm397_vm0, %v6525_v43  ;;  %v6320_v36 = vadd.f32 %v6246_v23, %v6086_v34  ;;  %v6014_v8 = vpop.f32.mrf.mxu1 }
 0x6fb   : > { %v6087_v25 = vadd.f32 %v6014_v8, %v13864_v35 }
 0x6fc   : > { %v6458_v2 = vadd.f32 %v6384_v55, %v6320_v36 }
 0x6fe   : > { %v6494_v9 = vadd.f32 %v14179_v26, %v6458_v2  ;;  %v11201_v2 = vld [vmem:[%s11838_s16 + $0x183] sm:$0xff] }
 0x700   : > { %v6526_v12 = vmax.f32 %v6494_v9, 0.0  ;;  %v11202_v9 = vld [vmem:[%s11838_s16 + $0x18b] sm:$0xff] }
 0x701   : > { %v6248_v20 = vpop.f32.mrf.mxu2  ;;  %v6386_v19 = vpop.f32.mrf.mxu3  ;;  %v6699_v51 = vld [vmem:[#allocation2 + $0x39] sm:$0xff] }
 0x702   : > { %6614 = vst.msk [vmem:[#allocation2 + $0x49] sm:$0xff] %vm397_vm0, %v6526_v12  ;;  %v6321_v58 = vadd.f32 %v6248_v20, %v6087_v25  ;;  %v6017_v30 = vpop.f32.mrf.mxu1  ;;  %v6728_v13 = vpack.c.bf16 %v6699_v51, %v6698_v14  ;;  %v5924_v20 = vpack.c.bf16 %v11202_v9, %v11201_v2  ;;  %v11264_v2 = vld [vmem:[%s11838_s16 + $0x1a4] sm:$0xff] }
 0x703   : > { %v6088_v32 = vadd.f32 %v6017_v30, %v13873_v21 }
 0x704   : > { %v6459_v46 = vadd.f32 %v6386_v19, %v6321_v58  ;;  %11339 = vmatmul.msk.bf16.gmra.mxu0 %vm397_vm0, %v6728_v13 }
 0x705   : > { %11232 = vmatmul.msk.bf16.gmra.mxu1 %vm397_vm0, %v5923_v54  ;;  %v6158_v54 = vpack.c.bf16 %v11262_v38, %v11261_v28 }
 0x706   : > { %v6495_v35 = vadd.f32 %v14179_v26, %v6459_v46  ;;  %11292 = vmatmul.msk.bf16.gmra.mxu2 %vm397_vm0, %v6157_v17  ;;  %11320 = vmatmul.msk.bf16.gmra.mxu3 %vm397_vm0, %v15993_v4 }
 0x708   : > { %v6527_v1 = vmax.f32 %v6495_v35, 0.0 }
 0x709   : > { %v6251_v43 = vpop.f32.mrf.mxu2  ;;  %v6389_v34 = vpop.f32.mrf.mxu3  ;;  %v6700_v25 = vld [vmem:[#allocation2 + $0x49] sm:$0xff] }
 0x70a   : > { %6615 = vst.msk [vmem:[#allocation2 + $0x51] sm:$0xff] %vm397_vm0, %v6527_v1  ;;  %v6322_v23 = vadd.f32 %v6251_v43, %v6088_v32  ;;  %v6019_v55 = vpop.f32.mrf.mxu1  ;;  %v16008_v43 = vld [vmem:[#allocation36_spill] sm:$0xff] }
 0x70b   : > { %v6089_v57 = vadd.f32 %v6019_v55, %v13878_v29  ;;  %v11203_v55 = vld [vmem:[%s11838_s16 + $0x19b] sm:$0xff] }
 0x70c   : > { %v6460_v36 = vadd.f32 %v6389_v34, %v6322_v23  ;;  %v5857_v34 = vadd.f32 %v16008_v43, %v13892_v45  ;;  %v11206_v43 = vld [vmem:[%s11838_s16 + $0x1bb] sm:$0xff] }
 0x70e   : > { %v6496_v8 = vadd.f32 %v14179_v26, %v6460_v36  ;;  %v11204_v36 = vld [vmem:[%s11838_s16 + $0x1a3] sm:$0xff] }
 0x710   : > { %v6528_v5 = vmax.f32 %v6496_v8, 0.0  ;;  %v11263_v8 = vld [vmem:[%s11838_s16 + $0x19c] sm:$0xff] }
 0x711   : > { %v6253_v4 = vpop.f32.mrf.mxu2  ;;  %v6391_v12 = vpop.f32.mrf.mxu3  ;;  %v6701_v21 = vld [vmem:[#allocation2 + $0x51] sm:$0xff] }
 0x712   : > { %6616 = vst.msk [vmem:[#allocation2 + $0x61] sm:$0xff] %vm397_vm0, %v6528_v5  ;;  %v6323_v19 = vadd.f32 %v6253_v4, %v6089_v57  ;;  %v6022_v14 = vpop.f32.mrf.mxu1  ;;  %v6729_v51 = vpack.c.bf16 %v6701_v21, %v6700_v25  ;;  %v5925_v57 = vpack.c.bf16 %v11204_v36, %v11203_v55  ;;  %v6159_v21 = vpack.c.bf16 %v11264_v2, %v11263_v8 }
 0x713   : > { %v6090_v13 = vadd.f32 %v6022_v14, %v13889_v42 }
 0x714   : > { %v6461_v58 = vadd.f32 %v6391_v12, %v6323_v19  ;;  %11340 = vmatmul.msk.bf16.gmra.mxu0 %vm397_vm0, %v6729_v51  ;;  %v16009_v19 = vld [vmem:[#allocation27_spill] sm:$0xff] }
 0x715   : > { %11233 = vmatmul.msk.bf16.gmra.mxu1 %vm397_vm0, %v5924_v20 }
 0x716   : > { %v6497_v29 = vadd.f32 %v14179_v26, %v6461_v58  ;;  %11293 = vmatmul.msk.bf16.gmra.mxu2 %vm397_vm0, %v6158_v54  ;;  %11321 = vmatmul.msk.bf16.gmra.mxu3 %vm397_vm0, %v15995_v59 }
 0x718   : > { %v6529_v30 = vmax.f32 %v6497_v29, 0.0 }
 0x719   : > { %v6256_v17 = vpop.f32.mrf.mxu2  ;;  %v6394_v46 = vpop.f32.mrf.mxu3  ;;  %v6702_v38 = vld [vmem:[#allocation2 + $0x61] sm:$0xff] }
 0x71a   : > { %6617 = vst.msk [vmem:[#allocation2 + $0x69] sm:$0xff] %vm397_vm0, %v6529_v30  ;;  %v6324_v35 = vadd.f32 %v6256_v17, %v6090_v13  ;;  %v6024_v1 = vpop.f32.mrf.mxu1  ;;  %v16010_v17 = vld [vmem:[#allocation41_spill] sm:$0xff] }
 0x71b   : > { %v6091_v9 = vadd.f32 %v6024_v1, %v5857_v34 }
 0x71c   : > { %v6462_v32 = vadd.f32 %v6394_v46, %v6324_v35  ;;  %v16011_v46 = vld [vmem:[#allocation37_spill] sm:$0xff] }
 0x71d   : > { %v5859_v35 = vadd.f32 %v16011_v46, %v16010_v17  ;;  %v11268_v17 = vld [vmem:[%s11838_s16 + $0x1d4] sm:$0xff] }
 0x71e   : > { %v6498_v23 = vadd.f32 %v14179_v26, %v6462_v32  ;;  %v11205_v32 = vld [vmem:[%s11838_s16 + $0x1b3] sm:$0xff] }
 0x71f   : > { %v5926_v2 = vpack.c.bf16 %v11206_v43, %v11205_v32 }
 0x720   : > { %v6530_v59 = vmax.f32 %v6498_v23, 0.0 }
 0x721   : > { %v6258_v28 = vpop.f32.mrf.mxu2  ;;  %v6396_v42 = vpop.f32.mrf.mxu3  ;;  %v6703_v5 = vld [vmem:[#allocation2 + $0x69] sm:$0xff] }
 0x722   : > { %6618 = vst.msk [vmem:[#allocation2 + $0x79] sm:$0xff] %vm397_vm0, %v6530_v59  ;;  %v6325_v4 = vadd.f32 %v6258_v28, %v6091_v9  ;;  %v6027_v12 = vpop.f32.mrf.mxu1  ;;  %v6730_v25 = vpack.c.bf16 %v6703_v5, %v6702_v38  ;;  %v11718_v38 = vld [vmem:[%s15764_s3] sm:$0xff] }
 0x723   : > { %v6092_v51 = vadd.f32 %v6027_v12, %v13905_v37  ;;  %v11722_v5 = vld [vmem:[%s15764_s3 + $0x20] sm:$0xff]  ;;  %v16012_v12 = vld [vmem:[#allocation30_spill] sm:$0xff]  ;;  %6963 = vmatpush.bf16.msra.mxu1 %v11718_v38 }
 0x724   : > { %v6463_v45 = vadd.f32 %v6396_v42, %v6325_v4  ;;  %11341 = vmatmul.msk.bf16.gmra.mxu0 %vm397_vm0, %v6730_v25  ;;  %7165 = vmatpush.bf16.msra.mxu2 %v11722_v5 }
 0x725   : > { %11234 = vmatmul.msk.bf16.gmra.mxu1 %vm397_vm0, %v5925_v57  ;;  %v11724_v57 = vld [vmem:[%s15764_s3 + $0x30] sm:$0xff] }
 0x726   : > { %v6499_v20 = vadd.f32 %v14179_v26, %v6463_v45  ;;  %11294 = vmatmul.msk.bf16.gmra.mxu2 %vm397_vm0, %v6159_v21  ;;  %11322 = vmatmul.msk.bf16.gmra.mxu3 %vm397_vm0, %v16009_v19 }
 0x727   : > { %7399 = vmatpush.bf16.msra.mxu3 %v11724_v57  ;;  %v11726_v57 = vld [vmem:[%s15764_s3 + $0x40] sm:$0xff] }
 0x728   : > { %v6531_v14 = vmax.f32 %v6499_v20, 0.0  ;;  %7633 = vmatpush.bf16.msra.mxu0 %v11726_v57 }
 0x729   : > { %v6261_v54 = vpop.f32.mrf.mxu2  ;;  %v6399_v58 = vpop.f32.mrf.mxu3  ;;  %v6704_v8 = vld [vmem:[#allocation2 + $0x79] sm:$0xff] }
 0x72a   : > { %6619 = vst.msk [vmem:[#allocation2 + $0x81] sm:$0xff] %vm397_vm0, %v6531_v14  ;;  %v6326_v29 = vadd.f32 %v6261_v54, %v6092_v51  ;;  %v6029_v30 = vpop.f32.mrf.mxu1 }
 0x72b   : > { %v6093_v23 = vadd.f32 %v6029_v30, %v5859_v35  ;;  %v11208_v30 = vld [vmem:[%s11838_s16 + $0x1d3] sm:$0xff] }
 0x72c   : > { %v6464_v13 = vadd.f32 %v6399_v58, %v6326_v29  ;;  %v11207_v29 = vld [vmem:[%s11838_s16 + $0x1cb] sm:$0xff] }
 0x72e   : > { %v6500_v1 = vadd.f32 %v14179_v26, %v6464_v13  ;;  %v11267_v13 = vld [vmem:[%s11838_s16 + $0x1cc] sm:$0xff] }
 0x730   : > { %v6532_v34 = vmax.f32 %v6500_v1, 0.0 }
 0x731   : > { %v6263_v55 = vpop.f32.mrf.mxu2  ;;  %v6401_v36 = vpop.f32.mrf.mxu3  ;;  %v6705_v37 = vld [vmem:[#allocation2 + $0x81] sm:$0xff] }
 0x732   : > { %6620 = vst.msk [vmem:[#allocation2 + $0x91] sm:$0xff] %vm397_vm0, %v6532_v34  ;;  %v6327_v59 = vadd.f32 %v6263_v55, %v6093_v23  ;;  %v6032_v9 = vpop.f32.mrf.mxu1  ;;  %v6731_v28 = vpack.c.bf16 %v6705_v37, %v6704_v8  ;;  %v5927_v34 = vpack.c.bf16 %v11208_v30, %v11207_v29  ;;  %v6161_v8 = vpack.c.bf16 %v11268_v17, %v11267_v13  ;;  %v7280_v30 = vld [vmem:[#allocation2 + $0x20] sm:$0xff] }
 0x733   : > { %v6094_v21 = vadd.f32 %v6032_v9, %v13922_v10 }
 0x734   : > { %v6465_v42 = vadd.f32 %v6401_v36, %v6327_v59  ;;  %11342 = vmatmul.msk.bf16.gmra.mxu0 %vm397_vm0, %v6731_v28 }
 0x735   : > { %11235 = vmatmul.msk.bf16.gmra.mxu1 %vm397_vm0, %v5926_v2  ;;  %v16014_v2 = vld [vmem:[#allocation32_spill] sm:$0xff] }
 0x736   : > { %v6501_v4 = vadd.f32 %v14179_v26, %v6465_v42  ;;  %11295 = vmatmul.msk.bf16.gmra.mxu2 %vm397_vm0, %v13928_v6  ;;  %11323 = vmatmul.msk.bf16.gmra.mxu3 %vm397_vm0, %v16012_v12  ;;  %v16013_v6 = vld [vmem:[#allocation39_spill] sm:$0xff]  ;;  %v5863_v12 = vadd.f32 %v13943_v7, %v13952_v15  ;;  %v7279_v15 = vld [vmem:[#allocation2 + $0x18] sm:$0xff] }
 0x737   : > { %v5861_v54 = vadd.f32 %v16013_v6, %v13931_v11 }
 0x738   : > { %v6533_v25 = vmax.f32 %v6501_v4, 0.0 }
 0x739   : > { %v6266_v45 = vpop.f32.mrf.mxu2  ;;  %v6404_v20 = vpop.f32.mrf.mxu3  ;;  %v6706_v32 = vld [vmem:[#allocation2 + $0x91] sm:$0xff] }
 0x73a   : > { %6621 = vst.msk [vmem:[#allocation2 + $0x99] sm:$0xff] %vm397_vm0, %v6533_v25  ;;  %v6328_v19 = vadd.f32 %v6266_v45, %v6094_v21  ;;  %v6034_v14 = vpop.f32.mrf.mxu1  ;;  %v6642_v21 = vld [vmem:[#allocation2] sm:$0xff]  ;;  %v6643_v45 = vld [vmem:[#allocation2 + $0x8] sm:$0xff] }
 0x73b   : > { %v6095_v35 = vadd.f32 %v6034_v14, %v5861_v54  ;;  %v6674_v29 = vpack.c.bf16 %v6643_v45, %v6642_v21 }
 0x73c   : > { %v6466_v51 = vadd.f32 %v6404_v20, %v6328_v19  ;;  %v7046_v20 = vld [vmem:[#allocation2 + $0xa] sm:$0xff] }
 0x73e   : > { %v6502_v58 = vadd.f32 %v14179_v26, %v6466_v51 }
 0x740   : > { %v6534_v46 = vmax.f32 %v6502_v58, 0.0 }
 0x741   : > { %v6268_v10 = vpop.f32.mrf.mxu2  ;;  %v6406_v1 = vpop.f32.mrf.mxu3  ;;  %v6707_v43 = vld [vmem:[#allocation2 + $0x99] sm:$0xff] }
 0x742   : > { %6622 = vst.msk [vmem:[#allocation2 + $0xa9] sm:$0xff] %vm397_vm0, %v6534_v46  ;;  %v6329_v23 = vadd.f32 %v6268_v10, %v6095_v35  ;;  %v6037_v55 = vpop.f32.mrf.mxu1  ;;  %v6732_v36 = vpack.c.bf16 %v6707_v43, %v6706_v32  ;;  %v7311_v10 = vpack.c.bf16 %v7280_v30, %v7279_v15  ;;  %v14337_v32 = vpop.f32.mrf.mxu0 }
 0x743   : > { %v6096_v9 = vadd.f32 %v6037_v55, %v13945_v47  ;;  %v7045_v47 = vld [vmem:[#allocation2 + $0x2] sm:$0xff] }
 0x744   : > { %v6467_v11 = vadd.f32 %v6406_v1, %v6329_v23  ;;  %11343 = vmatmul.msk.bf16.gmra.mxu0 %vm397_vm0, %v6732_v36  ;;  %v7077_v7 = vpack.c.bf16 %v7046_v20, %v7045_v47  ;;  %v7281_v47 = vld [vmem:[#allocation2 + $0x30] sm:$0xff] }
 0x745   : > { %11236 = vmatmul.msk.bf16.gmra.mxu1 %vm397_vm0, %v5927_v34 }
 0x746   : > { %v6503_v37 = vadd.f32 %v14179_v26, %v6467_v11  ;;  %11296 = vmatmul.msk.bf16.gmra.mxu2 %vm397_vm0, %v6161_v8  ;;  %11324 = vmatmul.msk.bf16.gmra.mxu3 %vm397_vm0, %v16014_v2 }
 0x748   : > { %v6535_v59 = vmax.f32 %v6503_v37, 0.0  ;;  %v5865_v37 = vadd.f32 %v13959_v24, %v13968_v61 }
 0x749   : > { %v6271_v28 = vpop.f32.mrf.mxu2  ;;  %v6409_v42 = vpop.f32.mrf.mxu3  ;;  %v6708_v54 = vld [vmem:[#allocation2 + $0xa9] sm:$0xff] }
 0x74a   : > { %6623 = vst.msk [vmem:[#allocation2 + $0xb1] sm:$0xff] %vm397_vm0, %v6535_v59  ;;  %v6330_v38 = vadd.f32 %v6271_v28, %v6096_v9  ;;  %v6039_v5 = vpop.f32.mrf.mxu1 }
 0x74b   : > { %v6097_v14 = vadd.f32 %v6039_v5, %v5863_v12  ;;  %v7282_v12 = vld [vmem:[#allocation2 + $0x38] sm:$0xff] }
 0x74c   : > { %v6468_v4 = vadd.f32 %v6409_v42, %v6330_v38  ;;  %v7047_v42 = vld [vmem:[#allocation2 + $0x1a] sm:$0xff]  ;;  %v7048_v38 = vld [vmem:[#allocation2 + $0x22] sm:$0xff]  ;;  %v7312_v20 = vpack.c.bf16 %v7282_v12, %v7281_v47 }
 0x74d   : > { %v7078_v61 = vpack.c.bf16 %v7048_v38, %v7047_v42 }
 0x74e   : > { %v6504_v25 = vadd.f32 %v14179_v26, %v6468_v4 }
 0x750   : > { %v6536_v19 = vmax.f32 %v6504_v25, 0.0 }
 0x751   : > { %v6273_v51 = vpop.f32.mrf.mxu2  ;;  %v6411_v6 = vpop.f32.mrf.mxu3  ;;  %v6709_v58 = vld [vmem:[#allocation2 + $0xb1] sm:$0xff] }
 0x752   : > { %6624 = vst.msk [vmem:[#allocation2 + $0xc1] sm:$0xff] %vm397_vm0, %v6536_v19  ;;  %v6331_v13 = vadd.f32 %v6273_v51, %v6097_v14  ;;  %v6042_v17 = vpop.f32.mrf.mxu1  ;;  %v6733_v46 = vpack.c.bf16 %v6709_v58, %v6708_v54 }
 0x753   : > { %v6098_v34 = vadd.f32 %v6042_v17, %v13961_v60  ;;  %v5867_v17 = vadd.f32 %v13975_v50, %v13984_v49 }
 0x754   : > { %v6469_v35 = vadd.f32 %v6411_v6, %v6331_v13  ;;  %11344 = vmatmul.msk.bf16.gmra.mxu0 %vm397_vm0, %v6733_v46  ;;  %v14344_v9 = vpop.f32.mrf.mxu0 }
 0x755   : > { %11361 = vmatmul.msk.bf16.vlgmr.msra.gmra.mxu1 %vm397_vm0, %v6674_v29 }
 0x756   : > { %v6505_v1 = vadd.f32 %v14179_v26, %v6469_v35  ;;  %11389 = vmatmul.msk.bf16.vlgmr.msra.gmra.mxu2 %vm397_vm0, %v7077_v7  ;;  %11417 = vmatmul.msk.bf16.vlgmr.msra.gmra.mxu3 %vm397_vm0, %v7311_v10  ;;  %v7049_v35 = vld [vmem:[#allocation2 + $0x32] sm:$0xff] }
 0x758   : > { %v6537_v43 = vmax.f32 %v6505_v1, 0.0 }
 0x759   : > { %v6276_v23 = vpop.f32.mrf.mxu2  ;;  %v6414_v55 = vpop.f32.mrf.mxu3  ;;  %v6710_v57 = vld [vmem:[#allocation2 + $0xc1] sm:$0xff] }
 0x75a   : > { %6625 = vst.msk [vmem:[#allocation2 + $0xc9] sm:$0xff] %vm397_vm0, %v6537_v43  ;;  %v6332_v36 = vadd.f32 %v6276_v23, %v6098_v34  ;;  %v6044_v8 = vpop.f32.mrf.mxu1  ;;  %v7284_v23 = vld [vmem:[#allocation2 + $0x50] sm:$0xff] }
 0x75b   : > { %v6099_v28 = vadd.f32 %v6044_v8, %v5865_v37  ;;  %v7283_v37 = vld [vmem:[#allocation2 + $0x48] sm:$0xff] }
 0x75c   : > { %v6470_v11 = vadd.f32 %v6414_v55, %v6332_v36  ;;  %v14354_v58 = vpop.f32.mrf.mxu0 }
 0x75e   : > { %v6506_v2 = vadd.f32 %v14179_v26, %v6470_v11 }
 0x760   : > { %v6538_v59 = vmax.f32 %v6506_v2, 0.0  ;;  %v7313_v2 = vpack.c.bf16 %v7284_v23, %v7283_v37  ;;  %v5871_v23 = vadd.f32 %v14007_v39, %v14016_v56  ;;  %v7053_v37 = vld [vmem:[#allocation2 + $0x62] sm:$0xff]  ;;  %v7287_v39 = vld [vmem:[#allocation2 + $0x78] sm:$0xff] }
 0x761   : > { %v6278_v5 = vpop.f32.mrf.mxu2  ;;  %v6416_v60 = vpop.f32.mrf.mxu3  ;;  %v6711_v4 = vld [vmem:[#allocation2 + $0xc9] sm:$0xff] }
 0x762   : > { %6626 = vst.msk [vmem:[#allocation2 + $0xd9] sm:$0xff] %vm397_vm0, %v6538_v59  ;;  %v6333_v25 = vadd.f32 %v6278_v5, %v6099_v28  ;;  %v6047_v21 = vpop.f32.mrf.mxu1  ;;  %v6734_v45 = vpack.c.bf16 %v6711_v4, %v6710_v57 }
 0x763   : > { %v6100_v51 = vadd.f32 %v6047_v21, %v13977_v63 }
 0x764   : > { %v6471_v24 = vadd.f32 %v6416_v60, %v6333_v25  ;;  %11345 = vmatmul.msk.bf16.gmra.mxu0 %vm397_vm0, %v6734_v45  ;;  %v5869_v25 = vadd.f32 %v13991_v0, %v14000_v33 }
 0x765   : > { %11362 = vmatmul.msk.bf16.gmra.mxu1 %vm397_vm0, %v7311_v10  ;;  %v7050_v10 = vld [vmem:[#allocation2 + $0x3a] sm:$0xff] }
 0x766   : > { %v6507_v19 = vadd.f32 %v14179_v26, %v6471_v24  ;;  %11390 = vmatmul.msk.bf16.gmra.mxu2 %vm397_vm0, %v7078_v61  ;;  %11418 = vmatmul.msk.bf16.gmra.mxu3 %vm397_vm0, %v7312_v20  ;;  %v7079_v49 = vpack.c.bf16 %v7050_v10, %v7049_v35  ;;  %v7051_v24 = vld [vmem:[#allocation2 + $0x4a] sm:$0xff]  ;;  %v7052_v61 = vld [vmem:[#allocation2 + $0x52] sm:$0xff] }
 0x767   : > { %v14378_v33 = vpack.c.bf16 %v7052_v61, %v7051_v24 }
 0x768   : > { %v6539_v14 = vmax.f32 %v6507_v19, 0.0 }
 0x769   : > { %v6281_v6 = vpop.f32.mrf.mxu2  ;;  %v6419_v54 = vpop.f32.mrf.mxu3  ;;  %v6712_v43 = vld [vmem:[#allocation2 + $0xd9] sm:$0xff] }
 0x76a   : > { %6627 = vst.msk [vmem:[#allocation2 + $0xe1] sm:$0xff] %vm397_vm0, %v6539_v14  ;;  %v6334_v29 = vadd.f32 %v6281_v6, %v6100_v51  ;;  %v6049_v30 = vpop.f32.mrf.mxu1  ;;  %v7286_v51 = vld [vmem:[#allocation2 + $0x68] sm:$0xff] }
 0x76b   : > { %v6101_v15 = vadd.f32 %v6049_v30, %v5867_v17 }
 0x76c   : > { %v6472_v13 = vadd.f32 %v6419_v54, %v6334_v29 }
 0x76e   : > { %v6508_v46 = vadd.f32 %v14179_v26, %v6472_v13  ;;  %v7285_v13 = vld [vmem:[#allocation2 + $0x60] sm:$0xff] }
 0x76f   : > { %v14380_v17 = vpack.c.bf16 %v7286_v51, %v7285_v13  ;;  %v7055_v13 = vld [vmem:[#allocation2 + $0x7a] sm:$0xff] }
 0x770   : > { %v6540_v7 = vmax.f32 %v6508_v46, 0.0 }
 0x771   : > { %v6283_v1 = vpop.f32.mrf.mxu2  ;;  %v6421_v63 = vpop.f32.mrf.mxu3  ;;  %v6713_v34 = vld [vmem:[#allocation2 + $0xe1] sm:$0xff] }
 0x772   : > { %6628 = vst.msk [vmem:[#allocation2 + $0xf1] sm:$0xff] %vm397_vm0, %v6540_v7  ;;  %v6335_v55 = vadd.f32 %v6283_v1, %v6101_v15  ;;  %v14360_v36 = vpop.f32.mrf.mxu0  ;;  %v6052_v8 = vpop.f32.mrf.mxu1  ;;  %v6735_v11 = vpack.c.bf16 %v6713_v34, %v6712_v43 }
 0x773   : > { %v6102_v42 = vadd.f32 %v6052_v8, %v13993_v18 }
 0x774   : > { %v6473_v50 = vadd.f32 %v6421_v63, %v6335_v55  ;;  %11346 = vmatmul.msk.bf16.gmra.mxu0 %vm397_vm0, %v6735_v11 }
 0x775   : > { %11363 = vmatmul.msk.bf16.gmra.mxu1 %vm397_vm0, %v7312_v20 }
 0x776   : > { %v6509_v59 = vadd.f32 %v14179_v26, %v6473_v50  ;;  %11391 = vmatmul.msk.bf16.gmra.mxu2 %vm397_vm0, %v7079_v49  ;;  %11419 = vmatmul.msk.bf16.gmra.mxu3 %vm397_vm0, %v7313_v2  ;;  %v7054_v50 = vld [vmem:[#allocation2 + $0x6a] sm:$0xff] }
 0x778   : > { %v6541_v28 = vmax.f32 %v6509_v59, 0.0 }
 0x779   : > { %v6286_v38 = vpop.f32.mrf.mxu2  ;;  %v6424_v5 = vpop.f32.mrf.mxu3  ;;  %v6714_v19 = vld [vmem:[#allocation2 + $0xf1] sm:$0xff] }
 0x77a   : > { %6629 = vst.msk [vmem:[#allocation2 + $0xf9] sm:$0xff] %vm397_vm0, %v6541_v28  ;;  %v6336_v60 = vadd.f32 %v6286_v38, %v6102_v42  ;;  %v14369_v57 = vpop.f32.mrf.mxu0  ;;  %v6054_v4 = vpop.f32.mrf.mxu1  ;;  %v7288_v28 = vld [vmem:[#allocation2 + $0x80] sm:$0xff] }
 0x77b   : > { %v6103_v47 = vadd.f32 %v6054_v4, %v5869_v25  ;;  %v14402_v4 = vpack.c.bf16 %v7054_v50, %v7053_v37 }
 0x77c   : > { %v6474_v12 = vadd.f32 %v6424_v5, %v6336_v60 }
 0x77e   : > { %v6510_v21 = vadd.f32 %v14179_v26, %v6474_v12  ;;  %v14404_v12 = vpack.c.bf16 %v7288_v28, %v7287_v39 }
 0x780   : > { %v6542_v45 = vmax.f32 %v6510_v21, 0.0 }
 0x781   : > { %v6288_v20 = vpop.f32.mrf.mxu2  ;;  %v6426_v18 = vpop.f32.mrf.mxu3  ;;  %v6715_v14 = vld [vmem:[#allocation2 + $0xf9] sm:$0xff] }
 0x782   : > { %6630 = vst.msk [vmem:[#allocation2 + $0x109] sm:$0xff] %vm397_vm0, %v6542_v45  ;;  %v6337_v6 = vadd.f32 %v6288_v20, %v6103_v47  ;;  %v14375_v54 = vpop.f32.mrf.mxu0  ;;  %v6057_v29 = vpop.f32.mrf.mxu1  ;;  %v6736_v30 = vpack.c.bf16 %v6715_v14, %v6714_v19  ;;  %v16015_v14 = vld [vmem:[#allocation40_spill] sm:$0xff] }
 0x783   : > { %v6104_v15 = vadd.f32 %v6057_v29, %v14009_v31  ;;  %v5873_v51 = vadd.f32 %v16015_v14, %v14032_v62  ;;  %v7289_v62 = vld [vmem:[#allocation2 + $0x90] sm:$0xff] }
 0x784   : > { %v6475_v0 = vadd.f32 %v6426_v18, %v6337_v6  ;;  %11347 = vmatmul.msk.bf16.gmra.mxu0 %vm397_vm0, %v6736_v30 }
 0x785   : > { %11364 = vmatmul.msk.bf16.gmra.mxu1 %vm397_vm0, %v7313_v2 }
 0x786   : > { %v6511_v46 = vadd.f32 %v14179_v26, %v6475_v0  ;;  %11392 = vmatmul.msk.bf16.gmra.mxu2 %vm397_vm0, %v14378_v33  ;;  %11420 = vmatmul.msk.bf16.gmra.mxu3 %vm397_vm0, %v14380_v17  ;;  %v7056_v0 = vld [vmem:[#allocation2 + $0x82] sm:$0xff] }
 0x788   : > { %v6543_v7 = vmax.f32 %v6511_v46, 0.0 }
 0x789   : > { %v6291_v35 = vpop.f32.mrf.mxu2  ;;  %v6429_v10 = vpop.f32.mrf.mxu3  ;;  %v6716_v2 = vld [vmem:[#allocation2 + $0x109] sm:$0xff] }
 0x78a   : > { %6631 = vst.msk [vmem:[#allocation2 + $0x111] sm:$0xff] %vm397_vm0, %v6543_v7  ;;  %v6338_v1 = vadd.f32 %v6291_v35, %v6104_v15  ;;  %v14390_v63 = vpop.f32.mrf.mxu0  ;;  %v6059_v43 = vpop.f32.mrf.mxu1  ;;  %v7290_v35 = vld [vmem:[#allocation2 + $0x98] sm:$0xff] }
 0x78b   : > { %v6105_v11 = vadd.f32 %v6059_v43, %v5871_v23 }
 0x78c   : > { %v6476_v34 = vadd.f32 %v6429_v10, %v6338_v1 }
 0x78e   : > { %v6512_v55 = vadd.f32 %v14179_v26, %v6476_v34 }
 0x790   : > { %v6544_v8 = vmax.f32 %v6512_v55, 0.0  ;;  %v14427_v55 = vpack.c.bf16 %v7056_v0, %v7055_v13 }
 0x791   : > { %v6293_v49 = vpop.f32.mrf.mxu2  ;;  %v6431_v31 = vpop.f32.mrf.mxu3  ;;  %v6717_v59 = vld [vmem:[#allocation2 + $0x111] sm:$0xff] }
 0x792   : > { %6632 = vst.msk [vmem:[#allocation2 + $0x121] sm:$0xff] %vm397_vm0, %v6544_v8  ;;  %v6339_v42 = vadd.f32 %v6293_v49, %v6105_v11  ;;  %v14396_v38 = vpop.f32.mrf.mxu0  ;;  %v6062_v5 = vpop.f32.mrf.mxu1  ;;  %v14398_v60 = vpack.c.bf16 %v6717_v59, %v6716_v2  ;;  %v14429_v8 = vpack.c.bf16 %v7290_v35, %v7289_v62  ;;  %v11731_v62 = vld [vmem:[%s15764_s3 + $0x68] sm:$0xff] }
 0x793   : > { %v6106_v45 = vadd.f32 %v6062_v5, %v14025_v52  ;;  %v5875_v5 = vadd.f32 %v14039_v22, %v14052_v41  ;;  %v7291_v22 = vld [vmem:[#allocation2 + $0xa8] sm:$0xff]  ;;  %8101 = vmatpush.bf16.msrb.mxu2 %v11731_v62 }
 0x794   : > { %v6477_v56 = vadd.f32 %v6431_v31, %v6339_v42  ;;  %11348 = vmatmul.msk.bf16.gmra.mxu0 %vm397_vm0, %v14398_v60  ;;  %v7062_v62 = vld [vmem:[#allocation2 + $0xca] sm:$0xff] }
 0x795   : > { %11365 = vmatmul.msk.bf16.gmra.mxu1 %vm397_vm0, %v14380_v17 }
 0x796   : > { %v6513_v25 = vadd.f32 %v14179_v26, %v6477_v56  ;;  %11393 = vmatmul.msk.bf16.gmra.mxu2 %vm397_vm0, %v14402_v4  ;;  %11421 = vmatmul.msk.bf16.gmra.mxu3 %vm397_vm0, %v14404_v12 }
 0x798   : > { %v6545_v21 = vmax.f32 %v6513_v25, 0.0 }
 0x799   : > { %v6296_v47 = vpop.f32.mrf.mxu2  ;;  %v6434_v24 = vpop.f32.mrf.mxu3  ;;  %v6718_v7 = vld [vmem:[#allocation2 + $0x121] sm:$0xff] }
 0x79a   : > { %6633 = vst.msk [vmem:[#allocation2 + $0x129] sm:$0xff] %vm397_vm0, %v6545_v21  ;;  %v6340_v61 = vadd.f32 %v6296_v47, %v6106_v45  ;;  %v14415_v20 = vpop.f32.mrf.mxu0  ;;  %v6064_v18 = vpop.f32.mrf.mxu1  ;;  %v7057_v21 = vld [vmem:[#allocation2 + $0x92] sm:$0xff]  ;;  %v7058_v45 = vld [vmem:[#allocation2 + $0x9a] sm:$0xff] }
 0x79b   : > { %v6107_v30 = vadd.f32 %v6064_v18, %v5873_v51  ;;  %v7292_v18 = vld [vmem:[#allocation2 + $0xb0] sm:$0xff] }
 0x79c   : > { %v6478_v19 = vadd.f32 %v6434_v24, %v6340_v61 }
 0x79e   : > { %v6514_v6 = vadd.f32 %v14179_v26, %v6478_v19 }
 0x7a0   : > { %v6546_v29 = vmax.f32 %v6514_v6, 0.0 }
 0x7a1   : > { %v6298_v46 = vpop.f32.mrf.mxu2  ;;  %v6436_v52 = vpop.f32.mrf.mxu3  ;;  %v6719_v15 = vld [vmem:[#allocation2 + $0x129] sm:$0xff] }
 0x7a2   : > { %6634 = vst.msk [vmem:[#allocation2 + $0x139] sm:$0xff] %vm397_vm0, %v6546_v29  ;;  %v6341_v10 = vadd.f32 %v6298_v46, %v6107_v30  ;;  %v14421_v1 = vpop.f32.mrf.mxu0  ;;  %v6067_v43 = vpop.f32.mrf.mxu1  ;;  %v14423_v34 = vpack.c.bf16 %v6719_v15, %v6718_v7  ;;  %v14452_v29 = vpack.c.bf16 %v7058_v45, %v7057_v21  ;;  %v14454_v30 = vpack.c.bf16 %v7292_v18, %v7291_v22  ;;  %v7293_v45 = vld [vmem:[#allocation2 + $0xc0] sm:$0xff] }
 0x7a3   : > { %v6108_v50 = vadd.f32 %v6067_v43, %v14041_v16 }
 0x7a4   : > { %v6479_v23 = vadd.f32 %v6436_v52, %v6341_v10  ;;  %11349 = vmatmul.msk.bf16.gmra.mxu0 %vm397_vm0, %v14423_v34 }
 0x7a5   : > { %11366 = vmatmul.msk.bf16.gmra.mxu1 %vm397_vm0, %v14404_v12 }
 0x7a6   : > { %v6515_v11 = vadd.f32 %v14179_v26, %v6479_v23  ;;  %11394 = vmatmul.msk.bf16.gmra.mxu2 %vm397_vm0, %v14427_v55  ;;  %11422 = vmatmul.msk.bf16.gmra.mxu3 %vm397_vm0, %v14429_v8  ;;  %v11733_v23 = vld [vmem:[%s15764_s3 + $0x78] sm:$0xff] }
 0x7a7   : > { %8335 = vmatpush.bf16.msrb.mxu3 %v11733_v23 }
 0x7a8   : > { %v6547_v37 = vmax.f32 %v6515_v11, 0.0  ;;  %v5877_v11 = vadd.f32 %v14089_v44, %v14103_v27 }
 0x7a9   : > { %v6301_v49 = vpop.f32.mrf.mxu2  ;;  %v6439_v31 = vpop.f32.mrf.mxu3  ;;  %v6720_v24 = vld [vmem:[#allocation2 + $0x139] sm:$0xff] }
 0x7aa   : > { %6635 = vst.msk [vmem:[#allocation2 + $0x141] sm:$0xff] %vm397_vm0, %v6547_v37  ;;  %v6342_v2 = vadd.f32 %v6301_v49, %v6108_v50  ;;  %v14440_v59 = vpop.f32.mrf.mxu0  ;;  %v6069_v28 = vpop.f32.mrf.mxu1 }
 0x7ab   : > { %v6109_v25 = vadd.f32 %v6069_v28, %v5875_v5 }
 0x7ac   : > { %v6480_v42 = vadd.f32 %v6439_v31, %v6342_v2  ;;  %v7059_v31 = vld [vmem:[#allocation2 + $0xaa] sm:$0xff]  ;;  %v7060_v2 = vld [vmem:[#allocation2 + $0xb2] sm:$0xff] }
 0x7ae   : > { %v6516_v39 = vadd.f32 %v14179_v26, %v6480_v42 }
 0x7b0   : > { %v6548_v56 = vmax.f32 %v6516_v39, 0.0 }
 0x7b1   : > { %v6303_v47 = vpop.f32.mrf.mxu2  ;;  %v6441_v16 = vpop.f32.mrf.mxu3  ;;  %v6721_v61 = vld [vmem:[#allocation2 + $0x141] sm:$0xff] }
 0x7b2   : > { %6636 = vst.msk [vmem:[#allocation2 + $0x151] sm:$0xff] %vm397_vm0, %v6548_v56  ;;  %v6343_v19 = vadd.f32 %v6303_v47, %v6109_v25  ;;  %v14446_v14 = vpop.f32.mrf.mxu0  ;;  %v6072_v51 = vpop.f32.mrf.mxu1  ;;  %v14448_v6 = vpack.c.bf16 %v6721_v61, %v6720_v24  ;;  %v7294_v56 = vld [vmem:[#allocation2 + $0xc8] sm:$0xff] }
 0x7b3   : > { %v6110_v46 = vadd.f32 %v6072_v51, %v14079_v53  ;;  %v11729_v53 = vld [vmem:[%s15764_s3 + $0x58] sm:$0xff]  ;;  %v14488_v24 = vpack.c.bf16 %v7294_v56, %v7293_v45  ;;  %v11735_v61 = vld [vmem:[%s15764_s3 + $0x88] sm:$0xff] }
 0x7b4   : > { %v6481_v41 = vadd.f32 %v6441_v16, %v6343_v19  ;;  %11350 = vmatmul.msk.bf16.gmra.mxu0 %vm397_vm0, %v14448_v6  ;;  %7866 = vmatpush.bf16.msrb.mxu1 %v11729_v53  ;;  %v14486_v16 = vpack.c.bf16 %v7060_v2, %v7059_v31  ;;  %v7295_v2 = vld [vmem:[#allocation2 + $0xd8] sm:$0xff] }
 0x7b5   : > { %11367 = vmatmul.msk.bf16.gmra.mxu1 %vm397_vm0, %v14429_v8  ;;  %16016 = vst [vmem:[#allocation42_spill] sm:$0xff] %v14488_v24  ;;  %8569 = vmatpush.bf16.msrb.mxu0 %v11735_v61 }
 0x7b6   : > { %v6517_v13 = vadd.f32 %v14179_v26, %v6481_v41  ;;  %11395 = vmatmul.msk.bf16.gmra.mxu2 %vm397_vm0, %v14452_v29  ;;  %11423 = vmatmul.msk.bf16.gmra.mxu3 %vm397_vm0, %v14454_v30 }
 0x7b8   : > { %v6549_v0 = vmax.f32 %v6517_v13, 0.0 }
 0x7b9   : > { %v6306_v52 = vpop.f32.mrf.mxu2  ;;  %v6444_v7 = vpop.f32.mrf.mxu3  ;;  %v6722_v5 = vld [vmem:[#allocation2 + $0x151] sm:$0xff] }
 0x7ba   : > { %6637 = vst.msk [vmem:[#allocation2 + $0x159] sm:$0xff] %vm397_vm0, %v6549_v0  ;;  %v6344_v15 = vadd.f32 %v6306_v52, %v6110_v46  ;;  %v14465_v35 = vpop.f32.mrf.mxu0  ;;  %v6074_v10 = vpop.f32.mrf.mxu1 }
 0x7bb   : > { %v6111_v49 = vadd.f32 %v6074_v10, %v5877_v11 }
 0x7bc   : > { %v6482_v43 = vadd.f32 %v6444_v7, %v6344_v15  ;;  %v11759_v7 = vld [vmem:[%s15763_s2] ss:$0 sm:$0xff] }
 0x7be   : > { %v6518_v37 = vadd.f32 %v14179_v26, %v6482_v43 }
 0x7c0   : > { %v6550_v50 = vmax.f32 %v6518_v37, 0.0 }
 0x7c1   : > { %v6308_v28 = vpop.f32.mrf.mxu2  ;;  %v6446_v42 = vpop.f32.mrf.mxu3  ;;  %v6723_v39 = vld [vmem:[#allocation2 + $0x159] sm:$0xff] }
 0x7c2   : > { %6638 = vst.msk [vmem:[#allocation2 + $0x169] sm:$0xff] %vm397_vm0, %v6550_v50  ;;  %v6345_v25 = vadd.f32 %v6308_v28, %v6111_v49  ;;  %v14480_v21 = vpop.f32.mrf.mxu0  ;;  %v6077_v44 = vpop.f32.mrf.mxu1  ;;  %v14482_v27 = vpack.c.bf16 %v6723_v39, %v6722_v5  ;;  %v7296_v50 = vld [vmem:[#allocation2 + $0xe0] sm:$0xff] }
 0x7c3   : > { %v6112_v51 = vadd.f32 %v6077_v44, %v14139_v48  ;;  %v7061_v48 = vld [vmem:[#allocation2 + $0xc2] sm:$0xff]  ;;  %v14518_v5 = vpack.c.bf16 %v7296_v50, %v7295_v2 }
 0x7c4   : > { %v6483_v47 = vadd.f32 %v6446_v42, %v6345_v25  ;;  %11351 = vmatmul.msk.bf16.gmra.mxu0 %vm397_vm0, %v14482_v27  ;;  %v14516_v42 = vpack.c.bf16 %v7062_v62, %v7061_v48  ;;  %v7297_v48 = vld [vmem:[#allocation2 + $0xf0] sm:$0xff] }
 0x7c5   : > { %11368 = vmatmul.msk.bf16.gmra.mxu1 %vm397_vm0, %v14454_v30  ;;  %16019 = vst [vmem:[#allocation44_spill] sm:$0xff] %v14518_v5 }
 0x7c6   : > { %v6519_v18 = vadd.f32 %v14179_v26, %v6483_v47  ;;  %11396 = vmatmul.msk.bf16.gmra.mxu2 %vm397_vm0, %v14486_v16  ;;  %11424 = vmatmul.msk.bf16.gmra.mxu3 %vm397_vm0, %v14488_v24  ;;  %v5879_v26 = vadd.f32 %v14337_v32, %v14157_v3  ;;  %16018 = vst [vmem:[#allocation43_spill] sm:$0xff] %v14516_v42 }
 0x7c8   : > { %v6551_v19 = vmax.f32 %v6519_v18, 0.0 }
 0x7c9   : > { %v6311_v22 = vpop.f32.mrf.mxu2  ;;  %v6449_v41 = vpop.f32.mrf.mxu3  ;;  %v6724_v11 = vld [vmem:[#allocation2 + $0x169] sm:$0xff] }
 0x7ca   : > { %6639 = vst.msk [vmem:[#allocation2 + $0x171] sm:$0xff] %vm397_vm0, %v6551_v19  ;;  %v6346_v13 = vadd.f32 %v6311_v22, %v6112_v51  ;;  %v14502_v0 = vpop.f32.mrf.mxu0  ;;  %v6079_v46 = vpop.f32.mrf.mxu1  ;;  %v7514_v51 = vld [vmem:[#allocation2 + $0x21] sm:$0xff] }
 0x7cb   : > { %v6113_v43 = vadd.f32 %v6079_v46, %v5879_v26  ;;  %v7064_v26 = vld [vmem:[#allocation2 + $0xe2] sm:$0xff] }
 0x7cc   : > { %v6484_v52 = vadd.f32 %v6449_v41, %v6346_v13  ;;  %v7513_v41 = vld [vmem:[#allocation2 + $0x19] sm:$0xff] }
 0x7ce   : > { %v6520_v15 = vadd.f32 %v11759_v7, %v6484_v52  ;;  %v7063_v52 = vld [vmem:[#allocation2 + $0xda] sm:$0xff] }
 0x7d0   : > { %v6552_v10 = vmax.f32 %v6520_v15, 0.0 }
 0x7d1   : > { %v6313_v23 = vpop.f32.mrf.mxu2  ;;  %v6451_v53 = vpop.f32.mrf.mxu3  ;;  %v6725_v37 = vld [vmem:[#allocation2 + $0x171] sm:$0xff] }
 0x7d2   : > { %6640 = vst.msk [vmem:[#allocation2 + $0x181] sm:$0xff] %vm397_vm0, %v6552_v10  ;;  %v6347_v49 = vadd.f32 %v6313_v23, %v6113_v43  ;;  %v14510_v31 = vpop.f32.mrf.mxu0  ;;  %v6965_v3 = vpop.f32.mrf.mxu1  ;;  %v14512_v32 = vpack.c.bf16 %v6725_v37, %v6724_v11  ;;  %v7545_v43 = vpack.c.bf16 %v7514_v51, %v7513_v41  ;;  %v14538_v23 = vpack.c.bf16 %v7064_v26, %v7063_v52 }
 0x7d3   : > { %v6966_v25 = vadd.f32 %v6965_v3, %v14344_v9 }
 0x7d4   : > { %16017 = vst [vmem:[#allocation45_spill] sm:$0xff] %v14512_v32  ;;  %v6485_v28 = vadd.f32 %v6451_v53, %v6347_v49  ;;  %11352 = vmatmul.msk.bf16.gmra.mxu0 %vm397_vm0, %v14512_v32  ;;  %v7075_v32 = vld [vmem:[#allocation2 + $0x16a] sm:$0xff] }
 0x7d5   : > { %11369 = vmatmul.msk.bf16.gmra.mxu1 %vm397_vm0, %v14488_v24  ;;  %16020 = vst [vmem:[#allocation46_spill] sm:$0xff] %v14538_v23 }
 0x7d6   : > { %v6521_v39 = vadd.f32 %v11759_v7, %v6485_v28  ;;  %11397 = vmatmul.msk.bf16.gmra.mxu2 %vm397_vm0, %v14516_v42  ;;  %11425 = vmatmul.msk.bf16.gmra.mxu3 %vm397_vm0, %v14518_v5  ;;  %v7298_v7 = vld [vmem:[#allocation2 + $0xf8] sm:$0xff]  ;;  %v7307_v42 = vld [vmem:[#allocation2 + $0x168] sm:$0xff] }
 0x7d7   : > { %v14540_v53 = vpack.c.bf16 %v7298_v7, %v7297_v48  ;;  %v7516_v28 = vld [vmem:[#allocation2 + $0x39] sm:$0xff] }
 0x7d8   : > { %v6553_v56 = vmax.f32 %v6521_v39, 0.0 }
 0x7d9   : > { %v7167_v44 = vpop.f32.mrf.mxu2  ;;  %v7401_v45 = vpop.f32.mrf.mxu3  ;;  %16021 = vst [vmem:[#allocation10_spill] sm:$0xff] %v14540_v53  ;;  %v7309_v24 = vld [vmem:[#allocation2 + $0x180] sm:$0xff] }
 0x7da   : > { %6641 = vst.msk [vmem:[#allocation2 + $0x189] sm:$0xff] %vm397_vm0, %v6553_v56  ;;  %v14528_v47 = vpop.f32.mrf.mxu0  ;;  %v7247_v61 = vadd.f32 %v7167_v44, %v6966_v25  ;;  %v6967_v18 = vpop.f32.mrf.mxu1  ;;  %v7515_v56 = vld [vmem:[#allocation2 + $0x31] sm:$0xff] }
 0x7db   : > { %v6968_v22 = vadd.f32 %v6967_v18, %v14354_v58  ;;  %v7300_v18 = vld [vmem:[#allocation2 + $0x110] sm:$0xff]  ;;  %v14556_v41 = vpack.c.bf16 %v7516_v28, %v7515_v56 }
 0x7dc   : > { %v14530_v19 = vadd.f32 %v7401_v45, %v7247_v61  ;;  %v7065_v45 = vld [vmem:[#allocation2 + $0xf2] sm:$0xff]  ;;  %v7066_v61 = vld [vmem:[#allocation2 + $0xfa] sm:$0xff] }
 0x7dd   : > { %v14562_v52 = vpack.c.bf16 %v7066_v61, %v7065_v45  ;;  %v7068_v56 = vld [vmem:[#allocation2 + $0x112] sm:$0xff] }
 0x7df   : > { %16022 = vst [vmem:[#allocation16_spill] sm:$0xff] %v14562_v52 }
 0x7e1   : > { %v7169_v13 = vpop.f32.mrf.mxu2  ;;  %v7403_v46 = vpop.f32.mrf.mxu3 }
 0x7e2   : > { %v14533_v9 = vpop.f32.mrf.mxu0  ;;  %v7248_v15 = vadd.f32 %v7169_v13, %v6968_v22  ;;  %v6970_v10 = vpop.f32.mrf.mxu1  ;;  %v7299_v13 = vld [vmem:[#allocation2 + $0x108] sm:$0xff] }
 0x7e3   : > { %v6971_v58 = vadd.f32 %v6970_v10, %v14360_v36 }
 0x7e4   : > { %v14535_v62 = vadd.f32 %v7403_v46, %v7248_v15  ;;  %11445 = vmatmul.msk.bf16.vlgmr.msra.gmra.mxu0 %vm397_vm0, %v7545_v43 }
 0x7e5   : > { %11370 = vmatmul.msk.bf16.gmra.mxu1 %vm397_vm0, %v14518_v5 }
 0x7e6   : > { %11398 = vmatmul.msk.bf16.gmra.mxu2 %vm397_vm0, %v14538_v23  ;;  %11426 = vmatmul.msk.bf16.gmra.mxu3 %vm397_vm0, %v14540_v53 }
 0x7e9   : > { %v7172_v11 = vpop.f32.mrf.mxu2  ;;  %v7406_v37 = vpop.f32.mrf.mxu3 }
 0x7ea   : > { %v14549_v50 = vpop.f32.mrf.mxu0  ;;  %v7249_v49 = vadd.f32 %v7172_v11, %v6971_v58  ;;  %v6972_v3 = vpop.f32.mrf.mxu1  ;;  %v7518_v11 = vld [vmem:[#allocation2 + $0x51] sm:$0xff] }
 0x7eb   : > { %v6973_v39 = vadd.f32 %v6972_v3, %v14369_v57  ;;  %v14564_v57 = vpack.c.bf16 %v7300_v18, %v7299_v13  ;;  %v7301_v18 = vld [vmem:[#allocation2 + $0x120] sm:$0xff] }
 0x7ec   : > { %v14551_v2 = vadd.f32 %v7406_v37, %v7249_v49  ;;  %v7517_v49 = vld [vmem:[#allocation2 + $0x49] sm:$0xff] }
 0x7ed   : > { %16023 = vst [vmem:[#allocation4_spill] sm:$0xff] %v14564_v57  ;;  %v14580_v61 = vpack.c.bf16 %v7518_v11, %v7517_v49 }
 0x7f1   : > { %v7174_v25 = vpop.f32.mrf.mxu2  ;;  %v7408_v44 = vpop.f32.mrf.mxu3 }
 0x7f2   : > { %v14554_v51 = vpop.f32.mrf.mxu0  ;;  %v7250_v36 = vadd.f32 %v7174_v25, %v6973_v39  ;;  %v6975_v22 = vpop.f32.mrf.mxu1  ;;  %v7067_v39 = vld [vmem:[#allocation2 + $0x10a] sm:$0xff] }
 0x7f3   : > { %v6976_v26 = vadd.f32 %v6975_v22, %v14375_v54  ;;  %v7302_v25 = vld [vmem:[#allocation2 + $0x128] sm:$0xff]  ;;  %v14586_v22 = vpack.c.bf16 %v7068_v56, %v7067_v39 }
 0x7f4   : > { %v14558_v46 = vadd.f32 %v7408_v44, %v7250_v36  ;;  %11446 = vmatmul.msk.bf16.gmra.mxu0 %vm397_vm0, %v14556_v41  ;;  %v7069_v56 = vld [vmem:[#allocation2 + $0x122] sm:$0xff] }
 0x7f5   : > { %11371 = vmatmul.msk.bf16.gmra.mxu1 %vm397_vm0, %v14540_v53  ;;  %16024 = vst [vmem:[#allocation13_spill] sm:$0xff] %v14586_v22  ;;  %v7305_v53 = vld [vmem:[#allocation2 + $0x150] sm:$0xff] }
 0x7f6   : > { %11399 = vmatmul.msk.bf16.gmra.mxu2 %vm397_vm0, %v14562_v52  ;;  %11427 = vmatmul.msk.bf16.gmra.mxu3 %vm397_vm0, %v14564_v57 }
 0x7f9   : > { %v7177_v7 = vpop.f32.mrf.mxu2  ;;  %v7411_v15 = vpop.f32.mrf.mxu3 }
 0x7fa   : > { %v14573_v10 = vpop.f32.mrf.mxu0  ;;  %v7251_v43 = vadd.f32 %v7177_v7, %v6976_v26  ;;  %v6977_v48 = vpop.f32.mrf.mxu1 }
 0x7fb   : > { %v6978_v37 = vadd.f32 %v6977_v48, %v14390_v63  ;;  %v14588_v63 = vpack.c.bf16 %v7302_v25, %v7301_v18  ;;  %v7070_v25 = vld [vmem:[#allocation2 + $0x12a] sm:$0xff] }
 0x7fc   : > { %v14575_v58 = vadd.f32 %v7411_v15, %v7251_v43 }
 0x7fd   : > { %16025 = vst [vmem:[#allocation7_spill] sm:$0xff] %v14588_v63 }
 0x801   : > { %v7179_v3 = vpop.f32.mrf.mxu2  ;;  %v7413_v28 = vpop.f32.mrf.mxu3 }
 0x802   : > { %v14578_v44 = vpop.f32.mrf.mxu0  ;;  %v7252_v54 = vadd.f32 %v7179_v3, %v6978_v37  ;;  %v6980_v45 = vpop.f32.mrf.mxu1  ;;  %v7520_v37 = vld [vmem:[#allocation2 + $0x69] sm:$0xff]  ;;  %v7519_v3 = vld [vmem:[#allocation2 + $0x61] sm:$0xff] }
 0x803   : > { %v6981_v13 = vadd.f32 %v6980_v45, %v14396_v38  ;;  %v14604_v40 = vpack.c.bf16 %v7520_v37, %v7519_v3 }
 0x804   : > { %v14582_v36 = vadd.f32 %v7413_v28, %v7252_v54  ;;  %11447 = vmatmul.msk.bf16.gmra.mxu0 %vm397_vm0, %v14580_v61  ;;  %v7304_v54 = vld [vmem:[#allocation2 + $0x140] sm:$0xff] }
 0x805   : > { %11372 = vmatmul.msk.bf16.gmra.mxu1 %vm397_vm0, %v14564_v57 }
 0x806   : > { %11400 = vmatmul.msk.bf16.gmra.mxu2 %vm397_vm0, %v14586_v22  ;;  %11428 = vmatmul.msk.bf16.gmra.mxu3 %vm397_vm0, %v14588_v63  ;;  %v7303_v22 = vld [vmem:[#allocation2 + $0x138] sm:$0xff] }
 0x809   : > { %v7182_v26 = vpop.f32.mrf.mxu2  ;;  %v7416_v7 = vpop.f32.mrf.mxu3 }
 0x80a   : > { %v14597_v15 = vpop.f32.mrf.mxu0  ;;  %v7253_v43 = vadd.f32 %v7182_v26, %v6981_v13  ;;  %v6982_v48 = vpop.f32.mrf.mxu1  ;;  %v14610_v26 = vpack.c.bf16 %v7070_v25, %v7069_v56  ;;  %v7521_v56 = vld [vmem:[#allocation2 + $0x79] sm:$0xff] }
 0x80b   : > { %v6983_v49 = vadd.f32 %v6982_v48, %v14415_v20  ;;  %v14612_v20 = vpack.c.bf16 %v7304_v54, %v7303_v22  ;;  %v7522_v22 = vld [vmem:[#allocation2 + $0x81] sm:$0xff] }
 0x80c   : > { %v14599_v11 = vadd.f32 %v7416_v7, %v7253_v43  ;;  %16026 = vst [vmem:[#allocation17_spill] sm:$0xff] %v14610_v26  ;;  %v14628_v52 = vpack.c.bf16 %v7522_v22, %v7521_v56 }
 0x80d   : > { %16027 = vst [vmem:[#allocation5_spill] sm:$0xff] %v14612_v20 }
 0x811   : > { %v7184_v28 = vpop.f32.mrf.mxu2  ;;  %v7418_v39 = vpop.f32.mrf.mxu3 }
 0x812   : > { %v14602_v18 = vpop.f32.mrf.mxu0  ;;  %v7254_v38 = vadd.f32 %v7184_v28, %v6983_v49  ;;  %v6985_v45 = vpop.f32.mrf.mxu1 }
 0x813   : > { %v6986_v7 = vadd.f32 %v6985_v45, %v14421_v1 }
 0x814   : > { %v14606_v13 = vadd.f32 %v7418_v39, %v7254_v38  ;;  %11448 = vmatmul.msk.bf16.gmra.mxu0 %vm397_vm0, %v14604_v40  ;;  %v7071_v38 = vld [vmem:[#allocation2 + $0x13a] sm:$0xff] }
 0x815   : > { %11373 = vmatmul.msk.bf16.gmra.mxu1 %vm397_vm0, %v14588_v63  ;;  %v7306_v63 = vld [vmem:[#allocation2 + $0x158] sm:$0xff] }
 0x816   : > { %11401 = vmatmul.msk.bf16.gmra.mxu2 %vm397_vm0, %v14610_v26  ;;  %11429 = vmatmul.msk.bf16.gmra.mxu3 %vm397_vm0, %v14612_v20  ;;  %v7072_v26 = vld [vmem:[#allocation2 + $0x142] sm:$0xff] }
 0x819   : > { %v7187_v43 = vpop.f32.mrf.mxu2  ;;  %v7421_v48 = vpop.f32.mrf.mxu3 }
 0x81a   : > { %v14621_v37 = vpop.f32.mrf.mxu0  ;;  %v7255_v49 = vadd.f32 %v7187_v43, %v6986_v7  ;;  %v6987_v3 = vpop.f32.mrf.mxu1  ;;  %v14634_v43 = vpack.c.bf16 %v7072_v26, %v7071_v38 }
 0x81b   : > { %v6988_v39 = vadd.f32 %v6987_v3, %v14440_v59  ;;  %v14636_v59 = vpack.c.bf16 %v7306_v63, %v7305_v53  ;;  %v7524_v53 = vld [vmem:[#allocation2 + $0x99] sm:$0xff] }
 0x81c   : > { %v14623_v28 = vadd.f32 %v7421_v48, %v7255_v49  ;;  %16028 = vst [vmem:[#allocation20_spill] sm:$0xff] %v14634_v43 }
 0x81d   : > { %16029 = vst [vmem:[#allocation18_spill] sm:$0xff] %v14636_v59 }
 0x821   : > { %v7189_v25 = vpop.f32.mrf.mxu2  ;;  %v7423_v54 = vpop.f32.mrf.mxu3 }
 0x822   : > { %v14626_v57 = vpop.f32.mrf.mxu0  ;;  %v7256_v1 = vadd.f32 %v7189_v25, %v6988_v39  ;;  %v6990_v45 = vpop.f32.mrf.mxu1  ;;  %v7523_v25 = vld [vmem:[#allocation2 + $0x91] sm:$0xff] }
 0x823   : > { %v6991_v48 = vadd.f32 %v6990_v45, %v14446_v14  ;;  %v14652_v5 = vpack.c.bf16 %v7524_v53, %v7523_v25 }
 0x824   : > { %v14630_v7 = vadd.f32 %v7423_v54, %v7256_v1  ;;  %11449 = vmatmul.msk.bf16.gmra.mxu0 %vm397_vm0, %v14628_v52  ;;  %v7073_v1 = vld [vmem:[#allocation2 + $0x152] sm:$0xff] }
 0x825   : > { %11374 = vmatmul.msk.bf16.gmra.mxu1 %vm397_vm0, %v14612_v20  ;;  %v7308_v20 = vld [vmem:[#allocation2 + $0x170] sm:$0xff] }
 0x826   : > { %11402 = vmatmul.msk.bf16.gmra.mxu2 %vm397_vm0, %v14634_v43  ;;  %11430 = vmatmul.msk.bf16.gmra.mxu3 %vm397_vm0, %v14636_v59  ;;  %v7074_v43 = vld [vmem:[#allocation2 + $0x15a] sm:$0xff] }
 0x829   : > { %v7192_v49 = vpop.f32.mrf.mxu2  ;;  %v7426_v3 = vpop.f32.mrf.mxu3 }
 0x82a   : > { %v14645_v22 = vpop.f32.mrf.mxu0  ;;  %v7257_v39 = vadd.f32 %v7192_v49, %v6991_v48  ;;  %v6992_v26 = vpop.f32.mrf.mxu1  ;;  %v14658_v49 = vpack.c.bf16 %v7074_v43, %v7073_v1 }
 0x82b   : > { %v6993_v63 = vadd.f32 %v6992_v26, %v14465_v35  ;;  %v14660_v35 = vpack.c.bf16 %v7308_v20, %v7307_v42  ;;  %v11732_v26 = vld [vmem:[%s15764_s3 + $0x70] sm:$0xff] }
 0x82c   : > { %v14647_v56 = vadd.f32 %v7426_v3, %v7257_v39  ;;  %16031 = vst [vmem:[#allocation19_spill] sm:$0xff] %v14658_v49  ;;  %v11728_v3 = vld [vmem:[%s15764_s3 + $0x50] sm:$0xff]  ;;  %v11730_v39 = vld [vmem:[%s15764_s3 + $0x60] sm:$0xff]  ;;  %8336 = vmatpush.bf16.msrb.mxu3 %v11732_v26 }
 0x82d   : > { %16032 = vst [vmem:[#allocation23_spill] sm:$0xff] %v14660_v35  ;;  %7867 = vmatpush.bf16.msrb.mxu1 %v11728_v3  ;;  %8102 = vmatpush.bf16.msrb.mxu2 %v11730_v39  ;;  %v7076_v3 = vld [vmem:[#allocation2 + $0x172] sm:$0xff]  ;;  %v7310_v39 = vld [vmem:[#allocation2 + $0x188] sm:$0xff] }
 0x831   : > { %v7194_v54 = vpop.f32.mrf.mxu2  ;;  %v7428_v38 = vpop.f32.mrf.mxu3 }
 0x832   : > { %v14650_v23 = vpop.f32.mrf.mxu0  ;;  %v7258_v14 = vadd.f32 %v7194_v54, %v6993_v63  ;;  %v6995_v45 = vpop.f32.mrf.mxu1 }
 0x833   : > { %v6996_v42 = vadd.f32 %v6995_v45, %v14480_v21 }
 0x834   : > { %v14654_v48 = vadd.f32 %v7428_v38, %v7258_v14  ;;  %11450 = vmatmul.msk.bf16.gmra.mxu0 %vm397_vm0, %v14652_v5  ;;  %v7526_v38 = vld [vmem:[#allocation2 + $0xb1] sm:$0xff]  ;;  %v7525_v14 = vld [vmem:[#allocation2 + $0xa9] sm:$0xff] }
 0x835   : > { %11375 = vmatmul.msk.bf16.gmra.mxu1 %vm397_vm0, %v14636_v59  ;;  %v14685_v26 = vpack.c.bf16 %v7526_v38, %v7525_v14 }
 0x836   : > { %16030 = vst [vmem:[#allocation8_spill] sm:$0xff] %v14654_v48  ;;  %11403 = vmatmul.msk.bf16.gmra.mxu2 %vm397_vm0, %v14658_v49  ;;  %11431 = vmatmul.msk.bf16.gmra.mxu3 %vm397_vm0, %v14660_v35 }
 0x839   : > { %v7197_v20 = vpop.f32.mrf.mxu2  ;;  %v7431_v43 = vpop.f32.mrf.mxu3 }
 0x83a   : > { %v14678_v53 = vpop.f32.mrf.mxu0  ;;  %v7259_v63 = vadd.f32 %v7197_v20, %v6996_v42  ;;  %v6997_v25 = vpop.f32.mrf.mxu1  ;;  %v14691_v20 = vpack.c.bf16 %v7076_v3, %v7075_v32  ;;  %v7747_v3 = vld [vmem:[#allocation2 + $0x1a] sm:$0xff] }
 0x83b   : > { %v6998_v1 = vadd.f32 %v6997_v25, %v14502_v0  ;;  %v14693_v0 = vpack.c.bf16 %v7310_v39, %v7309_v24  ;;  %v7748_v39 = vld [vmem:[#allocation2 + $0x22] sm:$0xff] }
 0x83c   : > { %v14680_v54 = vadd.f32 %v7431_v43, %v7259_v63  ;;  %16035 = vst [vmem:[#allocation22_spill] sm:$0xff] %v14691_v20  ;;  %v11734_v43 = vld [vmem:[%s15764_s3 + $0x80] sm:$0xff] }
 0x83d   : > { %16036 = vst [vmem:[#allocation14_spill] sm:$0xff] %v14693_v0  ;;  %8570 = vmatpush.bf16.msrb.mxu0 %v11734_v43 }
 0x83e   : > { %16033 = vst [vmem:[#allocation11_spill] sm:$0xff] %v14680_v54  ;;  %v7779_v54 = vpack.c.bf16 %v7748_v39, %v7747_v3  ;;  %v7530_v3 = vld [vmem:[#allocation2 + $0xe1] sm:$0xff]  ;;  %v7749_v39 = vld [vmem:[#allocation2 + $0x32] sm:$0xff] }
 0x841   : > { %v7199_v49 = vpop.f32.mrf.mxu2  ;;  %v7433_v59 = vpop.f32.mrf.mxu3 }
 0x842   : > { %v14683_v48 = vpop.f32.mrf.mxu0  ;;  %v7260_v21 = vadd.f32 %v7199_v49, %v6998_v1  ;;  %v7000_v45 = vpop.f32.mrf.mxu1  ;;  %v7528_v1 = vld [vmem:[#allocation2 + $0xc9] sm:$0xff] }
 0x844   : > { %v14687_v42 = vadd.f32 %v7433_v59, %v7260_v21  ;;  %11451 = vmatmul.msk.bf16.gmra.mxu0 %vm397_vm0, %v14685_v26  ;;  %v7001_v59 = vadd.f32 %v7000_v45, %v14510_v31 }
 0x845   : > { %11376 = vmatmul.msk.bf16.gmra.mxu1 %vm397_vm0, %v14660_v35  ;;  %v7527_v35 = vld [vmem:[#allocation2 + $0xc1] sm:$0xff] }
 0x846   : > { %16034 = vst [vmem:[#allocation21_spill] sm:$0xff] %v14687_v42  ;;  %11404 = vmatmul.msk.bf16.gmra.mxu2 %vm397_vm0, %v14691_v20  ;;  %11432 = vmatmul.msk.bf16.gmra.mxu3 %vm397_vm0, %v14693_v0  ;;  %v7983_v0 = vld [vmem:[#allocation2 + $0x38] sm:$0xff]  ;;  %v14712_v42 = vpack.c.bf16 %v7528_v1, %v7527_v35 }
 0x849   : > { %v7202_v32 = vpop.f32.mrf.mxu2  ;;  %v7436_v49 = vpop.f32.mrf.mxu3 }
 0x84a   : > { %v14705_v24 = vpop.f32.mrf.mxu0  ;;  %v7261_v63 = vadd.f32 %v7202_v32, %v7001_v59  ;;  %v7002_v25 = vpop.f32.mrf.mxu1  ;;  %v7982_v59 = vld [vmem:[#allocation2 + $0x30] sm:$0xff] }
 0x84b   : > { %v7003_v14 = vadd.f32 %v7002_v25, %v14528_v47  ;;  %v8014_v47 = vpack.c.bf16 %v7983_v0, %v7982_v59  ;;  %v7529_v59 = vld [vmem:[#allocation2 + $0xd9] sm:$0xff] }
 0x84c   : > { %v14707_v38 = vadd.f32 %v7436_v49, %v7261_v63 }
 0x84e   : > { %16037 = vst [vmem:[#allocation26_spill] sm:$0xff] %v14707_v38 }
 0x851   : > { %v7204_v21 = vpop.f32.mrf.mxu2  ;;  %v7438_v20 = vpop.f32.mrf.mxu3 }
 0x852   : > { %v14710_v43 = vpop.f32.mrf.mxu0  ;;  %v7262_v31 = vadd.f32 %v7204_v21, %v7003_v14  ;;  %v7005_v45 = vpop.f32.mrf.mxu1 }
 0x853   : > { %v7006_v49 = vadd.f32 %v7005_v45, %v14533_v9  ;;  %v14728_v45 = vpack.c.bf16 %v7530_v3, %v7529_v59 }
 0x854   : > { %v14714_v32 = vadd.f32 %v7438_v20, %v7262_v31  ;;  %11452 = vmatmul.msk.bf16.gmra.mxu0 %vm397_vm0, %v14712_v42 }
 0x855   : > { %11473 = vmatmul.msk.bf16.vlgmr.msrb.gmra.mxu1 %vm397_vm0, %v7779_v54  ;;  %v7750_v54 = vld [vmem:[#allocation2 + $0x3a] sm:$0xff] }
 0x856   : > { %16038 = vst [vmem:[#allocation24_spill] sm:$0xff] %v14714_v32  ;;  %11501 = vmatmul.msk.bf16.vlgmr.msrb.gmra.mxu2 %vm397_vm0, %v8014_v47  ;;  %11529 = vmatmul.msk.bf16.vlgmr.msrb.gmra.mxu3 %vm397_vm0, %v14556_v41  ;;  %v7985_v47 = vld [vmem:[#allocation2 + $0x50] sm:$0xff] }
 0x859   : > { %v7207_v63 = vpop.f32.mrf.mxu2  ;;  %v7441_v35 = vpop.f32.mrf.mxu3 }
 0x85a   : > { %v14723_v25 = vpop.f32.mrf.mxu0  ;;  %v7263_v1 = vadd.f32 %v7207_v63, %v7006_v49  ;;  %v7007_v20 = vpop.f32.mrf.mxu1  ;;  %v14733_v49 = vpack.c.bf16 %v7750_v54, %v7749_v39  ;;  %v7984_v63 = vld [vmem:[#allocation2 + $0x48] sm:$0xff] }
 0x85b   : > { %v7008_v0 = vadd.f32 %v7007_v20, %v14549_v50  ;;  %v8015_v50 = vpack.c.bf16 %v7985_v47, %v7984_v63 }
 0x85c   : > { %v14725_v14 = vadd.f32 %v7441_v35, %v7263_v1 }
 0x861   : > { %v7209_v21 = vpop.f32.mrf.mxu2  ;;  %v7443_v31 = vpop.f32.mrf.mxu3 }
 0x862   : > { %v7264_v41 = vadd.f32 %v7209_v21, %v7008_v0  ;;  %v7635_v32 = vpop.f32.mrf.mxu0  ;;  %v7010_v9 = vpop.f32.mrf.mxu1  ;;  %v7532_v21 = vld [vmem:[#allocation2 + $0xf9] sm:$0xff] }
 0x863   : > { %v14731_v38 = vadd.f32 %v7635_v32, %v14530_v19  ;;  %v7011_v19 = vadd.f32 %v7010_v9, %v14554_v51 }
 0x864   : > { %v14735_v35 = vadd.f32 %v7443_v31, %v7264_v41  ;;  %11453 = vmatmul.msk.bf16.gmra.mxu0 %vm397_vm0, %v14728_v45  ;;  %v7531_v41 = vld [vmem:[#allocation2 + $0xf1] sm:$0xff] }
 0x865   : > { %11474 = vmatmul.msk.bf16.gmra.mxu1 %vm397_vm0, %v14733_v49  ;;  %v14751_v51 = vpack.c.bf16 %v7532_v21, %v7531_v41 }
 0x866   : > { %11502 = vmatmul.msk.bf16.gmra.mxu2 %vm397_vm0, %v8015_v50  ;;  %11530 = vmatmul.msk.bf16.gmra.mxu3 %vm397_vm0, %v14580_v61 }
 0x869   : > { %v7212_v32 = vpop.f32.mrf.mxu2  ;;  %v7446_v1 = vpop.f32.mrf.mxu3 }
 0x86a   : > { %v7265_v20 = vadd.f32 %v7212_v32, %v7011_v19  ;;  %v7637_v3 = vpop.f32.mrf.mxu0  ;;  %v7012_v0 = vpop.f32.mrf.mxu1 }
 0x86b   : > { %v14746_v39 = vadd.f32 %v7637_v3, %v14535_v62  ;;  %v7013_v31 = vadd.f32 %v7012_v0, %v14573_v10 }
 0x86c   : > { %v14748_v54 = vadd.f32 %v7446_v1, %v7265_v20 }
 0x871   : > { %v7214_v59 = vpop.f32.mrf.mxu2  ;;  %v7448_v47 = vpop.f32.mrf.mxu3 }
 0x872   : > { %v7266_v63 = vadd.f32 %v7214_v59, %v7013_v31  ;;  %v7640_v61 = vpop.f32.mrf.mxu0  ;;  %v7015_v50 = vpop.f32.mrf.mxu1 }
 0x873   : > { %v14754_v9 = vadd.f32 %v7640_v61, %v14551_v2  ;;  %v7016_v62 = vadd.f32 %v7015_v50, %v14578_v44 }
 0x874   : > { %v14756_v19 = vadd.f32 %v7448_v47, %v7266_v63  ;;  %11454 = vmatmul.msk.bf16.gmra.mxu0 %vm397_vm0, %v14751_v51 }
 0x875   : > { %11475 = vmatmul.msk.bf16.gmra.mxu1 %vm397_vm0, %v14378_v33 }
 0x876   : > { %11503 = vmatmul.msk.bf16.gmra.mxu2 %vm397_vm0, %v14380_v17  ;;  %11531 = vmatmul.msk.bf16.gmra.mxu3 %vm397_vm0, %v14604_v40 }
 0x879   : > { %v7217_v10 = vpop.f32.mrf.mxu2  ;;  %v7451_v32 = vpop.f32.mrf.mxu3 }
 0x87a   : > { %v7267_v2 = vadd.f32 %v7217_v10, %v7016_v62  ;;  %v7642_v1 = vpop.f32.mrf.mxu0  ;;  %v7017_v20 = vpop.f32.mrf.mxu1 }
 0x87b   : > { %v14768_v3 = vadd.f32 %v7642_v1, %v14558_v46  ;;  %v7018_v33 = vadd.f32 %v7017_v20, %v14597_v15 }
 0x87c   : > { %v14770_v0 = vadd.f32 %v7451_v32, %v7267_v2 }
 0x881   : > { %v7219_v21 = vpop.f32.mrf.mxu2  ;;  %v7453_v31 = vpop.f32.mrf.mxu3 }
 0x882   : > { %v7268_v17 = vadd.f32 %v7219_v21, %v7018_v33  ;;  %v7645_v59 = vpop.f32.mrf.mxu0  ;;  %v7020_v47 = vpop.f32.mrf.mxu1 }
 0x883   : > { %v14774_v40 = vadd.f32 %v7645_v59, %v14575_v58  ;;  %v7021_v46 = vadd.f32 %v7020_v47, %v14602_v18 }
 0x884   : > { %v14776_v44 = vadd.f32 %v7453_v31, %v7268_v17  ;;  %11455 = vmatmul.msk.bf16.gmra.mxu0 %vm397_vm0, %v14398_v60 }
 0x885   : > { %11476 = vmatmul.msk.bf16.gmra.mxu1 %vm397_vm0, %v14402_v4 }
 0x886   : > { %11504 = vmatmul.msk.bf16.gmra.mxu2 %vm397_vm0, %v14404_v12  ;;  %11532 = vmatmul.msk.bf16.gmra.mxu3 %vm397_vm0, %v14628_v52 }
 0x889   : > { %v7222_v15 = vpop.f32.mrf.mxu2  ;;  %v7456_v41 = vpop.f32.mrf.mxu3 }
 0x88a   : > { %v7269_v58 = vadd.f32 %v7222_v15, %v7021_v46  ;;  %v7647_v63 = vpop.f32.mrf.mxu0  ;;  %v7022_v61 = vpop.f32.mrf.mxu1 }
 0x88b   : > { %v14788_v50 = vadd.f32 %v7647_v63, %v14582_v36  ;;  %v7023_v4 = vadd.f32 %v7022_v61, %v14621_v37 }
 0x88c   : > { %v14790_v60 = vadd.f32 %v7456_v41, %v7269_v58 }
 0x891   : > { %v7224_v62 = vpop.f32.mrf.mxu2  ;;  %v7458_v10 = vpop.f32.mrf.mxu3 }
 0x892   : > { %v7270_v12 = vadd.f32 %v7224_v62, %v7023_v4  ;;  %v7650_v32 = vpop.f32.mrf.mxu0  ;;  %v7025_v2 = vpop.f32.mrf.mxu1 }
 0x893   : > { %v14794_v52 = vadd.f32 %v7650_v32, %v14599_v11  ;;  %v7026_v36 = vadd.f32 %v7025_v2, %v14626_v57 }
 0x894   : > { %v14796_v18 = vadd.f32 %v7458_v10, %v7270_v12  ;;  %11456 = vmatmul.msk.bf16.gmra.mxu0 %vm397_vm0, %v14423_v34 }
 0x895   : > { %11477 = vmatmul.msk.bf16.gmra.mxu1 %vm397_vm0, %v14427_v55 }
 0x896   : > { %11505 = vmatmul.msk.bf16.gmra.mxu2 %vm397_vm0, %v14429_v8  ;;  %11533 = vmatmul.msk.bf16.gmra.mxu3 %vm397_vm0, %v14652_v5 }
 0x899   : > { %v7227_v37 = vpop.f32.mrf.mxu2  ;;  %v7461_v1 = vpop.f32.mrf.mxu3 }
 0x89a   : > { %v7271_v11 = vadd.f32 %v7227_v37, %v7026_v36  ;;  %v7652_v20 = vpop.f32.mrf.mxu0  ;;  %v7027_v33 = vpop.f32.mrf.mxu1  ;;  %v16040_v36 = vld [vmem:[#allocation8_spill] sm:$0xff] }
 0x89b   : > { %v14808_v21 = vadd.f32 %v7652_v20, %v14606_v13  ;;  %v7028_v55 = vadd.f32 %v7027_v33, %v14645_v22 }
 0x89c   : > { %v14810_v34 = vadd.f32 %v7461_v1, %v7271_v11 }
 0x8a1   : > { %v7229_v31 = vpop.f32.mrf.mxu2  ;;  %v7463_v17 = vpop.f32.mrf.mxu3 }
 0x8a2   : > { %v7272_v8 = vadd.f32 %v7229_v31, %v7028_v55  ;;  %v7655_v59 = vpop.f32.mrf.mxu0  ;;  %v7030_v47 = vpop.f32.mrf.mxu1 }
 0x8a3   : > { %v14814_v5 = vadd.f32 %v7655_v59, %v14623_v28  ;;  %v7031_v13 = vadd.f32 %v7030_v47, %v14650_v23  ;;  %v16042_v47 = vld [vmem:[#allocation45_spill] sm:$0xff] }
 0x8a4   : > { %v14816_v57 = vadd.f32 %v7463_v17, %v7272_v8  ;;  %11457 = vmatmul.msk.bf16.gmra.mxu0 %vm397_vm0, %v14448_v6  ;;  %v16041_v17 = vld [vmem:[#allocation11_spill] sm:$0xff] }
 0x8a5   : > { %11478 = vmatmul.msk.bf16.gmra.mxu1 %vm397_vm0, %v14452_v29 }
 0x8a6   : > { %11506 = vmatmul.msk.bf16.gmra.mxu2 %vm397_vm0, %v14454_v30  ;;  %11534 = vmatmul.msk.bf16.gmra.mxu3 %vm397_vm0, %v14685_v26 }
 0x8a9   : > { %v7232_v22 = vpop.f32.mrf.mxu2  ;;  %v7466_v46 = vpop.f32.mrf.mxu3 }
 0x8aa   : > { %v7273_v28 = vadd.f32 %v7232_v22, %v7031_v13  ;;  %v7657_v15 = vpop.f32.mrf.mxu0  ;;  %v7032_v41 = vpop.f32.mrf.mxu1  ;;  %v11739_v13 = vld [vmem:[%s15766_s5 + $0x18] sm:$0xff]  ;;  %v16043_v22 = vld [vmem:[#allocation43_spill] sm:$0xff] }
 0x8ab   : > { %v14828_v58 = vadd.f32 %v7657_v15, %v14630_v7  ;;  %v7033_v29 = vadd.f32 %v7032_v41, %v14678_v53  ;;  %v16039_v7 = vld [vmem:[#allocation42_spill] sm:$0xff]  ;;  %9563 = vmatpush.bf16.msra.mxu0 %v11739_v13 }
 0x8ac   : > { %v14830_v6 = vadd.f32 %v7466_v46, %v7273_v28 }
 0x8b1   : > { %v7234_v63 = vpop.f32.mrf.mxu2  ;;  %v7468_v61 = vpop.f32.mrf.mxu3 }
 0x8b2   : > { %v7274_v30 = vadd.f32 %v7234_v63, %v7033_v29  ;;  %v7660_v4 = vpop.f32.mrf.mxu0  ;;  %v7035_v62 = vpop.f32.mrf.mxu1 }
 0x8b3   : > { %v14834_v26 = vadd.f32 %v7660_v4, %v14647_v56  ;;  %v7036_v53 = vadd.f32 %v7035_v62, %v14683_v48  ;;  %v11737_v48 = vld [vmem:[%s15766_s5 + $0x8] sm:$0xff] }
 0x8b4   : > { %v14836_v23 = vadd.f32 %v7468_v61, %v7274_v30  ;;  %11458 = vmatmul.msk.bf16.gmra.mxu0 %vm397_vm0, %v14482_v27  ;;  %8999 = vmatpush.bf16.msra.mxu1 %v11737_v48  ;;  %v16045_v61 = vld [vmem:[#allocation21_spill] sm:$0xff]  ;;  %v16047_v48 = vld [vmem:[#allocation46_spill] sm:$0xff] }
 0x8b5   : > { %11479 = vmatmul.msk.bf16.gmra.mxu1 %vm397_vm0, %v14486_v16  ;;  %v11736_v16 = vld [vmem:[%s15766_s5] sm:$0xff]  ;;  %v7544_v62 = vld [vmem:[#allocation2 + $0x189] sm:$0xff] }
 0x8b6   : > { %11507 = vmatmul.msk.bf16.gmra.mxu2 %vm397_vm0, %v16039_v7  ;;  %11535 = vmatmul.msk.bf16.gmra.mxu3 %vm397_vm0, %v14712_v42  ;;  %v11738_v42 = vld [vmem:[%s15766_s5 + $0x10] sm:$0xff] }
 0x8b7   : > { %9142 = vmatpush.bf16.msra.mxu2 %v11736_v16  ;;  %9337 = vmatpush.bf16.msra.mxu3 %v11738_v42 }
 0x8b9   : > { %v7237_v10 = vpop.f32.mrf.mxu2  ;;  %v7471_v12 = vpop.f32.mrf.mxu3 }
 0x8ba   : > { %v7275_v56 = vadd.f32 %v7237_v10, %v7036_v53  ;;  %v7662_v32 = vpop.f32.mrf.mxu0  ;;  %v7037_v2 = vpop.f32.mrf.mxu1 }
 0x8bb   : > { %v14848_v37 = vadd.f32 %v7662_v32, %v16040_v36  ;;  %v7038_v1 = vadd.f32 %v7037_v2, %v14705_v24  ;;  %v16044_v24 = vld [vmem:[#allocation44_spill] sm:$0xff]  ;;  %v16046_v2 = vld [vmem:[#allocation26_spill] sm:$0xff] }
 0x8bc   : > { %v14850_v27 = vadd.f32 %v7471_v12, %v7275_v56  ;;  %v7543_v12 = vld [vmem:[#allocation2 + $0x181] sm:$0xff] }
 0x8c1   : > { %v7239_v11 = vpop.f32.mrf.mxu2  ;;  %v7473_v20 = vpop.f32.mrf.mxu3 }
 0x8c2   : > { %v7276_v33 = vadd.f32 %v7239_v11, %v7038_v1  ;;  %v7665_v55 = vpop.f32.mrf.mxu0  ;;  %v7040_v31 = vpop.f32.mrf.mxu1 }
 0x8c3   : > { %v14863_v8 = vadd.f32 %v7665_v55, %v16041_v17  ;;  %v7041_v46 = vadd.f32 %v7040_v31, %v14710_v43  ;;  %v14885_v43 = vpack.c.bf16 %v7544_v62, %v7543_v12  ;;  %v16051_v62 = vld [vmem:[#allocation4_spill] sm:$0xff] }
 0x8c4   : > { %v14865_v59 = vadd.f32 %v7473_v20, %v7276_v33  ;;  %11459 = vmatmul.msk.bf16.gmra.mxu0 %vm397_vm0, %v16042_v47 }
 0x8c5   : > { %11480 = vmatmul.msk.bf16.gmra.mxu1 %vm397_vm0, %v16043_v22 }
 0x8c6   : > { %11508 = vmatmul.msk.bf16.gmra.mxu2 %vm397_vm0, %v16044_v24  ;;  %11536 = vmatmul.msk.bf16.gmra.mxu3 %vm397_vm0, %v14728_v45  ;;  %v8235_v24 = vld [vmem:[#allocation2 + $0x111] sm:$0xff] }
 0x8c9   : > { %v7242_v28 = vpop.f32.mrf.mxu2  ;;  %v7476_v15 = vpop.f32.mrf.mxu3 }
 0x8ca   : > { %v7277_v41 = vadd.f32 %v7242_v28, %v7041_v46  ;;  %v7667_v29 = vpop.f32.mrf.mxu0  ;;  %v7042_v63 = vpop.f32.mrf.mxu1 }
 0x8cb   : > { %v14880_v30 = vadd.f32 %v7667_v29, %v16045_v61  ;;  %v7043_v7 = vadd.f32 %v7042_v63, %v14723_v25  ;;  %v16048_v25 = vld [vmem:[#allocation10_spill] sm:$0xff]  ;;  %v8234_v29 = vld [vmem:[#allocation2 + $0x109] sm:$0xff] }
 0x8cc   : > { %v14882_v4 = vadd.f32 %v7476_v15, %v7277_v41  ;;  %v16050_v61 = vld [vmem:[#allocation16_spill] sm:$0xff] }
 0x8d1   : > { %v7244_v53 = vpop.f32.mrf.mxu2  ;;  %v7478_v10 = vpop.f32.mrf.mxu3 }
 0x8d2   : > { %v7278_v45 = vadd.f32 %v7244_v53, %v7043_v7  ;;  %v7670_v56 = vpop.f32.mrf.mxu0  ;;  %v7869_v32 = vpop.f32.mrf.mxu1 }
 0x8d3   : > { %v14888_v36 = vadd.f32 %v7670_v56, %v16046_v2  ;;  %v7949_v16 = vadd.f32 %v7869_v32, %v14731_v38  ;;  %v16049_v38 = vld [vmem:[#allocation24_spill] sm:$0xff]  ;;  %v8453_v32 = vld [vmem:[#allocation2 + $0x52] sm:$0xff] }
 0x8d4   : > { %v14891_v42 = vadd.f32 %v7478_v10, %v7278_v45  ;;  %11460 = vmatmul.msk.bf16.gmra.mxu0 %vm397_vm0, %v14885_v43  ;;  %v8452_v56 = vld [vmem:[#allocation2 + $0x4a] sm:$0xff] }
 0x8d5   : > { %11481 = vmatmul.msk.bf16.gmra.mxu1 %vm397_vm0, %v16047_v48  ;;  %v8237_v48 = vld [vmem:[#allocation2 + $0x129] sm:$0xff] }
 0x8d6   : > { %11509 = vmatmul.msk.bf16.gmra.mxu2 %vm397_vm0, %v16048_v25  ;;  %11537 = vmatmul.msk.bf16.gmra.mxu3 %vm397_vm0, %v14751_v51 }
 0x8d9   : > { %v8104_v1 = vpop.f32.mrf.mxu2  ;;  %v8338_v11 = vpop.f32.mrf.mxu3 }
 0x8da   : > { %v7672_v20 = vpop.f32.mrf.mxu0  ;;  %v8184_v33 = vadd.f32 %v8104_v1, %v7949_v16  ;;  %v7871_v55 = vpop.f32.mrf.mxu1 }
 0x8db   : > { %v14902_v31 = vadd.f32 %v7672_v20, %v16049_v38  ;;  %v7950_v17 = vadd.f32 %v7871_v55, %v14746_v39  ;;  %v8257_v39 = vpack.c.bf16 %v8235_v24, %v8234_v29  ;;  %v8483_v20 = vpack.c.bf16 %v8453_v32, %v8452_v56  ;;  %v8454_v29 = vld [vmem:[#allocation2 + $0x62] sm:$0xff] }
 0x8dc   : > { %v14905_v47 = vadd.f32 %v8338_v11, %v8184_v33 }
 0x8e1   : > { %v8106_v13 = vpop.f32.mrf.mxu2  ;;  %v8340_v22 = vpop.f32.mrf.mxu3 }
 0x8e2   : > { %v7675_v46 = vpop.f32.mrf.mxu0  ;;  %v8185_v28 = vadd.f32 %v8106_v13, %v7950_v17  ;;  %v7874_v15 = vpop.f32.mrf.mxu1  ;;  %v16052_v17 = vld [vmem:[#allocation13_spill] sm:$0xff]  ;;  %v16053_v13 = vld [vmem:[#allocation7_spill] sm:$0xff] }
 0x8e3   : > { %v14908_v51 = vadd.f32 %v7675_v46, %v14725_v14  ;;  %v7951_v41 = vadd.f32 %v7874_v15, %v14754_v9 }
 0x8e4   : > { %v14911_v63 = vadd.f32 %v8340_v22, %v8185_v28  ;;  %11557 = vmatmul.msk.bf16.vlgmr.msrb.gmra.mxu0 %vm397_vm0, %v14733_v49 }
 0x8e5   : > { %11482 = vmatmul.msk.bf16.gmra.mxu1 %vm397_vm0, %v16050_v61 }
 0x8e6   : > { %11510 = vmatmul.msk.bf16.gmra.mxu2 %vm397_vm0, %v16051_v62  ;;  %11538 = vmatmul.msk.bf16.gmra.mxu3 %vm397_vm0, %v8257_v39  ;;  %v8455_v39 = vld [vmem:[#allocation2 + $0x6a] sm:$0xff] }
 0x8e9   : > { %v8109_v7 = vpop.f32.mrf.mxu2  ;;  %v8343_v14 = vpop.f32.mrf.mxu3 }
 0x8ea   : > { %v7677_v53 = vpop.f32.mrf.mxu0  ;;  %v8186_v10 = vadd.f32 %v8109_v7, %v7951_v41  ;;  %v7876_v9 = vpop.f32.mrf.mxu1  ;;  %v8239_v7 = vld [vmem:[#allocation2 + $0x141] sm:$0xff] }
 0x8eb   : > { %v14921_v12 = vadd.f32 %v7677_v53, %v14735_v35  ;;  %v7952_v45 = vadd.f32 %v7876_v9, %v14768_v3  ;;  %v8236_v35 = vld [vmem:[#allocation2 + $0x121] sm:$0xff]  ;;  %v8484_v9 = vpack.c.bf16 %v8455_v39, %v8454_v29  ;;  %v16060_v39 = vld [vmem:[#allocation18_spill] sm:$0xff] }
 0x8ec   : > { %v14924_v49 = vadd.f32 %v8343_v14, %v8186_v10  ;;  %v8258_v3 = vpack.c.bf16 %v8237_v48, %v8236_v35  ;;  %v8456_v35 = vld [vmem:[#allocation2 + $0x7a] sm:$0xff] }
 0x8f1   : > { %v8111_v2 = vpop.f32.mrf.mxu2  ;;  %v8345_v16 = vpop.f32.mrf.mxu3 }
 0x8f2   : > { %v7680_v25 = vpop.f32.mrf.mxu0  ;;  %v8187_v1 = vadd.f32 %v8111_v2, %v7952_v45  ;;  %v7879_v11 = vpop.f32.mrf.mxu1  ;;  %v16055_v2 = vld [vmem:[#allocation17_spill] sm:$0xff] }
 0x8f3   : > { %v14927_v33 = vadd.f32 %v7680_v25, %v14748_v54  ;;  %v7953_v55 = vadd.f32 %v7879_v11, %v14774_v40 }
 0x8f4   : > { %v14930_v38 = vadd.f32 %v8345_v16, %v8187_v1  ;;  %11558 = vmatmul.msk.bf16.gmra.mxu0 %vm397_vm0, %v8483_v20  ;;  %v16056_v16 = vld [vmem:[#allocation5_spill] sm:$0xff] }
 0x8f5   : > { %11483 = vmatmul.msk.bf16.gmra.mxu1 %vm397_vm0, %v16052_v17 }
 0x8f6   : > { %11511 = vmatmul.msk.bf16.gmra.mxu2 %vm397_vm0, %v16053_v13  ;;  %11539 = vmatmul.msk.bf16.gmra.mxu3 %vm397_vm0, %v8258_v3  ;;  %v8457_v3 = vld [vmem:[#allocation2 + $0x82] sm:$0xff]  ;;  %v8241_v13 = vld [vmem:[#allocation2 + $0x159] sm:$0xff] }
 0x8f9   : > { %v8114_v22 = vpop.f32.mrf.mxu2  ;;  %v8348_v24 = vpop.f32.mrf.mxu3 }
 0x8fa   : > { %v7682_v54 = vpop.f32.mrf.mxu0  ;;  %v8188_v46 = vadd.f32 %v8114_v22, %v7953_v55  ;;  %v7881_v28 = vpop.f32.mrf.mxu1 }
 0x8fb   : > { %v14939_v40 = vadd.f32 %v7682_v54, %v14756_v19  ;;  %v7954_v15 = vadd.f32 %v7881_v28, %v14788_v50  ;;  %v8238_v19 = vld [vmem:[#allocation2 + $0x139] sm:$0xff]  ;;  %v8485_v54 = vpack.c.bf16 %v8457_v3, %v8456_v35 }
 0x8fc   : > { %v14942_v41 = vadd.f32 %v8348_v24, %v8188_v46  ;;  %v8259_v50 = vpack.c.bf16 %v8239_v7, %v8238_v19  ;;  %v8459_v7 = vld [vmem:[#allocation2 + $0x9a] sm:$0xff] }
 0x8fd   : > { %v16067_v3 = vld [vmem:[#allocation22_spill] sm:$0xff] }
 0x901   : > { %v8116_v61 = vpop.f32.mrf.mxu2  ;;  %v8350_v62 = vpop.f32.mrf.mxu3 }
 0x902   : > { %v7685_v14 = vpop.f32.mrf.mxu0  ;;  %v8189_v53 = vadd.f32 %v8116_v61, %v7954_v15  ;;  %v7884_v10 = vpop.f32.mrf.mxu1  ;;  %v8240_v15 = vld [vmem:[#allocation2 + $0x151] sm:$0xff] }
 0x903   : > { %v14945_v45 = vadd.f32 %v7685_v14, %v14770_v0  ;;  %v7955_v56 = vadd.f32 %v7884_v10, %v14794_v52  ;;  %v8243_v14 = vld [vmem:[#allocation2 + $0x171] sm:$0xff] }
 0x904   : > { %v14948_v32 = vadd.f32 %v8350_v62, %v8189_v53  ;;  %11559 = vmatmul.msk.bf16.gmra.mxu0 %vm397_vm0, %v8484_v9 }
 0x905   : > { %16054 = vst [vmem:[#allocation6_spill] sm:$0xff] %v14945_v45  ;;  %11484 = vmatmul.msk.bf16.gmra.mxu1 %vm397_vm0, %v16055_v2  ;;  %v16064_v2 = vld [vmem:[#allocation23_spill] sm:$0xff] }
 0x906   : > { %11512 = vmatmul.msk.bf16.gmra.mxu2 %vm397_vm0, %v16056_v16  ;;  %11540 = vmatmul.msk.bf16.gmra.mxu3 %vm397_vm0, %v8259_v50  ;;  %v16063_v50 = vld [vmem:[#allocation19_spill] sm:$0xff] }
 0x909   : > { %v8119_v48 = vpop.f32.mrf.mxu2  ;;  %v8353_v25 = vpop.f32.mrf.mxu3 }
 0x90a   : > { %v7687_v0 = vpop.f32.mrf.mxu0  ;;  %v8190_v1 = vadd.f32 %v8119_v48, %v7955_v56  ;;  %v7886_v11 = vpop.f32.mrf.mxu1  ;;  %v8242_v56 = vld [vmem:[#allocation2 + $0x169] sm:$0xff] }
 0x90b   : > { %v14957_v52 = vadd.f32 %v7687_v0, %v14776_v44  ;;  %v7956_v20 = vadd.f32 %v7886_v11, %v14808_v21  ;;  %v8260_v44 = vpack.c.bf16 %v8241_v13, %v8240_v15  ;;  %v16059_v21 = vld [vmem:[#allocation20_spill] sm:$0xff]  ;;  %v8261_v19 = vpack.c.bf16 %v8243_v14, %v8242_v56  ;;  %v8012_v15 = vld [vmem:[#allocation2 + $0x198] sm:$0xff] }
 0x90c   : > { %v14960_v55 = vadd.f32 %v8353_v25, %v8190_v1  ;;  %v8460_v48 = vld [vmem:[#allocation2 + $0xaa] sm:$0xff]  ;;  %v8461_v25 = vld [vmem:[#allocation2 + $0xb2] sm:$0xff] }
 0x90d   : > { %16057 = vst [vmem:[#allocation25_spill] sm:$0xff] %v14957_v52  ;;  %v8487_v11 = vpack.c.bf16 %v8461_v25, %v8460_v48 }
 0x911   : > { %v8121_v17 = vpop.f32.mrf.mxu2  ;;  %v8355_v28 = vpop.f32.mrf.mxu3 }
 0x912   : > { %v7690_v22 = vpop.f32.mrf.mxu0  ;;  %v8191_v24 = vadd.f32 %v8121_v17, %v7956_v20  ;;  %v14990_v0 = vpop.f32.mrf.mxu1 }
 0x913   : > { %v14963_v46 = vadd.f32 %v7690_v22, %v14790_v60  ;;  %v8458_v60 = vld [vmem:[#allocation2 + $0x92] sm:$0xff] }
 0x914   : > { %v14965_v29 = vadd.f32 %v8355_v28, %v8191_v24  ;;  %11560 = vmatmul.msk.bf16.gmra.mxu0 %vm397_vm0, %v8485_v54  ;;  %v8486_v10 = vpack.c.bf16 %v8459_v7, %v8458_v60  ;;  %v8462_v54 = vld [vmem:[#allocation2 + $0xc2] sm:$0xff]  ;;  %v8463_v28 = vld [vmem:[#allocation2 + $0xca] sm:$0xff] }
 0x915   : > { %16058 = vst [vmem:[#allocation31_spill] sm:$0xff] %v14963_v46  ;;  %11485 = vmatmul.msk.bf16.gmra.mxu1 %vm397_vm0, %v16059_v21  ;;  %v8246_v21 = vld [vmem:[#allocation2 + $0x199] sm:$0xff]  ;;  %v7778_v60 = vld [vmem:[#allocation2 + $0x18a] sm:$0xff] }
 0x916   : > { %11513 = vmatmul.msk.bf16.gmra.mxu2 %vm397_vm0, %v16060_v39  ;;  %11541 = vmatmul.msk.bf16.gmra.mxu3 %vm397_vm0, %v8260_v44  ;;  %v8013_v44 = vld [vmem:[#allocation2 + $0x1a0] sm:$0xff] }
 0x917   : > { %v8247_v39 = vld [vmem:[#allocation2 + $0x1a1] sm:$0xff]  ;;  %v8029_v14 = vpack.c.bf16 %v8013_v44, %v8012_v15 }
 0x919   : > { %v14995_v35 = vpop.f32.mrf.mxu3 }
 0x91a   : > { %v7692_v61 = vpop.f32.mrf.mxu0  ;;  %v15006_v22 = vpop.f32.mrf.mxu1 }
 0x91b   : > { %v14974_v62 = vadd.f32 %v7692_v61, %v14796_v18  ;;  %v7777_v61 = vld [vmem:[#allocation2 + $0x182] sm:$0xff] }
 0x91c   : > { %v15016_v56 = vpack.c.bf16 %v7778_v60, %v7777_v61 }
 0x91d   : > { %16061 = vst [vmem:[#allocation9_spill] sm:$0xff] %v14974_v62 }
 0x921   : > { %v15011_v24 = vpop.f32.mrf.mxu3 }
 0x922   : > { %v7695_v53 = vpop.f32.mrf.mxu0 }
 0x923   : > { %v14977_v9 = vadd.f32 %v7695_v53, %v14810_v34  ;;  %v14988_v34 = vpop.f32.mrf.mxu2  ;;  %v8263_v53 = vpack.c.bf16 %v8247_v39, %v8246_v21  ;;  %v8466_v21 = vld [vmem:[#allocation2 + $0xf2] sm:$0xff]  ;;  %v15104_v39 = vld [vmem:[%s15765_s4] ss:$0 sm:$0xff] }
 0x924   : > { %11561 = vmatmul.msk.bf16.gmra.mxu0 %vm397_vm0, %v8486_v10 }
 0x925   : > { %16062 = vst [vmem:[#allocation28_spill] sm:$0xff] %v14977_v9  ;;  %11486 = vmatmul.msk.bf16.gmra.mxu1 %vm397_vm0, %v16063_v50 }
 0x926   : > { %11514 = vmatmul.msk.bf16.gmra.mxu2 %vm397_vm0, %v16064_v2  ;;  %11542 = vmatmul.msk.bf16.gmra.mxu3 %vm397_vm0, %v8261_v19  ;;  %v15021_v19 = vpop.f32.mrf.mxu1 }
 0x929   : > { %v15027_v50 = vpop.f32.mrf.mxu3 }
 0x92a   : > { %v7697_v18 = vpop.f32.mrf.mxu0 }
 0x92b   : > { %v14986_v16 = vadd.f32 %v7697_v18, %v14816_v57  ;;  %v16068_v57 = vld [vmem:[#allocation14_spill] sm:$0xff]  ;;  %v15004_v17 = vpop.f32.mrf.mxu2 }
 0x92d   : > { %16065 = vst [vmem:[#allocation12_spill] sm:$0xff] %v14986_v16 }
 0x92e   : > { %v15048_v25 = vpop.f32.mrf.mxu1 }
 0x932   : > { %v7700_v1 = vpop.f32.mrf.mxu0 }
 0x933   : > { %v14993_v20 = vadd.f32 %v7700_v1, %v14830_v6  ;;  %v8464_v1 = vld [vmem:[#allocation2 + $0xda] sm:$0xff] }
 0x934   : > { %11562 = vmatmul.msk.bf16.gmra.mxu0 %vm397_vm0, %v8487_v11  ;;  %v8465_v11 = vld [vmem:[#allocation2 + $0xe2] sm:$0xff] }
 0x935   : > { %16066 = vst [vmem:[#allocation29_spill] sm:$0xff] %v14993_v20  ;;  %11487 = vmatmul.msk.bf16.gmra.mxu1 %vm397_vm0, %v16067_v3 }
 0x936   : > { %11515 = vmatmul.msk.bf16.gmra.mxu2 %vm397_vm0, %v16068_v57  ;;  %11543 = vmatmul.msk.bf16.gmra.mxu3 %vm397_vm0, %v14885_v43  ;;  %v8488_v43 = vpack.c.bf16 %v8463_v28, %v8462_v54  ;;  %v8489_v57 = vpack.c.bf16 %v8465_v11, %v8464_v1 }
 0x93a   : > { %v7702_v13 = vpop.f32.mrf.mxu0 }
 0x93b   : > { %v15009_v6 = vadd.f32 %v7702_v13, %v14836_v23  ;;  %v15018_v23 = vpop.f32.mrf.mxu2 }
 0x93d   : > { %16069 = vst [vmem:[#allocation15_spill] sm:$0xff] %v15009_v6 }
 0x942   : > { %v7705_v7 = vpop.f32.mrf.mxu0 }
 0x943   : > { %v15014_v10 = vadd.f32 %v7705_v7, %v14850_v27  ;;  %v16071_v27 = vmov 0.0   ;;  %v15044_v48 = vpop.f32.mrf.mxu2 }
 0x944   : > { %11563 = vmatmul.msk.bf16.gmra.mxu0 %vm397_vm0, %v8488_v43  ;;  %8753 = vst.msk [vmem:[#allocation3] sm:$0xff] %vm8752_vm2, %v16071_v27 }
 0x945   : > { %16070 = vst [vmem:[#allocation35_spill] sm:$0xff] %v15014_v10  ;;  %11488 = vmatmul.msk.bf16.gmra.mxu1 %vm397_vm0, %v15016_v56 }
 0x946   : > { %11516 = vmatmul.msk.bf16.gmra.mxu2 %vm397_vm0, %v8029_v14  ;;  %11544 = vmatmul.msk.bf16.gmra.mxu3 %vm397_vm0, %v8263_v53  ;;  %8754 = vst.msk [vmem:[#allocation3 + $0x8] sm:$0xff] %vm8752_vm2, %v16071_v27 }
 0x947   : > { %8757 = vst.msk [vmem:[#allocation3 + $0x18] sm:$0xff] %vm8752_vm2, %v16071_v27 }
 0x948   : > { %8758 = vst.msk [vmem:[#allocation3 + $0x20] sm:$0xff] %vm8752_vm2, %v16071_v27 }
 0x949   : > { %8760 = vst.msk [vmem:[#allocation3 + $0x30] sm:$0xff] %vm8752_vm2, %v16071_v27 }
 0x94a   : > { %v7707_v2 = vpop.f32.mrf.mxu0  ;;  %8761 = vst.msk [vmem:[#allocation3 + $0x38] sm:$0xff] %vm8752_vm2, %v16071_v27 }
 0x94b   : > { %v15036_v18 = vadd.f32 %v7707_v2, %v14865_v59  ;;  %8763 = vst.msk [vmem:[#allocation3 + $0x48] sm:$0xff] %vm8752_vm2, %v16071_v27  ;;  %v15056_v59 = vpop.f32.mrf.mxu3  ;;  %v15074_v54 = vpop.f32.mrf.mxu2 }
 0x94c   : > { %8764 = vst.msk [vmem:[#allocation3 + $0x50] sm:$0xff] %vm8752_vm2, %v16071_v27 }
 0x94d   : > { %16072 = vst [vmem:[#allocation33_spill] sm:$0xff] %v15036_v18 }
 0x94e   : > { %8766 = vst.msk [vmem:[#allocation3 + $0x60] sm:$0xff] %vm8752_vm2, %v16071_v27 }
 0x94f   : > { %8767 = vst.msk [vmem:[#allocation3 + $0x68] sm:$0xff] %vm8752_vm2, %v16071_v27 }
 0x950   : > { %8769 = vst.msk [vmem:[#allocation3 + $0x78] sm:$0xff] %vm8752_vm2, %v16071_v27 }
 0x951   : > { %8770 = vst.msk [vmem:[#allocation3 + $0x80] sm:$0xff] %vm8752_vm2, %v16071_v27 }
 0x952   : > { %v7710_v3 = vpop.f32.mrf.mxu0  ;;  %8772 = vst.msk [vmem:[#allocation3 + $0x90] sm:$0xff] %vm8752_vm2, %v16071_v27 }
 0x953   : > { %v15061_v13 = vadd.f32 %v7710_v3, %v14882_v4  ;;  %8773 = vst.msk [vmem:[#allocation3 + $0x98] sm:$0xff] %vm8752_vm2, %v16071_v27  ;;  %v15078_v4 = vpop.f32.mrf.mxu1  ;;  %v15089_v44 = vpop.f32.mrf.mxu3 }
 0x954   : > { %11564 = vmatmul.msk.bf16.gmra.mxu0 %vm397_vm0, %v8489_v57  ;;  %8775 = vst.msk [vmem:[#allocation3 + $0xa8] sm:$0xff] %vm8752_vm2, %v16071_v27  ;;  %v15108_v61 = vpop.f32.mrf.mxu2 }
 0x955   : > { %16073 = vst [vmem:[#allocation34_spill] sm:$0xff] %v15061_v13 }
 0x956   : > { %8776 = vst.msk [vmem:[#allocation3 + $0xb0] sm:$0xff] %vm8752_vm2, %v16071_v27 }
 0x957   : > { %8778 = vst.msk [vmem:[#allocation3 + $0xc0] sm:$0xff] %vm8752_vm2, %v16071_v27 }
 0x958   : > { %8779 = vst.msk [vmem:[#allocation3 + $0xc8] sm:$0xff] %vm8752_vm2, %v16071_v27 }
 0x959   : > { %8781 = vst.msk [vmem:[#allocation3 + $0xd8] sm:$0xff] %vm8752_vm2, %v16071_v27 }
 0x95a   : > { %v7712_v28 = vpop.f32.mrf.mxu0  ;;  %8782 = vst.msk [vmem:[#allocation3 + $0xe0] sm:$0xff] %vm8752_vm2, %v16071_v27 }
 0x95b   : > { %v15085_v15 = vadd.f32 %v7712_v28, %v14891_v42  ;;  %8784 = vst.msk [vmem:[#allocation3 + $0xf0] sm:$0xff] %vm8752_vm2, %v16071_v27  ;;  %v8467_v42 = vld [vmem:[#allocation2 + $0xfa] sm:$0xff]  ;;  %v15112_v43 = vpop.f32.mrf.mxu1  ;;  %v15123_v2 = vpop.f32.mrf.mxu3 }
 0x95c   : > { %8785 = vst.msk [vmem:[#allocation3 + $0xf8] sm:$0xff] %vm8752_vm2, %v16071_v27  ;;  %v8490_v7 = vpack.c.bf16 %v8467_v42, %v8466_v21  ;;  %v15137_v3 = vpop.f32.mrf.mxu2  ;;  %v8469_v42 = vld [vmem:[#allocation2 + $0x112] sm:$0xff] }
 0x95d   : > { %16074 = vst [vmem:[#allocation38_spill] sm:$0xff] %v15085_v15 }
 0x95e   : > { %8787 = vst.msk [vmem:[#allocation3 + $0x108] sm:$0xff] %vm8752_vm2, %v16071_v27 }
 0x95f   : > { %8788 = vst.msk [vmem:[#allocation3 + $0x110] sm:$0xff] %vm8752_vm2, %v16071_v27 }
 0x960   : > { %8790 = vst.msk [vmem:[#allocation3 + $0x120] sm:$0xff] %vm8752_vm2, %v16071_v27 }
 0x961   : > { %8791 = vst.msk [vmem:[#allocation3 + $0x128] sm:$0xff] %vm8752_vm2, %v16071_v27 }
 0x962   : > { %v8572_v60 = vpop.f32.mrf.mxu0  ;;  %8793 = vst.msk [vmem:[#allocation3 + $0x138] sm:$0xff] %vm8752_vm2, %v16071_v27 }
 0x963   : > { %v8652_v14 = vadd.f32 %v8572_v60, %v14905_v47  ;;  %8794 = vst.msk [vmem:[#allocation3 + $0x140] sm:$0xff] %vm8752_vm2, %v16071_v27  ;;  %v15141_v57 = vpop.f32.mrf.mxu1  ;;  %v15150_v60 = vpop.f32.mrf.mxu3 }
 0x964   : > { %8796 = vst.msk [vmem:[#allocation3 + $0x150] sm:$0xff] %vm8752_vm2, %v16071_v27  ;;  %11565 = vmatmul.msk.bf16.gmra.mxu0 %vm397_vm0, %v8490_v7 }
 0x965   : > { %v8688_v53 = vadd.f32 %v15104_v39, %v8652_v14  ;;  %8797 = vst.msk [vmem:[#allocation3 + $0x158] sm:$0xff] %vm8752_vm2, %v16071_v27 }
 0x966   : > { %8799 = vst.msk [vmem:[#allocation3 + $0x168] sm:$0xff] %vm8752_vm2, %v16071_v27 }
 0x967   : > { %v8720_v1 = vmax.f32 %v8688_v53, 0.0  ;;  %8800 = vst.msk [vmem:[#allocation3 + $0x170] sm:$0xff] %vm8752_vm2, %v16071_v27 }
 0x968   : > { %8802 = vst.msk [vmem:[#allocation3 + $0x180] sm:$0xff] %vm8752_vm2, %v16071_v27 }
 0x969   : > { %8805 = vst.msk [vmem:[#allocation3] sm:$0xff] %vm8752_vm2, %v8720_v1 }
 0x96a   : > { %8803 = vst.msk [vmem:[#allocation3 + $0x188] sm:$0xff] %vm8752_vm2, %v16071_v27  ;;  %v8574_v47 = vpop.f32.mrf.mxu0 }
 0x96b   : > { %v8653_v11 = vadd.f32 %v8574_v47, %v14911_v63  ;;  %8756 = vst.msk [vmem:[#allocation3 + $0x10] sm:$0x1] %vm8755_vm3, %v16071_v27  ;;  %v8468_v63 = vld [vmem:[#allocation2 + $0x10a] sm:$0xff]  ;;  %v15166_v47 = vpop.f32.mrf.mxu2 }
 0x96c   : > { %8759 = vst.msk [vmem:[#allocation3 + $0x28] sm:$0x1] %vm8755_vm3, %v16071_v27  ;;  %v8491_v14 = vpack.c.bf16 %v8469_v42, %v8468_v63 }
 0x96d   : > { %v8689_v28 = vadd.f32 %v15104_v39, %v8653_v11  ;;  %8762 = vst.msk [vmem:[#allocation3 + $0x40] sm:$0x1] %vm8755_vm3, %v16071_v27  ;;  %v15170_v11 = vpop.f32.mrf.mxu1 }
 0x96e   : > { %8765 = vst.msk [vmem:[#allocation3 + $0x58] sm:$0x1] %vm8755_vm3, %v16071_v27 }
 0x96f   : > { %v8721_v21 = vmax.f32 %v8689_v28, 0.0  ;;  %8768 = vst.msk [vmem:[#allocation3 + $0x70] sm:$0x1] %vm8755_vm3, %v16071_v27 }
 0x970   : > { %8771 = vst.msk [vmem:[#allocation3 + $0x88] sm:$0x1] %vm8755_vm3, %v16071_v27  ;;  %v8837_v28 = vld [vmem:[#allocation3] sm:$0xff] }
 0x971   : > { %8806 = vst.msk [vmem:[#allocation3 + $0x8] sm:$0xff] %vm8752_vm2, %v8721_v21 }
 0x972   : > { %v8577_v7 = vpop.f32.mrf.mxu0  ;;  %8774 = vst.msk [vmem:[#allocation3 + $0xa0] sm:$0x1] %vm8755_vm3, %v16071_v27 }
 0x973   : > { %v8654_v53 = vadd.f32 %v8577_v7, %v14924_v49  ;;  %8777 = vst.msk [vmem:[#allocation3 + $0xb8] sm:$0x1] %vm8755_vm3, %v16071_v27 }
 0x974   : > { %11566 = vmatmul.msk.bf16.gmra.mxu0 %vm397_vm0, %v8491_v14  ;;  %8780 = vst.msk [vmem:[#allocation3 + $0xd0] sm:$0x1] %vm8755_vm3, %v16071_v27 }
 0x975   : > { %v8690_v1 = vadd.f32 %v15104_v39, %v8654_v53  ;;  %8783 = vst.msk [vmem:[#allocation3 + $0xe8] sm:$0x1] %vm8755_vm3, %v16071_v27  ;;  %v15177_v53 = vpop.f32.mrf.mxu3 }
 0x976   : > { %8786 = vst.msk [vmem:[#allocation3 + $0x100] sm:$0x1] %vm8755_vm3, %v16071_v27 }
 0x977   : > { %v8722_v49 = vmax.f32 %v8690_v1, 0.0  ;;  %8789 = vst.msk [vmem:[#allocation3 + $0x118] sm:$0x1] %vm8755_vm3, %v16071_v27 }
 0x978   : > { %v8887_v21 = vld [vmem:[#allocation3 + $0x1] sm:$0xff]  ;;  %v8888_v63 = vld [vmem:[#allocation3 + $0x9] sm:$0xff]  ;;  %8792 = vst.msk [vmem:[#allocation3 + $0x130] sm:$0x1] %vm8755_vm3, %v16071_v27 }
 0x979   : > { %v8838_v42 = vld [vmem:[#allocation3 + $0x8] sm:$0xff]  ;;  %8807 = vst.msk [vmem:[#allocation3 + $0x18] sm:$0xff] %vm8752_vm2, %v8722_v49  ;;  %v8919_v7 = vpack.c.bf16 %v8888_v63, %v8887_v21  ;;  %v8470_v21 = vld [vmem:[#allocation2 + $0x122] sm:$0xff]  ;;  %v8471_v63 = vld [vmem:[#allocation2 + $0x12a] sm:$0xff] }
 0x97a   : > { %v8869_v14 = vpack.c.bf16 %v8838_v42, %v8837_v28  ;;  %v8579_v15 = vpop.f32.mrf.mxu0  ;;  %8795 = vst.msk [vmem:[#allocation3 + $0x148] sm:$0x1] %vm8755_vm3, %v16071_v27  ;;  %v15191_v42 = vpop.f32.mrf.mxu2 }
 0x97b   : > { %v8655_v1 = vadd.f32 %v8579_v15, %v14930_v38  ;;  %11579 = vmatmul.msk.bf16.vlgmr.msra.gmra.mxu1 %vm8752_vm2, %v8919_v7  ;;  %8798 = vst.msk [vmem:[#allocation3 + $0x160] sm:$0x1] %vm8755_vm3, %v16071_v27  ;;  %v15193_v38 = vpop.f32.mrf.mxu1  ;;  %v8492_v7 = vpack.c.bf16 %v8471_v63, %v8470_v21 }
 0x97c   : > { %11599 = vmatmul.msk.bf16.vlgmr.msra.gmra.mxu2 %vm8752_vm2, %v8869_v14  ;;  %8801 = vst.msk [vmem:[#allocation3 + $0x178] sm:$0x1] %vm8755_vm3, %v16071_v27 }
 0x97d   : > { %v8691_v49 = vadd.f32 %v15104_v39, %v8655_v1  ;;  %8804 = vst.msk [vmem:[#allocation3 + $0x190] sm:$0x1] %vm8755_vm3, %v16071_v27  ;;  %v15197_v13 = vpop.f32.mrf.mxu3 }
 0x97f   : > { %v8723_v28 = vmax.f32 %v8691_v49, 0.0 }
 0x980   : > { %v8839_v49 = vld [vmem:[#allocation3 + $0x18] sm:$0xff] }
 0x981   : > { %8808 = vst.msk [vmem:[#allocation3 + $0x20] sm:$0xff] %vm8752_vm2, %v8723_v28 }
 0x982   : > { %v8582_v15 = vpop.f32.mrf.mxu0  ;;  %v15204_v16 = vpop.f32.mrf.mxu2 }
 0x983   : > { %v8656_v14 = vadd.f32 %v8582_v15, %v14942_v41  ;;  %v15206_v41 = vpop.f32.mrf.mxu1 }
 0x984   : > { %11567 = vmatmul.msk.bf16.gmra.mxu0 %vm397_vm0, %v8492_v7 }
 0x985   : > { %v8692_v1 = vadd.f32 %v15104_v39, %v8656_v14  ;;  %v15214_v7 = vpop.f32.mrf.mxu3 }
 0x987   : > { %v8724_v27 = vmax.f32 %v8692_v1, 0.0 }
 0x988   : > { %v8889_v18 = vld [vmem:[#allocation3 + $0x19] sm:$0xff]  ;;  %v8890_v10 = vld [vmem:[#allocation3 + $0x21] sm:$0xff] }
 0x989   : > { %v8840_v6 = vld [vmem:[#allocation3 + $0x20] sm:$0xff]  ;;  %8809 = vst.msk [vmem:[#allocation3 + $0x30] sm:$0xff] %vm8752_vm2, %v8724_v27  ;;  %v15202_v20 = vpack.c.bf16 %v8890_v10, %v8889_v18  ;;  %v8473_v18 = vld [vmem:[#allocation2 + $0x142] sm:$0xff] }
 0x98a   : > { %v8870_v28 = vpack.c.bf16 %v8840_v6, %v8839_v49  ;;  %v8584_v21 = vpop.f32.mrf.mxu0  ;;  %v8472_v6 = vld [vmem:[#allocation2 + $0x13a] sm:$0xff]  ;;  %v15218_v27 = vpop.f32.mrf.mxu2 }
 0x98b   : > { %v8657_v63 = vadd.f32 %v8584_v21, %v14948_v32  ;;  %11580 = vmatmul.msk.bf16.gmra.mxu1 %vm8752_vm2, %v15202_v20  ;;  %v8493_v1 = vpack.c.bf16 %v8473_v18, %v8472_v6  ;;  %v15221_v49 = vpop.f32.mrf.mxu1  ;;  %v7957_v18 = vadd.f32 %v14990_v0, %v14814_v5  ;;  %v8475_v5 = vld [vmem:[#allocation2 + $0x15a] sm:$0xff] }
 0x98c   : > { %11600 = vmatmul.msk.bf16.gmra.mxu2 %vm8752_vm2, %v8870_v28  ;;  %11621 = vmatmul.msk.bf16.vlgmr.msra.gmra.mxu3 %vm8752_vm2, %v8870_v28 }
 0x98d   : > { %v8693_v15 = vadd.f32 %v15104_v39, %v8657_v63  ;;  %v15224_v9 = vpop.f32.mrf.mxu3 }
 0x98f   : > { %v8725_v10 = vmax.f32 %v8693_v15, 0.0 }
 0x990   : > { %v8841_v63 = vld [vmem:[#allocation3 + $0x30] sm:$0xff] }
 0x991   : > { %8810 = vst.msk [vmem:[#allocation3 + $0x38] sm:$0xff] %vm8752_vm2, %v8725_v10 }
 0x992   : > { %v8587_v14 = vpop.f32.mrf.mxu0 }
 0x993   : > { %v8658_v32 = vadd.f32 %v8587_v14, %v14960_v55 }
 0x994   : > { %11568 = vmatmul.msk.bf16.gmra.mxu0 %vm397_vm0, %v8493_v1  ;;  %v8192_v1 = vadd.f32 %v14988_v34, %v7957_v18  ;;  %v7958_v34 = vadd.f32 %v15006_v22, %v14828_v58 }
 0x995   : > { %v8694_v28 = vadd.f32 %v15104_v39, %v8658_v32  ;;  %v15244_v0 = vpop.f32.mrf.mxu3 }
 0x997   : > { %v8726_v21 = vmax.f32 %v8694_v28, 0.0 }
 0x998   : > { %v8891_v15 = vld [vmem:[#allocation3 + $0x31] sm:$0xff]  ;;  %v8892_v62 = vld [vmem:[#allocation3 + $0x39] sm:$0xff] }
 0x999   : > { %v8842_v46 = vld [vmem:[#allocation3 + $0x38] sm:$0xff]  ;;  %8811 = vst.msk [vmem:[#allocation3 + $0x48] sm:$0xff] %vm8752_vm2, %v8726_v21  ;;  %v15227_v10 = vpack.c.bf16 %v8892_v62, %v8891_v15  ;;  %v15238_v62 = vpop.f32.mrf.mxu2  ;;  %v8474_v21 = vld [vmem:[#allocation2 + $0x152] sm:$0xff] }
 0x99a   : > { %v8871_v55 = vpack.c.bf16 %v8842_v46, %v8841_v63  ;;  %v8589_v6 = vpop.f32.mrf.mxu0  ;;  %v15240_v46 = vpop.f32.mrf.mxu1  ;;  %v8494_v15 = vpack.c.bf16 %v8475_v5, %v8474_v21 }
 0x99b   : > { %v8659_v14 = vadd.f32 %v8589_v6, %v14965_v29  ;;  %11581 = vmatmul.msk.bf16.gmra.mxu1 %vm8752_vm2, %v15227_v10  ;;  %v8426_v29 = vadd.f32 %v14995_v35, %v8192_v1  ;;  %v8193_v6 = vadd.f32 %v15004_v17, %v7958_v34  ;;  %v7959_v17 = vadd.f32 %v15021_v19, %v14834_v26 }
 0x99c   : > { %11601 = vmatmul.msk.bf16.gmra.mxu2 %vm8752_vm2, %v8871_v55  ;;  %11622 = vmatmul.msk.bf16.gmra.mxu3 %vm8752_vm2, %v8871_v55 }
 0x99d   : > { %v8695_v32 = vadd.f32 %v15104_v39, %v8659_v14  ;;  %v8427_v45 = vadd.f32 %v15011_v24, %v8193_v6  ;;  %v8194_v24 = vadd.f32 %v15018_v23, %v7959_v17  ;;  %v8477_v6 = vld [vmem:[#allocation2 + $0x172] sm:$0xff] }
 0x99f   : > { %v8727_v28 = vmax.f32 %v8695_v32, 0.0 }
 0x9a0   : > { %v8843_v32 = vld [vmem:[#allocation3 + $0x48] sm:$0xff] }
 0x9a1   : > { %8812 = vst.msk [vmem:[#allocation3 + $0x50] sm:$0xff] %vm8752_vm2, %v8727_v28  ;;  %v15251_v52 = vpop.f32.mrf.mxu2 }
 0x9a2   : > { %v8592_v63 = vpop.f32.mrf.mxu0  ;;  %v15254_v21 = vpop.f32.mrf.mxu1 }
 0x9a3   : > { %v8660_v55 = vadd.f32 %v8592_v63, %v8426_v29  ;;  %v15264_v63 = vpop.f32.mrf.mxu3 }
 0x9a4   : > { %11569 = vmatmul.msk.bf16.gmra.mxu0 %vm397_vm0, %v8494_v15 }
 0x9a5   : > { %v8696_v18 = vadd.f32 %v15104_v39, %v8660_v55  ;;  %v8476_v55 = vld [vmem:[#allocation2 + $0x16a] sm:$0xff] }
 0x9a6   : > { %v8495_v19 = vpack.c.bf16 %v8477_v6, %v8476_v55 }
 0x9a7   : > { %v8728_v14 = vmax.f32 %v8696_v18, 0.0  ;;  %v8428_v18 = vadd.f32 %v15027_v50, %v8194_v24 }
 0x9a8   : > { %v8893_v35 = vld [vmem:[#allocation3 + $0x49] sm:$0xff]  ;;  %v8894_v1 = vld [vmem:[#allocation3 + $0x51] sm:$0xff] }
 0x9a9   : > { %v8844_v28 = vld [vmem:[#allocation3 + $0x50] sm:$0xff]  ;;  %8813 = vst.msk [vmem:[#allocation3 + $0x60] sm:$0xff] %vm8752_vm2, %v8728_v14  ;;  %v15257_v58 = vpack.c.bf16 %v8894_v1, %v8893_v35  ;;  %v15271_v26 = vpop.f32.mrf.mxu2  ;;  %v7960_v14 = vadd.f32 %v15048_v25, %v14848_v37 }
 0x9aa   : > { %v8872_v22 = vpack.c.bf16 %v8844_v28, %v8843_v32  ;;  %v8594_v5 = vpop.f32.mrf.mxu0  ;;  %v15275_v32 = vpop.f32.mrf.mxu1 }
 0x9ab   : > { %v8661_v29 = vadd.f32 %v8594_v5, %v8427_v45  ;;  %11582 = vmatmul.msk.bf16.gmra.mxu1 %vm8752_vm2, %v15257_v58  ;;  %v8195_v23 = vadd.f32 %v15044_v48, %v7960_v14  ;;  %v15280_v28 = vpop.f32.mrf.mxu3  ;;  %v7961_v48 = vadd.f32 %v15078_v4, %v14863_v8  ;;  %v7962_v14 = vadd.f32 %v15112_v43, %v14880_v30 }
 0x9ac   : > { %11602 = vmatmul.msk.bf16.gmra.mxu2 %vm8752_vm2, %v8872_v22  ;;  %11623 = vmatmul.msk.bf16.gmra.mxu3 %vm8752_vm2, %v8872_v22 }
 0x9ad   : > { %v8697_v15 = vadd.f32 %v15104_v39, %v8661_v29  ;;  %v8429_v24 = vadd.f32 %v15056_v59, %v8195_v23  ;;  %v8196_v59 = vadd.f32 %v15074_v54, %v7961_v48  ;;  %v8197_v54 = vadd.f32 %v15108_v61, %v7962_v14 }
 0x9ae   : > { %v7964_v14 = vadd.f32 %v15170_v11, %v14902_v31 }
 0x9af   : > { %v8729_v34 = vmax.f32 %v8697_v15, 0.0  ;;  %v8430_v8 = vadd.f32 %v15089_v44, %v8196_v59  ;;  %v8481_v59 = vld [vmem:[#allocation2 + $0x1a2] sm:$0xff] }
 0x9b0   : > { %v8845_v22 = vld [vmem:[#allocation3 + $0x60] sm:$0xff] }
 0x9b1   : > { %8814 = vst.msk [vmem:[#allocation3 + $0x68] sm:$0xff] %vm8752_vm2, %v8729_v34  ;;  %v15291_v55 = vpop.f32.mrf.mxu2 }
 0x9b2   : > { %v8597_v45 = vpop.f32.mrf.mxu0  ;;  %v15295_v6 = vpop.f32.mrf.mxu1 }
 0x9b3   : > { %v8662_v35 = vadd.f32 %v8597_v45, %v8428_v18 }
 0x9b4   : > { %11570 = vmatmul.msk.bf16.gmra.mxu0 %vm397_vm0, %v8495_v19  ;;  %v15298_v19 = vpop.f32.mrf.mxu3 }
 0x9b5   : > { %v8698_v1 = vadd.f32 %v15104_v39, %v8662_v35 }
 0x9b7   : > { %v8730_v50 = vmax.f32 %v8698_v1, 0.0 }
 0x9b8   : > { %v8895_v5 = vld [vmem:[#allocation3 + $0x61] sm:$0xff]  ;;  %v8896_v17 = vld [vmem:[#allocation3 + $0x69] sm:$0xff] }
 0x9b9   : > { %v8846_v29 = vld [vmem:[#allocation3 + $0x68] sm:$0xff]  ;;  %8815 = vst.msk [vmem:[#allocation3 + $0x78] sm:$0xff] %vm8752_vm2, %v8730_v50  ;;  %v15284_v37 = vpack.c.bf16 %v8896_v17, %v8895_v5  ;;  %v15308_v1 = vpop.f32.mrf.mxu2 }
 0x9ba   : > { %v8873_v25 = vpack.c.bf16 %v8846_v29, %v8845_v22  ;;  %v8599_v15 = vpop.f32.mrf.mxu0  ;;  %v15310_v50 = vpop.f32.mrf.mxu1 }
 0x9bb   : > { %v8663_v34 = vadd.f32 %v8599_v15, %v8429_v24  ;;  %11583 = vmatmul.msk.bf16.gmra.mxu1 %vm8752_vm2, %v15284_v37  ;;  %v8431_v24 = vadd.f32 %v15123_v2, %v8197_v54  ;;  %v8199_v54 = vadd.f32 %v15166_v47, %v7964_v14  ;;  %v7965_v47 = vadd.f32 %v15193_v38, %v14908_v51 }
 0x9bc   : > { %11603 = vmatmul.msk.bf16.gmra.mxu2 %vm8752_vm2, %v8873_v25  ;;  %11624 = vmatmul.msk.bf16.gmra.mxu3 %vm8752_vm2, %v8873_v25  ;;  %v15316_v43 = vpop.f32.mrf.mxu3  ;;  %v7963_v25 = vadd.f32 %v15141_v57, %v14888_v36  ;;  %v7966_v38 = vadd.f32 %v15206_v41, %v14921_v12 }
 0x9bd   : > { %v8699_v18 = vadd.f32 %v15104_v39, %v8663_v34  ;;  %v8480_v34 = vld [vmem:[#allocation2 + $0x19a] sm:$0xff] }
 0x9be   : > { %v8198_v2 = vadd.f32 %v15137_v3, %v7963_v25 }
 0x9bf   : > { %v8731_v45 = vmax.f32 %v8699_v18, 0.0 }
 0x9c0   : > { %v8847_v44 = vld [vmem:[#allocation3 + $0x78] sm:$0xff]  ;;  %v8432_v36 = vadd.f32 %v15150_v60, %v8198_v2 }
 0x9c1   : > { %8816 = vst.msk [vmem:[#allocation3 + $0x80] sm:$0xff] %vm8752_vm2, %v8731_v45  ;;  %v15326_v45 = vpop.f32.mrf.mxu2 }
 0x9c2   : > { %v8602_v4 = vpop.f32.mrf.mxu0  ;;  %v15329_v57 = vpop.f32.mrf.mxu1 }
 0x9c3   : > { %v8664_v35 = vadd.f32 %v8602_v4, %v8430_v8  ;;  %v8497_v8 = vpack.c.bf16 %v8481_v59, %v8480_v34 }
 0x9c4   : > { %11571 = vmatmul.msk.bf16.gmra.mxu0 %vm397_vm0, %v15016_v56  ;;  %v15334_v3 = vpop.f32.mrf.mxu3 }
 0x9c5   : > { %v8700_v23 = vadd.f32 %v15104_v39, %v8664_v35 }
 0x9c7   : > { %v8732_v22 = vmax.f32 %v8700_v23, 0.0 }
 0x9c8   : > { %v8897_v5 = vld [vmem:[#allocation3 + $0x79] sm:$0xff]  ;;  %v8898_v17 = vld [vmem:[#allocation3 + $0x81] sm:$0xff] }
 0x9c9   : > { %v8848_v29 = vld [vmem:[#allocation3 + $0x80] sm:$0xff]  ;;  %8817 = vst.msk [vmem:[#allocation3 + $0x90] sm:$0xff] %vm8752_vm2, %v8732_v22  ;;  %v15314_v30 = vpack.c.bf16 %v8898_v17, %v8897_v5  ;;  %v15343_v11 = vpop.f32.mrf.mxu2 }
 0x9ca   : > { %v8874_v56 = vpack.c.bf16 %v8848_v29, %v8847_v44  ;;  %v8604_v61 = vpop.f32.mrf.mxu0  ;;  %v8433_v29 = vadd.f32 %v15177_v53, %v8199_v54  ;;  %v8200_v53 = vadd.f32 %v15191_v42, %v7965_v47  ;;  %v8201_v42 = vadd.f32 %v15204_v16, %v7966_v38 }
 0x9cb   : > { %v8665_v15 = vadd.f32 %v8604_v61, %v8431_v24  ;;  %11584 = vmatmul.msk.bf16.gmra.mxu1 %vm8752_vm2, %v15314_v30  ;;  %v15347_v61 = vpop.f32.mrf.mxu1  ;;  %v7967_v16 = vadd.f32 %v15221_v49, %v14927_v33 }
 0x9cc   : > { %11604 = vmatmul.msk.bf16.gmra.mxu2 %vm8752_vm2, %v8874_v56  ;;  %11625 = vmatmul.msk.bf16.gmra.mxu3 %vm8752_vm2, %v8874_v56  ;;  %v15355_v2 = vpop.f32.mrf.mxu3  ;;  %v8434_v34 = vadd.f32 %v15197_v13, %v8200_v53  ;;  %v8435_v12 = vadd.f32 %v15214_v7, %v8201_v42 }
 0x9cd   : > { %v8701_v48 = vadd.f32 %v15104_v39, %v8665_v15 }
 0x9cf   : > { %v8733_v18 = vmax.f32 %v8701_v48, 0.0 }
 0x9d0   : > { %v8849_v44 = vld [vmem:[#allocation3 + $0x90] sm:$0xff] }
 0x9d1   : > { %8818 = vst.msk [vmem:[#allocation3 + $0x98] sm:$0xff] %vm8752_vm2, %v8733_v18  ;;  %v15361_v18 = vpop.f32.mrf.mxu2 }
 0x9d2   : > { %v8607_v4 = vpop.f32.mrf.mxu0 }
 0x9d3   : > { %v8666_v35 = vadd.f32 %v8607_v4, %v8432_v36 }
 0x9d4   : > { %11572 = vmatmul.msk.bf16.gmra.mxu0 %vm397_vm0, %v8497_v8  ;;  %v15366_v8 = vpop.f32.mrf.mxu1  ;;  %v15369_v14 = vpop.f32.mrf.mxu3 }
 0x9d5   : > { %v8702_v23 = vadd.f32 %v15104_v39, %v8666_v35 }
 0x9d7   : > { %v8734_v22 = vmax.f32 %v8702_v23, 0.0 }
 0x9d8   : > { %v8899_v60 = vld [vmem:[#allocation3 + $0x91] sm:$0xff]  ;;  %v8900_v5 = vld [vmem:[#allocation3 + $0x99] sm:$0xff] }
 0x9d9   : > { %v8850_v17 = vld [vmem:[#allocation3 + $0x98] sm:$0xff]  ;;  %8819 = vst.msk [vmem:[#allocation3 + $0xa8] sm:$0xff] %vm8752_vm2, %v8734_v22  ;;  %v15341_v24 = vpack.c.bf16 %v8900_v5, %v8899_v60  ;;  %v8202_v60 = vadd.f32 %v15218_v27, %v7967_v16  ;;  %v15383_v5 = vpop.f32.mrf.mxu2 }
 0x9da   : > { %v8875_v31 = vpack.c.bf16 %v8850_v17, %v8849_v44  ;;  %v8609_v56 = vpop.f32.mrf.mxu0 }
 0x9db   : > { %v8667_v25 = vadd.f32 %v8609_v56, %v8433_v29  ;;  %11585 = vmatmul.msk.bf16.gmra.mxu1 %vm8752_vm2, %v15341_v24  ;;  %v7968_v56 = vadd.f32 %v15240_v46, %v14939_v40 }
 0x9dc   : > { %11605 = vmatmul.msk.bf16.gmra.mxu2 %vm8752_vm2, %v8875_v31  ;;  %11626 = vmatmul.msk.bf16.gmra.mxu3 %vm8752_vm2, %v8875_v31  ;;  %v15385_v17 = vpop.f32.mrf.mxu1  ;;  %v8436_v31 = vadd.f32 %v15224_v9, %v8202_v60  ;;  %v15389_v33 = vpop.f32.mrf.mxu3 }
 0x9dd   : > { %v8703_v15 = vadd.f32 %v15104_v39, %v8667_v25  ;;  %v8203_v27 = vadd.f32 %v15238_v62, %v7968_v56  ;;  %v16075_v62 = vld [vmem:[#allocation6_spill] sm:$0xff] }
 0x9de   : > { %v7969_v42 = vadd.f32 %v15254_v21, %v16075_v62 }
 0x9df   : > { %v8735_v48 = vmax.f32 %v8703_v15, 0.0  ;;  %v8437_v38 = vadd.f32 %v15244_v0, %v8203_v27 }
 0x9e0   : > { %v8851_v13 = vld [vmem:[#allocation3 + $0xa8] sm:$0xff]  ;;  %v8204_v0 = vadd.f32 %v15251_v52, %v7969_v42 }
 0x9e1   : > { %8820 = vst.msk [vmem:[#allocation3 + $0xb0] sm:$0xff] %vm8752_vm2, %v8735_v48  ;;  %v15397_v48 = vpop.f32.mrf.mxu2 }
 0x9e2   : > { %v8612_v51 = vpop.f32.mrf.mxu0 }
 0x9e3   : > { %v8668_v59 = vadd.f32 %v8612_v51, %v8434_v34 }
 0x9e4   : > { %11643 = vmatmul.msk.bf16.vlgmr.msra.gmra.mxu0 %vm8752_vm2, %v15202_v20 }
 0x9e5   : > { %v8704_v36 = vadd.f32 %v15104_v39, %v8668_v59  ;;  %v15400_v59 = vpop.f32.mrf.mxu1 }
 0x9e7   : > { %v8736_v4 = vmax.f32 %v8704_v36, 0.0 }
 0x9e8   : > { %v8901_v35 = vld [vmem:[#allocation3 + $0xa9] sm:$0xff]  ;;  %v8902_v54 = vld [vmem:[#allocation3 + $0xb1] sm:$0xff] }
 0x9e9   : > { %v8852_v23 = vld [vmem:[#allocation3 + $0xb0] sm:$0xff]  ;;  %8821 = vst.msk [vmem:[#allocation3 + $0xc0] sm:$0xff] %vm8752_vm2, %v8736_v4  ;;  %v15373_v41 = vpack.c.bf16 %v8902_v54, %v8901_v35  ;;  %v15410_v4 = vpop.f32.mrf.mxu3  ;;  %v8438_v54 = vadd.f32 %v15264_v63, %v8204_v0  ;;  %v15417_v21 = vpop.f32.mrf.mxu2 }
 0x9ea   : > { %v8876_v20 = vpack.c.bf16 %v8852_v23, %v8851_v13  ;;  %v8614_v22 = vpop.f32.mrf.mxu0 }
 0x9eb   : > { %v8669_v44 = vadd.f32 %v8614_v22, %v8435_v12  ;;  %11586 = vmatmul.msk.bf16.gmra.mxu1 %vm8752_vm2, %v15373_v41  ;;  %v16076_v12 = vld [vmem:[#allocation25_spill] sm:$0xff] }
 0x9ec   : > { %11606 = vmatmul.msk.bf16.gmra.mxu2 %vm8752_vm2, %v8876_v20  ;;  %11627 = vmatmul.msk.bf16.gmra.mxu3 %vm8752_vm2, %v8876_v20  ;;  %v7970_v20 = vadd.f32 %v15275_v32, %v16076_v12 }
 0x9ed   : > { %v8705_v7 = vadd.f32 %v15104_v39, %v8669_v44  ;;  %v15421_v22 = vpop.f32.mrf.mxu1 }
 0x9ee   : > { %v8205_v52 = vadd.f32 %v15271_v26, %v7970_v20 }
 0x9ef   : > { %v8737_v29 = vmax.f32 %v8705_v7, 0.0 }
 0x9f0   : > { %v8853_v15 = vld [vmem:[#allocation3 + $0xc0] sm:$0xff]  ;;  %v8439_v56 = vadd.f32 %v15280_v28, %v8205_v52 }
 0x9f1   : > { %8822 = vst.msk [vmem:[#allocation3 + $0xc8] sm:$0xff] %vm8752_vm2, %v8737_v29  ;;  %v15427_v60 = vpop.f32.mrf.mxu3 }
 0x9f2   : > { %v8617_v49 = vpop.f32.mrf.mxu0 }
 0x9f3   : > { %v8670_v47 = vadd.f32 %v8617_v49, %v8436_v31 }
 0x9f4   : > { %11644 = vmatmul.msk.bf16.gmra.mxu0 %vm8752_vm2, %v15227_v10 }
 0x9f5   : > { %v8706_v25 = vadd.f32 %v15104_v39, %v8670_v47 }
 0x9f7   : > { %v8738_v53 = vmax.f32 %v8706_v25, 0.0 }
 0x9f8   : > { %v8903_v9 = vld [vmem:[#allocation3 + $0xc1] sm:$0xff]  ;;  %v8904_v34 = vld [vmem:[#allocation3 + $0xc9] sm:$0xff] }
 0x9f9   : > { %v8854_v51 = vld [vmem:[#allocation3 + $0xc8] sm:$0xff]  ;;  %8823 = vst.msk [vmem:[#allocation3 + $0xd8] sm:$0xff] %vm8752_vm2, %v8738_v53  ;;  %v15403_v40 = vpack.c.bf16 %v8904_v34, %v8903_v9  ;;  %v15438_v53 = vpop.f32.mrf.mxu2  ;;  %v15445_v34 = vpop.f32.mrf.mxu3 }
 0x9fa   : > { %v8877_v10 = vpack.c.bf16 %v8854_v51, %v8853_v15  ;;  %v8619_v46 = vpop.f32.mrf.mxu0  ;;  %v15442_v15 = vpop.f32.mrf.mxu1 }
 0x9fb   : > { %v8671_v36 = vadd.f32 %v8619_v46, %v8437_v38  ;;  %11587 = vmatmul.msk.bf16.gmra.mxu1 %vm8752_vm2, %v15403_v40 }
 0x9fc   : > { %11607 = vmatmul.msk.bf16.gmra.mxu2 %vm8752_vm2, %v8877_v10  ;;  %11628 = vmatmul.msk.bf16.gmra.mxu3 %vm8752_vm2, %v8877_v10  ;;  %v16078_v10 = vld [vmem:[#allocation9_spill] sm:$0xff] }
 0x9fd   : > { %v8707_v13 = vadd.f32 %v15104_v39, %v8671_v36  ;;  %v7972_v46 = vadd.f32 %v15310_v50, %v16078_v10 }
 0x9ff   : > { %v8739_v35 = vmax.f32 %v8707_v13, 0.0 }
 0xa00   : > { %v8855_v7 = vld [vmem:[#allocation3 + $0xd8] sm:$0xff] }
 0xa01   : > { %8824 = vst.msk [vmem:[#allocation3 + $0xe0] sm:$0xff] %vm8752_vm2, %v8739_v35  ;;  %v15455_v36 = vpop.f32.mrf.mxu2  ;;  %v15459_v35 = vpop.f32.mrf.mxu3 }
 0xa02   : > { %v8622_v23 = vpop.f32.mrf.mxu0  ;;  %v15457_v0 = vpop.f32.mrf.mxu1 }
 0xa03   : > { %v8672_v16 = vadd.f32 %v8622_v23, %v8438_v54 }
 0xa04   : > { %11645 = vmatmul.msk.bf16.gmra.mxu0 %vm8752_vm2, %v15257_v58  ;;  %v16077_v58 = vld [vmem:[#allocation31_spill] sm:$0xff] }
 0xa05   : > { %v8708_v44 = vadd.f32 %v15104_v39, %v8672_v16  ;;  %v7971_v26 = vadd.f32 %v15295_v6, %v16077_v58  ;;  %v16079_v16 = vld [vmem:[#allocation28_spill] sm:$0xff] }
 0xa06   : > { %v7973_v52 = vadd.f32 %v15329_v57, %v16079_v16 }
 0xa07   : > { %v8740_v63 = vmax.f32 %v8708_v44, 0.0  ;;  %v8206_v28 = vadd.f32 %v15291_v55, %v7971_v26  ;;  %v8207_v55 = vadd.f32 %v15308_v1, %v7972_v46 }
 0xa08   : > { %v8905_v29 = vld [vmem:[#allocation3 + $0xd9] sm:$0xff]  ;;  %v8906_v31 = vld [vmem:[#allocation3 + $0xe1] sm:$0xff] }
 0xa09   : > { %v8856_v49 = vld [vmem:[#allocation3 + $0xe0] sm:$0xff]  ;;  %8825 = vst.msk [vmem:[#allocation3 + $0xf0] sm:$0xff] %vm8752_vm2, %v8740_v63  ;;  %v15431_v32 = vpack.c.bf16 %v8906_v31, %v8905_v29  ;;  %v8440_v6 = vadd.f32 %v15298_v19, %v8206_v28  ;;  %v8441_v50 = vadd.f32 %v15316_v43, %v8207_v55  ;;  %v8208_v63 = vadd.f32 %v15326_v45, %v7973_v52 }
 0xa0a   : > { %v8878_v47 = vpack.c.bf16 %v8856_v49, %v8855_v7  ;;  %v8624_v27 = vpop.f32.mrf.mxu0  ;;  %v15473_v7 = vpop.f32.mrf.mxu2 }
 0xa0b   : > { %v8673_v25 = vadd.f32 %v8624_v27, %v8439_v56  ;;  %11588 = vmatmul.msk.bf16.gmra.mxu1 %vm8752_vm2, %v15431_v32  ;;  %v15475_v29 = vpop.f32.mrf.mxu1  ;;  %v8442_v57 = vadd.f32 %v15334_v3, %v8208_v63 }
 0xa0c   : > { %11608 = vmatmul.msk.bf16.gmra.mxu2 %vm8752_vm2, %v8878_v47  ;;  %11629 = vmatmul.msk.bf16.gmra.mxu3 %vm8752_vm2, %v8878_v47  ;;  %v16080_v47 = vld [vmem:[#allocation12_spill] sm:$0xff] }
 0xa0d   : > { %v8709_v9 = vadd.f32 %v15104_v39, %v8673_v25  ;;  %v7974_v27 = vadd.f32 %v15347_v61, %v16080_v47 }
 0xa0f   : > { %v8741_v51 = vmax.f32 %v8709_v9, 0.0  ;;  %v15477_v49 = vpop.f32.mrf.mxu3  ;;  %v8209_v45 = vadd.f32 %v15343_v11, %v7974_v27  ;;  %v16083_v27 = vld [vmem:[#allocation35_spill] sm:$0xff] }
 0xa10   : > { %v8857_v19 = vld [vmem:[#allocation3 + $0xf0] sm:$0xff] }
 0xa11   : > { %8826 = vst.msk [vmem:[#allocation3 + $0xf8] sm:$0xff] %vm8752_vm2, %v8741_v51 }
 0xa12   : > { %v8627_v38 = vpop.f32.mrf.mxu0  ;;  %v15487_v9 = vpop.f32.mrf.mxu2 }
 0xa13   : > { %v8674_v62 = vadd.f32 %v8627_v38, %v8440_v6  ;;  %v8443_v38 = vadd.f32 %v15355_v2, %v8209_v45  ;;  %v15490_v10 = vpop.f32.mrf.mxu1 }
 0xa14   : > { %11646 = vmatmul.msk.bf16.gmra.mxu0 %vm8752_vm2, %v15284_v37 }
 0xa15   : > { %v8710_v42 = vadd.f32 %v15104_v39, %v8674_v62  ;;  %v16081_v62 = vld [vmem:[#allocation29_spill] sm:$0xff] }
 0xa16   : > { %v7975_v55 = vadd.f32 %v15366_v8, %v16081_v62 }
 0xa17   : > { %v8742_v13 = vmax.f32 %v8710_v42, 0.0  ;;  %v15495_v46 = vpop.f32.mrf.mxu3 }
 0xa18   : > { %v8907_v54 = vld [vmem:[#allocation3 + $0xf1] sm:$0xff]  ;;  %v8908_v23 = vld [vmem:[#allocation3 + $0xf9] sm:$0xff]  ;;  %v8210_v2 = vadd.f32 %v15361_v18, %v7975_v55 }
 0xa19   : > { %v8858_v12 = vld [vmem:[#allocation3 + $0xf8] sm:$0xff]  ;;  %8827 = vst.msk [vmem:[#allocation3 + $0x108] sm:$0xff] %vm8752_vm2, %v8742_v13  ;;  %v15463_v37 = vpack.c.bf16 %v8908_v23, %v8907_v54 }
 0xa1a   : > { %v8879_v1 = vpack.c.bf16 %v8858_v12, %v8857_v19  ;;  %v8629_v20 = vpop.f32.mrf.mxu0  ;;  %v8444_v54 = vadd.f32 %v15369_v14, %v8210_v2  ;;  %v15507_v23 = vpop.f32.mrf.mxu2  ;;  %v16082_v12 = vld [vmem:[#allocation15_spill] sm:$0xff] }
 0xa1b   : > { %v8675_v44 = vadd.f32 %v8629_v20, %v8441_v50  ;;  %11589 = vmatmul.msk.bf16.gmra.mxu1 %vm8752_vm2, %v15463_v37  ;;  %v7976_v50 = vadd.f32 %v15385_v17, %v16082_v12 }
 0xa1c   : > { %11609 = vmatmul.msk.bf16.gmra.mxu2 %vm8752_vm2, %v8879_v1  ;;  %11630 = vmatmul.msk.bf16.gmra.mxu3 %vm8752_vm2, %v8879_v1  ;;  %v15511_v1 = vpop.f32.mrf.mxu1 }
 0xa1d   : > { %v8711_v43 = vadd.f32 %v15104_v39, %v8675_v44  ;;  %v8211_v18 = vadd.f32 %v15383_v5, %v7976_v50 }
 0xa1f   : > { %v8743_v31 = vmax.f32 %v8711_v43, 0.0  ;;  %v15513_v16 = vpop.f32.mrf.mxu3 }
 0xa20   : > { %v8859_v28 = vld [vmem:[#allocation3 + $0x108] sm:$0xff] }
 0xa21   : > { %8828 = vst.msk [vmem:[#allocation3 + $0x110] sm:$0xff] %vm8752_vm2, %v8743_v31 }
 0xa22   : > { %v8632_v56 = vpop.f32.mrf.mxu0  ;;  %v15528_v5 = vpop.f32.mrf.mxu2 }
 0xa23   : > { %v8676_v58 = vadd.f32 %v8632_v56, %v8442_v57  ;;  %v8445_v57 = vadd.f32 %v15389_v33, %v8211_v18 }
 0xa24   : > { %11647 = vmatmul.msk.bf16.gmra.mxu0 %vm8752_vm2, %v15314_v30  ;;  %v15532_v45 = vpop.f32.mrf.mxu1 }
 0xa25   : > { %v8712_v26 = vadd.f32 %v15104_v39, %v8676_v58 }
 0xa27   : > { %v8744_v25 = vmax.f32 %v8712_v26, 0.0 }
 0xa28   : > { %v8909_v51 = vld [vmem:[#allocation3 + $0x109] sm:$0xff]  ;;  %v8910_v3 = vld [vmem:[#allocation3 + $0x111] sm:$0xff] }
 0xa29   : > { %v8860_v6 = vld [vmem:[#allocation3 + $0x110] sm:$0xff]  ;;  %8829 = vst.msk [vmem:[#allocation3 + $0x120] sm:$0xff] %vm8752_vm2, %v8744_v25  ;;  %v15493_v61 = vpack.c.bf16 %v8910_v3, %v8909_v51  ;;  %v15535_v25 = vpop.f32.mrf.mxu3  ;;  %v16084_v3 = vld [vmem:[#allocation33_spill] sm:$0xff] }
 0xa2a   : > { %v8880_v30 = vpack.c.bf16 %v8860_v6, %v8859_v28  ;;  %v8634_v11 = vpop.f32.mrf.mxu0  ;;  %v7978_v6 = vadd.f32 %v15421_v22, %v16084_v3  ;;  %v9145_v3 = vadd.f32 %v15473_v7, %v15475_v29 }
 0xa2b   : > { %v8677_v42 = vadd.f32 %v8634_v11, %v8443_v38  ;;  %11590 = vmatmul.msk.bf16.gmra.mxu1 %vm8752_vm2, %v15493_v61  ;;  %v15545_v11 = vpop.f32.mrf.mxu2 }
 0xa2c   : > { %11610 = vmatmul.msk.bf16.gmra.mxu2 %vm8752_vm2, %v8880_v30  ;;  %11631 = vmatmul.msk.bf16.gmra.mxu3 %vm8752_vm2, %v8880_v30  ;;  %v15547_v62 = vpop.f32.mrf.mxu1 }
 0xa2d   : > { %v8713_v13 = vadd.f32 %v15104_v39, %v8677_v42 }
 0xa2f   : > { %v8745_v19 = vmax.f32 %v8713_v13, 0.0 }
 0xa30   : > { %v8861_v44 = vld [vmem:[#allocation3 + $0x120] sm:$0xff] }
 0xa31   : > { %8830 = vst.msk [vmem:[#allocation3 + $0x128] sm:$0xff] %vm8752_vm2, %v8745_v19  ;;  %v15549_v42 = vpop.f32.mrf.mxu3 }
 0xa32   : > { %v8637_v8 = vpop.f32.mrf.mxu0 }
 0xa33   : > { %v8678_v20 = vadd.f32 %v8637_v8, %v8444_v54  ;;  %v16085_v8 = vld [vmem:[#allocation34_spill] sm:$0xff] }
 0xa34   : > { %11648 = vmatmul.msk.bf16.gmra.mxu0 %vm8752_vm2, %v15341_v24  ;;  %v7977_v24 = vadd.f32 %v15400_v59, %v16083_v27  ;;  %v7979_v12 = vadd.f32 %v15442_v15, %v16085_v8 }
 0xa35   : > { %v8714_v14 = vadd.f32 %v15104_v39, %v8678_v20 }
 0xa36   : > { %v8212_v33 = vadd.f32 %v15397_v48, %v7977_v24  ;;  %v8213_v48 = vadd.f32 %v15417_v21, %v7978_v6  ;;  %v8214_v20 = vadd.f32 %v15438_v53, %v7979_v12 }
 0xa37   : > { %v8746_v52 = vmax.f32 %v8714_v14, 0.0  ;;  %v15563_v14 = vpop.f32.mrf.mxu2 }
 0xa38   : > { %v8911_v63 = vld [vmem:[#allocation3 + $0x121] sm:$0xff]  ;;  %v8912_v43 = vld [vmem:[#allocation3 + $0x129] sm:$0xff]  ;;  %v8446_v59 = vadd.f32 %v15410_v4, %v8212_v33  ;;  %v8447_v22 = vadd.f32 %v15427_v60, %v8213_v48 }
 0xa39   : > { %v8862_v31 = vld [vmem:[#allocation3 + $0x128] sm:$0xff]  ;;  %8831 = vst.msk [vmem:[#allocation3 + $0x138] sm:$0xff] %vm8752_vm2, %v8746_v52  ;;  %v15521_v17 = vpack.c.bf16 %v8912_v43, %v8911_v63  ;;  %v8448_v52 = vadd.f32 %v15445_v34, %v8214_v20  ;;  %v15569_v15 = vpop.f32.mrf.mxu3  ;;  %v15599_v48 = vld [vmem:[%s15767_s6] ss:$0 sm:$0xff] }
 0xa3a   : > { %v8881_v56 = vpack.c.bf16 %v8862_v31, %v8861_v44  ;;  %v8639_v47 = vpop.f32.mrf.mxu0  ;;  %v15566_v44 = vpop.f32.mrf.mxu1  ;;  %v16086_v43 = vld [vmem:[#allocation38_spill] sm:$0xff] }
 0xa3b   : > { %v8679_v58 = vadd.f32 %v8639_v47, %v8445_v57  ;;  %11591 = vmatmul.msk.bf16.gmra.mxu1 %vm8752_vm2, %v15521_v17  ;;  %v7980_v31 = vadd.f32 %v15457_v0, %v16086_v43 }
 0xa3c   : > { %11611 = vmatmul.msk.bf16.gmra.mxu2 %vm8752_vm2, %v8881_v56  ;;  %11632 = vmatmul.msk.bf16.gmra.mxu3 %vm8752_vm2, %v8881_v56 }
 0xa3d   : > { %v8715_v26 = vadd.f32 %v15104_v39, %v8679_v58  ;;  %v8215_v53 = vadd.f32 %v15455_v36, %v7980_v31 }
 0xa3f   : > { %v8747_v28 = vmax.f32 %v8715_v26, 0.0  ;;  %v8449_v33 = vadd.f32 %v15459_v35, %v8215_v53  ;;  %v9256_v53 = vld [vmem:[#allocation3 + $0x188] sm:$0xff] }
 0xa40   : > { %v8863_v4 = vld [vmem:[#allocation3 + $0x138] sm:$0xff] }
 0xa41   : > { %8832 = vst.msk [vmem:[#allocation3 + $0x140] sm:$0xff] %vm8752_vm2, %v8747_v28  ;;  %v15581_v28 = vpop.f32.mrf.mxu2 }
 0xa42   : > { %v8642_v51 = vpop.f32.mrf.mxu0 }
 0xa43   : > { %v8680_v38 = vadd.f32 %v8642_v51, %v8446_v59  ;;  %v15583_v59 = vpop.f32.mrf.mxu1  ;;  %v15588_v51 = vpop.f32.mrf.mxu3 }
 0xa44   : > { %11649 = vmatmul.msk.bf16.gmra.mxu0 %vm8752_vm2, %v15373_v41 }
 0xa45   : > { %v8716_v30 = vadd.f32 %v15104_v39, %v8680_v38  ;;  %v9419_v38 = vadd.f32 %v15477_v49, %v9145_v3  ;;  %v9147_v49 = vadd.f32 %v15487_v9, %v15490_v10 }
 0xa47   : > { %v8748_v55 = vmax.f32 %v8716_v30, 0.0 }
 0xa48   : > { %v8913_v2 = vld [vmem:[#allocation3 + $0x139] sm:$0xff]  ;;  %v8914_v13 = vld [vmem:[#allocation3 + $0x141] sm:$0xff] }
 0xa49   : > { %v8864_v19 = vld [vmem:[#allocation3 + $0x140] sm:$0xff]  ;;  %8833 = vst.msk [vmem:[#allocation3 + $0x150] sm:$0xff] %vm8752_vm2, %v8748_v55  ;;  %v15553_v41 = vpack.c.bf16 %v8914_v13, %v8913_v2 }
 0xa4a   : > { %v8882_v21 = vpack.c.bf16 %v8864_v19, %v8863_v4  ;;  %v8644_v54 = vpop.f32.mrf.mxu0  ;;  %v15602_v4 = vpop.f32.mrf.mxu2 }
 0xa4b   : > { %v8681_v50 = vadd.f32 %v8644_v54, %v8447_v22  ;;  %11592 = vmatmul.msk.bf16.gmra.mxu1 %vm8752_vm2, %v15553_v41  ;;  %v15609_v29 = vpop.f32.mrf.mxu3 }
 0xa4c   : > { %11612 = vmatmul.msk.bf16.gmra.mxu2 %vm8752_vm2, %v8882_v21  ;;  %11633 = vmatmul.msk.bf16.gmra.mxu3 %vm8752_vm2, %v8882_v21  ;;  %v9420_v21 = vadd.f32 %v15495_v46, %v9147_v49  ;;  %v9150_v46 = vadd.f32 %v15507_v23, %v15511_v1  ;;  %v9152_v23 = vadd.f32 %v15528_v5, %v15532_v45 }
 0xa4d   : > { %v8717_v60 = vadd.f32 %v15104_v39, %v8681_v50 }
 0xa4f   : > { %v8749_v18 = vmax.f32 %v8717_v60, 0.0 }
 0xa50   : > { %v8865_v34 = vld [vmem:[#allocation3 + $0x150] sm:$0xff] }
 0xa51   : > { %8834 = vst.msk [vmem:[#allocation3 + $0x158] sm:$0xff] %vm8752_vm2, %v8749_v18 }
 0xa52   : > { %v8647_v63 = vpop.f32.mrf.mxu0  ;;  %v15628_v10 = vpop.f32.mrf.mxu2 }
 0xa53   : > { %v8682_v57 = vadd.f32 %v8647_v63, %v8448_v52  ;;  %v15632_v18 = vpop.f32.mrf.mxu3  ;;  %v9421_v52 = vadd.f32 %v15513_v16, %v9150_v46  ;;  %v9422_v16 = vadd.f32 %v15535_v25, %v9152_v23 }
 0xa54   : > { %11650 = vmatmul.msk.bf16.gmra.mxu0 %vm8752_vm2, %v15403_v40 }
 0xa55   : > { %v8718_v56 = vadd.f32 %v15104_v39, %v8682_v57  ;;  %v9255_v57 = vld [vmem:[#allocation3 + $0x180] sm:$0xff] }
 0xa57   : > { %v8750_v47 = vmax.f32 %v8718_v56, 0.0 }
 0xa58   : > { %v8915_v27 = vld [vmem:[#allocation3 + $0x151] sm:$0xff]  ;;  %v8916_v24 = vld [vmem:[#allocation3 + $0x159] sm:$0xff] }
 0xa59   : > { %v8866_v58 = vld [vmem:[#allocation3 + $0x158] sm:$0xff]  ;;  %8835 = vst.msk [vmem:[#allocation3 + $0x168] sm:$0xff] %vm8752_vm2, %v8750_v47  ;;  %v15579_v26 = vpack.c.bf16 %v8916_v24, %v8915_v27  ;;  %v9272_v47 = vpack.c.bf16 %v9256_v53, %v9255_v57 }
 0xa5a   : > { %v8883_v0 = vpack.c.bf16 %v8866_v58, %v8865_v34  ;;  %v8649_v40 = vpop.f32.mrf.mxu0  ;;  %v9166_v56 = vpop.f32.mrf.mxu2 }
 0xa5b   : > { %v8683_v36 = vadd.f32 %v8649_v40, %v8449_v33  ;;  %11593 = vmatmul.msk.bf16.gmra.mxu1 %vm8752_vm2, %v15579_v26  ;;  %v9361_v27 = vpop.f32.mrf.mxu3  ;;  %v9155_v33 = vadd.f32 %v15545_v11, %v15547_v62 }
 0xa5c   : > { %11613 = vmatmul.msk.bf16.gmra.mxu2 %vm8752_vm2, %v8883_v0  ;;  %11634 = vmatmul.msk.bf16.gmra.mxu3 %vm8752_vm2, %v8883_v0 }
 0xa5d   : > { %v8719_v35 = vadd.f32 %v15104_v39, %v8683_v36  ;;  %v15606_v39 = vpop.f32.mrf.mxu1  ;;  %v9423_v45 = vadd.f32 %v15549_v42, %v9155_v33 }
 0xa5f   : > { %v8751_v6 = vmax.f32 %v8719_v35, 0.0 }
 0xa60   : > { %v8867_v13 = vld [vmem:[#allocation3 + $0x168] sm:$0xff] }
 0xa61   : > { %8836 = vst.msk [vmem:[#allocation3 + $0x170] sm:$0xff] %vm8752_vm2, %v8751_v6  ;;  %v9157_v6 = vadd.f32 %v15563_v14, %v15566_v44 }
 0xa62   : > { %v9565_v30 = vpop.f32.mrf.mxu0  ;;  %v9169_v25 = vpop.f32.mrf.mxu2 }
 0xa63   : > { %v9645_v55 = vadd.f32 %v9565_v30, %v9419_v38  ;;  %v9364_v35 = vpop.f32.mrf.mxu3  ;;  %v9424_v62 = vadd.f32 %v15569_v15, %v9157_v6 }
 0xa64   : > { %11651 = vmatmul.msk.bf16.gmra.mxu0 %vm8752_vm2, %v15431_v32 }
 0xa65   : > { %v9681_v7 = vadd.f32 %v15599_v48, %v9645_v55  ;;  %v9021_v20 = vpop.f32.mrf.mxu1 }
 0xa67   : > { %v9713_v2 = vpack.c.bf16 %v9681_v7, %v9681_v7 }
 0xa68   : > { %v8917_v19 = vld [vmem:[#allocation3 + $0x169] sm:$0xff]  ;;  %v8918_v32 = vld [vmem:[#allocation3 + $0x171] sm:$0xff] }
 0xa69   : > { %v8868_v22 = vld [vmem:[#allocation3 + $0x170] sm:$0xff]  ;;  %9746 = vst.msk [vmem:[%s15614_s11] sm:$0xf] %vm9745_vm4, %v9713_v2  ;;  %v15621_v54 = vpack.c.bf16 %v8918_v32, %v8917_v19  ;;  %v9162_v32 = vadd.f32 %v15602_v4, %v15606_v39 }
 0xa6a   : > { %v8884_v8 = vpack.c.bf16 %v8868_v22, %v8867_v13  ;;  %v9567_v12 = vpop.f32.mrf.mxu0  ;;  %v9171_v30 = vpop.f32.mrf.mxu2 }
 0xa6b   : > { %v9646_v50 = vadd.f32 %v9567_v12, %v9420_v21  ;;  %11594 = vmatmul.msk.bf16.gmra.mxu1 %vm8752_vm2, %v15621_v54  ;;  %v9366_v49 = vpop.f32.mrf.mxu3 }
 0xa6c   : > { %11614 = vmatmul.msk.bf16.gmra.mxu2 %vm8752_vm2, %v8884_v8  ;;  %11635 = vmatmul.msk.bf16.gmra.mxu3 %vm8752_vm2, %v8884_v8 }
 0xa6d   : > { %v9682_v9 = vadd.f32 %v15599_v48, %v9646_v50  ;;  %v9023_v34 = vpop.f32.mrf.mxu1 }
 0xa6f   : > { %v9714_v60 = vpack.c.bf16 %v9682_v9, %v9682_v9 }
 0xa71   : > { %9747 = vst.msk [vmem:[%s15614_s11 + $0x4] sm:$0xf] %vm9745_vm4, %v9714_v60 }
 0xa72   : > { %v9570_v63 = vpop.f32.mrf.mxu0  ;;  %v9174_v19 = vpop.f32.mrf.mxu2 }
 0xa73   : > { %v9647_v43 = vadd.f32 %v9570_v63, %v9421_v52  ;;  %v9167_v63 = vadd.f32 %v9166_v56, %v9023_v34 }
 0xa74   : > { %11652 = vmatmul.msk.bf16.gmra.mxu0 %vm8752_vm2, %v15463_v37 }
 0xa75   : > { %v9683_v31 = vadd.f32 %v15599_v48, %v9647_v43  ;;  %v9026_v40 = vpop.f32.mrf.mxu1 }
 0xa77   : > { %v9715_v1 = vpack.c.bf16 %v9683_v31, %v9683_v31  ;;  %v9428_v31 = vadd.f32 %v9361_v27, %v9167_v63 }
 0xa79   : > { %9748 = vst.msk [vmem:[%s15614_s11 + $0x8] sm:$0xf] %vm9745_vm4, %v9715_v1  ;;  %v9170_v1 = vadd.f32 %v9169_v25, %v9026_v40 }
 0xa7a   : > { %v9572_v24 = vpop.f32.mrf.mxu0  ;;  %v9176_v9 = vpop.f32.mrf.mxu2 }
 0xa7b   : > { %v9648_v58 = vadd.f32 %v9572_v24, %v9422_v16  ;;  %v9429_v16 = vadd.f32 %v9364_v35, %v9170_v1 }
 0xa7c   : > { %11636 = vmatmul.msk.bf16.gmra.mxu3 %vm8752_vm2, %v9272_v47 }
 0xa7d   : > { %v9684_v37 = vadd.f32 %v15599_v48, %v9648_v58  ;;  %v9028_v55 = vpop.f32.mrf.mxu1 }
 0xa7f   : > { %v9716_v5 = vpack.c.bf16 %v9684_v37, %v9684_v37  ;;  %v9172_v37 = vadd.f32 %v9171_v30, %v9028_v55 }
 0xa81   : > { %9749 = vst.msk [vmem:[%s15614_s11 + $0xc] sm:$0xf] %vm9745_vm4, %v9716_v5  ;;  %v9430_v5 = vadd.f32 %v9366_v49, %v9172_v37 }
 0xa82   : > { %v9575_v0 = vpop.f32.mrf.mxu0 }
 0xa83   : > { %v9649_v36 = vadd.f32 %v9575_v0, %v9423_v45 }
 0xa84   : > { %11653 = vmatmul.msk.bf16.gmra.mxu0 %vm8752_vm2, %v15493_v61  ;;  %v9160_v61 = vadd.f32 %v15581_v28, %v15583_v59  ;;  %v9369_v28 = vpop.f32.mrf.mxu3  ;;  %v9426_v59 = vadd.f32 %v15609_v29, %v9162_v32 }
 0xa85   : > { %v9685_v3 = vadd.f32 %v15599_v48, %v9649_v36  ;;  %v9031_v22 = vpop.f32.mrf.mxu1 }
 0xa86   : > { %v9425_v13 = vadd.f32 %v15588_v51, %v9160_v61  ;;  %v9175_v36 = vadd.f32 %v9174_v19, %v9031_v22 }
 0xa87   : > { %v9717_v11 = vpack.c.bf16 %v9685_v3, %v9685_v3 }
 0xa88   : > { %v9431_v6 = vadd.f32 %v9369_v28, %v9175_v36 }
 0xa89   : > { %9750 = vst.msk [vmem:[%s15614_s11 + $0x10] sm:$0xf] %vm9745_vm4, %v9717_v11 }
 0xa8a   : > { %v9577_v42 = vpop.f32.mrf.mxu0 }
 0xa8b   : > { %v9650_v38 = vadd.f32 %v9577_v42, %v9424_v62 }
 0xa8c   : > { %v9371_v4 = vpop.f32.mrf.mxu3 }
 0xa8d   : > { %v9686_v7 = vadd.f32 %v15599_v48, %v9650_v38  ;;  %v9033_v60 = vpop.f32.mrf.mxu1 }
 0xa8e   : > { %v9177_v38 = vadd.f32 %v9176_v9, %v9033_v60 }
 0xa8f   : > { %v9718_v2 = vpack.c.bf16 %v9686_v7, %v9686_v7 }
 0xa90   : > { %v9432_v7 = vadd.f32 %v9371_v4, %v9177_v38 }
 0xa91   : > { %9751 = vst.msk [vmem:[%s15614_s11 + $0x14] sm:$0xf] %vm9745_vm4, %v9718_v2 }
 0xa92   : > { %v9580_v14 = vpop.f32.mrf.mxu0 }
 0xa93   : > { %v9651_v44 = vadd.f32 %v9580_v14, %v9425_v13 }
 0xa94   : > { %11654 = vmatmul.msk.bf16.gmra.mxu0 %vm8752_vm2, %v15521_v17  ;;  %v9165_v17 = vadd.f32 %v15628_v10, %v9021_v20  ;;  %v9179_v10 = vpop.f32.mrf.mxu2  ;;  %v9374_v53 = vpop.f32.mrf.mxu3 }
 0xa95   : > { %v9687_v15 = vadd.f32 %v15599_v48, %v9651_v44  ;;  %v9481_v44 = vld [vmem:[#allocation3 + $0x181] sm:$0xff] }
 0xa96   : > { %v9427_v46 = vadd.f32 %v15632_v18, %v9165_v17  ;;  %v9036_v18 = vpop.f32.mrf.mxu1 }
 0xa97   : > { %v9719_v21 = vpack.c.bf16 %v9687_v15, %v9687_v15  ;;  %v9482_v15 = vld [vmem:[#allocation3 + $0x189] sm:$0xff]  ;;  %v9180_v19 = vadd.f32 %v9179_v10, %v9036_v18 }
 0xa98   : > { %v9498_v32 = vpack.c.bf16 %v9482_v15, %v9481_v44 }
 0xa99   : > { %9752 = vst.msk [vmem:[%s15614_s11 + $0x18] sm:$0xf] %vm9745_vm4, %v9719_v21  ;;  %v9433_v22 = vadd.f32 %v9374_v53, %v9180_v19 }
 0xa9a   : > { %v9582_v51 = vpop.f32.mrf.mxu0 }
 0xa9b   : > { %v9652_v8 = vadd.f32 %v9582_v51, %v9426_v59 }
 0xa9c   : > { %v9181_v56 = vpop.f32.mrf.mxu2  ;;  %v9376_v58 = vpop.f32.mrf.mxu3 }
 0xa9d   : > { %v9688_v12 = vadd.f32 %v15599_v48, %v9652_v8 }
 0xa9e   : > { %v9038_v34 = vpop.f32.mrf.mxu1 }
 0xa9f   : > { %v9720_v50 = vpack.c.bf16 %v9688_v12, %v9688_v12  ;;  %v9182_v17 = vadd.f32 %v9181_v56, %v9038_v34 }
 0xaa1   : > { %9753 = vst.msk [vmem:[%s15614_s11 + $0x1c] sm:$0xf] %vm9745_vm4, %v9720_v50  ;;  %v9434_v9 = vadd.f32 %v9376_v58, %v9182_v17 }
 0xaa2   : > { %v9585_v39 = vpop.f32.mrf.mxu0 }
 0xaa3   : > { %v9653_v52 = vadd.f32 %v9585_v39, %v9427_v46 }
 0xaa4   : > { %11655 = vmatmul.msk.bf16.gmra.mxu0 %vm8752_vm2, %v15553_v41  ;;  %v9184_v40 = vpop.f32.mrf.mxu2 }
 0xaa5   : > { %v9689_v29 = vadd.f32 %v15599_v48, %v9653_v52 }
 0xaa6   : > { %v9041_v35 = vpop.f32.mrf.mxu1 }
 0xaa7   : > { %v9721_v43 = vpack.c.bf16 %v9689_v29, %v9689_v29  ;;  %v9185_v63 = vadd.f32 %v9184_v40, %v9041_v35 }
 0xaa9   : > { %9754 = vst.msk [vmem:[%s15614_s11 + $0x20] sm:$0xf] %vm9745_vm4, %v9721_v43 }
 0xaaa   : > { %v9587_v20 = vpop.f32.mrf.mxu0 }
 0xaab   : > { %v9654_v57 = vadd.f32 %v9587_v20, %v9428_v31 }
 0xaac   : > { %v9186_v55 = vpop.f32.mrf.mxu2 }
 0xaad   : > { %v9690_v23 = vadd.f32 %v15599_v48, %v9654_v57 }
 0xaae   : > { %v9043_v49 = vpop.f32.mrf.mxu1 }
 0xaaf   : > { %v9722_v47 = vpack.c.bf16 %v9690_v23, %v9690_v23  ;;  %v9187_v53 = vadd.f32 %v9186_v55, %v9043_v49 }
 0xab1   : > { %9755 = vst.msk [vmem:[%s15614_s11 + $0x24] sm:$0xf] %vm9745_vm4, %v9722_v47 }
 0xab2   : > { %v9590_v41 = vpop.f32.mrf.mxu0 }
 0xab3   : > { %v9655_v24 = vadd.f32 %v9590_v41, %v9429_v16 }
 0xab4   : > { %11656 = vmatmul.msk.bf16.gmra.mxu0 %vm8752_vm2, %v15579_v26  ;;  %v9379_v26 = vpop.f32.mrf.mxu3  ;;  %v9189_v21 = vpop.f32.mrf.mxu2 }
 0xab5   : > { %v9691_v27 = vadd.f32 %v15599_v48, %v9655_v24  ;;  %v9435_v31 = vadd.f32 %v9379_v26, %v9185_v63 }
 0xab6   : > { %v9046_v59 = vpop.f32.mrf.mxu1 }
 0xab7   : > { %v9723_v33 = vpack.c.bf16 %v9691_v27, %v9691_v27  ;;  %v9190_v34 = vadd.f32 %v9189_v21, %v9046_v59 }
 0xab9   : > { %9756 = vst.msk [vmem:[%s15614_s11 + $0x28] sm:$0xf] %vm9745_vm4, %v9723_v33 }
 0xaba   : > { %v9592_v45 = vpop.f32.mrf.mxu0 }
 0xabb   : > { %v9656_v25 = vadd.f32 %v9592_v45, %v9430_v5 }
 0xabc   : > { %v9381_v61 = vpop.f32.mrf.mxu3  ;;  %v9191_v4 = vpop.f32.mrf.mxu2 }
 0xabd   : > { %v9692_v0 = vadd.f32 %v15599_v48, %v9656_v25  ;;  %v9436_v16 = vadd.f32 %v9381_v61, %v9187_v53 }
 0xabe   : > { %v9048_v39 = vpop.f32.mrf.mxu1 }
 0xabf   : > { %v9724_v3 = vpack.c.bf16 %v9692_v0, %v9692_v0  ;;  %v9192_v40 = vadd.f32 %v9191_v4, %v9048_v39 }
 0xac1   : > { %9757 = vst.msk [vmem:[%s15614_s11 + $0x2c] sm:$0xf] %vm9745_vm4, %v9724_v3 }
 0xac2   : > { %v9595_v11 = vpop.f32.mrf.mxu0 }
 0xac3   : > { %v9657_v62 = vadd.f32 %v9595_v11, %v9431_v6 }
 0xac4   : > { %11657 = vmatmul.msk.bf16.gmra.mxu0 %vm8752_vm2, %v15621_v54  ;;  %v9384_v8 = vpop.f32.mrf.mxu3  ;;  %v9194_v57 = vpop.f32.mrf.mxu2 }
 0xac5   : > { %v9693_v42 = vadd.f32 %v15599_v48, %v9657_v62  ;;  %v9437_v37 = vadd.f32 %v9384_v8, %v9190_v34 }
 0xac6   : > { %v9051_v23 = vpop.f32.mrf.mxu1 }
 0xac7   : > { %v9725_v30 = vpack.c.bf16 %v9693_v42, %v9693_v42  ;;  %v9195_v38 = vadd.f32 %v9194_v57, %v9051_v23 }
 0xac9   : > { %9758 = vst.msk [vmem:[%s15614_s11 + $0x30] sm:$0xf] %vm9745_vm4, %v9725_v30 }
 0xaca   : > { %v9597_v2 = vpop.f32.mrf.mxu0 }
 0xacb   : > { %v9658_v13 = vadd.f32 %v9597_v2, %v9432_v7 }
 0xacc   : > { %v9386_v29 = vpop.f32.mrf.mxu3  ;;  %v9196_v58 = vpop.f32.mrf.mxu2 }
 0xacd   : > { %v9694_v14 = vadd.f32 %v15599_v48, %v9658_v13  ;;  %v9438_v35 = vadd.f32 %v9386_v29, %v9192_v40 }
 0xace   : > { %v9053_v33 = vpop.f32.mrf.mxu1 }
 0xacf   : > { %v9726_v54 = vpack.c.bf16 %v9694_v14, %v9694_v14  ;;  %v9197_v44 = vadd.f32 %v9196_v58, %v9053_v33 }
 0xad1   : > { %9759 = vst.msk [vmem:[%s15614_s11 + $0x34] sm:$0xf] %vm9745_vm4, %v9726_v54 }
 0xad2   : > { %v9600_v28 = vpop.f32.mrf.mxu0 }
 0xad3   : > { %v9659_v51 = vadd.f32 %v9600_v28, %v9433_v22 }
 0xad4   : > { %11658 = vmatmul.msk.bf16.gmra.mxu0 %vm8752_vm2, %v9498_v32  ;;  %v9389_v47 = vpop.f32.mrf.mxu3  ;;  %v9199_v3 = vpop.f32.mrf.mxu2 }
 0xad5   : > { %v9695_v12 = vadd.f32 %v15599_v48, %v9659_v51  ;;  %v9439_v55 = vadd.f32 %v9389_v47, %v9195_v38 }
 0xad6   : > { %v9056_v6 = vpop.f32.mrf.mxu1 }
 0xad7   : > { %v9727_v50 = vpack.c.bf16 %v9695_v12, %v9695_v12  ;;  %v9200_v28 = vadd.f32 %v9199_v3, %v9056_v6 }
 0xad9   : > { %9760 = vst.msk [vmem:[%s15614_s11 + $0x38] sm:$0xf] %vm9745_vm4, %v9727_v50 }
 0xada   : > { %v9602_v46 = vpop.f32.mrf.mxu0 }
 0xadb   : > { %v9660_v60 = vadd.f32 %v9602_v46, %v9434_v9 }
 0xadc   : > { %v9391_v5 = vpop.f32.mrf.mxu3  ;;  %v9201_v61 = vpop.f32.mrf.mxu2 }
 0xadd   : > { %v9696_v52 = vadd.f32 %v15599_v48, %v9660_v60  ;;  %v9440_v19 = vadd.f32 %v9391_v5, %v9197_v44 }
 0xade   : > { %v9058_v2 = vpop.f32.mrf.mxu1 }
 0xadf   : > { %v9728_v43 = vpack.c.bf16 %v9696_v52, %v9696_v52  ;;  %v9202_v46 = vadd.f32 %v9201_v61, %v9058_v2 }
 0xae1   : > { %9761 = vst.msk [vmem:[%s15614_s11 + $0x3c] sm:$0xf] %vm9745_vm4, %v9728_v43 }
 0xae2   : > { %v9605_v10 = vpop.f32.mrf.mxu0 }
 0xae3   : > { %v9661_v20 = vadd.f32 %v9605_v10, %v9435_v31 }
 0xae4   : > { %v9394_v62 = vpop.f32.mrf.mxu3  ;;  %v9204_v21 = vpop.f32.mrf.mxu2 }
 0xae5   : > { %v9697_v18 = vadd.f32 %v15599_v48, %v9661_v20  ;;  %v9441_v12 = vadd.f32 %v9394_v62, %v9200_v28 }
 0xae6   : > { %v9061_v59 = vpop.f32.mrf.mxu1 }
 0xae7   : > { %v9729_v1 = vpack.c.bf16 %v9697_v18, %v9697_v18  ;;  %v9205_v10 = vadd.f32 %v9204_v21, %v9061_v59 }
 0xae9   : > { %9762 = vst.msk [vmem:[%s15614_s11 + $0x40] sm:$0xf] %vm9745_vm4, %v9729_v1 }
 0xaea   : > { %v9607_v41 = vpop.f32.mrf.mxu0 }
 0xaeb   : > { %v9662_v24 = vadd.f32 %v9607_v41, %v9436_v16 }
 0xaec   : > { %v9396_v14 = vpop.f32.mrf.mxu3  ;;  %v9206_v4 = vpop.f32.mrf.mxu2 }
 0xaed   : > { %v9698_v56 = vadd.f32 %v15599_v48, %v9662_v24  ;;  %v9442_v52 = vadd.f32 %v9396_v14, %v9202_v46 }
 0xaee   : > { %v9063_v39 = vpop.f32.mrf.mxu1 }
 0xaef   : > { %v9730_v27 = vpack.c.bf16 %v9698_v56, %v9698_v56  ;;  %v9207_v41 = vadd.f32 %v9206_v4, %v9063_v39 }
 0xaf1   : > { %9763 = vst.msk [vmem:[%s15614_s11 + $0x44] sm:$0xf] %vm9745_vm4, %v9730_v27 }
 0xaf2   : > { %v9610_v45 = vpop.f32.mrf.mxu0 }
 0xaf3   : > { %v9663_v25 = vadd.f32 %v9610_v45, %v9437_v37 }
 0xaf4   : > { %v9399_v8 = vpop.f32.mrf.mxu3  ;;  %v9209_v57 = vpop.f32.mrf.mxu2 }
 0xaf5   : > { %v9699_v0 = vadd.f32 %v15599_v48, %v9663_v25  ;;  %v9443_v18 = vadd.f32 %v9399_v8, %v9205_v10 }
 0xaf6   : > { %v9066_v23 = vpop.f32.mrf.mxu1 }
 0xaf7   : > { %v9731_v36 = vpack.c.bf16 %v9699_v0, %v9699_v0  ;;  %v9210_v45 = vadd.f32 %v9209_v57, %v9066_v23 }
 0xaf9   : > { %9764 = vst.msk [vmem:[%s15614_s11 + $0x48] sm:$0xf] %vm9745_vm4, %v9731_v36 }
 0xafa   : > { %v9612_v26 = vpop.f32.mrf.mxu0 }
 0xafb   : > { %v9664_v11 = vadd.f32 %v9612_v26, %v9438_v35 }
 0xafc   : > { %v9401_v29 = vpop.f32.mrf.mxu3  ;;  %v9211_v58 = vpop.f32.mrf.mxu2 }
 0xafd   : > { %v9700_v42 = vadd.f32 %v15599_v48, %v9664_v11  ;;  %v9444_v56 = vadd.f32 %v9401_v29, %v9207_v41 }
 0xafe   : > { %v9068_v37 = vpop.f32.mrf.mxu1 }
 0xaff   : > { %v9732_v30 = vpack.c.bf16 %v9700_v42, %v9700_v42  ;;  %v9212_v26 = vadd.f32 %v9211_v58, %v9068_v37 }
 0xb01   : > { %9765 = vst.msk [vmem:[%s15614_s11 + $0x4c] sm:$0xf] %vm9745_vm4, %v9732_v30 }
 0xb02   : > { %v9615_v7 = vpop.f32.mrf.mxu0 }
 0xb03   : > { %v9665_v49 = vadd.f32 %v9615_v7, %v9439_v55 }
 0xb04   : > { %v9404_v47 = vpop.f32.mrf.mxu3  ;;  %v9214_v3 = vpop.f32.mrf.mxu2 }
 0xb05   : > { %v9701_v13 = vadd.f32 %v15599_v48, %v9665_v49  ;;  %v9445_v0 = vadd.f32 %v9404_v47, %v9210_v45 }
 0xb06   : > { %v9071_v6 = vpop.f32.mrf.mxu1 }
 0xb07   : > { %v9733_v15 = vpack.c.bf16 %v9701_v13, %v9701_v13  ;;  %v9215_v7 = vadd.f32 %v9214_v3, %v9071_v6 }
 0xb09   : > { %9766 = vst.msk [vmem:[%s15614_s11 + $0x50] sm:$0xf] %vm9745_vm4, %v9733_v15 }
 0xb0a   : > { %v9617_v54 = vpop.f32.mrf.mxu0 }
 0xb0b   : > { %v9666_v32 = vadd.f32 %v9617_v54, %v9440_v19 }
 0xb0c   : > { %v9406_v5 = vpop.f32.mrf.mxu3  ;;  %v9216_v61 = vpop.f32.mrf.mxu2 }
 0xb0d   : > { %v9702_v22 = vadd.f32 %v15599_v48, %v9666_v32  ;;  %v9446_v42 = vadd.f32 %v9406_v5, %v9212_v26 }
 0xb0e   : > { %v9073_v2 = vpop.f32.mrf.mxu1 }
 0xb0f   : > { %v9734_v51 = vpack.c.bf16 %v9702_v22, %v9702_v22  ;;  %v9217_v54 = vadd.f32 %v9216_v61, %v9073_v2 }
 0xb11   : > { %9767 = vst.msk [vmem:[%s15614_s11 + $0x54] sm:$0xf] %vm9745_vm4, %v9734_v51 }
 0xb12   : > { %v9620_v17 = vpop.f32.mrf.mxu0 }
 0xb13   : > { %v9667_v50 = vadd.f32 %v9620_v17, %v9441_v12 }
 0xb14   : > { %v9409_v62 = vpop.f32.mrf.mxu3  ;;  %v9219_v21 = vpop.f32.mrf.mxu2 }
 0xb15   : > { %v9703_v9 = vadd.f32 %v15599_v48, %v9667_v50  ;;  %v9447_v13 = vadd.f32 %v9409_v62, %v9215_v7 }
 0xb16   : > { %v9076_v51 = vpop.f32.mrf.mxu1 }
 0xb17   : > { %v9735_v60 = vpack.c.bf16 %v9703_v9, %v9703_v9  ;;  %v9220_v17 = vadd.f32 %v9219_v21, %v9076_v51 }
 0xb19   : > { %9768 = vst.msk [vmem:[%s15614_s11 + $0x58] sm:$0xf] %vm9745_vm4, %v9735_v60 }
 0xb1a   : > { %v9622_v63 = vpop.f32.mrf.mxu0 }
 0xb1b   : > { %v9668_v43 = vadd.f32 %v9622_v63, %v9442_v52 }
 0xb1c   : > { %v9411_v14 = vpop.f32.mrf.mxu3  ;;  %v9221_v4 = vpop.f32.mrf.mxu2 }
 0xb1d   : > { %v9704_v31 = vadd.f32 %v15599_v48, %v9668_v43  ;;  %v9448_v22 = vadd.f32 %v9411_v14, %v9217_v54 }
 0xb1e   : > { %v9078_v52 = vpop.f32.mrf.mxu1 }
 0xb1f   : > { %v9736_v20 = vpack.c.bf16 %v9704_v31, %v9704_v31  ;;  %v9222_v63 = vadd.f32 %v9221_v4, %v9078_v52 }
 0xb21   : > { %9769 = vst.msk [vmem:[%s15614_s11 + $0x5c] sm:$0xf] %vm9745_vm4, %v9736_v20 }
 0xb22   : > { %v9625_v53 = vpop.f32.mrf.mxu0 }
 0xb23   : > { %v9669_v1 = vadd.f32 %v9625_v53, %v9443_v18 }
 0xb24   : > { %v9414_v8 = vpop.f32.mrf.mxu3 }
 0xb25   : > { %v9705_v16 = vadd.f32 %v15599_v48, %v9669_v1  ;;  %v9449_v9 = vadd.f32 %v9414_v8, %v9220_v17 }
 0xb27   : > { %v9737_v24 = vpack.c.bf16 %v9705_v16, %v9705_v16 }
 0xb29   : > { %9770 = vst.msk [vmem:[%s15614_s11 + $0x60] sm:$0xf] %vm9745_vm4, %v9737_v24 }
 0xb2a   : > { %v9627_v34 = vpop.f32.mrf.mxu0 }
 0xb2b   : > { %v9670_v27 = vadd.f32 %v9627_v34, %v9444_v56 }
 0xb2c   : > { %v9416_v29 = vpop.f32.mrf.mxu3 }
 0xb2d   : > { %v9706_v33 = vadd.f32 %v15599_v48, %v9670_v27  ;;  %v9450_v31 = vadd.f32 %v9416_v29, %v9222_v63 }
 0xb2f   : > { %v9738_v25 = vpack.c.bf16 %v9706_v33, %v9706_v33 }
 0xb31   : > { %9771 = vst.msk [vmem:[%s15614_s11 + $0x64] sm:$0xf] %vm9745_vm4, %v9738_v25 }
 0xb32   : > { %v9630_v40 = vpop.f32.mrf.mxu0 }
 0xb33   : > { %v9671_v36 = vadd.f32 %v9630_v40, %v9445_v0 }
 0xb35   : > { %v9707_v35 = vadd.f32 %v15599_v48, %v9671_v36 }
 0xb37   : > { %v9739_v11 = vpack.c.bf16 %v9707_v35, %v9707_v35 }
 0xb39   : > { %9772 = vst.msk [vmem:[%s15614_s11 + $0x68] sm:$0xf] %vm9745_vm4, %v9739_v11 }
 0xb3a   : > { %v9632_v38 = vpop.f32.mrf.mxu0 }
 0xb3b   : > { %v9672_v30 = vadd.f32 %v9632_v38, %v9446_v42 }
 0xb3d   : > { %v9708_v55 = vadd.f32 %v15599_v48, %v9672_v30 }
 0xb3f   : > { %v9740_v49 = vpack.c.bf16 %v9708_v55, %v9708_v55 }
 0xb41   : > { %9773 = vst.msk [vmem:[%s15614_s11 + $0x6c] sm:$0xf] %vm9745_vm4, %v9740_v49 }
 0xb42   : > { %v9635_v44 = vpop.f32.mrf.mxu0 }
 0xb43   : > { %v9673_v15 = vadd.f32 %v9635_v44, %v9447_v13 }
 0xb45   : > { %v9709_v19 = vadd.f32 %v15599_v48, %v9673_v15 }
 0xb47   : > { %v9741_v32 = vpack.c.bf16 %v9709_v19, %v9709_v19 }
 0xb49   : > { %9774 = vst.msk [vmem:[%s15614_s11 + $0x70] sm:$0xf] %vm9745_vm4, %v9741_v32 }
 0xb4a   : > { %v9637_v28 = vpop.f32.mrf.mxu0 }
 0xb4b   : > { %v9674_v59 = vadd.f32 %v9637_v28, %v9448_v22 }
 0xb4d   : > { %v9710_v12 = vadd.f32 %v15599_v48, %v9674_v59 }
 0xb4f   : > { %v9742_v50 = vpack.c.bf16 %v9710_v12, %v9710_v12 }
 0xb51   : > { %9775 = vst.msk [vmem:[%s15614_s11 + $0x74] sm:$0xf] %vm9745_vm4, %v9742_v50 }
 0xb52   : > { %v9640_v46 = vpop.f32.mrf.mxu0 }
 0xb53   : > { %v9675_v60 = vadd.f32 %v9640_v46, %v9449_v9 }
 0xb55   : > { %v9711_v39 = vadd.f32 %v15599_v48, %v9675_v60 }
 0xb57   : > { %v9743_v43 = vpack.c.bf16 %v9711_v39, %v9711_v39 }
 0xb59   : > { %9776 = vst.msk [vmem:[%s15614_s11 + $0x78] sm:$0xf] %vm9745_vm4, %v9743_v43 }
 0xb5a   : > { %v9642_v10 = vpop.f32.mrf.mxu0 }
 0xb5b   : > { %v9676_v20 = vadd.f32 %v9642_v10, %v9450_v31 }
 0xb5d   : > { %v9712_v18 = vadd.f32 %v15599_v48, %v9676_v20 }
 0xb5f   : > { %v9744_v57 = vpack.c.bf16 %v9712_v18, %v9712_v18 }
 0xb61   : > { %9777 = vst.msk [vmem:[%s15614_s11 + $0x7c] sm:$0xf] %vm9745_vm4, %v9744_v57 }
 0xb62 PF: > { %s17_s24 = sadd.s32 1, %s11766_s24  }
 0xb63   : > { %p14_p4 = scmp.ge.s32.totalorder %s17_s24, 4  }
 0xb65   :  { %16 = sbr.rel (!%p14_p4) target bundleno = 1 (0x1), region = 125 }

</bundles_post_ra>
